<compile_context>
chip_gen: v5e
topology: v5e:2x2
jax: 0.10.0
libtpu: 0.0.40
codegen_flags: <defaults>
</compile_context>

<pallas_src>
import jax
import jax.numpy as jnp
from jax.experimental import pallas as pl
from jax.experimental.pallas import tpu as pltpu

# ----- synthetic encoder config (lane-dense stand-in for the AutoModel) -----
VOCAB = 100
HIDDEN = 128                 # lane-aligned hidden size
NUM_HEADS = 2
HEAD_DIM = HIDDEN // NUM_HEADS
FFN = 256
NUM_LAYERS = 2
NUM_LABELS = 4
LABELS_PAD = 128             # classifier output padded to a full lane width
SEQ = 8
BATCH = 16                   # B*S = 128 rows -> fills the MXU M dimension
TOKENS = BATCH * SEQ         # batch folded into the row (sublane) axis


def _layer_norm(x, gamma, beta, eps=1e-12):
    mu = jnp.mean(x, axis=-1, keepdims=True)
    var = jnp.mean((x - mu) ** 2, axis=-1, keepdims=True)
    return (x - mu) * jax.lax.rsqrt(var + eps) * gamma + beta


# --------------------------- the fused Pallas kernel -------------------------

def fused_model_kernel(x0_ref, maskb_ref,
                       wqkv_ref, bqkv_ref, wo_ref, bo_ref, g1_ref, be1_ref,
                       w1_ref, b1_ref, w2_ref, b2_ref, g2_ref, be2_ref,
                       wc_ref, bc_ref, out_ref):
    """Whole forward pass in one invocation (no grid).

    x0_ref:    (T, H)    f32 embeddings (T = B*S folded tokens)
    maskb_ref: (T, T)    f32 additive block-diagonal attention mask (0 / -1e9)
    w*_ref:    (L, ...)  layer-stacked weights, matmul weights in bf16
    wc/bc_ref: classifier (H, 128) bf16 / (1, 128) f32, lane-padded
    out_ref:   (B, 128)  f32 sigmoid outputs
    """
    mask_bias = maskb_ref[...]                                    # (T, T) f32

    def layer_body(l, x):
        x_bf = x.astype(jnp.bfloat16)
        # Fused QKV: one lane-dense (T,128)x(128,384) bf16 MXU matmul, f32 acc.
        qkv = jnp.dot(x_bf, wqkv_ref[l],
                      preferred_element_type=jnp.float32) + bqkv_ref[l]  # (T, 3H)
        q = qkv[:, :HIDDEN].astype(jnp.bfloat16)      # 1/sqrt(HD) folded into Wq
        k = qkv[:, HIDDEN:2 * HIDDEN].astype(jnp.bfloat16)
        v = qkv[:, 2 * HIDDEN:].astype(jnp.bfloat16)
        wo = wo_ref[l]                                # (H, H) bf16

        attn = jnp.zeros((TOKENS, HIDDEN), jnp.float32)
        for h in range(NUM_HEADS):                    # 2 heads, static slices
            sl = slice(h * HEAD_DIM, (h + 1) * HEAD_DIM)
            s = jnp.einsum("qd,kd->qk", q[:, sl], k[:, sl],
                           preferred_element_type=jnp.float32)    # (T, T) f32
            s = s + mask_bias                                     # mask add in f32
            s = s - jnp.max(s, axis=-1, keepdims=True)
            p = jnp.exp(s)
            p = p * pl.reciprocal(jnp.sum(p, axis=-1, keepdims=True), approx=True)
            ctx = jnp.dot(p.astype(jnp.bfloat16), v[:, sl],
                          preferred_element_type=jnp.float32)     # (T, HD)
            # Accumulating per-head (HD,H) projections == concat(heads) @ Wo.
            attn = attn + jnp.dot(ctx.astype(jnp.bfloat16), wo[sl, :],
                                  preferred_element_type=jnp.float32)
        attn = attn + bo_ref[l]
        h1 = _layer_norm(x + attn, g1_ref[l], be1_ref[l])

        # TODO(synk): HF BERT uses exact erf GELU; tanh approximation used here.
        ff = jnp.dot(h1.astype(jnp.bfloat16), w1_ref[l],
                     preferred_element_type=jnp.float32) + b1_ref[l]
        ff = jax.nn.gelu(ff, approximate=True)
        ff = jnp.dot(ff.astype(jnp.bfloat16), w2_ref[l],
                     preferred_element_type=jnp.float32) + b2_ref[l]
        return _layer_norm(h1 + ff, g2_ref[l], be2_ref[l])

    y = jax.lax.fori_loop(0, NUM_LAYERS, layer_body, x0_ref[...], unroll=True)

    # ---- fused epilogue: CLS pooling + classifier + sigmoid ----
    # Select rows b*SEQ (the CLS tokens) with an exact one-hot selection matmul
    # (avoids in-kernel gathers/strided reshapes).  Dropout(0.1) == identity.
    t_idx = jax.lax.broadcasted_iota(jnp.int32, (BATCH, TOKENS), 1)
    b_idx = jax.lax.broadcasted_iota(jnp.int32, (BATCH, TOKENS), 0)
    sel = (t_idx == b_idx * SEQ).astype(jnp.float32)                      # (B, T)
    pooled = jnp.dot(sel, y, preferred_element_type=jnp.float32)          # (B, H)
    logits = jnp.dot(pooled.astype(jnp.bfloat16), wc_ref[...],
                     preferred_element_type=jnp.float32) + bc_ref[...]    # (B, 128)
    out_ref[...] = jax.nn.sigmoid(logits)


# --------------------------- wrapper (single pallas_call) --------------------

def forward(params, input_ids, attention_mask, token_type_ids=None):
    """Mirrors HiringSentimentModel.forward (eval mode)."""
    B, S = input_ids.shape
    if token_type_ids is None:
        token_type_ids = jnp.zeros_like(input_ids)

    # Embedding gathers + embedding LayerNorm: glue, stays in plain JAX/XLA.
    x = (params["word_emb"][input_ids]
         + params["pos_emb"][jnp.arange(S)][None, :, :]
         + params["type_emb"][token_type_ids])
    x = _layer_norm(x, params["emb_ln_g"], params["emb_ln_b"])
    x0 = x.reshape(B * S, HIDDEN).astype(jnp.float32)

    # Batch folded into the token axis -> block-diagonal additive mask:
    # 0 where (same batch element AND key valid), else -1e9.  Kept in f32.
    key_ok = attention_mask.reshape(B * S) > 0
    bid = jnp.repeat(jnp.arange(B), S)
    allowed = (bid[:, None] == bid[None, :]) & key_ok[None, :]
    maskb = jnp.where(allowed, 0.0, -1e9).astype(jnp.float32)             # (T, T)

    args = (x0, maskb,
            params["wqkv"], params["bqkv"], params["wo"], params["bo"],
            params["ln1_g"], params["ln1_b"],
            params["w1"], params["b1"], params["w2"], params["b2"],
            params["ln2_g"], params["ln2_b"],
            params["clf_w"], params["clf_b"])

    # No grid: everything (weights + activations, <1 MiB) is VMEM-resident for
    # the single invocation.  Whole-array blocks in VMEM.
    vmem_spec = pl.BlockSpec(memory_space=pltpu.MemorySpace.VMEM)
    out_padded = pl.pallas_call(
        fused_model_kernel,
        out_shape=jax.ShapeDtypeStruct((BATCH, LABELS_PAD), jnp.float32),
        in_specs=[vmem_spec] * len(args),
        out_specs=vmem_spec,
    )(*args)

    return out_padded[:, :NUM_LABELS]    # drop the lane padding of the classifier


# --------------------------- parameters --------------------------------------

def init_params(key):
    keys = iter(jax.random.split(key, 16))

    def normal(shape):
        return 0.02 * jax.random.normal(next(keys), shape, jnp.float32)

    # Fused QKV weights; the 1/sqrt(HEAD_DIM) score scale is folded into Wq.
    wq = normal((NUM_LAYERS, HIDDEN, HIDDEN)) * (HEAD_DIM ** -0.5)
    wk = normal((NUM_LAYERS, HIDDEN, HIDDEN))
    wv = normal((NUM_LAYERS, HIDDEN, HIDDEN))
    wqkv = jnp.concatenate([wq, wk, wv], axis=-1).astype(jnp.bfloat16)   # (L,H,3H)

    # Classifier: real (H, 4) weights zero-padded to 128 lane-dense columns.
    clf_w_real = normal((HIDDEN, NUM_LABELS))
    clf_w = jnp.zeros((HIDDEN, LABELS_PAD),
                      jnp.float32).at[:, :NUM_LABELS].set(clf_w_real)

    params = {
        "word_emb": normal((VOCAB, HIDDEN)),
        "pos_emb":  normal((SEQ, HIDDEN)),
        "type_emb": normal((2, HIDDEN)),
        "emb_ln_g": jnp.ones((HIDDEN,), jnp.float32),
        "emb_ln_b": jnp.zeros((HIDDEN,), jnp.float32),
        # matmul weights in bf16 (halved DMA / VMEM, 2x MXU on v6e/v7x);
        # biases and LayerNorm params stay f32 (added/used in f32 math).
        "wqkv": wqkv,
        "bqkv": jnp.zeros((NUM_LAYERS, 1, 3 * HIDDEN), jnp.float32),
        "wo": normal((NUM_LAYERS, HIDDEN, HIDDEN)).astype(jnp.bfloat16),
        "bo": jnp.zeros((NUM_LAYERS, 1, HIDDEN), jnp.float32),
        "ln1_g": jnp.ones((NUM_LAYERS, 1, HIDDEN), jnp.float32),
        "ln1_b": jnp.zeros((NUM_LAYERS, 1, HIDDEN), jnp.float32),
        "w1": normal((NUM_LAYERS, HIDDEN, FFN)).astype(jnp.bfloat16),
        "b1": jnp.zeros((NUM_LAYERS, 1, FFN), jnp.float32),
        "w2": normal((NUM_LAYERS, FFN, HIDDEN)).astype(jnp.bfloat16),
        "b2": jnp.zeros((NUM_LAYERS, 1, HIDDEN), jnp.float32),
        "ln2_g": jnp.ones((NUM_LAYERS, 1, HIDDEN), jnp.float32),
        "ln2_b": jnp.zeros((NUM_LAYERS, 1, HIDDEN), jnp.float32),
        "clf_w": clf_w.astype(jnp.bfloat16),
        "clf_b": jnp.zeros((1, LABELS_PAD), jnp.float32),
    }
    return params


# --------------------------- demo --------------------------------------------

if __name__ == "__main__":
    key = jax.random.PRNGKey(0)
    pkey, dkey = jax.random.split(key)
    params = init_params(pkey)

    input_ids = jax.random.randint(dkey, (BATCH, SEQ), 0, VOCAB, dtype=jnp.int32)
    attention_mask = jnp.ones((BATCH, SEQ), jnp.int32)
    attention_mask = attention_mask.at[1, 6:].set(0).at[5, 4:].set(0)  # ragged rows
    token_type_ids = jnp.zeros((BATCH, SEQ), jnp.int32)

    apply_fn = jax.jit(forward)
    out = apply_fn(params, input_ids, attention_mask, token_type_ids)
    out = jax.block_until_ready(out)

    assert out.shape == (BATCH, NUM_LABELS), out.shape
    assert bool(jnp.all(jnp.isfinite(out))), "non-finite outputs"
    assert bool(jnp.all((out >= 0.0) & (out <= 1.0))), "sigmoid range violated"
    print("KERNEL_OK")
</pallas_src>

<mosaic_0001>
module attributes {stable_mosaic.version = 11 : i64} {
  func.func @fused_model_kernel(%arg0: memref<128x128xf32, #tpu.memory_space<vmem>>, %arg1: memref<128x128xf32, #tpu.memory_space<vmem>>, %arg2: memref<2x128x384xbf16, #tpu.memory_space<vmem>>, %arg3: memref<2x1x384xf32, #tpu.memory_space<vmem>>, %arg4: memref<2x128x128xbf16, #tpu.memory_space<vmem>>, %arg5: memref<2x1x128xf32, #tpu.memory_space<vmem>>, %arg6: memref<2x1x128xf32, #tpu.memory_space<vmem>>, %arg7: memref<2x1x128xf32, #tpu.memory_space<vmem>>, %arg8: memref<2x128x256xbf16, #tpu.memory_space<vmem>>, %arg9: memref<2x1x256xf32, #tpu.memory_space<vmem>>, %arg10: memref<2x256x128xbf16, #tpu.memory_space<vmem>>, %arg11: memref<2x1x128xf32, #tpu.memory_space<vmem>>, %arg12: memref<2x1x128xf32, #tpu.memory_space<vmem>>, %arg13: memref<2x1x128xf32, #tpu.memory_space<vmem>>, %arg14: memref<128x128xbf16, #tpu.memory_space<vmem>>, %arg15: memref<1x128xf32, #tpu.memory_space<vmem>>, %arg16: memref<16x128xf32, #tpu.memory_space<vmem>>) attributes {dimension_semantics = [], scalar_prefetch = 0 : i64, scratch_operands = 0 : i64, tpu.core_type = #tpu.core_type<tc>} {
    %c0 = arith.constant 0 : index
    %c0_0 = arith.constant 0 : index
    %0 = vector.load %arg1[%c0, %c0_0] : memref<128x128xf32, #tpu.memory_space<vmem>>, vector<128x128xf32>
    %c0_1 = arith.constant 0 : index
    %c0_2 = arith.constant 0 : index
    %1 = vector.load %arg0[%c0_1, %c0_2] : memref<128x128xf32, #tpu.memory_space<vmem>>, vector<128x128xf32>
    %c0_i32 = arith.constant 0 : i32
    %2 = arith.truncf %1 : vector<128x128xf32> to vector<128x128xbf16>
    %3 = arith.index_cast %c0_i32 : i32 to index
    %c0_3 = arith.constant 0 : index
    %c0_4 = arith.constant 0 : index
    %4 = vector.load %arg2[%3, %c0_3, %c0_4] : memref<2x128x384xbf16, #tpu.memory_space<vmem>>, vector<1x128x384xbf16>
    %5 = vector.shape_cast %4 : vector<1x128x384xbf16> to vector<128x384xbf16>
    %cst = arith.constant dense<0.000000e+00> : vector<128x384xf32>
    %6 = tpu.matmul %2, %5, %cst {dimension_numbers = #tpu.dot_dimension_numbers<[1], [0], [0], [1], [0, 0, 1, 1], [], []>} : vector<128x128xbf16>, vector<128x384xbf16>, vector<128x384xf32> -> vector<128x384xf32>
    %7 = arith.index_cast %c0_i32 : i32 to index
    %c0_5 = arith.constant 0 : index
    %c0_6 = arith.constant 0 : index
    %8 = vector.load %arg3[%7, %c0_5, %c0_6] : memref<2x1x384xf32, #tpu.memory_space<vmem>>, vector<1x1x384xf32>
    %9 = vector.shape_cast %8 : vector<1x1x384xf32> to vector<1x384xf32>
    %10 = vector.broadcast %9 : vector<1x384xf32> to vector<128x384xf32>
    %11 = arith.addf %6, %10 : vector<128x384xf32>
    %12 = vector.extract_strided_slice %11 {offsets = [0, 0], sizes = [128, 128], strides = [1, 1]} : vector<128x384xf32> to vector<128x128xf32>
    %13 = arith.truncf %12 : vector<128x128xf32> to vector<128x128xbf16>
    %14 = vector.extract_strided_slice %11 {offsets = [0, 128], sizes = [128, 128], strides = [1, 1]} : vector<128x384xf32> to vector<128x128xf32>
    %15 = arith.truncf %14 : vector<128x128xf32> to vector<128x128xbf16>
    %16 = vector.extract_strided_slice %11 {offsets = [0, 256], sizes = [128, 128], strides = [1, 1]} : vector<128x384xf32> to vector<128x128xf32>
    %17 = arith.truncf %16 : vector<128x128xf32> to vector<128x128xbf16>
    %18 = arith.index_cast %c0_i32 : i32 to index
    %c0_7 = arith.constant 0 : index
    %c0_8 = arith.constant 0 : index
    %19 = vector.load %arg4[%18, %c0_7, %c0_8] : memref<2x128x128xbf16, #tpu.memory_space<vmem>>, vector<1x128x128xbf16>
    %20 = vector.shape_cast %19 : vector<1x128x128xbf16> to vector<128x128xbf16>
    %cst_9 = arith.constant 0.000000e+00 : f32
    %21 = vector.broadcast %cst_9 : f32 to vector<128x128xf32>
    %22 = vector.extract_strided_slice %13 {offsets = [0, 0], sizes = [128, 64], strides = [1, 1]} : vector<128x128xbf16> to vector<128x64xbf16>
    %23 = vector.extract_strided_slice %15 {offsets = [0, 0], sizes = [128, 64], strides = [1, 1]} : vector<128x128xbf16> to vector<128x64xbf16>
    "tpu.trace_start"() <{level = 10 : i32, message = "qd,kd->qk"}> : () -> ()
    %cst_10 = arith.constant dense<0.000000e+00> : vector<128x128xf32>
    %24 = tpu.matmul %22, %23, %cst_10 {dimension_numbers = #tpu.dot_dimension_numbers<[1], [1], [0], [0], [0, 0, 1, 0], [], []>} : vector<128x64xbf16>, vector<128x64xbf16>, vector<128x128xf32> -> vector<128x128xf32>
    "tpu.trace_stop"() : () -> ()
    %25 = arith.addf %24, %0 : vector<128x128xf32>
    %cst_11 = arith.constant dense<0xFF800000> : vector<128xf32>
    %26 = vector.multi_reduction <maximumf>, %25, %cst_11 [1] : vector<128x128xf32> to vector<128xf32>
    %27 = vector.shape_cast %26 : vector<128xf32> to vector<128x1xf32>
    %28 = vector.broadcast %27 : vector<128x1xf32> to vector<128x128xf32>
    %29 = arith.subf %25, %28 : vector<128x128xf32>
    %30 = math.exp %29 : vector<128x128xf32>
    %cst_12 = arith.constant dense<0.000000e+00> : vector<128xf32>
    %31 = vector.multi_reduction <add>, %30, %cst_12 [1] : vector<128x128xf32> to vector<128xf32>
    %32 = vector.shape_cast %31 : vector<128xf32> to vector<128x1xf32>
    %33 = tpu.reciprocal %32 {approx = true} : vector<128x1xf32> -> vector<128x1xf32>
    %34 = vector.broadcast %33 : vector<128x1xf32> to vector<128x128xf32>
    %35 = arith.mulf %30, %34 : vector<128x128xf32>
    %36 = arith.truncf %35 : vector<128x128xf32> to vector<128x128xbf16>
    %37 = vector.extract_strided_slice %17 {offsets = [0, 0], sizes = [128, 64], strides = [1, 1]} : vector<128x128xbf16> to vector<128x64xbf16>
    %cst_13 = arith.constant dense<0.000000e+00> : vector<128x64xf32>
    %38 = tpu.matmul %36, %37, %cst_13 {dimension_numbers = #tpu.dot_dimension_numbers<[1], [0], [0], [1], [0, 0, 1, 1], [], []>} : vector<128x128xbf16>, vector<128x64xbf16>, vector<128x64xf32> -> vector<128x64xf32>
    %39 = arith.truncf %38 : vector<128x64xf32> to vector<128x64xbf16>
    %40 = vector.extract_strided_slice %20 {offsets = [0, 0], sizes = [64, 128], strides = [1, 1]} : vector<128x128xbf16> to vector<64x128xbf16>
    %cst_14 = arith.constant dense<0.000000e+00> : vector<128x128xf32>
    %41 = tpu.matmul %39, %40, %cst_14 {dimension_numbers = #tpu.dot_dimension_numbers<[1], [0], [0], [1], [0, 0, 1, 1], [], []>} : vector<128x64xbf16>, vector<64x128xbf16>, vector<128x128xf32> -> vector<128x128xf32>
    %42 = arith.addf %21, %41 : vector<128x128xf32>
    %43 = vector.extract_strided_slice %13 {offsets = [0, 64], sizes = [128, 64], strides = [1, 1]} : vector<128x128xbf16> to vector<128x64xbf16>
    %44 = vector.extract_strided_slice %15 {offsets = [0, 64], sizes = [128, 64], strides = [1, 1]} : vector<128x128xbf16> to vector<128x64xbf16>
    "tpu.trace_start"() <{level = 10 : i32, message = "qd,kd->qk"}> : () -> ()
    %cst_15 = arith.constant dense<0.000000e+00> : vector<128x128xf32>
    %45 = tpu.matmul %43, %44, %cst_15 {dimension_numbers = #tpu.dot_dimension_numbers<[1], [1], [0], [0], [0, 0, 1, 0], [], []>} : vector<128x64xbf16>, vector<128x64xbf16>, vector<128x128xf32> -> vector<128x128xf32>
    "tpu.trace_stop"() : () -> ()
    %46 = arith.addf %45, %0 : vector<128x128xf32>
    %cst_16 = arith.constant dense<0xFF800000> : vector<128xf32>
    %47 = vector.multi_reduction <maximumf>, %46, %cst_16 [1] : vector<128x128xf32> to vector<128xf32>
    %48 = vector.shape_cast %47 : vector<128xf32> to vector<128x1xf32>
    %49 = vector.broadcast %48 : vector<128x1xf32> to vector<128x128xf32>
    %50 = arith.subf %46, %49 : vector<128x128xf32>
    %51 = math.exp %50 : vector<128x128xf32>
    %cst_17 = arith.constant dense<0.000000e+00> : vector<128xf32>
    %52 = vector.multi_reduction <add>, %51, %cst_17 [1] : vector<128x128xf32> to vector<128xf32>
    %53 = vector.shape_cast %52 : vector<128xf32> to vector<128x1xf32>
    %54 = tpu.reciprocal %53 {approx = true} : vector<128x1xf32> -> vector<128x1xf32>
    %55 = vector.broadcast %54 : vector<128x1xf32> to vector<128x128xf32>
    %56 = arith.mulf %51, %55 : vector<128x128xf32>
    %57 = arith.truncf %56 : vector<128x128xf32> to vector<128x128xbf16>
    %58 = vector.extract_strided_slice %17 {offsets = [0, 64], sizes = [128, 64], strides = [1, 1]} : vector<128x128xbf16> to vector<128x64xbf16>
    %cst_18 = arith.constant dense<0.000000e+00> : vector<128x64xf32>
    %59 = tpu.matmul %57, %58, %cst_18 {dimension_numbers = #tpu.dot_dimension_numbers<[1], [0], [0], [1], [0, 0, 1, 1], [], []>} : vector<128x128xbf16>, vector<128x64xbf16>, vector<128x64xf32> -> vector<128x64xf32>
    %60 = arith.truncf %59 : vector<128x64xf32> to vector<128x64xbf16>
    %61 = vector.extract_strided_slice %20 {offsets = [64, 0], sizes = [64, 128], strides = [1, 1]} : vector<128x128xbf16> to vector<64x128xbf16>
    %cst_19 = arith.constant dense<0.000000e+00> : vector<128x128xf32>
    %62 = tpu.matmul %60, %61, %cst_19 {dimension_numbers = #tpu.dot_dimension_numbers<[1], [0], [0], [1], [0, 0, 1, 1], [], []>} : vector<128x64xbf16>, vector<64x128xbf16>, vector<128x128xf32> -> vector<128x128xf32>
    %63 = arith.addf %42, %62 : vector<128x128xf32>
    %64 = arith.index_cast %c0_i32 : i32 to index
    %c0_20 = arith.constant 0 : index
    %c0_21 = arith.constant 0 : index
    %65 = vector.load %arg5[%64, %c0_20, %c0_21] : memref<2x1x128xf32, #tpu.memory_space<vmem>>, vector<1x1x128xf32>
    %66 = vector.shape_cast %65 : vector<1x1x128xf32> to vector<1x128xf32>
    %67 = vector.broadcast %66 : vector<1x128xf32> to vector<128x128xf32>
    %68 = arith.addf %63, %67 : vector<128x128xf32>
    %69 = arith.addf %1, %68 : vector<128x128xf32>
    %70 = arith.index_cast %c0_i32 : i32 to index
    %c0_22 = arith.constant 0 : index
    %c0_23 = arith.constant 0 : index
    %71 = vector.load %arg6[%70, %c0_22, %c0_23] : memref<2x1x128xf32, #tpu.memory_space<vmem>>, vector<1x1x128xf32>
    %72 = vector.shape_cast %71 : vector<1x1x128xf32> to vector<1x128xf32>
    %73 = arith.index_cast %c0_i32 : i32 to index
    %c0_24 = arith.constant 0 : index
    %c0_25 = arith.constant 0 : index
    %74 = vector.load %arg7[%73, %c0_24, %c0_25] : memref<2x1x128xf32, #tpu.memory_space<vmem>>, vector<1x1x128xf32>
    %75 = vector.shape_cast %74 : vector<1x1x128xf32> to vector<1x128xf32>
    %cst_26 = arith.constant dense<0.000000e+00> : vector<128xf32>
    %76 = vector.multi_reduction <add>, %69, %cst_26 [1] : vector<128x128xf32> to vector<128xf32>
    %77 = vector.shape_cast %76 : vector<128xf32> to vector<128x1xf32>
    %cst_27 = arith.constant 1.280000e+02 : f32
    %78 = vector.broadcast %cst_27 : f32 to vector<128x1xf32>
    %79 = arith.divf %77, %78 : vector<128x1xf32>
    %80 = vector.broadcast %79 : vector<128x1xf32> to vector<128x128xf32>
    %81 = arith.subf %69, %80 : vector<128x128xf32>
    %82 = arith.mulf %81, %81 : vector<128x128xf32>
    %cst_28 = arith.constant dense<0.000000e+00> : vector<128xf32>
    %83 = vector.multi_reduction <add>, %82, %cst_28 [1] : vector<128x128xf32> to vector<128xf32>
    %84 = vector.shape_cast %83 : vector<128xf32> to vector<128x1xf32>
    %cst_29 = arith.constant 1.280000e+02 : f32
    %85 = vector.broadcast %cst_29 : f32 to vector<128x1xf32>
    %86 = arith.divf %84, %85 : vector<128x1xf32>
    %87 = vector.broadcast %79 : vector<128x1xf32> to vector<128x128xf32>
    %88 = arith.subf %69, %87 : vector<128x128xf32>
    %cst_30 = arith.constant 9.99999996E-13 : f32
    %89 = vector.broadcast %cst_30 : f32 to vector<128x1xf32>
    %90 = arith.addf %86, %89 : vector<128x1xf32>
    %91 = math.rsqrt %90 : vector<128x1xf32>
    %92 = vector.broadcast %91 : vector<128x1xf32> to vector<128x128xf32>
    %93 = arith.mulf %88, %92 : vector<128x128xf32>
    %94 = vector.broadcast %72 : vector<1x128xf32> to vector<128x128xf32>
    %95 = arith.mulf %93, %94 : vector<128x128xf32>
    %96 = vector.broadcast %75 : vector<1x128xf32> to vector<128x128xf32>
    %97 = arith.addf %95, %96 : vector<128x128xf32>
    %98 = arith.truncf %97 : vector<128x128xf32> to vector<128x128xbf16>
    %99 = arith.index_cast %c0_i32 : i32 to index
    %c0_31 = arith.constant 0 : index
    %c0_32 = arith.constant 0 : index
    %100 = vector.load %arg8[%99, %c0_31, %c0_32] : memref<2x128x256xbf16, #tpu.memory_space<vmem>>, vector<1x128x256xbf16>
    %101 = vector.shape_cast %100 : vector<1x128x256xbf16> to vector<128x256xbf16>
    %cst_33 = arith.constant dense<0.000000e+00> : vector<128x256xf32>
    %102 = tpu.matmul %98, %101, %cst_33 {dimension_numbers = #tpu.dot_dimension_numbers<[1], [0], [0], [1], [0, 0, 1, 1], [], []>} : vector<128x128xbf16>, vector<128x256xbf16>, vector<128x256xf32> -> vector<128x256xf32>
    %103 = arith.index_cast %c0_i32 : i32 to index
    %c0_34 = arith.constant 0 : index
    %c0_35 = arith.constant 0 : index
    %104 = vector.load %arg9[%103, %c0_34, %c0_35] : memref<2x1x256xf32, #tpu.memory_space<vmem>>, vector<1x1x256xf32>
    %105 = vector.shape_cast %104 : vector<1x1x256xf32> to vector<1x256xf32>
    %106 = vector.broadcast %105 : vector<1x256xf32> to vector<128x256xf32>
    %107 = arith.addf %102, %106 : vector<128x256xf32>
    %108 = arith.mulf %107, %107 : vector<128x256xf32>
    %109 = arith.mulf %107, %108 : vector<128x256xf32>
    %cst_36 = arith.constant 4.471500e-02 : f32
    %110 = vector.broadcast %cst_36 : f32 to vector<128x256xf32>
    %111 = arith.mulf %110, %109 : vector<128x256xf32>
    %112 = arith.addf %107, %111 : vector<128x256xf32>
    %cst_37 = arith.constant 0.797884583 : f32
    %113 = vector.broadcast %cst_37 : f32 to vector<128x256xf32>
    %114 = arith.mulf %113, %112 : vector<128x256xf32>
    %115 = math.tanh %114 : vector<128x256xf32>
    %cst_38 = arith.constant 1.000000e+00 : f32
    %116 = vector.broadcast %cst_38 : f32 to vector<128x256xf32>
    %117 = arith.addf %116, %115 : vector<128x256xf32>
    %cst_39 = arith.constant 5.000000e-01 : f32
    %118 = vector.broadcast %cst_39 : f32 to vector<128x256xf32>
    %119 = arith.mulf %118, %117 : vector<128x256xf32>
    %120 = arith.mulf %107, %119 : vector<128x256xf32>
    %121 = arith.truncf %120 : vector<128x256xf32> to vector<128x256xbf16>
    %122 = arith.index_cast %c0_i32 : i32 to index
    %c0_40 = arith.constant 0 : index
    %c0_41 = arith.constant 0 : index
    %123 = vector.load %arg10[%122, %c0_40, %c0_41] : memref<2x256x128xbf16, #tpu.memory_space<vmem>>, vector<1x256x128xbf16>
    %124 = vector.shape_cast %123 : vector<1x256x128xbf16> to vector<256x128xbf16>
    %cst_42 = arith.constant dense<0.000000e+00> : vector<128x128xf32>
    %125 = tpu.matmul %121, %124, %cst_42 {dimension_numbers = #tpu.dot_dimension_numbers<[1], [0], [0], [1], [0, 0, 1, 1], [], []>} : vector<128x256xbf16>, vector<256x128xbf16>, vector<128x128xf32> -> vector<128x128xf32>
    %126 = arith.index_cast %c0_i32 : i32 to index
    %c0_43 = arith.constant 0 : index
    %c0_44 = arith.constant 0 : index
    %127 = vector.load %arg11[%126, %c0_43, %c0_44] : memref<2x1x128xf32, #tpu.memory_space<vmem>>, vector<1x1x128xf32>
    %128 = vector.shape_cast %127 : vector<1x1x128xf32> to vector<1x128xf32>
    %129 = vector.broadcast %128 : vector<1x128xf32> to vector<128x128xf32>
    %130 = arith.addf %125, %129 : vector<128x128xf32>
    %131 = arith.addf %97, %130 : vector<128x128xf32>
    %132 = arith.index_cast %c0_i32 : i32 to index
    %c0_45 = arith.constant 0 : index
    %c0_46 = arith.constant 0 : index
    %133 = vector.load %arg12[%132, %c0_45, %c0_46] : memref<2x1x128xf32, #tpu.memory_space<vmem>>, vector<1x1x128xf32>
    %134 = vector.shape_cast %133 : vector<1x1x128xf32> to vector<1x128xf32>
    %135 = arith.index_cast %c0_i32 : i32 to index
    %c0_47 = arith.constant 0 : index
    %c0_48 = arith.constant 0 : index
    %136 = vector.load %arg13[%135, %c0_47, %c0_48] : memref<2x1x128xf32, #tpu.memory_space<vmem>>, vector<1x1x128xf32>
    %137 = vector.shape_cast %136 : vector<1x1x128xf32> to vector<1x128xf32>
    %cst_49 = arith.constant dense<0.000000e+00> : vector<128xf32>
    %138 = vector.multi_reduction <add>, %131, %cst_49 [1] : vector<128x128xf32> to vector<128xf32>
    %139 = vector.shape_cast %138 : vector<128xf32> to vector<128x1xf32>
    %cst_50 = arith.constant 1.280000e+02 : f32
    %140 = vector.broadcast %cst_50 : f32 to vector<128x1xf32>
    %141 = arith.divf %139, %140 : vector<128x1xf32>
    %142 = vector.broadcast %141 : vector<128x1xf32> to vector<128x128xf32>
    %143 = arith.subf %131, %142 : vector<128x128xf32>
    %144 = arith.mulf %143, %143 : vector<128x128xf32>
    %cst_51 = arith.constant dense<0.000000e+00> : vector<128xf32>
    %145 = vector.multi_reduction <add>, %144, %cst_51 [1] : vector<128x128xf32> to vector<128xf32>
    %146 = vector.shape_cast %145 : vector<128xf32> to vector<128x1xf32>
    %cst_52 = arith.constant 1.280000e+02 : f32
    %147 = vector.broadcast %cst_52 : f32 to vector<128x1xf32>
    %148 = arith.divf %146, %147 : vector<128x1xf32>
    %149 = vector.broadcast %141 : vector<128x1xf32> to vector<128x128xf32>
    %150 = arith.subf %131, %149 : vector<128x128xf32>
    %cst_53 = arith.constant 9.99999996E-13 : f32
    %151 = vector.broadcast %cst_53 : f32 to vector<128x1xf32>
    %152 = arith.addf %148, %151 : vector<128x1xf32>
    %153 = math.rsqrt %152 : vector<128x1xf32>
    %154 = vector.broadcast %153 : vector<128x1xf32> to vector<128x128xf32>
    %155 = arith.mulf %150, %154 : vector<128x128xf32>
    %156 = vector.broadcast %134 : vector<1x128xf32> to vector<128x128xf32>
    %157 = arith.mulf %155, %156 : vector<128x128xf32>
    %158 = vector.broadcast %137 : vector<1x128xf32> to vector<128x128xf32>
    %159 = arith.addf %157, %158 : vector<128x128xf32>
    %c1_i32 = arith.constant 1 : i32
    %160 = arith.truncf %159 : vector<128x128xf32> to vector<128x128xbf16>
    %161 = arith.index_cast %c1_i32 : i32 to index
    %c0_54 = arith.constant 0 : index
    %c0_55 = arith.constant 0 : index
    %162 = vector.load %arg2[%161, %c0_54, %c0_55] : memref<2x128x384xbf16, #tpu.memory_space<vmem>>, vector<1x128x384xbf16>
    %163 = vector.shape_cast %162 : vector<1x128x384xbf16> to vector<128x384xbf16>
    %cst_56 = arith.constant dense<0.000000e+00> : vector<128x384xf32>
    %164 = tpu.matmul %160, %163, %cst_56 {dimension_numbers = #tpu.dot_dimension_numbers<[1], [0], [0], [1], [0, 0, 1, 1], [], []>} : vector<128x128xbf16>, vector<128x384xbf16>, vector<128x384xf32> -> vector<128x384xf32>
    %165 = arith.index_cast %c1_i32 : i32 to index
    %c0_57 = arith.constant 0 : index
    %c0_58 = arith.constant 0 : index
    %166 = vector.load %arg3[%165, %c0_57, %c0_58] : memref<2x1x384xf32, #tpu.memory_space<vmem>>, vector<1x1x384xf32>
    %167 = vector.shape_cast %166 : vector<1x1x384xf32> to vector<1x384xf32>
    %168 = vector.broadcast %167 : vector<1x384xf32> to vector<128x384xf32>
    %169 = arith.addf %164, %168 : vector<128x384xf32>
    %170 = vector.extract_strided_slice %169 {offsets = [0, 0], sizes = [128, 128], strides = [1, 1]} : vector<128x384xf32> to vector<128x128xf32>
    %171 = arith.truncf %170 : vector<128x128xf32> to vector<128x128xbf16>
    %172 = vector.extract_strided_slice %169 {offsets = [0, 128], sizes = [128, 128], strides = [1, 1]} : vector<128x384xf32> to vector<128x128xf32>
    %173 = arith.truncf %172 : vector<128x128xf32> to vector<128x128xbf16>
    %174 = vector.extract_strided_slice %169 {offsets = [0, 256], sizes = [128, 128], strides = [1, 1]} : vector<128x384xf32> to vector<128x128xf32>
    %175 = arith.truncf %174 : vector<128x128xf32> to vector<128x128xbf16>
    %176 = arith.index_cast %c1_i32 : i32 to index
    %c0_59 = arith.constant 0 : index
    %c0_60 = arith.constant 0 : index
    %177 = vector.load %arg4[%176, %c0_59, %c0_60] : memref<2x128x128xbf16, #tpu.memory_space<vmem>>, vector<1x128x128xbf16>
    %178 = vector.shape_cast %177 : vector<1x128x128xbf16> to vector<128x128xbf16>
    %cst_61 = arith.constant 0.000000e+00 : f32
    %179 = vector.broadcast %cst_61 : f32 to vector<128x128xf32>
    %180 = vector.extract_strided_slice %171 {offsets = [0, 0], sizes = [128, 64], strides = [1, 1]} : vector<128x128xbf16> to vector<128x64xbf16>
    %181 = vector.extract_strided_slice %173 {offsets = [0, 0], sizes = [128, 64], strides = [1, 1]} : vector<128x128xbf16> to vector<128x64xbf16>
    "tpu.trace_start"() <{level = 10 : i32, message = "qd,kd->qk"}> : () -> ()
    %cst_62 = arith.constant dense<0.000000e+00> : vector<128x128xf32>
    %182 = tpu.matmul %180, %181, %cst_62 {dimension_numbers = #tpu.dot_dimension_numbers<[1], [1], [0], [0], [0, 0, 1, 0], [], []>} : vector<128x64xbf16>, vector<128x64xbf16>, vector<128x128xf32> -> vector<128x128xf32>
    "tpu.trace_stop"() : () -> ()
    %183 = arith.addf %182, %0 : vector<128x128xf32>
    %cst_63 = arith.constant dense<0xFF800000> : vector<128xf32>
    %184 = vector.multi_reduction <maximumf>, %183, %cst_63 [1] : vector<128x128xf32> to vector<128xf32>
    %185 = vector.shape_cast %184 : vector<128xf32> to vector<128x1xf32>
    %186 = vector.broadcast %185 : vector<128x1xf32> to vector<128x128xf32>
    %187 = arith.subf %183, %186 : vector<128x128xf32>
    %188 = math.exp %187 : vector<128x128xf32>
    %cst_64 = arith.constant dense<0.000000e+00> : vector<128xf32>
    %189 = vector.multi_reduction <add>, %188, %cst_64 [1] : vector<128x128xf32> to vector<128xf32>
    %190 = vector.shape_cast %189 : vector<128xf32> to vector<128x1xf32>
    %191 = tpu.reciprocal %190 {approx = true} : vector<128x1xf32> -> vector<128x1xf32>
    %192 = vector.broadcast %191 : vector<128x1xf32> to vector<128x128xf32>
    %193 = arith.mulf %188, %192 : vector<128x128xf32>
    %194 = arith.truncf %193 : vector<128x128xf32> to vector<128x128xbf16>
    %195 = vector.extract_strided_slice %175 {offsets = [0, 0], sizes = [128, 64], strides = [1, 1]} : vector<128x128xbf16> to vector<128x64xbf16>
    %cst_65 = arith.constant dense<0.000000e+00> : vector<128x64xf32>
    %196 = tpu.matmul %194, %195, %cst_65 {dimension_numbers = #tpu.dot_dimension_numbers<[1], [0], [0], [1], [0, 0, 1, 1], [], []>} : vector<128x128xbf16>, vector<128x64xbf16>, vector<128x64xf32> -> vector<128x64xf32>
    %197 = arith.truncf %196 : vector<128x64xf32> to vector<128x64xbf16>
    %198 = vector.extract_strided_slice %178 {offsets = [0, 0], sizes = [64, 128], strides = [1, 1]} : vector<128x128xbf16> to vector<64x128xbf16>
    %cst_66 = arith.constant dense<0.000000e+00> : vector<128x128xf32>
    %199 = tpu.matmul %197, %198, %cst_66 {dimension_numbers = #tpu.dot_dimension_numbers<[1], [0], [0], [1], [0, 0, 1, 1], [], []>} : vector<128x64xbf16>, vector<64x128xbf16>, vector<128x128xf32> -> vector<128x128xf32>
    %200 = arith.addf %179, %199 : vector<128x128xf32>
    %201 = vector.extract_strided_slice %171 {offsets = [0, 64], sizes = [128, 64], strides = [1, 1]} : vector<128x128xbf16> to vector<128x64xbf16>
    %202 = vector.extract_strided_slice %173 {offsets = [0, 64], sizes = [128, 64], strides = [1, 1]} : vector<128x128xbf16> to vector<128x64xbf16>
    "tpu.trace_start"() <{level = 10 : i32, message = "qd,kd->qk"}> : () -> ()
    %cst_67 = arith.constant dense<0.000000e+00> : vector<128x128xf32>
    %203 = tpu.matmul %201, %202, %cst_67 {dimension_numbers = #tpu.dot_dimension_numbers<[1], [1], [0], [0], [0, 0, 1, 0], [], []>} : vector<128x64xbf16>, vector<128x64xbf16>, vector<128x128xf32> -> vector<128x128xf32>
    "tpu.trace_stop"() : () -> ()
    %204 = arith.addf %203, %0 : vector<128x128xf32>
    %cst_68 = arith.constant dense<0xFF800000> : vector<128xf32>
    %205 = vector.multi_reduction <maximumf>, %204, %cst_68 [1] : vector<128x128xf32> to vector<128xf32>
    %206 = vector.shape_cast %205 : vector<128xf32> to vector<128x1xf32>
    %207 = vector.broadcast %206 : vector<128x1xf32> to vector<128x128xf32>
    %208 = arith.subf %204, %207 : vector<128x128xf32>
    %209 = math.exp %208 : vector<128x128xf32>
    %cst_69 = arith.constant dense<0.000000e+00> : vector<128xf32>
    %210 = vector.multi_reduction <add>, %209, %cst_69 [1] : vector<128x128xf32> to vector<128xf32>
    %211 = vector.shape_cast %210 : vector<128xf32> to vector<128x1xf32>
    %212 = tpu.reciprocal %211 {approx = true} : vector<128x1xf32> -> vector<128x1xf32>
    %213 = vector.broadcast %212 : vector<128x1xf32> to vector<128x128xf32>
    %214 = arith.mulf %209, %213 : vector<128x128xf32>
    %215 = arith.truncf %214 : vector<128x128xf32> to vector<128x128xbf16>
    %216 = vector.extract_strided_slice %175 {offsets = [0, 64], sizes = [128, 64], strides = [1, 1]} : vector<128x128xbf16> to vector<128x64xbf16>
    %cst_70 = arith.constant dense<0.000000e+00> : vector<128x64xf32>
    %217 = tpu.matmul %215, %216, %cst_70 {dimension_numbers = #tpu.dot_dimension_numbers<[1], [0], [0], [1], [0, 0, 1, 1], [], []>} : vector<128x128xbf16>, vector<128x64xbf16>, vector<128x64xf32> -> vector<128x64xf32>
    %218 = arith.truncf %217 : vector<128x64xf32> to vector<128x64xbf16>
    %219 = vector.extract_strided_slice %178 {offsets = [64, 0], sizes = [64, 128], strides = [1, 1]} : vector<128x128xbf16> to vector<64x128xbf16>
    %cst_71 = arith.constant dense<0.000000e+00> : vector<128x128xf32>
    %220 = tpu.matmul %218, %219, %cst_71 {dimension_numbers = #tpu.dot_dimension_numbers<[1], [0], [0], [1], [0, 0, 1, 1], [], []>} : vector<128x64xbf16>, vector<64x128xbf16>, vector<128x128xf32> -> vector<128x128xf32>
    %221 = arith.addf %200, %220 : vector<128x128xf32>
    %222 = arith.index_cast %c1_i32 : i32 to index
    %c0_72 = arith.constant 0 : index
    %c0_73 = arith.constant 0 : index
    %223 = vector.load %arg5[%222, %c0_72, %c0_73] : memref<2x1x128xf32, #tpu.memory_space<vmem>>, vector<1x1x128xf32>
    %224 = vector.shape_cast %223 : vector<1x1x128xf32> to vector<1x128xf32>
    %225 = vector.broadcast %224 : vector<1x128xf32> to vector<128x128xf32>
    %226 = arith.addf %221, %225 : vector<128x128xf32>
    %227 = arith.addf %159, %226 : vector<128x128xf32>
    %228 = arith.index_cast %c1_i32 : i32 to index
    %c0_74 = arith.constant 0 : index
    %c0_75 = arith.constant 0 : index
    %229 = vector.load %arg6[%228, %c0_74, %c0_75] : memref<2x1x128xf32, #tpu.memory_space<vmem>>, vector<1x1x128xf32>
    %230 = vector.shape_cast %229 : vector<1x1x128xf32> to vector<1x128xf32>
    %231 = arith.index_cast %c1_i32 : i32 to index
    %c0_76 = arith.constant 0 : index
    %c0_77 = arith.constant 0 : index
    %232 = vector.load %arg7[%231, %c0_76, %c0_77] : memref<2x1x128xf32, #tpu.memory_space<vmem>>, vector<1x1x128xf32>
    %233 = vector.shape_cast %232 : vector<1x1x128xf32> to vector<1x128xf32>
    %cst_78 = arith.constant dense<0.000000e+00> : vector<128xf32>
    %234 = vector.multi_reduction <add>, %227, %cst_78 [1] : vector<128x128xf32> to vector<128xf32>
    %235 = vector.shape_cast %234 : vector<128xf32> to vector<128x1xf32>
    %cst_79 = arith.constant 1.280000e+02 : f32
    %236 = vector.broadcast %cst_79 : f32 to vector<128x1xf32>
    %237 = arith.divf %235, %236 : vector<128x1xf32>
    %238 = vector.broadcast %237 : vector<128x1xf32> to vector<128x128xf32>
    %239 = arith.subf %227, %238 : vector<128x128xf32>
    %240 = arith.mulf %239, %239 : vector<128x128xf32>
    %cst_80 = arith.constant dense<0.000000e+00> : vector<128xf32>
    %241 = vector.multi_reduction <add>, %240, %cst_80 [1] : vector<128x128xf32> to vector<128xf32>
    %242 = vector.shape_cast %241 : vector<128xf32> to vector<128x1xf32>
    %cst_81 = arith.constant 1.280000e+02 : f32
    %243 = vector.broadcast %cst_81 : f32 to vector<128x1xf32>
    %244 = arith.divf %242, %243 : vector<128x1xf32>
    %245 = vector.broadcast %237 : vector<128x1xf32> to vector<128x128xf32>
    %246 = arith.subf %227, %245 : vector<128x128xf32>
    %cst_82 = arith.constant 9.99999996E-13 : f32
    %247 = vector.broadcast %cst_82 : f32 to vector<128x1xf32>
    %248 = arith.addf %244, %247 : vector<128x1xf32>
    %249 = math.rsqrt %248 : vector<128x1xf32>
    %250 = vector.broadcast %249 : vector<128x1xf32> to vector<128x128xf32>
    %251 = arith.mulf %246, %250 : vector<128x128xf32>
    %252 = vector.broadcast %230 : vector<1x128xf32> to vector<128x128xf32>
    %253 = arith.mulf %251, %252 : vector<128x128xf32>
    %254 = vector.broadcast %233 : vector<1x128xf32> to vector<128x128xf32>
    %255 = arith.addf %253, %254 : vector<128x128xf32>
    %256 = arith.truncf %255 : vector<128x128xf32> to vector<128x128xbf16>
    %257 = arith.index_cast %c1_i32 : i32 to index
    %c0_83 = arith.constant 0 : index
    %c0_84 = arith.constant 0 : index
    %258 = vector.load %arg8[%257, %c0_83, %c0_84] : memref<2x128x256xbf16, #tpu.memory_space<vmem>>, vector<1x128x256xbf16>
    %259 = vector.shape_cast %258 : vector<1x128x256xbf16> to vector<128x256xbf16>
    %cst_85 = arith.constant dense<0.000000e+00> : vector<128x256xf32>
    %260 = tpu.matmul %256, %259, %cst_85 {dimension_numbers = #tpu.dot_dimension_numbers<[1], [0], [0], [1], [0, 0, 1, 1], [], []>} : vector<128x128xbf16>, vector<128x256xbf16>, vector<128x256xf32> -> vector<128x256xf32>
    %261 = arith.index_cast %c1_i32 : i32 to index
    %c0_86 = arith.constant 0 : index
    %c0_87 = arith.constant 0 : index
    %262 = vector.load %arg9[%261, %c0_86, %c0_87] : memref<2x1x256xf32, #tpu.memory_space<vmem>>, vector<1x1x256xf32>
    %263 = vector.shape_cast %262 : vector<1x1x256xf32> to vector<1x256xf32>
    %264 = vector.broadcast %263 : vector<1x256xf32> to vector<128x256xf32>
    %265 = arith.addf %260, %264 : vector<128x256xf32>
    %266 = arith.mulf %265, %265 : vector<128x256xf32>
    %267 = arith.mulf %265, %266 : vector<128x256xf32>
    %cst_88 = arith.constant 4.471500e-02 : f32
    %268 = vector.broadcast %cst_88 : f32 to vector<128x256xf32>
    %269 = arith.mulf %268, %267 : vector<128x256xf32>
    %270 = arith.addf %265, %269 : vector<128x256xf32>
    %cst_89 = arith.constant 0.797884583 : f32
    %271 = vector.broadcast %cst_89 : f32 to vector<128x256xf32>
    %272 = arith.mulf %271, %270 : vector<128x256xf32>
    %273 = math.tanh %272 : vector<128x256xf32>
    %cst_90 = arith.constant 1.000000e+00 : f32
    %274 = vector.broadcast %cst_90 : f32 to vector<128x256xf32>
    %275 = arith.addf %274, %273 : vector<128x256xf32>
    %cst_91 = arith.constant 5.000000e-01 : f32
    %276 = vector.broadcast %cst_91 : f32 to vector<128x256xf32>
    %277 = arith.mulf %276, %275 : vector<128x256xf32>
    %278 = arith.mulf %265, %277 : vector<128x256xf32>
    %279 = arith.truncf %278 : vector<128x256xf32> to vector<128x256xbf16>
    %280 = arith.index_cast %c1_i32 : i32 to index
    %c0_92 = arith.constant 0 : index
    %c0_93 = arith.constant 0 : index
    %281 = vector.load %arg10[%280, %c0_92, %c0_93] : memref<2x256x128xbf16, #tpu.memory_space<vmem>>, vector<1x256x128xbf16>
    %282 = vector.shape_cast %281 : vector<1x256x128xbf16> to vector<256x128xbf16>
    %cst_94 = arith.constant dense<0.000000e+00> : vector<128x128xf32>
    %283 = tpu.matmul %279, %282, %cst_94 {dimension_numbers = #tpu.dot_dimension_numbers<[1], [0], [0], [1], [0, 0, 1, 1], [], []>} : vector<128x256xbf16>, vector<256x128xbf16>, vector<128x128xf32> -> vector<128x128xf32>
    %284 = arith.index_cast %c1_i32 : i32 to index
    %c0_95 = arith.constant 0 : index
    %c0_96 = arith.constant 0 : index
    %285 = vector.load %arg11[%284, %c0_95, %c0_96] : memref<2x1x128xf32, #tpu.memory_space<vmem>>, vector<1x1x128xf32>
    %286 = vector.shape_cast %285 : vector<1x1x128xf32> to vector<1x128xf32>
    %287 = vector.broadcast %286 : vector<1x128xf32> to vector<128x128xf32>
    %288 = arith.addf %283, %287 : vector<128x128xf32>
    %289 = arith.addf %255, %288 : vector<128x128xf32>
    %290 = arith.index_cast %c1_i32 : i32 to index
    %c0_97 = arith.constant 0 : index
    %c0_98 = arith.constant 0 : index
    %291 = vector.load %arg12[%290, %c0_97, %c0_98] : memref<2x1x128xf32, #tpu.memory_space<vmem>>, vector<1x1x128xf32>
    %292 = vector.shape_cast %291 : vector<1x1x128xf32> to vector<1x128xf32>
    %293 = arith.index_cast %c1_i32 : i32 to index
    %c0_99 = arith.constant 0 : index
    %c0_100 = arith.constant 0 : index
    %294 = vector.load %arg13[%293, %c0_99, %c0_100] : memref<2x1x128xf32, #tpu.memory_space<vmem>>, vector<1x1x128xf32>
    %295 = vector.shape_cast %294 : vector<1x1x128xf32> to vector<1x128xf32>
    %cst_101 = arith.constant dense<0.000000e+00> : vector<128xf32>
    %296 = vector.multi_reduction <add>, %289, %cst_101 [1] : vector<128x128xf32> to vector<128xf32>
    %297 = vector.shape_cast %296 : vector<128xf32> to vector<128x1xf32>
    %cst_102 = arith.constant 1.280000e+02 : f32
    %298 = vector.broadcast %cst_102 : f32 to vector<128x1xf32>
    %299 = arith.divf %297, %298 : vector<128x1xf32>
    %300 = vector.broadcast %299 : vector<128x1xf32> to vector<128x128xf32>
    %301 = arith.subf %289, %300 : vector<128x128xf32>
    %302 = arith.mulf %301, %301 : vector<128x128xf32>
    %cst_103 = arith.constant dense<0.000000e+00> : vector<128xf32>
    %303 = vector.multi_reduction <add>, %302, %cst_103 [1] : vector<128x128xf32> to vector<128xf32>
    %304 = vector.shape_cast %303 : vector<128xf32> to vector<128x1xf32>
    %cst_104 = arith.constant 1.280000e+02 : f32
    %305 = vector.broadcast %cst_104 : f32 to vector<128x1xf32>
    %306 = arith.divf %304, %305 : vector<128x1xf32>
    %307 = vector.broadcast %299 : vector<128x1xf32> to vector<128x128xf32>
    %308 = arith.subf %289, %307 : vector<128x128xf32>
    %cst_105 = arith.constant 9.99999996E-13 : f32
    %309 = vector.broadcast %cst_105 : f32 to vector<128x1xf32>
    %310 = arith.addf %306, %309 : vector<128x1xf32>
    %311 = math.rsqrt %310 : vector<128x1xf32>
    %312 = vector.broadcast %311 : vector<128x1xf32> to vector<128x128xf32>
    %313 = arith.mulf %308, %312 : vector<128x128xf32>
    %314 = vector.broadcast %292 : vector<1x128xf32> to vector<128x128xf32>
    %315 = arith.mulf %313, %314 : vector<128x128xf32>
    %316 = vector.broadcast %295 : vector<1x128xf32> to vector<128x128xf32>
    %317 = arith.addf %315, %316 : vector<128x128xf32>
    %c2_i32 = arith.constant 2 : i32
    %318 = tpu.iota {dimensions = array<i32: 1>} : vector<16x128xi32>
    %319 = tpu.iota {dimensions = array<i32: 0>} : vector<16x128xi32>
    %c8_i32 = arith.constant 8 : i32
    %320 = vector.broadcast %c8_i32 : i32 to vector<16x128xi32>
    %321 = arith.muli %319, %320 : vector<16x128xi32>
    %322 = arith.cmpi eq, %318, %321 : vector<16x128xi32>
    %323 = arith.extui %322 : vector<16x128xi1> to vector<16x128xi32>
    %324 = arith.sitofp %323 : vector<16x128xi32> to vector<16x128xf32>
    %cst_106 = arith.constant dense<0.000000e+00> : vector<16x128xf32>
    %325 = tpu.matmul %324, %317, %cst_106 {dimension_numbers = #tpu.dot_dimension_numbers<[1], [0], [0], [1], [0, 0, 1, 1], [], []>} : vector<16x128xf32>, vector<128x128xf32>, vector<16x128xf32> -> vector<16x128xf32>
    %326 = arith.truncf %325 : vector<16x128xf32> to vector<16x128xbf16>
    %c0_107 = arith.constant 0 : index
    %c0_108 = arith.constant 0 : index
    %327 = vector.load %arg14[%c0_107, %c0_108] : memref<128x128xbf16, #tpu.memory_space<vmem>>, vector<128x128xbf16>
    %cst_109 = arith.constant dense<0.000000e+00> : vector<16x128xf32>
    %328 = tpu.matmul %326, %327, %cst_109 {dimension_numbers = #tpu.dot_dimension_numbers<[1], [0], [0], [1], [0, 0, 1, 1], [], []>} : vector<16x128xbf16>, vector<128x128xbf16>, vector<16x128xf32> -> vector<16x128xf32>
    %c0_110 = arith.constant 0 : index
    %c0_111 = arith.constant 0 : index
    %329 = vector.load %arg15[%c0_110, %c0_111] : memref<1x128xf32, #tpu.memory_space<vmem>>, vector<1x128xf32>
    %330 = vector.broadcast %329 : vector<1x128xf32> to vector<16x128xf32>
    %331 = arith.addf %328, %330 : vector<16x128xf32>
    %332 = arith.negf %331 : vector<16x128xf32>
    %333 = math.exp %332 : vector<16x128xf32>
    %cst_112 = arith.constant 1.000000e+00 : f32
    %334 = vector.broadcast %cst_112 : f32 to vector<16x128xf32>
    %335 = arith.addf %334, %333 : vector<16x128xf32>
    %336 = arith.divf %334, %335 : vector<16x128xf32>
    %c0_113 = arith.constant 0 : index
    %c0_114 = arith.constant 0 : index
    %337 = vector.load %arg16[%c0_113, %c0_114] : memref<16x128xf32, #tpu.memory_space<vmem>>, vector<16x128xf32>
    tpu.vector_store %arg16[%c0_113, %c0_114], %336 {strides = array<i32>} : memref<16x128xf32, #tpu.memory_space<vmem>>, vector<16x128xf32>,
    return
  }
}

</mosaic_0001>

<bundles_post_ra>
// kernel: forward.1
= control target key start
LH: loop header
LB: loop body
LE: loop exit
PB: predicated region body
PF: predicated region fallthrough
CT: control target
= control target key end

     0   :  { %s7499_s26 = smov 64   ;;  %vm553_vm0 = vcmask 523264   ;;  %s11465_s2 = inlined_call_operand.vmem [shape: bf16[2,128,384], index: 2, kind: input, shape index: {}]   ;;  %s11466_s0 = inlined_call_operand.vmem [shape: f32[128,128], index: 0, kind: input, shape index: {}]   ;;  %s11467_s3 = inlined_call_operand.vmem [shape: f32[2,1,384], index: 3, kind: input, shape index: {}]   ;;  %s11468_s1 = inlined_call_operand.vmem [shape: f32[128,128], index: 1, kind: input, shape index: {}]   ;;  %s11469_s4 = inlined_call_operand.vmem [shape: bf16[2,128,128], index: 4, kind: input, shape index: {}]   ;;  %s11470_s5 = inlined_call_operand.vmem [shape: f32[2,1,128], index: 5, kind: input, shape index: {}]   ;;  %s11471_s6 = inlined_call_operand.vmem [shape: f32[2,1,128], index: 6, kind: input, shape index: {}]   ;;  %s11472_s7 = inlined_call_operand.vmem [shape: f32[2,1,128], index: 7, kind: input, shape index: {}]   ;;  %s11473_s8 = inlined_call_operand.vmem [shape: bf16[2,128,256], index: 8, kind: input, shape index: {}]   ;;  %s11474_s10 = inlined_call_operand.vmem [shape: bf16[2,256,128], index: 10, kind: input, shape index: {}]   ;;  %s11475_s9 = inlined_call_operand.vmem [shape: f32[2,1,256], index: 9, kind: input, shape index: {}]   ;;  %s11476_s11 = inlined_call_operand.vmem [shape: f32[2,1,128], index: 11, kind: input, shape index: {}]   ;;  %s11477_s12 = inlined_call_operand.vmem [shape: f32[2,1,128], index: 12, kind: input, shape index: {}]   ;;  %s11478_s13 = inlined_call_operand.vmem [shape: f32[2,1,128], index: 13, kind: input, shape index: {}]   ;;  %s11479_s14 = inlined_call_operand.vmem [shape: bf16[128,128], index: 14, kind: input, shape index: {}]   ;;  %s11480_s15 = inlined_call_operand.vmem [shape: f32[1,128], index: 15, kind: input, shape index: {}]   ;;  %s11481_s16 = inlined_call_operand.vmem [shape: f32[16,128], index: 16, kind: output, shape index: {}]  }
   0x1   :  { %11489 = sst [smem:[#allocation8_spill]] %s11465_s2  ;;  %v70_v46 = vld [vmem:[%s11466_s0] sm:$0xff]  ;;  %v71_v50 = vld [vmem:[%s11466_s0 + $0x8] sm:$0xff]  ;;  %v76_v54 = vld [vmem:[%s11466_s0 + $0x30] sm:$0xff] }
   0x2   :  { %s11490_s23 = sld [smem:[#allocation8_spill]]  ;;  %v74_v51 = vld [vmem:[%s11466_s0 + $0x20] sm:$0xff]  ;;  %v75_v52 = vld [vmem:[%s11466_s0 + $0x28] sm:$0xff]  ;;  %v77_v55 = vld [vmem:[%s11466_s0 + $0x38] sm:$0xff]  ;;  %v7730_v57 = vpack.c.bf16 %v71_v50, %v70_v46 }
   0x3   :  { %v7732_v58 = vpack.c.bf16 %v75_v52, %v74_v51  ;;  %v7740_v61 = vpack.c.bf16 %v77_v55, %v76_v54  ;;  %v78_v62 = vld [vmem:[%s11466_s0 + $0x40] sm:$0xff]  ;;  %v79_v63 = vld [vmem:[%s11466_s0 + $0x48] sm:$0xff] }
   0x8   :  { %v6137_v0 = vld [vmem:[%s11490_s23 + $0xa8] sm:$0xf]  ;;  %v6791_v1 = vld [vmem:[%s11490_s23 + $0xb0] sm:$0xf0]  ;;  %v6790_v2 = vld [vmem:[%s11490_s23 + $0xac] sm:$0xf] }
   0x9   :  { %v6138_v3 = vor.u32 %v6791_v1, %v6137_v0  ;;  %v6139_v4 = vld [vmem:[%s11490_s23 + $0xb4] sm:$0xf0]  ;;  %v6125_v5 = vld [vmem:[%s11490_s23 + $0x90] sm:$0xf]  ;;  %v6788_v6 = vld [vmem:[%s11490_s23 + $0x98] sm:$0xf0] }
   0xa   :  { %v7605_v7 = vor.u32 %v6790_v2, %v6139_v4  ;;  %v6787_v8 = vld [vmem:[%s11490_s23 + $0x94] sm:$0xf]  ;;  %v6127_v9 = vld [vmem:[%s11490_s23 + $0x9c] sm:$0xf0]  ;;  %v6126_v10 = vor.u32 %v6788_v6, %v6125_v5  ;;  %v6113_v12 = vld [vmem:[%s11490_s23 + $0x78] sm:$0xf] }
   0xb   :  { %262 = vmatpush.bf16.msra.mxu0 %v6138_v3  ;;  %6905 = vmatpush.bf16.msra.mxu2 %v6138_v3  ;;  %v7614_v11 = vor.u32 %v6787_v8, %v6127_v9  ;;  %v6785_v13 = vld [vmem:[%s11490_s23 + $0x80] sm:$0xf0]  ;;  %v6784_v14 = vld [vmem:[%s11490_s23 + $0x7c] sm:$0xf]  ;;  %v6115_v15 = vld [vmem:[%s11490_s23 + $0x84] sm:$0xf0] }
   0xc   :  { %6921 = vmatpush.bf16.msra.mxu1 %v7605_v7  ;;  %6906 = vmatpush.bf16.msra.mxu3 %v6138_v3  ;;  %v6114_v16 = vor.u32 %v6785_v13, %v6113_v12  ;;  %v7629_v17 = vor.u32 %v6784_v14, %v6115_v15  ;;  %v6101_v18 = vld [vmem:[%s11490_s23 + $0x60] sm:$0xf]  ;;  %v6782_v19 = vld [vmem:[%s11490_s23 + $0x68] sm:$0xf0]  ;;  %v6781_v20 = vld [vmem:[%s11490_s23 + $0x64] sm:$0xf]  ;;  %v90_v3 = vpack.c.bf16 %v79_v63, %v78_v62 }
   0xd   :  { %v6103_v21 = vld [vmem:[%s11490_s23 + $0x6c] sm:$0xf0]  ;;  %v6102_v22 = vor.u32 %v6782_v19, %v6101_v18  ;;  %v6089_v24 = vld [vmem:[%s11490_s23 + $0x48] sm:$0xf]  ;;  %v6779_v25 = vld [vmem:[%s11490_s23 + $0x50] sm:$0xf0] }
   0xe   :  { %v7644_v23 = vor.u32 %v6781_v20, %v6103_v21  ;;  %v6778_v26 = vld [vmem:[%s11490_s23 + $0x4c] sm:$0xf]  ;;  %v6091_v27 = vld [vmem:[%s11490_s23 + $0x54] sm:$0xf0]  ;;  %v6090_v28 = vor.u32 %v6779_v25, %v6089_v24  ;;  %v6077_v30 = vld [vmem:[%s11490_s23 + $0x30] sm:$0xf] }
   0xf   :  { %263 = vmatpush.bf16.msra.mxu0 %v6126_v10  ;;  %6907 = vmatpush.bf16.msra.mxu2 %v6126_v10  ;;  %v7659_v29 = vor.u32 %v6778_v26, %v6091_v27  ;;  %v6776_v31 = vld [vmem:[%s11490_s23 + $0x38] sm:$0xf0]  ;;  %v6775_v32 = vld [vmem:[%s11490_s23 + $0x34] sm:$0xf]  ;;  %v6079_v33 = vld [vmem:[%s11490_s23 + $0x3c] sm:$0xf0] }
  0x10   :  { %6922 = vmatpush.bf16.msra.mxu1 %v7614_v11  ;;  %6908 = vmatpush.bf16.msra.mxu3 %v6126_v10  ;;  %v6078_v34 = vor.u32 %v6776_v31, %v6077_v30  ;;  %v7674_v35 = vor.u32 %v6775_v32, %v6079_v33  ;;  %v6065_v36 = vld [vmem:[%s11490_s23 + $0x18] sm:$0xf]  ;;  %v6773_v37 = vld [vmem:[%s11490_s23 + $0x20] sm:$0xf0]  ;;  %v6772_v38 = vld [vmem:[%s11490_s23 + $0x1c] sm:$0xf] }
  0x11   :  { %v6067_v39 = vld [vmem:[%s11490_s23 + $0x24] sm:$0xf0]  ;;  %v6066_v40 = vor.u32 %v6773_v37, %v6065_v36  ;;  %v6053_v42 = vld [vmem:[%s11490_s23] sm:$0xf]  ;;  %v6770_v43 = vld [vmem:[%s11490_s23 + $0x8] sm:$0xf0] }
  0x12   :  { %v7689_v41 = vor.u32 %v6772_v38, %v6067_v39  ;;  %v6769_v44 = vld [vmem:[%s11490_s23 + $0x4] sm:$0xf]  ;;  %v6055_v45 = vld [vmem:[%s11490_s23 + $0xc] sm:$0xf0]  ;;  %v6792_v48 = vld [vmem:[%s11490_s23 + $0xb8] sm:$0xf0]  ;;  %v6054_v49 = vor.u32 %v6770_v43, %v6053_v42 }
  0x13   :  { %264 = vmatpush.bf16.msra.mxu0 %v6114_v16  ;;  %6909 = vmatpush.bf16.msra.mxu2 %v6114_v16  ;;  %v6145_v47 = vld [vmem:[%s11490_s23 + $0xb0] sm:$0xf]  ;;  %v7722_v53 = vor.u32 %v6769_v44, %v6055_v45  ;;  %v6133_v59 = vld [vmem:[%s11490_s23 + $0x98] sm:$0xf]  ;;  %v6789_v60 = vld [vmem:[%s11490_s23 + $0xa0] sm:$0xf0] }
  0x14   :  { %6923 = vmatpush.bf16.msra.mxu1 %v7629_v17  ;;  %6910 = vmatpush.bf16.msra.mxu3 %v6114_v16  ;;  %v6146_v56 = vor.u32 %v6792_v48, %v6145_v47  ;;  %v6134_v0 = vor.u32 %v6789_v60, %v6133_v59  ;;  %v6121_v1 = vld [vmem:[%s11490_s23 + $0x80] sm:$0xf]  ;;  %v6786_v2 = vld [vmem:[%s11490_s23 + $0x88] sm:$0xf0]  ;;  %v6109_v5 = vld [vmem:[%s11490_s23 + $0x68] sm:$0xf] }
  0x15   :  { %v6122_v4 = vor.u32 %v6786_v2, %v6121_v1  ;;  %v6783_v6 = vld [vmem:[%s11490_s23 + $0x70] sm:$0xf0]  ;;  %v6097_v8 = vld [vmem:[%s11490_s23 + $0x50] sm:$0xf]  ;;  %v6780_v9 = vld [vmem:[%s11490_s23 + $0x58] sm:$0xf0] }
  0x16   :  { %v72_v10 = vld [vmem:[%s11466_s0 + $0x10] sm:$0xff]  ;;  %v6098_v12 = vor.u32 %v6780_v9, %v6097_v8  ;;  %v6085_v14 = vld [vmem:[%s11490_s23 + $0x38] sm:$0xf]  ;;  %v6777_v15 = vld [vmem:[%s11490_s23 + $0x40] sm:$0xf0] }
  0x17   :  { %265 = vmatpush.bf16.msra.mxu0 %v6102_v22  ;;  %6911 = vmatpush.bf16.msra.mxu2 %v6102_v22  ;;  %v80_v16 = vld [vmem:[%s11466_s0 + $0x50] sm:$0xff]  ;;  %v6086_v18 = vor.u32 %v6777_v15, %v6085_v14  ;;  %v6073_v19 = vld [vmem:[%s11490_s23 + $0x20] sm:$0xf]  ;;  %v6774_v20 = vld [vmem:[%s11490_s23 + $0x28] sm:$0xf0] }
  0x18   :  { %6924 = vmatpush.bf16.msra.mxu1 %v7644_v23  ;;  %6912 = vmatpush.bf16.msra.mxu3 %v6102_v22  ;;  %v6074_v22 = vor.u32 %v6774_v20, %v6073_v19  ;;  %v6771_v24 = vld [vmem:[%s11490_s23 + $0x10] sm:$0xf0]  ;;  %v82_v26 = vld [vmem:[%s11466_s0 + $0x60] sm:$0xff]  ;;  %v83_v27 = vld [vmem:[%s11466_s0 + $0x68] sm:$0xff] }
  0x19   :  { %v85_v30 = vld [vmem:[%s11466_s0 + $0x78] sm:$0xff]  ;;  %v7829_v32 = vld [vmem:[%s11467_s3] sm:$0x7] }
  0x1a   :  { %v7857_v55 = vperm.slane %v7829_v32, 2 }
  0x1b   :  { %266 = vmatpush.bf16.msra.mxu0 %v6090_v28  ;;  %6913 = vmatpush.bf16.msra.mxu2 %v6090_v28 }
  0x1c   :  { %6925 = vmatpush.bf16.msra.mxu1 %v7659_v29  ;;  %6914 = vmatpush.bf16.msra.mxu3 %v6090_v28  ;;  %v92_v28 = vpack.c.bf16 %v83_v27, %v82_v26 }
  0x1f   :  { %267 = vmatpush.bf16.msra.mxu0 %v6078_v34  ;;  %6915 = vmatpush.bf16.msra.mxu2 %v6078_v34 }
  0x20   :  { %6926 = vmatpush.bf16.msra.mxu1 %v7674_v35  ;;  %6916 = vmatpush.bf16.msra.mxu3 %v6078_v34 }
  0x23   :  { %268 = vmatpush.bf16.msra.mxu0 %v6066_v40  ;;  %6917 = vmatpush.bf16.msra.mxu2 %v6066_v40 }
  0x24   :  { %6927 = vmatpush.bf16.msra.mxu1 %v7689_v41  ;;  %6918 = vmatpush.bf16.msra.mxu3 %v6066_v40 }
  0x27   :  { %269 = vmatpush.bf16.msra.mxu0 %v6054_v49  ;;  %6919 = vmatpush.bf16.msra.mxu2 %v6054_v49 }
  0x28   :  { %6928 = vmatpush.bf16.msra.mxu1 %v7722_v53  ;;  %6920 = vmatpush.bf16.msra.mxu3 %v6054_v49 }
  0x2a   :  { %270 = vmatmul.bf16.vlgmr.msra.gmra.mxu0 %v7730_v57  ;;  %280 = vmatmul.bf16.vlgmr.msra.gmra.mxu2 %v7732_v58 }
  0x2b   :  { %311 = vmatpush.bf16.msrb.mxu0 %v7605_v7  ;;  %360 = vmatpush.bf16.msrb.mxu2 %v6146_v56  ;;  %v6110_v7 = vor.u32 %v6783_v6, %v6109_v5 }
  0x2c   :  { %334 = vmatmul.bf16.vlgmr.msra.gmra.mxu1 %v7740_v61  ;;  %290 = vmatmul.bf16.vlgmr.msra.gmra.mxu3 %v90_v3 }
  0x2f   :  { %312 = vmatpush.bf16.msrb.mxu0 %v7614_v11  ;;  %361 = vmatpush.bf16.msrb.mxu2 %v6134_v0  ;;  %v73_v11 = vld [vmem:[%s11466_s0 + $0x18] sm:$0xff] }
  0x30   :  { %v87_v13 = vpack.c.bf16 %v73_v11, %v72_v10 }
  0x33   :  { %313 = vmatpush.bf16.msrb.mxu0 %v7629_v17  ;;  %362 = vmatpush.bf16.msrb.mxu2 %v6122_v4  ;;  %v81_v17 = vld [vmem:[%s11466_s0 + $0x58] sm:$0xff] }
  0x34   :  { %v91_v21 = vpack.c.bf16 %v81_v17, %v80_v16 }
  0x37   :  { %314 = vmatpush.bf16.msrb.mxu0 %v7644_v23  ;;  %363 = vmatpush.bf16.msrb.mxu2 %v6110_v7  ;;  %v6061_v23 = vld [vmem:[%s11490_s23 + $0x8] sm:$0xf] }
  0x38   :  { %v6062_v25 = vor.u32 %v6771_v24, %v6061_v23 }
  0x3a   :  { %275 = vmatmul.bf16.gmra.mxu0 %v87_v13  ;;  %285 = vmatmul.bf16.gmra.mxu2 %v7740_v61 }
  0x3b   :  { %315 = vmatpush.bf16.msrb.mxu0 %v7659_v29  ;;  %364 = vmatpush.bf16.msrb.mxu2 %v6098_v12  ;;  %v84_v29 = vld [vmem:[%s11466_s0 + $0x70] sm:$0xff] }
  0x3c   :  { %339 = vmatmul.bf16.gmra.mxu1 %v90_v3  ;;  %295 = vmatmul.bf16.gmra.mxu3 %v91_v21  ;;  %v93_v31 = vpack.c.bf16 %v85_v30, %v84_v29  ;;  %v7886_v29 = vperm.slane %v7829_v32, 0 }
  0x3f   :  { %316 = vmatpush.bf16.msrb.mxu0 %v7674_v35  ;;  %365 = vmatpush.bf16.msrb.mxu2 %v6086_v18  ;;  %v7834_v35 = vperm.slane %v7829_v32, 1 }
  0x43   :  { %317 = vmatpush.bf16.msrb.mxu0 %v7689_v41  ;;  %366 = vmatpush.bf16.msrb.mxu2 %v6074_v22 }
  0x47   :  { %318 = vmatpush.bf16.msrb.mxu0 %v7722_v53  ;;  %367 = vmatpush.bf16.msrb.mxu2 %v6062_v25 }
  0x4a   :  { %319 = vmatmul.bf16.vlgmr.msrb.gmra.mxu0 %v7730_v57  ;;  %368 = vmatmul.bf16.vlgmr.msrb.gmra.mxu2 %v7730_v57 }
  0x4c   :  { %344 = vmatmul.bf16.gmra.mxu1 %v91_v21  ;;  %300 = vmatmul.bf16.gmra.mxu3 %v92_v28 }
  0x5a   :  { %324 = vmatmul.bf16.gmra.mxu0 %v87_v13  ;;  %373 = vmatmul.bf16.gmra.mxu2 %v87_v13 }
  0x5c   :  { %349 = vmatmul.bf16.gmra.mxu1 %v92_v28  ;;  %305 = vmatmul.bf16.gmra.mxu3 %v93_v31 }
  0x6a   :  { %329 = vmatmul.bf16.gmra.mxu0 %v7732_v58  ;;  %378 = vmatmul.bf16.gmra.mxu2 %v7732_v58 }
  0x6c   :  { %354 = vmatmul.bf16.gmra.mxu1 %v93_v31 }
  0x7a   :  { %383 = vmatmul.bf16.gmra.mxu2 %v7740_v61 }
  0x8a   :  { %388 = vmatmul.bf16.gmra.mxu2 %v90_v3 }
  0x9a   :  { %393 = vmatmul.bf16.gmra.mxu2 %v91_v21 }
  0xa7   :  { %v7831_v33 = vpop.f32.mrf.mxu0 }
  0xa8   :  { %v272_v32 = vadd.f32 %v7831_v33, %v7886_v29 }
  0xa9   :  { %v335_v34 = vpop.f32.mrf.mxu1 }
  0xaa   :  { %398 = vmatmul.bf16.gmra.mxu2 %v92_v28  ;;  %v336_v36 = vadd.f32 %v335_v34, %v7834_v35 }
  0xac   :  { %v431_v40 = vpack.c.bf16 %v336_v36, %v336_v36 }
  0xad   :  { %v7837_v37 = vpop.f32.mrf.mxu2 }
  0xae   :  { %v535_v43 = vunpack.c.l.b16 %v431_v40 }
  0xaf   :  { %v7839_v38 = vpop.f32.mrf.mxu0 }
  0xb1   :  { %v337_v39 = vpop.f32.mrf.mxu1 }
  0xb2   :  { %v338_v41 = vadd.f32 %v337_v39, %v7834_v35 }
  0xb4   :  { %v432_v42 = vpack.c.bf16 %v338_v41, %v338_v41 }
  0xb5   :  { %v7842_v45 = vpop.f32.mrf.mxu2 }
  0xb6   :  { %v536_v44 = vunpack.c.l.b16 %v432_v42 }
  0xb7   :  { %v7844_v46 = vpop.f32.mrf.mxu0 }
  0xb8   :  { %v7846_v47 = vpack.c.b16 %v536_v44, %v535_v43  ;;  %v274_v44 = vadd.f32 %v7839_v38, %v7886_v29 }
  0xb9   :  { %v340_v48 = vpop.f32.mrf.mxu1 }
  0xba   :  { %930 = vrot.lane.b32.xlu2 %v7846_v47, %s7499_s26  ;;  %403 = vmatmul.bf16.gmra.mxu2 %v93_v31  ;;  %v341_v1 = vadd.f32 %v340_v48, %v7834_v35 }
  0xbc   :  { %v433_v9 = vpack.c.bf16 %v341_v1, %v341_v1 }
  0xbd   :  { %v7850_v49 = vpop.f32.mrf.mxu2 }
  0xbe   :  { %v537_v11 = vunpack.c.l.b16 %v433_v9 }
  0xbf   :  { %v7852_v50 = vpop.f32.mrf.mxu0 }
  0xc1   :  { %v342_v51 = vpop.f32.mrf.mxu1 }
  0xc2   :  { %v343_v63 = vadd.f32 %v342_v51, %v7834_v35 }
  0xc4   :  { %v434_v5 = vpack.c.bf16 %v343_v63, %v343_v63  ;;  %v410_v63 = vpack.c.bf16 %v274_v44, %v274_v44 }
  0xc5   :  { %v7854_v52 = vpop.f32.mrf.mxu2 }
  0xc6   :  { %v538_v10 = vunpack.c.l.b16 %v434_v5  ;;  %v490_v9 = vunpack.c.l.b16 %v410_v63 }
  0xc7   :  { %v320_v53 = vpop.f32.mrf.mxu0 }
  0xc8   :  { %v7875_v15 = vpack.c.b16 %v538_v10, %v537_v11  ;;  %v321_v17 = vadd.f32 %v320_v53, %v7834_v35 }
  0xc9   :  { %v345_v54 = vpop.f32.mrf.mxu1 }
  0xca   :  { %v346_v56 = vadd.f32 %v345_v54, %v7834_v35  ;;  %v425_v20 = vpack.c.bf16 %v321_v17, %v321_v17 }
  0xcc   :  { %v435_v61 = vpack.c.bf16 %v346_v56, %v346_v56  ;;  %v529_v25 = vunpack.c.l.b16 %v425_v20 }
  0xcd   :  { %v369_v57 = vpop.f32.mrf.mxu2 }
  0xce   :  { %v7861_v58 = vadd.f32 %v369_v57, %v7857_v55  ;;  %v539_v2 = vunpack.c.l.b16 %v435_v61 }
  0xcf   :  { %v322_v59 = vpop.f32.mrf.mxu0 }
  0xd0   :  { %v323_v18 = vadd.f32 %v322_v59, %v7834_v35 }
  0xd1   :  { %v347_v60 = vpop.f32.mrf.mxu1 }
  0xd2   :  { %v348_v62 = vadd.f32 %v347_v60, %v7834_v35  ;;  %v426_v21 = vpack.c.bf16 %v323_v18, %v323_v18 }
  0xd4   :  { %v436_v0 = vpack.c.bf16 %v348_v62, %v348_v62  ;;  %v530_v26 = vunpack.c.l.b16 %v426_v21  ;;  %v409_v62 = vpack.c.bf16 %v272_v32, %v272_v32  ;;  %v277_v21 = vadd.f32 %v7844_v46, %v7886_v29 }
  0xd5   :  { %v7866_v4 = vpop.f32.mrf.mxu2  ;;  %v591_v46 = vsel %vm553_vm0, %v7875_v15, 0 }
  0xd6   :  { %v540_v3 = vunpack.c.l.b16 %v436_v0  ;;  %v7891_v36 = vpack.c.b16 %v530_v26, %v529_v25  ;;  %v411_v25 = vpack.c.bf16 %v277_v21, %v277_v21 }
  0xd7   :  { %v325_v6 = vpop.f32.mrf.mxu0 }
  0xd8   :  { %v7868_v7 = vpack.c.b16 %v540_v3, %v539_v2  ;;  %v326_v33 = vadd.f32 %v325_v6, %v7834_v35 }
  0xd9   :  { %v350_v8 = vpop.f32.mrf.mxu1 }
  0xda   :  { %934 = vrot.lane.b32.xlu1 %v7868_v7, %s7499_s26  ;;  %v351_v53 = vadd.f32 %v350_v8, %v7834_v35  ;;  %v489_v8 = vunpack.c.l.b16 %v409_v62  ;;  %v427_v11 = vpack.c.bf16 %v326_v33, %v326_v33 }
  0xdc   :  { %v437_v1 = vpack.c.bf16 %v351_v53, %v351_v53  ;;  %v7913_v20 = vpack.c.b16 %v490_v9, %v489_v8 }
  0xdd   :  { %v374_v12 = vpop.f32.mrf.mxu2 }
  0xde   :  { %v7873_v13 = vadd.f32 %v374_v12, %v7857_v55  ;;  %v541_v10 = vunpack.c.l.b16 %v437_v1 }
  0xdf   :  { %v327_v14 = vpop.f32.mrf.mxu0 }
  0xe0   :  { %v328_v38 = vadd.f32 %v327_v14, %v7834_v35 }
  0xe1   :  { %v352_v16 = vpop.f32.mrf.mxu1 }
  0xe2   :  { %932 = vrot.lane.b32.xlu1 %v7875_v15, %s7499_s26  ;;  %v353_v41 = vadd.f32 %v352_v16, %v7834_v35  ;;  %v428_v12 = vpack.c.bf16 %v328_v38, %v328_v38  ;;  %v579_v38 = vsel %vm553_vm0, %v7891_v36, 0 }
  0xe4   :  { %v438_v57 = vpack.c.bf16 %v353_v41, %v353_v41  ;;  %v532_v6 = vunpack.c.l.b16 %v428_v12  ;;  %v588_v41 = vsel %vm553_vm0, %v7846_v47, 0 }
  0xe5   :  { %v7881_v19 = vpop.f32.mrf.mxu2 }
  0xe6   :  { %v542_v3 = vunpack.c.l.b16 %v438_v57 }
  0xe7   :  { %v330_v22 = vpop.f32.mrf.mxu0 }
  0xe8   :  { %v331_v24 = vadd.f32 %v330_v22, %v7834_v35  ;;  %v551_v17 = vpack.c.b16 %v542_v3, %v541_v10  ;;  %v279_v22 = vadd.f32 %v7852_v50, %v7886_v29  ;;  %v377_v10 = vadd.f32 %v7881_v19, %v7857_v55 }
  0xe9   :  { %v355_v23 = vpop.f32.mrf.mxu1 }
  0xea   :  { %v356_v27 = vadd.f32 %v355_v23, %v7834_v35  ;;  %v429_v30 = vpack.c.bf16 %v331_v24, %v331_v24  ;;  %924 = vrot.lane.b32.xlu1 %v7891_v36, %s7499_s26  ;;  %v597_v14 = vsel %vm553_vm0, %v551_v17, 0  ;;  %v412_v26 = vpack.c.bf16 %v279_v22, %v279_v22 }
  0xeb   :  { %v444_v19 = vpack.c.bf16 %v377_v10, %v377_v10 }
  0xec   :  { %v439_v42 = vpack.c.bf16 %v356_v27, %v356_v27  ;;  %v533_v48 = vunpack.c.l.b16 %v429_v30  ;;  %v594_v27 = vsel %vm553_vm0, %v7868_v7, 0  ;;  %v492_v30 = vunpack.c.l.b16 %v412_v26  ;;  %v7935_v7 = vpop.f32.mrf.mxu3 }
  0xed   :  { %v379_v28 = vpop.f32.mrf.mxu2  ;;  %v822_v26 = vunpack.c.l.b16 %v444_v19 }
  0xee   :  { %v7889_v31 = vadd.f32 %v379_v28, %v7857_v55  ;;  %v543_v59 = vunpack.c.l.b16 %v439_v42  ;;  %v491_v28 = vunpack.c.l.b16 %v411_v25  ;;  %v282_v42 = vadd.f32 %v7837_v37, %v7886_v29 }
  0xef   :  { %v332_v34 = vpop.f32.mrf.mxu0  ;;  %v287_v37 = vadd.f32 %v7850_v49, %v7886_v29 }
  0xf0   :  { %v333_v39 = vadd.f32 %v332_v34, %v7834_v35  ;;  %v445_v36 = vpack.c.bf16 %v7889_v31, %v7889_v31 }
  0xf1   :  { %v357_v40 = vpop.f32.mrf.mxu1 }
  0xf2   :  { %v358_v43 = vadd.f32 %v357_v40, %v7834_v35  ;;  %v430_v51 = vpack.c.bf16 %v333_v39, %v333_v39  ;;  %v531_v35 = vunpack.c.l.b16 %v427_v11  ;;  %v7927_v40 = vpack.c.b16 %v492_v30, %v491_v28 }
  0xf3   :  { %v823_v21 = vunpack.c.l.b16 %v445_v36 }
  0xf4   :  { %v440_v54 = vpack.c.bf16 %v358_v43, %v358_v43  ;;  %v534_v56 = vunpack.c.l.b16 %v430_v51  ;;  %v546_v24 = vpack.c.b16 %v532_v6, %v531_v35  ;;  %v284_v43 = vadd.f32 %v7842_v45, %v7886_v29  ;;  %v7944_v51 = vpop.f32.mrf.mxu3 }
  0xf5   :  { %v7903_v61 = vpop.f32.mrf.mxu2  ;;  %v289_v45 = vadd.f32 %v7854_v52, %v7886_v29 }
  0xf6   :  { %v544_v60 = vunpack.c.l.b16 %v440_v54  ;;  %v547_v0 = vpack.c.b16 %v534_v56, %v533_v48  ;;  %v413_v48 = vpack.c.bf16 %v282_v42, %v282_v42  ;;  %v414_v15 = vpack.c.bf16 %v284_v43, %v284_v43 }
  0xf7   :  { %v582_v57 = vsel %vm553_vm0, %v546_v24, 0  ;;  %v416_v1 = vpack.c.bf16 %v289_v45, %v289_v45  ;;  %v382_v49 = vadd.f32 %v7903_v61, %v7857_v55 }
  0xf8   :  { %v552_v2 = vpack.c.b16 %v544_v60, %v543_v59  ;;  %928 = vrot.lane.b32.xlu2 %v547_v0, %s7499_s26  ;;  %v585_v44 = vsel %vm553_vm0, %v547_v0, 0  ;;  %v493_v53 = vunpack.c.l.b16 %v413_v48  ;;  %v494_v47 = vunpack.c.l.b16 %v414_v15 }
  0xf9   :  { %v415_v0 = vpack.c.bf16 %v287_v37, %v287_v37  ;;  %v496_v8 = vunpack.c.l.b16 %v416_v1  ;;  %v294_v37 = vadd.f32 %v7944_v51, %v7886_v29 }
  0xfa   :  { %938 = vrot.lane.b32.xlu0 %v552_v2, %s7499_s26  ;;  %v600_v5 = vsel %vm553_vm0, %v552_v2, 0  ;;  %v7946_v56 = vpack.c.b16 %v494_v47, %v493_v53  ;;  %v292_v47 = vadd.f32 %v7935_v7, %v7886_v29 }
  0xfb   :  { %602 = vmatpush.bf16.xpose.msrb.mxu3 %v600_v5  ;;  %v495_v5 = vunpack.c.l.b16 %v415_v0 }
  0xfc   :  { %912 = vrot.lane.b32.xlu1 %v7946_v56, %s7499_s26  ;;  %v7955_v59 = vpop.f32.mrf.mxu3  ;;  %v417_v1 = vpack.c.bf16 %v292_v47, %v292_v47 }
  0xfd   :  { %v384_v16 = vpop.f32.mrf.mxu2  ;;  %v7969_v6 = vpack.c.b16 %v496_v8, %v495_v5 }
  0xfe   :  { %v7911_v18 = vadd.f32 %v384_v16, %v7857_v55  ;;  %v497_v51 = vunpack.c.l.b16 %v417_v1 }
 0x100   :  { %908 = vrot.lane.b32.xlu2 %v7913_v20, %s7499_s26  ;;  %v447_v52 = vpack.c.bf16 %v7911_v18, %v7911_v18  ;;  %v443_v18 = vpack.c.bf16 %v7873_v13, %v7873_v13 }
 0x102   :  { %936 = vrot.lane.b32.xlu0 %v551_v17, %s7499_s26  ;;  %v446_v17 = vpack.c.bf16 %v382_v49, %v382_v49  ;;  %v825_v35 = vunpack.c.l.b16 %v447_v52  ;;  %v821_v13 = vunpack.c.l.b16 %v443_v18 }
 0x103   :  { %603 = vmatpush.bf16.xpose.msrb.mxu3 %v597_v14 }
 0x104   :  { %v298_v9 = vpop.f32.mrf.mxu3  ;;  %v824_v22 = vunpack.c.l.b16 %v446_v17 }
 0x105   :  { %v386_v23 = vpop.f32.mrf.mxu2  ;;  %v299_v5 = vadd.f32 %v298_v9, %v7886_v29 }
 0x106   :  { %v387_v63 = vadd.f32 %v386_v23, %v7857_v55  ;;  %v372_v23 = vadd.f32 %v7866_v4, %v7857_v55 }
 0x108   :  { %v448_v3 = vpack.c.bf16 %v387_v63, %v387_v63  ;;  %914 = vrot.lane.b32.xlu2 %v7969_v6, %s7499_s26  ;;  %v442_v28 = vpack.c.bf16 %v372_v23, %v372_v23 }
 0x10a   :  { %926 = vrot.lane.b32.xlu0 %v546_v24, %s7499_s26  ;;  %v826_v61 = vunpack.c.l.b16 %v448_v3  ;;  %v297_v3 = vadd.f32 %v7955_v59, %v7886_v29 }
 0x10b   :  { %604 = vmatpush.bf16.xpose.msrb.mxu3 %v594_v27  ;;  %v7985_v27 = vpack.c.b16 %v824_v22, %v823_v21 }
 0x10c   :  { %v7979_v31 = vpack.c.b16 %v826_v61, %v825_v35  ;;  %v7983_v24 = vpop.f32.mrf.mxu3  ;;  %v419_v10 = vpack.c.bf16 %v297_v3, %v297_v3 }
 0x10d   :  { %v389_v34 = vpop.f32.mrf.mxu2  ;;  %v302_v22 = vadd.f32 %v7983_v24, %v7886_v29 }
 0x10e   :  { %v390_v39 = vadd.f32 %v389_v34, %v7857_v55  ;;  %v499_v61 = vunpack.c.l.b16 %v419_v10 }
 0x110   :  { %v449_v2 = vpack.c.bf16 %v390_v39, %v390_v39 }
 0x112   :  { %910 = vrot.lane.b32.xlu0 %v7927_v40, %s7499_s26  ;;  %v827_v11 = vunpack.c.l.b16 %v449_v2 }
 0x113   :  { %605 = vmatpush.bf16.xpose.msrb.mxu3 %v591_v46  ;;  %v7992_v46 = vpack.c.b16 %v822_v26, %v821_v13 }
 0x114   :  { %v303_v42 = vpop.f32.mrf.mxu3 }
 0x115   :  { %v391_v50 = vpop.f32.mrf.mxu2  ;;  %v304_v23 = vadd.f32 %v303_v42, %v7886_v29 }
 0x116   :  { %v392_v60 = vadd.f32 %v391_v50, %v7857_v55  ;;  %v820_v50 = vunpack.c.l.b16 %v442_v28 }
 0x118   :  { %v450_v33 = vpack.c.bf16 %v392_v60, %v392_v60 }
 0x11a   :  { %v828_v12 = vunpack.c.l.b16 %v450_v33 }
 0x11b   :  { %606 = vmatpush.bf16.xpose.msrb.mxu3 %v588_v41 }
 0x11c   :  { %v7975_v14 = vpack.c.b16 %v828_v12, %v827_v11  ;;  %v306_v33 = vpop.f32.mrf.mxu3  ;;  %v420_v11 = vpack.c.bf16 %v299_v5, %v299_v5 }
 0x11d   :  { %v7941_v32 = vpop.f32.mrf.mxu2 }
 0x11e   :  { %v395_v43 = vadd.f32 %v7941_v32, %v7857_v55  ;;  %v500_v18 = vunpack.c.l.b16 %v420_v11 }
 0x120   :  { %v510_v19 = vpack.c.b16 %v500_v18, %v499_v61 }
 0x122   :  { %918 = vrot.lane.b32.xlu1 %v510_v19, %s7499_s26 }
 0x123   :  { %607 = vmatpush.bf16.xpose.msrb.mxu3 %v585_v44 }
 0x125   :  { %v396_v54 = vpop.f32.mrf.mxu2 }
 0x126   :  { %v397_v48 = vadd.f32 %v396_v54, %v7857_v55 }
 0x128   :  { %v452_v32 = vpack.c.bf16 %v397_v48, %v397_v48 }
 0x12b   :  { %608 = vmatpush.bf16.xpose.msrb.mxu3 %v582_v57 }
 0x12d   :  { %v399_v62 = vpop.f32.mrf.mxu2 }
 0x12e   :  { %v400_v34 = vadd.f32 %v399_v62, %v7857_v55  ;;  %v451_v62 = vpack.c.bf16 %v395_v43, %v395_v43 }
 0x130   :  { %v829_v7 = vunpack.c.l.b16 %v451_v62 }
 0x133   :  { %609 = vmatpush.bf16.xpose.msrb.mxu3 %v579_v38  ;;  %v830_v38 = vunpack.c.l.b16 %v452_v32 }
 0x135   :  { %v401_v16 = vpop.f32.mrf.mxu2  ;;  %v840_v8 = vpack.c.b16 %v830_v38, %v829_v7  ;;  %v57_v38 = vld [vmem:[%s11468_s1 + $0x18] sm:$0xff] }
 0x136   :  { %v402_v39 = vadd.f32 %v401_v16, %v7857_v55  ;;  %v308_v16 = vpop.f32.mrf.mxu3 }
 0x137   :  { %v309_v17 = vadd.f32 %v308_v16, %v7886_v29  ;;  %v59_v16 = vld [vmem:[%s11468_s1 + $0x28] sm:$0xff] }
 0x138   :  { %v454_v15 = vpack.c.bf16 %v402_v39, %v402_v39 }
 0x139   :  { %v424_v35 = vpack.c.bf16 %v309_v17, %v309_v17 }
 0x13a   :  { %6147 = vmatmul.msk.bf16.vlgmr.msrb.gmra.mxu3 %vm553_vm0, %v7913_v20  ;;  %v441_v20 = vpack.c.bf16 %v7861_v58, %v7861_v58  ;;  %v453_v58 = vpack.c.bf16 %v400_v34, %v400_v34  ;;  %v832_v63 = vunpack.c.l.b16 %v454_v15  ;;  %v54_v15 = vld [vmem:[%s11468_s1] sm:$0xff] }
 0x13b   :  { %v504_v9 = vunpack.c.l.b16 %v424_v35  ;;  %v8094_v35 = vld [vmem:[%s11468_s1 + $0x30] sm:$0xff] }
 0x13c   :  { %v819_v4 = vunpack.c.l.b16 %v441_v20  ;;  %v831_v54 = vunpack.c.l.b16 %v453_v58 }
 0x13d   :  { %v404_v25 = vpop.f32.mrf.mxu2 }
 0x13e   :  { %v405_v30 = vadd.f32 %v404_v25, %v7857_v55  ;;  %v8002_v60 = vpack.c.b16 %v820_v50, %v819_v4  ;;  %v841_v49 = vpack.c.b16 %v832_v63, %v831_v54  ;;  %v421_v25 = vpack.c.bf16 %v302_v22, %v302_v22  ;;  %v931_v4 = vpop.permute.xlu2 %930 }
 0x13f   :  { %v974_v50 = vsel %vm553_vm0, %v931_v4, 0 }
 0x140   :  { %v455_v41 = vpack.c.bf16 %v405_v30, %v405_v30  ;;  %v501_v13 = vunpack.c.l.b16 %v421_v25 }
 0x142   :  { %v833_v57 = vunpack.c.l.b16 %v455_v41 }
 0x145   :  { %v406_v44 = vpop.f32.mrf.mxu2 }
 0x146   :  { %v407_v53 = vadd.f32 %v406_v44, %v7857_v55  ;;  %v418_v55 = vpack.c.bf16 %v294_v37, %v294_v37  ;;  %v55_v37 = vld [vmem:[%s11468_s1 + $0x8] sm:$0xff] }
 0x148   :  { %v456_v45 = vpack.c.bf16 %v407_v53, %v407_v53  ;;  %v498_v52 = vunpack.c.l.b16 %v418_v55 }
 0x14a   :  { %6148 = vmatmul.msk.bf16.gmra.mxu3 %vm553_vm0, %v7927_v40  ;;  %v834_v0 = vunpack.c.l.b16 %v456_v45  ;;  %v307_v40 = vadd.f32 %v306_v33, %v7886_v29  ;;  %v509_v36 = vpack.c.b16 %v498_v52, %v497_v51 }
 0x14c   :  { %v842_v2 = vpack.c.b16 %v834_v0, %v833_v57  ;;  %v423_v12 = vpack.c.bf16 %v307_v40, %v307_v40  ;;  %916 = vrot.lane.b32.xlu0 %v509_v36, %s7499_s26  ;;  %v8060_v0 = vld [vmem:[%s11468_s1 + $0x10] sm:$0xff]  ;;  %v8076_v40 = vld [vmem:[%s11468_s1 + $0x20] sm:$0xff] }
 0x14e   :  { %851 = vmatpush.bf16.msra.mxu0 %v842_v2  ;;  %v503_v59 = vunpack.c.l.b16 %v423_v12  ;;  %1203 = vrot.lane.b32.xlu1 %v842_v2, %s7499_s26 }
 0x150   :  { %v512_v21 = vpack.c.b16 %v504_v9, %v503_v59 }
 0x152   :  { %852 = vmatpush.bf16.msra.mxu0 %v841_v49  ;;  %v929_v41 = vpop.permute.xlu2 %928 }
 0x154   :  { %922 = vrot.lane.b32.xlu0 %v512_v21, %s7499_s26 }
 0x156   :  { %853 = vmatpush.bf16.msra.mxu0 %v840_v8 }
 0x15a   :  { %6149 = vmatmul.msk.bf16.gmra.mxu3 %vm553_vm0, %v7946_v56  ;;  %854 = vmatpush.bf16.msra.mxu0 %v7975_v14  ;;  %v422_v56 = vpack.c.bf16 %v304_v23, %v304_v23  ;;  %v909_v58 = vpop.permute.xlu2 %908 }
 0x15c   :  { %1195 = vrot.lane.b32.xlu0 %v7979_v31, %s7499_s26  ;;  %v502_v26 = vunpack.c.l.b16 %v422_v56 }
 0x15e   :  { %855 = vmatpush.bf16.msra.mxu0 %v7979_v31  ;;  %v511_v20 = vpack.c.b16 %v502_v26, %v501_v13  ;;  %v935_v31 = vpop.permute.xlu1 %934 }
 0x160   :  { %920 = vrot.lane.b32.xlu2 %v511_v20, %s7499_s26 }
 0x162   :  { %856 = vmatpush.bf16.msra.mxu0 %v7985_v27  ;;  %v915_v45 = vpop.permute.xlu2 %914 }
 0x164   :  { %1199 = vrot.lane.b32.xlu0 %v840_v8, %s7499_s26 }
 0x166   :  { %857 = vmatpush.bf16.msra.mxu0 %v7992_v46  ;;  %v933_v34 = vpop.permute.xlu1 %932 }
 0x167   :  { %v977_v39 = vsel %vm553_vm0, %v933_v34, 0 }
 0x168   :  { %1197 = vrot.lane.b32.xlu2 %v7975_v14, %s7499_s26  ;;  %v971_v14 = vsel %vm553_vm0, %v929_v41, 0 }
 0x16a   :  { %6150 = vmatmul.msk.bf16.gmra.mxu3 %vm553_vm0, %v7969_v6  ;;  %858 = vmatpush.bf16.msra.mxu0 %v8002_v60  ;;  %v980_v6 = vsel %vm553_vm0, %v935_v31, 0 }
 0x16c   :  { %v939_v24 = vpop.permute.xlu0 %938 }
 0x16d   :  { %v986_v29 = vsel %vm553_vm0, %v939_v24, 0 }
 0x16e   :  { %988 = vmatpush.bf16.xpose.msrb.mxu1 %v986_v29  ;;  %v925_v44 = vpop.permute.xlu1 %924 }
 0x16f   :  { %v965_v48 = vsel %vm553_vm0, %v925_v44, 0  ;;  %v61_v44 = vld [vmem:[%s11468_s1 + $0x38] sm:$0xff] }
 0x170   :  { %1201 = vrot.lane.b32.xlu2 %v841_v49, %s7499_s26 }
 0x174   :  { %v937_v28 = vpop.permute.xlu0 %936 }
 0x175   :  { %v983_v30 = vsel %vm553_vm0, %v937_v28, 0 }
 0x176   :  { %989 = vmatpush.bf16.xpose.msrb.mxu1 %v983_v30  ;;  %v913_v54 = vpop.permute.xlu1 %912 }
 0x17a   :  { %6151 = vmatmul.msk.bf16.gmra.mxu3 %vm553_vm0, %v509_v36 }
 0x17c   :  { %v927_v42 = vpop.permute.xlu0 %926 }
 0x17d   :  { %v968_v43 = vsel %vm553_vm0, %v927_v42, 0 }
 0x17e   :  { %990 = vmatpush.bf16.xpose.msrb.mxu1 %v980_v6  ;;  %v62_v6 = vld [vmem:[%s11468_s1 + $0x40] sm:$0xff] }
 0x184   :  { %v911_v53 = vpop.permute.xlu0 %910 }
 0x186   :  { %991 = vmatpush.bf16.xpose.msrb.mxu1 %v977_v39 }
 0x18a   :  { %6152 = vmatmul.msk.bf16.gmra.mxu3 %vm553_vm0, %v510_v19 }
 0x18e   :  { %992 = vmatpush.bf16.xpose.msrb.mxu1 %v974_v50 }
 0x194   :  { %v919_v33 = vpop.permute.xlu1 %918 }
 0x196   :  { %993 = vmatpush.bf16.xpose.msrb.mxu1 %v971_v14  ;;  %v63_v14 = vld [vmem:[%s11468_s1 + $0x48] sm:$0xff] }
 0x19a   :  { %6153 = vmatmul.msk.bf16.gmra.mxu3 %vm553_vm0, %v511_v20 }
 0x19e   :  { %994 = vmatpush.bf16.xpose.msrb.mxu1 %v968_v43 }
 0x1a6   :  { %995 = vmatpush.bf16.xpose.msrb.mxu1 %v965_v48 }
 0x1aa   :  { %6154 = vmatmul.msk.bf16.gmra.mxu3 %vm553_vm0, %v512_v21 }
 0x1ad   :  { %6155 = vmatmul.msk.bf16.vlgmr.msrb.gmra.mxu1 %vm553_vm0, %v909_v58 }
 0x1ba   :  { %v921_v55 = vpop.permute.xlu2 %920 }
 0x1bd   :  { %v611_v47 = vpop.f32.mrf.mxu3  ;;  %6156 = vmatmul.msk.bf16.gmra.mxu1 %vm553_vm0, %v911_v53 }
 0x1be   :  { %v8051_v57 = vadd.f32 %v611_v47, %v54_v15  ;;  %v917_v63 = vpop.permute.xlu0 %916 }
 0x1c0   :  { %651 = vmax.xlane.f32.xlu0 %v8051_v57  ;;  %v1204_v3 = vpop.permute.xlu1 %1203 }
 0x1c1   :  { %1213 = vmatpush.bf16.msra.mxu2 %v1204_v3 }
 0x1c2   :  { %v1198_v51 = vpop.permute.xlu2 %1197 }
 0x1c5   :  { %v613_v62 = vpop.f32.mrf.mxu3 }
 0x1c6   :  { %v614_v32 = vadd.f32 %v613_v62, %v55_v37  ;;  %v923_v7 = vpop.permute.xlu0 %922  ;;  %v8156_v62 = vld [vmem:[%s11468_s1 + $0x58] sm:$0xff] }
 0x1c8   :  { %653 = vmax.xlane.f32.xlu2 %v614_v32 }
 0x1ca   :  { %v1202_v10 = vpop.permute.xlu2 %1201 }
 0x1cb   :  { %1214 = vmatpush.bf16.msra.mxu2 %v1202_v10 }
 0x1cd   :  { %v616_v1 = vpop.f32.mrf.mxu3  ;;  %6157 = vmatmul.msk.bf16.gmra.mxu1 %vm553_vm0, %v913_v54 }
 0x1ce   :  { %v8064_v2 = vadd.f32 %v616_v1, %v8060_v0  ;;  %v1196_v5 = vpop.permute.xlu0 %1195 }
 0x1d0   :  { %655 = vmax.xlane.f32.xlu0 %v8064_v2 }
 0x1d5   :  { %v618_v49 = vpop.f32.mrf.mxu3 }
 0x1d6   :  { %v8070_v52 = vadd.f32 %v618_v49, %v57_v38  ;;  %v1200_v12 = vpop.permute.xlu0 %1199 }
 0x1d7   :  { %1215 = vmatpush.bf16.msra.mxu2 %v1200_v12 }
 0x1d8   :  { %657 = vmax.xlane.f32.xlu1 %v8070_v52 }
 0x1db   :  { %1216 = vmatpush.bf16.msra.mxu2 %v1198_v51 }
 0x1dd   :  { %v621_v8 = vpop.f32.mrf.mxu3  ;;  %6158 = vmatmul.msk.bf16.gmra.mxu1 %vm553_vm0, %v915_v45 }
 0x1de   :  { %v8080_v11 = vadd.f32 %v621_v8, %v8076_v40 }
 0x1df   :  { %1217 = vmatpush.bf16.msra.mxu2 %v1196_v5 }
 0x1e0   :  { %659 = vmax.xlane.f32.xlu1 %v8080_v11  ;;  %1191 = vrot.lane.b32.xlu2 %v7992_v46, %s7499_s26 }
 0x1e5   :  { %v623_v36 = vpop.f32.mrf.mxu3 }
 0x1e6   :  { %v8088_v17 = vadd.f32 %v623_v36, %v59_v16 }
 0x1e8   :  { %661 = vmax.xlane.f32.xlu0 %v8088_v17 }
 0x1ed   :  { %6159 = vmatmul.msk.bf16.gmra.mxu1 %vm553_vm0, %v917_v63  ;;  %v626_v46 = vpop.f32.mrf.mxu3 }
 0x1ee   :  { %v8098_v61 = vadd.f32 %v626_v46, %v8094_v35 }
 0x1f0   :  { %663 = vmax.xlane.f32.xlu0 %v8098_v61 }
 0x1f5   :  { %v628_v42 = vpop.f32.mrf.mxu3 }
 0x1f6   :  { %v8143_v48 = vadd.f32 %v628_v42, %v61_v44 }
 0x1fd   :  { %6160 = vmatmul.msk.bf16.gmra.mxu1 %vm553_vm0, %v919_v33  ;;  %v631_v53 = vpop.f32.mrf.mxu3 }
 0x1fe   :  { %v8149_v47 = vadd.f32 %v631_v53, %v62_v6 }
 0x20d   :  { %6161 = vmatmul.msk.bf16.gmra.mxu1 %vm553_vm0, %v921_v55 }
 0x21d   :  { %6162 = vmatmul.msk.bf16.gmra.mxu1 %vm553_vm0, %v923_v7 }
 0x22a   :  { %v997_v18 = vpop.f32.mrf.mxu1 }
 0x22b   :  { %v8104_v59 = vadd.f32 %v997_v18, %v54_v15 }
 0x22d   :  { %1037 = vmax.xlane.f32.xlu1 %v8104_v59 }
 0x232   :  { %v999_v9 = vpop.f32.mrf.mxu1 }
 0x233   :  { %v8107_v19 = vadd.f32 %v999_v9, %v55_v37  ;;  %v652_v31 = vpop.xlane.xlu0 %651 }
 0x234   :  { %v683_v37 = vsub.f32 %v8051_v57, %v652_v31 }
 0x235   :  { %1039 = vmax.xlane.f32.xlu2 %v8107_v19 }
 0x23a   :  { %v1002_v21 = vpop.f32.mrf.mxu1 }
 0x23b   :  { %v654_v22 = vpop.xlane.xlu2 %653  ;;  %v8130_v4 = vadd.f32 %v1002_v21, %v8060_v0 }
 0x23c   :  { %v684_v23 = vsub.f32 %v614_v32, %v654_v22  ;;  %v699_v32 = vmul.f32 1.442695, %v683_v37  ;;  %v66_v37 = vld [vmem:[%s11468_s1 + $0x60] sm:$0xff] }
 0x23e   :  { %v701_v25 = vmul.f32 1.442695, %v684_v23 }
 0x240   :  { %6945 = vpow2.f32 %v701_v25 }
 0x242   :  { %v1004_v56 = vpop.f32.mrf.mxu1 }
 0x243   :  { %v8110_v13 = vadd.f32 %v1004_v56, %v57_v38  ;;  %v1192_v33 = vpop.permute.xlu2 %1191  ;;  %v64_v56 = vld [vmem:[%s11468_s1 + $0x50] sm:$0xff] }
 0x245   :  { %1043 = vmax.xlane.f32.xlu2 %v8110_v13 }
 0x246   :  { %v8113_v26 = vpop.eup %6945  ;;  %1193 = vrot.lane.b32.xlu1 %v7985_v27, %s7499_s26  ;;  %v656_v27 = vpop.xlane.xlu0 %655 }
 0x247   :  { %733 = vadd.xlane.f32.xlu0 %v8113_v26  ;;  %v685_v50 = vsub.f32 %v8064_v2, %v656_v27 }
 0x24a   :  { %v1007_v24 = vpop.f32.mrf.mxu1 }
 0x24b   :  { %v8162_v63 = vadd.f32 %v1007_v24, %v8076_v40  ;;  %v658_v1 = vpop.xlane.xlu1 %657 }
 0x24c   :  { %v686_v51 = vsub.f32 %v8070_v52, %v658_v1 }
 0x24e   :  { %v705_v3 = vmul.f32 1.442695, %v686_v51 }
 0x252   :  { %v1009_v29 = vpop.f32.mrf.mxu1 }
 0x253   :  { %v8118_v20 = vadd.f32 %v1009_v29, %v59_v16  ;;  %v660_v2 = vpop.xlane.xlu1 %659  ;;  %v633_v16 = vpop.f32.mrf.mxu3 }
 0x254   :  { %v687_v22 = vsub.f32 %v8080_v11, %v660_v2 }
 0x255   :  { %1047 = vmax.xlane.f32.xlu0 %v8118_v20 }
 0x256   :  { %v707_v24 = vmul.f32 1.442695, %v687_v22 }
 0x25a   :  { %v1012_v28 = vpop.f32.mrf.mxu1 }
 0x25b   :  { %v8173_v55 = vadd.f32 %v1012_v28, %v8094_v35  ;;  %v662_v12 = vpop.xlane.xlu0 %661 }
 0x25d   :  { %1189 = vrot.lane.b32.xlu2 %v8002_v60, %s7499_s26  ;;  %v703_v60 = vmul.f32 1.442695, %v685_v50 }
 0x25f   :  { %6947 = vpow2.f32 %v703_v60 }
 0x260   :  { %6949 = vpow2.f32 %v699_v32 }
 0x262   :  { %v1014_v30 = vpop.f32.mrf.mxu1 }
 0x263   :  { %v8166_v57 = vadd.f32 %v1014_v30, %v61_v44  ;;  %v8188_v52 = vpop.xlane.xlu0 %663  ;;  %v688_v30 = vsub.f32 %v8088_v17, %v662_v12  ;;  %v67_v44 = vld [vmem:[%s11468_s1 + $0x68] sm:$0xff] }
 0x265   :  { %v8146_v15 = vpop.eup %6947  ;;  %v709_v11 = vmul.f32 1.442695, %v688_v30 }
 0x266   :  { %v8169_v0 = vpop.eup %6949 }
 0x26a   :  { %v1017_v34 = vpop.f32.mrf.mxu1 }
 0x26b   :  { %v8126_v39 = vadd.f32 %v1017_v34, %v62_v6 }
 0x26d   :  { %1053 = vmax.xlane.f32.xlu0 %v8126_v39 }
 0x270   :  { %1041 = vmax.xlane.f32.xlu1 %v8130_v4 }
 0x272   :  { %v1019_v41 = vpop.f32.mrf.mxu1 }
 0x273   :  { %v8137_v43 = vadd.f32 %v1019_v41, %v63_v14 }
 0x275   :  { %1055 = vmax.xlane.f32.xlu0 %v8137_v43 }
 0x278   :  { %665 = vmax.xlane.f32.xlu1 %v8143_v48 }
 0x27a   :  { %v1022_v58 = vpop.f32.mrf.mxu1 }
 0x27d   :  { %735 = vadd.xlane.f32.xlu0 %v8146_v15 }
 0x280   :  { %667 = vmax.xlane.f32.xlu1 %v8149_v47 }
 0x282   :  { %v1024_v45 = vpop.f32.mrf.mxu1 }
 0x283   :  { %v8159_v54 = vadd.f32 %v1024_v45, %v8156_v62 }
 0x285   :  { %1059 = vmax.xlane.f32.xlu0 %v8159_v54 }
 0x286   :  { %1045 = vmax.xlane.f32.xlu2 %v8162_v63 }
 0x288   :  { %1051 = vmax.xlane.f32.xlu1 %v8166_v57 }
 0x28a   :  { %v1027_v60 = vpop.f32.mrf.mxu1 }
 0x28e   :  { %731 = vadd.xlane.f32.xlu2 %v8169_v0 }
 0x292   :  { %v1029_v42 = vpop.f32.mrf.mxu1 }
 0x293   :  { %v8225_v53 = vadd.f32 %v1029_v42, %v67_v44 }
 0x296   :  { %1049 = vmax.xlane.f32.xlu2 %v8173_v55 }
 0x2a0   :  { %v1038_v7 = vpop.xlane.xlu1 %1037 }
 0x2a1   :  { %v1069_v38 = vsub.f32 %v8104_v59, %v1038_v7  ;;  %v636_v59 = vpop.f32.mrf.mxu3 }
 0x2a2   :  { %v8208_v34 = vadd.f32 %v636_v59, %v64_v56 }
 0x2a3   :  { %v1085_v49 = vmul.f32 1.442695, %v1069_v38 }
 0x2a5   :  { %6951 = vpow2.f32 %v1085_v49 }
 0x2a6   :  { %6953 = vpow2.f32 %v705_v3 }
 0x2a8   :  { %v1040_v5 = vpop.xlane.xlu2 %1039 }
 0x2a9   :  { %v1070_v40 = vsub.f32 %v8107_v19, %v1040_v5  ;;  %v8191_v19 = vadd.f32 %v633_v16, %v63_v14  ;;  %v638_v28 = vpop.f32.mrf.mxu3 }
 0x2ab   :  { %v8179_v8 = vpop.eup %6951  ;;  %v1087_v10 = vmul.f32 1.442695, %v1070_v40  ;;  %v8242_v40 = vadd.f32 %v638_v28, %v8156_v62 }
 0x2ac   :  { %1117 = vadd.xlane.f32.xlu1 %v8179_v8  ;;  %v8182_v36 = vpop.eup %6953 }
 0x2ad   :  { %6955 = vpow2.f32 %v1087_v10 }
 0x2b1   :  { %v641_v17 = vpop.f32.mrf.mxu3 }
 0x2b2   :  { %v8232_v45 = vadd.f32 %v641_v17, %v66_v37 }
 0x2b3   :  { %v8184_v35 = vpop.eup %6955 }
 0x2b4   :  { %737 = vadd.xlane.f32.xlu1 %v8182_v36  ;;  %1119 = vadd.xlane.f32.xlu2 %v8184_v35 }
 0x2b8   :  { %v1194_v46 = vpop.permute.xlu1 %1193  ;;  %v1044_v18 = vpop.xlane.xlu2 %1043 }
 0x2b9   :  { %v1072_v9 = vsub.f32 %v8110_v13, %v1044_v18  ;;  %1218 = vmatpush.bf16.msra.mxu2 %v1194_v46  ;;  %v8200_v13 = vadd.f32 %v1022_v58, %v64_v56 }
 0x2ba   :  { %v8195_v23 = vpop.xlane.xlu0 %733 }
 0x2bb   :  { %v1091_v21 = vmul.f32 1.442695, %v1072_v9  ;;  %v69_v9 = vld [vmem:[%s11468_s1 + $0x78] sm:$0xff] }
 0x2bc   :  { %669 = vmax.xlane.f32.xlu2 %v8191_v19 }
 0x2bd   :  { %6957 = vpow2.f32 %v1091_v21  ;;  %1219 = vmatpush.bf16.msra.mxu2 %v1192_v33 }
 0x2be   :  { %6959 = vpow2.f32 %v707_v24 }
 0x2bf   :  { %6961 = vpow2.f32 %v709_v11 }
 0x2c0   :  { %v1190_v25 = vpop.permute.xlu2 %1189 }
 0x2c1   :  { %1220 = vmatpush.bf16.msra.mxu2 %v1190_v25 }
 0x2c3   :  { %v8202_v29 = vpop.eup %6957 }
 0x2c4   :  { %1057 = vmax.xlane.f32.xlu2 %v8200_v13  ;;  %1123 = vadd.xlane.f32.xlu0 %v8202_v29  ;;  %v8210_v27 = vpop.eup %6959 }
 0x2c5   :  { %v8214_v41 = vpop.eup %6961 }
 0x2c8   :  { %v1048_v31 = vpop.xlane.xlu0 %1047 }
 0x2c9   :  { %v1074_v6 = vsub.f32 %v8118_v20, %v1048_v31  ;;  %v643_v20 = vpop.f32.mrf.mxu3  ;;  %v8268_v31 = vadd.f32 %v1027_v60, %v66_v37 }
 0x2ca   :  { %v8223_v58 = vadd.f32 %v643_v20, %v67_v44 }
 0x2cb   :  { %v1095_v50 = vmul.f32 1.442695, %v1074_v6 }
 0x2cc   :  { %739 = vadd.xlane.f32.xlu2 %v8210_v27  ;;  %671 = vmax.xlane.f32.xlu0 %v8208_v34 }
 0x2cd   :  { %6963 = vpow2.f32 %v1095_v50  ;;  %v689_v50 = vsub.f32 %v8098_v61, %v8188_v52  ;;  %v68_v61 = vld [vmem:[%s11468_s1 + $0x70] sm:$0xff] }
 0x2d3   :  { %v8216_v14 = vpop.eup %6963 }
 0x2d4   :  { %741 = vadd.xlane.f32.xlu0 %v8214_v41  ;;  %1127 = vadd.xlane.f32.xlu2 %v8216_v14 }
 0x2dc   :  { %677 = vmax.xlane.f32.xlu0 %v8223_v58  ;;  %1063 = vmax.xlane.f32.xlu2 %v8225_v53 }
 0x2e0   :  { %v1054_v38 = vpop.xlane.xlu0 %1053 }
 0x2e1   :  { %v1077_v3 = vsub.f32 %v8126_v39, %v1054_v38 }
 0x2e3   :  { %v1042_v32 = vpop.xlane.xlu1 %1041  ;;  %v1101_v5 = vmul.f32 1.442695, %v1077_v3 }
 0x2e4   :  { %v1071_v1 = vsub.f32 %v8130_v4, %v1042_v32  ;;  %675 = vmax.xlane.f32.xlu2 %v8232_v45 }
 0x2e6   :  { %v1089_v2 = vmul.f32 1.442695, %v1071_v1 }
 0x2e8   :  { %6965 = vpow2.f32 %v1089_v2  ;;  %v1056_v17 = vpop.xlane.xlu0 %1055 }
 0x2e9   :  { %v1078_v60 = vsub.f32 %v8137_v43, %v1056_v17 }
 0x2eb   :  { %v666_v33 = vpop.xlane.xlu1 %665  ;;  %v1103_v52 = vmul.f32 1.442695, %v1078_v60 }
 0x2ec   :  { %v690_v7 = vsub.f32 %v8143_v48, %v666_v33  ;;  %v8248_v48 = vpop.f32.mrf.mxu3 }
 0x2ee   :  { %v8237_v49 = vpop.eup %6965  ;;  %v713_v51 = vmul.f32 1.442695, %v690_v7 }
 0x2ef   :  { %1121 = vadd.xlane.f32.xlu1 %v8237_v49 }
 0x2f0   :  { %6967 = vpow2.f32 %v713_v51  ;;  %v736_v42 = vpop.xlane.xlu0 %735 }
 0x2f1   :  { %6969 = vpow2.f32 %v1101_v5 }
 0x2f3   :  { %v668_v10 = vpop.xlane.xlu1 %667 }
 0x2f4   :  { %v648_v18 = vpop.f32.mrf.mxu3  ;;  %v691_v32 = vsub.f32 %v8149_v47, %v668_v10 }
 0x2f5   :  { %v8262_v22 = vadd.f32 %v648_v18, %v69_v9 }
 0x2f6   :  { %v8244_v4 = vpop.eup %6967  ;;  %v715_v43 = vmul.f32 1.442695, %v691_v32 }
 0x2f7   :  { %673 = vmax.xlane.f32.xlu1 %v8242_v40  ;;  %745 = vadd.xlane.f32.xlu2 %v8244_v4  ;;  %v8251_v39 = vpop.eup %6969 }
 0x2f8   :  { %v1060_v33 = vpop.xlane.xlu0 %1059 }
 0x2f9   :  { %v1046_v12 = vpop.xlane.xlu2 %1045  ;;  %v1080_v51 = vsub.f32 %v8159_v54, %v1060_v33 }
 0x2fa   :  { %v1073_v16 = vsub.f32 %v8162_v63, %v1046_v12  ;;  %v8298_v12 = vadd.f32 %v8248_v48, %v68_v61 }
 0x2fb   :  { %v1052_v59 = vpop.xlane.xlu1 %1051  ;;  %v1107_v47 = vmul.f32 1.442695, %v1080_v51 }
 0x2fc   :  { %v1093_v46 = vmul.f32 1.442695, %v1073_v16  ;;  %v1076_v63 = vsub.f32 %v8166_v57, %v1052_v59 }
 0x2fe   :  { %6971 = vpow2.f32 %v1093_v46  ;;  %v1099_v24 = vmul.f32 1.442695, %v1076_v63 }
 0x2ff   :  { %1133 = vadd.xlane.f32.xlu2 %v8251_v39  ;;  %6973 = vrcp.f32 %v8195_v23 }
 0x301   :  { %v732_v62 = vpop.xlane.xlu2 %731 }
 0x302   :  { %6975 = vrcp.f32 %v732_v62 }
 0x303   :  { %6977 = vpow2.f32 %v1099_v24 }
 0x304   :  { %v8258_v21 = vpop.eup %6971 }
 0x305   :  { %1125 = vadd.xlane.f32.xlu1 %v8258_v21  ;;  %v6974_v25 = vpop.eup %6973 }
 0x306   :  { %v780_v56 = vmul.f32 %v6974_v25, %v8113_v26  ;;  %v711_v26 = vmul.f32 1.442695, %v689_v50 }
 0x307   :  { %681 = vmax.xlane.f32.xlu2 %v8262_v22 }
 0x308   :  { %v6976_v23 = vpop.eup %6975 }
 0x309   :  { %v779_v28 = vmul.f32 %v6976_v23, %v8169_v0  ;;  %v1050_v30 = vpop.xlane.xlu2 %1049  ;;  %v8273_v20 = vpop.eup %6977 }
 0x30a   :  { %v1075_v11 = vsub.f32 %v8173_v55, %v1050_v30  ;;  %v1032_v55 = vpop.f32.mrf.mxu1 }
 0x30b   :  { %v795_v6 = vpack.c.bf16 %v780_v56, %v779_v28  ;;  %v8283_v44 = vadd.f32 %v1032_v55, %v68_v61 }
 0x30c   :  { %v1097_v57 = vmul.f32 1.442695, %v1075_v11 }
 0x30d   :  { %1061 = vmax.xlane.f32.xlu1 %v8268_v31  ;;  %859 = vmatmul.bf16.vlgmr.msra.gmra.mxu0 %v795_v6 }
 0x30e   :  { %6979 = vpow2.f32 %v1097_v57 }
 0x30f   :  { %6981 = vpow2.f32 %v711_v26 }
 0x310   :  { %6983 = vpow2.f32 %v1103_v52 }
 0x311   :  { %6985 = vrcp.f32 %v736_v42 }
 0x312   :  { %v1034_v2 = vpop.f32.mrf.mxu1  ;;  %6987 = vpow2.f32 %v715_v43 }
 0x313   :  { %v8290_v7 = vadd.f32 %v1034_v2, %v69_v9 }
 0x314   :  { %v8275_v0 = vpop.eup %6979 }
 0x315   :  { %1131 = vadd.xlane.f32.xlu1 %v8273_v20  ;;  %1129 = vadd.xlane.f32.xlu0 %v8275_v0  ;;  %v8285_v37 = vpop.eup %6981 }
 0x316   :  { %v8292_v38 = vpop.eup %6983 }
 0x317   :  { %v6986_v10 = vpop.eup %6985 }
 0x318   :  { %v8300_v16 = vpop.eup %6987  ;;  %v781_v59 = vmul.f32 %v6986_v10, %v8146_v15 }
 0x31d   :  { %1065 = vmax.xlane.f32.xlu0 %v8283_v44  ;;  %743 = vadd.xlane.f32.xlu1 %v8285_v37 }
 0x31f   :  { %v1118_v1 = vpop.xlane.xlu1 %1117 }
 0x320   :  { %6989 = vrcp.f32 %v1118_v1 }
 0x325   :  { %1067 = vmax.xlane.f32.xlu1 %v8290_v7  ;;  %1135 = vadd.xlane.f32.xlu0 %v8292_v38 }
 0x326   :  { %v6990_v46 = vpop.eup %6989 }
 0x327   :  { %v738_v3 = vpop.xlane.xlu1 %737  ;;  %v1120_v5 = vpop.xlane.xlu2 %1119  ;;  %v1165_v63 = vmul.f32 %v6990_v46, %v8179_v8 }
 0x328   :  { %6991 = vrcp.f32 %v738_v3 }
 0x329   :  { %6993 = vrcp.f32 %v1120_v5 }
 0x32a   :  { %6995 = vpow2.f32 %v1107_v47 }
 0x32d   :  { %679 = vmax.xlane.f32.xlu1 %v8298_v12  ;;  %747 = vadd.xlane.f32.xlu0 %v8300_v16 }
 0x32e   :  { %v6992_v62 = vpop.eup %6991 }
 0x32f   :  { %v6994_v54 = vpop.eup %6993  ;;  %v670_v18 = vpop.xlane.xlu2 %669  ;;  %v782_v9 = vmul.f32 %v6992_v62, %v8182_v36 }
 0x330   :  { %v1166_v48 = vmul.f32 %v6994_v54, %v8184_v35  ;;  %v692_v25 = vsub.f32 %v8191_v19, %v670_v18  ;;  %v8309_v28 = vpop.eup %6995 }
 0x331   :  { %v796_v23 = vpack.c.bf16 %v782_v9, %v781_v59 }
 0x332   :  { %v717_v56 = vmul.f32 1.442695, %v692_v25  ;;  %v1181_v24 = vpack.c.bf16 %v1166_v48, %v1165_v63 }
 0x333   :  { %864 = vmatmul.bf16.gmra.mxu0 %v796_v23 }
 0x334   :  { %6997 = vpow2.f32 %v717_v56  ;;  %1221 = vmatmul.bf16.vlgmr.msra.gmra.mxu2 %v1181_v24 }
 0x335   :  { %1139 = vadd.xlane.f32.xlu0 %v8309_v28 }
 0x337   :  { %v1058_v30 = vpop.xlane.xlu2 %1057  ;;  %v1124_v15 = vpop.xlane.xlu0 %1123 }
 0x338   :  { %v1079_v36 = vsub.f32 %v8200_v13, %v1058_v30 }
 0x33a   :  { %v8313_v11 = vpop.eup %6997  ;;  %v1105_v8 = vmul.f32 1.442695, %v1079_v36 }
 0x33b   :  { %749 = vadd.xlane.f32.xlu1 %v8313_v11 }
 0x33c   :  { %6999 = vpow2.f32 %v1105_v8 }
 0x33f   :  { %v740_v35 = vpop.xlane.xlu2 %739  ;;  %v672_v19 = vpop.xlane.xlu0 %671 }
 0x340   :  { %v693_v6 = vsub.f32 %v8208_v34, %v672_v19 }
 0x342   :  { %v8317_v57 = vpop.eup %6999  ;;  %v719_v50 = vmul.f32 1.442695, %v693_v6 }
 0x343   :  { %1137 = vadd.xlane.f32.xlu2 %v8317_v57 }
 0x344   :  { %7001 = vpow2.f32 %v719_v50 }
 0x345   :  { %7003 = vrcp.f32 %v740_v35 }
 0x347   :  { %v1128_v17 = vpop.xlane.xlu2 %1127  ;;  %v742_v26 = vpop.xlane.xlu0 %741 }
 0x348   :  { %7005 = vrcp.f32 %v742_v26 }
 0x34a   :  { %v8320_v13 = vpop.eup %7001 }
 0x34b   :  { %751 = vadd.xlane.f32.xlu1 %v8320_v13  ;;  %v7004_v55 = vpop.eup %7003 }
 0x34c   :  { %v783_v34 = vmul.f32 %v7004_v55, %v8210_v27 }
 0x34e   :  { %v7006_v60 = vpop.eup %7005 }
 0x34f   :  { %v1064_v42 = vpop.xlane.xlu2 %1063  ;;  %v784_v52 = vmul.f32 %v7006_v60, %v8214_v41  ;;  %v678_v9 = vpop.xlane.xlu0 %677 }
 0x350   :  { %v1082_v61 = vsub.f32 %v8225_v53, %v1064_v42  ;;  %v696_v24 = vsub.f32 %v8223_v58, %v678_v9  ;;  %v6800_v58 = vld [vmem:[%s11469_s4 + $0x38] sm:$0xff] }
 0x351   :  { %v797_v1 = vpack.c.bf16 %v784_v52, %v783_v34  ;;  %1322 = vmatpush.bf16.msra.mxu3 %v6800_v58  ;;  %v6799_v34 = vld [vmem:[%s11469_s4 + $0x30] sm:$0xff]  ;;  %v6796_v58 = vld [vmem:[%s11469_s4 + $0x18] sm:$0xff] }
 0x352   :  { %v1111_v32 = vmul.f32 1.442695, %v1082_v61  ;;  %v725_v8 = vmul.f32 1.442695, %v696_v24  ;;  %1419 = vmatpush.bf16.msrb.mxu0 %v6796_v58 }
 0x353   :  { %869 = vmatmul.bf16.gmra.mxu0 %v797_v1 }
 0x354   :  { %7007 = vpow2.f32 %v1111_v32 }
 0x355   :  { %7009 = vrcp.f32 %v1124_v15  ;;  %1323 = vmatpush.bf16.msra.mxu3 %v6799_v34 }
 0x357   :  { %v676_v5 = vpop.xlane.xlu2 %675 }
 0x358   :  { %v695_v46 = vsub.f32 %v8232_v45, %v676_v5 }
 0x35a   :  { %v8326_v2 = vpop.eup %7007  ;;  %v723_v62 = vmul.f32 1.442695, %v695_v46 }
 0x35b   :  { %1143 = vadd.xlane.f32.xlu1 %v8326_v2  ;;  %v7010_v33 = vpop.eup %7009 }
 0x35c   :  { %v1168_v27 = vmul.f32 %v7010_v33, %v8202_v29  ;;  %v6798_v33 = vld [vmem:[%s11469_s4 + $0x28] sm:$0xff] }
 0x35d   :  { %1324 = vmatpush.bf16.msra.mxu3 %v6798_v33 }
 0x362   :  { %v1122_v43 = vpop.xlane.xlu1 %1121 }
 0x363   :  { %7011 = vrcp.f32 %v1122_v43 }
 0x369   :  { %v7012_v51 = vpop.eup %7011 }
 0x36a   :  { %v674_v3 = vpop.xlane.xlu1 %673  ;;  %v1167_v53 = vmul.f32 %v7012_v51, %v8237_v49 }
 0x36b   :  { %v694_v41 = vsub.f32 %v8242_v40, %v674_v3  ;;  %v746_v40 = vpop.xlane.xlu2 %745 }
 0x36c   :  { %v1182_v47 = vpack.c.bf16 %v1168_v27, %v1167_v53 }
 0x36d   :  { %v721_v10 = vmul.f32 1.442695, %v694_v41 }
 0x36e   :  { %1226 = vmatmul.bf16.gmra.mxu2 %v1182_v47 }
 0x36f   :  { %7013 = vpow2.f32 %v721_v10 }
 0x370   :  { %7015 = vrcp.f32 %v1128_v17 }
 0x371   :  { %7017 = vpow2.f32 %v723_v62 }
 0x373   :  { %v1134_v30 = vpop.xlane.xlu2 %1133 }
 0x375   :  { %v8333_v54 = vpop.eup %7013 }
 0x376   :  { %753 = vadd.xlane.f32.xlu2 %v8333_v54  ;;  %v7016_v49 = vpop.eup %7015 }
 0x377   :  { %v8336_v29 = vpop.eup %7017  ;;  %v1170_v48 = vmul.f32 %v7016_v49, %v8216_v14 }
 0x378   :  { %v1126_v18 = vpop.xlane.xlu1 %1125 }
 0x379   :  { %7019 = vrcp.f32 %v1126_v18 }
 0x37b   :  { %v682_v50 = vpop.xlane.xlu2 %681 }
 0x37c   :  { %v698_v61 = vsub.f32 %v8262_v22, %v682_v50 }
 0x37e   :  { %755 = vadd.xlane.f32.xlu2 %v8336_v29 }
 0x37f   :  { %v7020_v59 = vpop.eup %7019 }
 0x380   :  { %v1062_v63 = vpop.xlane.xlu1 %1061  ;;  %v1169_v45 = vmul.f32 %v7020_v59, %v8258_v21 }
 0x381   :  { %v1081_v25 = vsub.f32 %v8268_v31, %v1062_v63 }
 0x382   :  { %v1183_v23 = vpack.c.bf16 %v1170_v48, %v1169_v45 }
 0x383   :  { %v1109_v56 = vmul.f32 1.442695, %v1081_v25 }
 0x384   :  { %1231 = vmatmul.bf16.gmra.mxu2 %v1183_v23 }
 0x385   :  { %7021 = vpow2.f32 %v1109_v56 }
 0x388   :  { %v1132_v15 = vpop.xlane.xlu1 %1131  ;;  %v1130_v36 = vpop.xlane.xlu0 %1129 }
 0x389   :  { %7023 = vrcp.f32 %v1132_v15 }
 0x38a   :  { %7025 = vrcp.f32 %v1130_v36 }
 0x38b   :  { %v8343_v35 = vpop.eup %7021  ;;  %7027 = vpow2.f32 %v725_v8 }
 0x38c   :  { %1141 = vadd.xlane.f32.xlu0 %v8343_v35  ;;  %7029 = vrcp.f32 %v746_v40 }
 0x38f   :  { %v7024_v14 = vpop.eup %7023 }
 0x390   :  { %v7026_v21 = vpop.eup %7025  ;;  %v744_v31 = vpop.xlane.xlu1 %743  ;;  %v1172_v6 = vmul.f32 %v7024_v14, %v8273_v20 }
 0x391   :  { %v1066_v19 = vpop.xlane.xlu0 %1065  ;;  %7031 = vrcp.f32 %v744_v31  ;;  %v1171_v26 = vmul.f32 %v7026_v21, %v8275_v0  ;;  %v8352_v55 = vpop.eup %7027  ;;  %v729_v0 = vmul.f32 1.442695, %v698_v61 }
 0x392   :  { %v1083_v17 = vsub.f32 %v8283_v44, %v1066_v19  ;;  %v7030_v20 = vpop.eup %7029 }
 0x393   :  { %v1184_v42 = vpack.c.bf16 %v1172_v6, %v1171_v26  ;;  %v786_v43 = vmul.f32 %v7030_v20, %v8244_v4  ;;  %v6797_v4 = vld [vmem:[%s11469_s4 + $0x20] sm:$0xff] }
 0x394   :  { %v1113_v60 = vmul.f32 1.442695, %v1083_v17  ;;  %757 = vadd.xlane.f32.xlu0 %v8352_v55  ;;  %1325 = vmatpush.bf16.msra.mxu3 %v6797_v4 }
 0x395   :  { %1236 = vmatmul.bf16.gmra.mxu2 %v1184_v42 }
 0x396   :  { %7033 = vpow2.f32 %v1113_v60 }
 0x397   :  { %v7032_v52 = vpop.eup %7031  ;;  %7035 = vrcp.f32 %v1134_v30 }
 0x398   :  { %v1068_v44 = vpop.xlane.xlu1 %1067  ;;  %v785_v1 = vmul.f32 %v7032_v52, %v8285_v37 }
 0x399   :  { %v1136_v32 = vpop.xlane.xlu0 %1135  ;;  %v1084_v22 = vsub.f32 %v8290_v7, %v1068_v44 }
 0x39a   :  { %7037 = vrcp.f32 %v1136_v32  ;;  %v798_v51 = vpack.c.bf16 %v786_v43, %v785_v1 }
 0x39b   :  { %v1115_v53 = vmul.f32 1.442695, %v1084_v22  ;;  %7039 = vpow2.f32 %v729_v0  ;;  %v6795_v22 = vld [vmem:[%s11469_s4 + $0x10] sm:$0xff] }
 0x39c   :  { %v8365_v3 = vpop.eup %7033  ;;  %874 = vmatmul.bf16.gmra.mxu0 %v798_v51 }
 0x39d   :  { %1145 = vadd.xlane.f32.xlu1 %v8365_v3  ;;  %v7036_v27 = vpop.eup %7035  ;;  %7041 = vpow2.f32 %v1115_v53  ;;  %1420 = vmatpush.bf16.msrb.mxu0 %v6795_v22  ;;  %v7467_v22 = vld [vmem:[%s11466_s0] sm:$0xff] }
 0x39e   :  { %v1173_v41 = vmul.f32 %v7036_v27, %v8251_v39 }
 0x3a0   :  { %v7038_v37 = vpop.eup %7037  ;;  %v680_v7 = vpop.xlane.xlu1 %679 }
 0x3a1   :  { %v1174_v5 = vmul.f32 %v7038_v37, %v8292_v38  ;;  %v697_v47 = vsub.f32 %v8298_v12, %v680_v7  ;;  %v8374_v10 = vpop.eup %7039  ;;  %v748_v49 = vpop.xlane.xlu0 %747 }
 0x3a3   :  { %v1185_v46 = vpack.c.bf16 %v1174_v5, %v1173_v41  ;;  %v8376_v62 = vpop.eup %7041  ;;  %v727_v18 = vmul.f32 1.442695, %v697_v47 }
 0x3a4   :  { %1147 = vadd.xlane.f32.xlu2 %v8376_v62 }
 0x3a5   :  { %761 = vadd.xlane.f32.xlu1 %v8374_v10  ;;  %7043 = vpow2.f32 %v727_v18  ;;  %1241 = vmatmul.bf16.gmra.mxu2 %v1185_v46 }
 0x3a6   :  { %7045 = vrcp.f32 %v748_v49  ;;  %v860_v49 = vpop.f32.mrf.mxu0 }
 0x3a9   :  { %v1140_v38 = vpop.xlane.xlu0 %1139 }
 0x3ab   :  { %v8380_v40 = vpop.eup %7043 }
 0x3ac   :  { %759 = vadd.xlane.f32.xlu0 %v8380_v40  ;;  %v7046_v12 = vpop.eup %7045 }
 0x3ad   :  { %v787_v63 = vmul.f32 %v7046_v12, %v8300_v16 }
 0x3ae   :  { %v750_v39 = vpop.xlane.xlu1 %749 }
 0x3af   :  { %7047 = vrcp.f32 %v750_v39 }
 0x3b0   :  { %7049 = vrcp.f32 %v1140_v38 }
 0x3b5   :  { %v7048_v59 = vpop.eup %7047 }
 0x3b6   :  { %v1138_v9 = vpop.xlane.xlu2 %1137  ;;  %v788_v45 = vmul.f32 %v7048_v59, %v8313_v11  ;;  %v7050_v23 = vpop.eup %7049 }
 0x3b7   :  { %v1222_v48 = vpop.f32.mrf.mxu2  ;;  %7051 = vrcp.f32 %v1138_v9  ;;  %v1176_v30 = vmul.f32 %v7050_v23, %v8309_v28 }
 0x3b8   :  { %v799_v25 = vpack.c.bf16 %v788_v45, %v787_v63 }
 0x3ba   :  { %879 = vmatmul.bf16.gmra.mxu0 %v799_v25 }
 0x3bd   :  { %v7052_v56 = vpop.eup %7051 }
 0x3be   :  { %v1175_v24 = vmul.f32 %v7052_v56, %v8317_v57  ;;  %v752_v14 = vpop.xlane.xlu1 %751 }
 0x3bf   :  { %v1224_v15 = vpop.f32.mrf.mxu2  ;;  %7053 = vrcp.f32 %v752_v14 }
 0x3c0   :  { %v1262_v36 = vpack.c.bf16 %v1224_v15, %v1222_v48  ;;  %v1186_v8 = vpack.c.bf16 %v1176_v30, %v1175_v24 }
 0x3c2   :  { %6179 = vmatmul.msk.bf16.vlgmr.msra.gmra.mxu3 %vm553_vm0, %v1262_v36  ;;  %1246 = vmatmul.bf16.gmra.mxu2 %v1186_v8 }
 0x3c5   :  { %v7054_v11 = vpop.eup %7053 }
 0x3c6   :  { %v789_v19 = vmul.f32 %v7054_v11, %v8320_v13 }
 0x3ce   :  { %v1144_v17 = vpop.xlane.xlu1 %1143 }
 0x3e9   :  { %v754_v16 = vpop.xlane.xlu2 %753 }
 0x3ea   :  { %7055 = vrcp.f32 %v754_v16 }
 0x3eb   :  { %7057 = vrcp.f32 %v1144_v17 }
 0x3f0   :  { %v7056_v21 = vpop.eup %7055 }
 0x3f1   :  { %v1227_v31 = vpop.f32.mrf.mxu2  ;;  %v790_v6 = vmul.f32 %v7056_v21, %v8333_v54  ;;  %v756_v60 = vpop.xlane.xlu2 %755 }
 0x3f2   :  { %v7058_v42 = vpop.eup %7057 }
 0x3f3   :  { %v800_v57 = vpack.c.bf16 %v790_v6, %v789_v19  ;;  %v1178_v34 = vmul.f32 %v7058_v42, %v8326_v2  ;;  %v6794_v2 = vld [vmem:[%s11469_s4 + $0x8] sm:$0xff] }
 0x3f4   :  { %1421 = vmatpush.bf16.msrb.mxu0 %v6794_v2 }
 0x3f5   :  { %884 = vmatmul.bf16.gmra.mxu0 %v800_v57 }
 0x3f9   :  { %v1229_v28 = vpop.f32.mrf.mxu2 }
 0x3fa   :  { %v1263_v50 = vpack.c.bf16 %v1229_v28, %v1227_v31 }
 0x3fc   :  { %6180 = vmatmul.msk.bf16.gmra.mxu3 %vm553_vm0, %v1263_v50 }
 0x3ff   :  { %v1142_v26 = vpop.xlane.xlu0 %1141 }
 0x400   :  { %7059 = vrcp.f32 %v1142_v26 }
 0x401   :  { %7061 = vrcp.f32 %v756_v60 }
 0x406   :  { %v7060_v13 = vpop.eup %7059 }
 0x407   :  { %v1232_v54 = vpop.f32.mrf.mxu2  ;;  %v758_v61 = vpop.xlane.xlu0 %757  ;;  %v1177_v20 = vmul.f32 %v7060_v13, %v8343_v35  ;;  %v6793_v35 = vld [vmem:[%s11469_s4] sm:$0xff] }
 0x408   :  { %7063 = vrcp.f32 %v758_v61  ;;  %v7062_v0 = vpop.eup %7061  ;;  %1422 = vmatpush.bf16.msrb.mxu0 %v6793_v35  ;;  %v7468_v35 = vld [vmem:[%s11466_s0 + $0x8] sm:$0xff] }
 0x409   :  { %v1187_v52 = vpack.c.bf16 %v1178_v34, %v1177_v20  ;;  %v791_v1 = vmul.f32 %v7062_v0, %v8336_v29  ;;  %v8428_v0 = vld [vmem:[%s11470_s5] ss:$0 sm:$0xff] }
 0x40b   :  { %1251 = vmatmul.bf16.gmra.mxu2 %v1187_v52 }
 0x40e   :  { %v7064_v44 = vpop.eup %7063 }
 0x40f   :  { %v1234_v32 = vpop.f32.mrf.mxu2  ;;  %v792_v43 = vmul.f32 %v7064_v44, %v8352_v55 }
 0x410   :  { %v1264_v33 = vpack.c.bf16 %v1234_v32, %v1232_v54  ;;  %v1146_v51 = vpop.xlane.xlu1 %1145 }
 0x411   :  { %v801_v53 = vpack.c.bf16 %v792_v43, %v791_v1  ;;  %7065 = vrcp.f32 %v1146_v51 }
 0x412   :  { %6181 = vmatmul.msk.bf16.gmra.mxu3 %vm553_vm0, %v1264_v33 }
 0x413   :  { %889 = vmatmul.bf16.gmra.mxu0 %v801_v53 }
 0x417   :  { %v1148_v29 = vpop.xlane.xlu2 %1147  ;;  %v7066_v4 = vpop.eup %7065 }
 0x418   :  { %7067 = vrcp.f32 %v1148_v29  ;;  %v1237_v55 = vpop.f32.mrf.mxu2  ;;  %v762_v27 = vpop.xlane.xlu1 %761  ;;  %v1179_v41 = vmul.f32 %v7066_v4, %v8365_v3 }
 0x419   :  { %7069 = vrcp.f32 %v762_v27  ;;  %v862_v3 = vpop.f32.mrf.mxu0 }
 0x41a   :  { %v900_v25 = vpack.c.bf16 %v862_v3, %v860_v49 }
 0x41e   :  { %v7068_v37 = vpop.eup %7067 }
 0x41f   :  { %v760_v7 = vpop.xlane.xlu0 %759  ;;  %v1180_v5 = vmul.f32 %v7068_v37, %v8376_v62  ;;  %v7070_v39 = vpop.eup %7069 }
 0x420   :  { %v1239_v47 = vpop.f32.mrf.mxu2  ;;  %7071 = vrcp.f32 %v760_v7  ;;  %v794_v59 = vmul.f32 %v7070_v39, %v8374_v10  ;;  %v7470_v39 = vld [vmem:[%s11466_s0 + $0x18] sm:$0xff] }
 0x421   :  { %v1265_v46 = vpack.c.bf16 %v1239_v47, %v1237_v55  ;;  %v1188_v18 = vpack.c.bf16 %v1180_v5, %v1179_v41  ;;  %v865_v48 = vpop.f32.mrf.mxu0  ;;  %v7469_v41 = vld [vmem:[%s11466_s0 + $0x10] sm:$0xff] }
 0x423   :  { %6182 = vmatmul.msk.bf16.gmra.mxu3 %vm553_vm0, %v1265_v46  ;;  %1256 = vmatmul.bf16.gmra.mxu2 %v1188_v18 }
 0x426   :  { %v7072_v38 = vpop.eup %7071 }
 0x427   :  { %v793_v12 = vmul.f32 %v7072_v38, %v8380_v40 }
 0x428   :  { %v1242_v9 = vpop.f32.mrf.mxu2 }
 0x429   :  { %v802_v63 = vpack.c.bf16 %v794_v59, %v793_v12  ;;  %v867_v23 = vpop.f32.mrf.mxu0 }
 0x42a   :  { %v901_v30 = vpack.c.bf16 %v867_v23, %v865_v48  ;;  %v7472_v23 = vld [vmem:[%s11466_s0 + $0x28] sm:$0xff] }
 0x42b   :  { %894 = vmatmul.bf16.gmra.mxu0 %v802_v63  ;;  %v7471_v63 = vld [vmem:[%s11466_s0 + $0x20] sm:$0xff] }
 0x430   :  { %v1244_v45 = vpop.f32.mrf.mxu2 }
 0x431   :  { %v1266_v62 = vpack.c.bf16 %v1244_v45, %v1242_v9  ;;  %v870_v24 = vpop.f32.mrf.mxu0 }
 0x433   :  { %6183 = vmatmul.msk.bf16.gmra.mxu3 %vm553_vm0, %v1266_v62 }
 0x439   :  { %v872_v15 = vpop.f32.mrf.mxu0 }
 0x43a   :  { %v902_v8 = vpack.c.bf16 %v872_v15, %v870_v24  ;;  %v7473_v15 = vld [vmem:[%s11466_s0 + $0x30] sm:$0xff] }
 0x43b   :  { %6203 = vmatmul.msk.bf16.vlgmr.msrb.gmra.mxu0 %vm553_vm0, %v900_v25 }
 0x441   :  { %v875_v36 = vpop.f32.mrf.mxu0 }
 0x445   :  { %v1247_v56 = vpop.f32.mrf.mxu2  ;;  %v1327_v20 = vpop.f32.mrf.mxu3 }
 0x449   :  { %v877_v14 = vpop.f32.mrf.mxu0 }
 0x44a   :  { %v903_v16 = vpack.c.bf16 %v877_v14, %v875_v36 }
 0x44b   :  { %6204 = vmatmul.msk.bf16.gmra.mxu0 %vm553_vm0, %v901_v30 }
 0x44d   :  { %v1249_v40 = vpop.f32.mrf.mxu2  ;;  %v1329_v1 = vpop.f32.mrf.mxu3 }
 0x44e   :  { %v1267_v10 = vpack.c.bf16 %v1249_v40, %v1247_v56 }
 0x450   :  { %6184 = vmatmul.msk.bf16.gmra.mxu3 %vm553_vm0, %v1267_v10 }
 0x451   :  { %v880_v11 = vpop.f32.mrf.mxu0 }
 0x459   :  { %v882_v21 = vpop.f32.mrf.mxu0 }
 0x45a   :  { %v904_v31 = vpack.c.bf16 %v882_v21, %v880_v11 }
 0x45b   :  { %6205 = vmatmul.msk.bf16.gmra.mxu0 %vm553_vm0, %v902_v8  ;;  %v7500_v8 = vmov 128.0  }
 0x45c   :  { %7073 = vrcp.f32 %v7500_v8 }
 0x462   :  { %v7074_v14 = vpop.eup %7073 }
 0x463   :  { %vm1539_vm1 = vweird.f32 %v7074_v14 }
 0x46b   :  { %6206 = vmatmul.msk.bf16.gmra.mxu0 %vm553_vm0, %v903_v16  ;;  %v1535_v16 = vmul.f32 128.0, %v7074_v14 }
 0x46d   :  { %v1536_v11 = vsub.f32 1.0, %v1535_v16 }
 0x46f   :  { %v1537_v21 = vmul.f32 %v7074_v14, %v1536_v11 }
 0x472   :  { %v885_v19 = vpop.f32.mrf.mxu0 }
 0x47a   :  { %v887_v6 = vpop.f32.mrf.mxu0 }
 0x47b   :  { %6207 = vmatmul.msk.bf16.gmra.mxu0 %vm553_vm0, %v904_v31  ;;  %v905_v57 = vpack.c.bf16 %v887_v6, %v885_v19  ;;  %v1538_v6 = vadd.f32 %v7074_v14, %v1537_v21 }
 0x47f   :  { %v1332_v2 = vpop.f32.mrf.mxu3 }
 0x487   :  { %v1334_v7 = vpop.f32.mrf.mxu3 }
 0x48b   :  { %6208 = vmatmul.msk.bf16.gmra.mxu0 %vm553_vm0, %v905_v57  ;;  %v8473_v57 = vsel %vm1539_vm1, %v7074_v14, %v1538_v6  ;;  %v7478_v14 = vld [vmem:[%s11466_s0 + $0x58] sm:$0xff] }
 0x48e   :  { %v1252_v28 = vpop.f32.mrf.mxu2 }
 0x490   :  { %v890_v58 = vpop.f32.mrf.mxu0 }
 0x495   :  { %v1337_v49 = vpop.f32.mrf.mxu3 }
 0x496   :  { %v1254_v50 = vpop.f32.mrf.mxu2 }
 0x497   :  { %v1268_v17 = vpack.c.bf16 %v1254_v50, %v1252_v28 }
 0x498   :  { %v892_v26 = vpop.f32.mrf.mxu0 }
 0x499   :  { %v906_v60 = vpack.c.bf16 %v892_v26, %v890_v58  ;;  %6185 = vmatmul.msk.bf16.gmra.mxu3 %vm553_vm0, %v1268_v17 }
 0x49b   :  { %6209 = vmatmul.msk.bf16.gmra.mxu0 %vm553_vm0, %v906_v60 }
 0x49d   :  { %v1339_v45 = vpop.f32.mrf.mxu3 }
 0x4a6   :  { %v1257_v42 = vpop.f32.mrf.mxu2  ;;  %v1342_v24 = vpop.f32.mrf.mxu3 }
 0x4a8   :  { %v895_v13 = vpop.f32.mrf.mxu0 }
 0x4ae   :  { %v1259_v54 = vpop.f32.mrf.mxu2  ;;  %v1344_v19 = vpop.f32.mrf.mxu3 }
 0x4af   :  { %v1269_v61 = vpack.c.bf16 %v1259_v54, %v1257_v42 }
 0x4b0   :  { %v897_v34 = vpop.f32.mrf.mxu0 }
 0x4b1   :  { %v907_v52 = vpack.c.bf16 %v897_v34, %v895_v13  ;;  %6186 = vmatmul.msk.bf16.gmra.mxu3 %vm553_vm0, %v1269_v61 }
 0x4b3   :  { %6210 = vmatmul.msk.bf16.gmra.mxu0 %vm553_vm0, %v907_v52 }
 0x4b6   :  { %v1347_v17 = vpop.f32.mrf.mxu3 }
 0x4b8   :  { %v1424_v44 = vpop.f32.mrf.mxu0 }
 0x4b9   :  { %v1425_v32 = vadd.f32 %v1424_v44, %v1327_v20 }
 0x4bb   :  { %v1468_v43 = vadd.f32 %v8428_v0, %v1425_v32 }
 0x4bd   :  { %v1484_v33 = vadd.f32 %v7467_v22, %v1468_v43 }
 0x4be   :  { %v1349_v52 = vpop.f32.mrf.mxu3 }
 0x4bf   :  { %1502 = vadd.xlane.f32.xlu2 %v1484_v33 }
 0x4c0   :  { %v1426_v51 = vpop.f32.mrf.mxu0 }
 0x4c1   :  { %v1427_v53 = vadd.f32 %v1426_v51, %v1329_v1  ;;  %v7474_v1 = vld [vmem:[%s11466_s0 + $0x38] sm:$0xff] }
 0x4c3   :  { %v1469_v29 = vadd.f32 %v8428_v0, %v1427_v53 }
 0x4c5   :  { %v1485_v55 = vadd.f32 %v7468_v35, %v1469_v29 }
 0x4c7   :  { %1504 = vadd.xlane.f32.xlu0 %v1485_v55 }
 0x4c8   :  { %v1429_v27 = vpop.f32.mrf.mxu0 }
 0x4c9   :  { %v1430_v4 = vadd.f32 %v1429_v27, %v1332_v2 }
 0x4cb   :  { %v1470_v37 = vadd.f32 %v8428_v0, %v1430_v4 }
 0x4cd   :  { %v8442_v5 = vadd.f32 %v7469_v41, %v1470_v37 }
 0x4cf   :  { %1506 = vadd.xlane.f32.xlu1 %v8442_v5 }
 0x4d0   :  { %v1431_v47 = vpop.f32.mrf.mxu0 }
 0x4d1   :  { %v1432_v46 = vadd.f32 %v1431_v47, %v1334_v7 }
 0x4d3   :  { %v1471_v18 = vadd.f32 %v8428_v0, %v1432_v46  ;;  %v1352_v2 = vpop.f32.mrf.mxu3  ;;  %v7476_v46 = vld [vmem:[%s11466_s0 + $0x48] sm:$0xff] }
 0x4d5   :  { %v8449_v38 = vadd.f32 %v7470_v39, %v1471_v18 }
 0x4d7   :  { %1508 = vadd.xlane.f32.xlu2 %v8449_v38 }
 0x4d8   :  { %v1434_v12 = vpop.f32.mrf.mxu0 }
 0x4d9   :  { %v1435_v59 = vadd.f32 %v1434_v12, %v1337_v49 }
 0x4db   :  { %v1472_v9 = vadd.f32 %v8428_v0, %v1435_v59  ;;  %v1354_v39 = vpop.f32.mrf.mxu3 }
 0x4dd   :  { %v8456_v3 = vadd.f32 %v7471_v63, %v1472_v9 }
 0x4df   :  { %1510 = vadd.xlane.f32.xlu0 %v8456_v3 }
 0x4e0   :  { %v1436_v62 = vpop.f32.mrf.mxu0 }
 0x4e1   :  { %v1437_v48 = vadd.f32 %v1436_v62, %v1339_v45  ;;  %v7477_v62 = vld [vmem:[%s11466_s0 + $0x50] sm:$0xff] }
 0x4e3   :  { %v1473_v25 = vadd.f32 %v8428_v0, %v1437_v48 }
 0x4e5   :  { %v8463_v56 = vadd.f32 %v7472_v23, %v1473_v25 }
 0x4e7   :  { %1512 = vadd.xlane.f32.xlu1 %v8463_v56 }
 0x4e8   :  { %v1439_v30 = vpop.f32.mrf.mxu0 }
 0x4e9   :  { %v1440_v40 = vadd.f32 %v1439_v30, %v1342_v24 }
 0x4eb   :  { %v1474_v10 = vadd.f32 %v8428_v0, %v1440_v40 }
 0x4ed   :  { %v8470_v36 = vadd.f32 %v7473_v15, %v1474_v10 }
 0x4ef   :  { %1514 = vadd.xlane.f32.xlu1 %v8470_v36 }
 0x4f0   :  { %v1441_v31 = vpop.f32.mrf.mxu0 }
 0x4f1   :  { %v1442_v60 = vadd.f32 %v1441_v31, %v1344_v19 }
 0x4f3   :  { %v1475_v61 = vadd.f32 %v8428_v0, %v1442_v60 }
 0x4f5   :  { %v8489_v43 = vadd.f32 %v7474_v1, %v1475_v61  ;;  %v6816_v1 = vld [vmem:[%s11473_s8 + $0x74] sm:$0xf0] }
 0x4f8   :  { %v1444_v50 = vpop.f32.mrf.mxu0 }
 0x4f9   :  { %v1445_v44 = vadd.f32 %v1444_v50, %v1347_v17  ;;  %v7479_v50 = vld [vmem:[%s11466_s0 + $0x60] sm:$0xff] }
 0x500   :  { %v1446_v34 = vpop.f32.mrf.mxu0 }
 0x501   :  { %v1447_v29 = vadd.f32 %v1446_v34, %v1349_v52  ;;  %v7481_v52 = vld [vmem:[%s11466_s0 + $0x70] sm:$0xff] }
 0x503   :  { %v1477_v41 = vadd.f32 %v8428_v0, %v1447_v29  ;;  %v6261_v29 = vld [vmem:[%s11473_s8 + $0x60] sm:$0xf] }
 0x505   :  { %v8513_v18 = vadd.f32 %v7476_v46, %v1477_v41  ;;  %v6253_v41 = vld [vmem:[%s11473_s8 + $0x50] sm:$0xf]  ;;  %v6811_v46 = vld [vmem:[%s11473_s8 + $0x54] sm:$0xf] }
 0x508   :  { %v1449_v4 = vpop.f32.mrf.mxu0 }
 0x509   :  { %v1450_v47 = vadd.f32 %v1449_v4, %v1352_v2 }
 0x50b   :  { %v1478_v9 = vadd.f32 %v8428_v0, %v1450_v47  ;;  %v6812_v47 = vld [vmem:[%s11473_s8 + $0x54] sm:$0xf0] }
 0x50d   :  { %v8526_v48 = vadd.f32 %v7477_v62, %v1478_v9  ;;  %v6810_v9 = vld [vmem:[%s11473_s8 + $0x44] sm:$0xf0]  ;;  %v6247_v62 = vld [vmem:[%s11473_s8 + $0x48] sm:$0xf0] }
 0x510   :  { %v1451_v12 = vpop.f32.mrf.mxu0 }
 0x511   :  { %v1452_v45 = vadd.f32 %v1451_v12, %v1354_v39  ;;  %v6255_v39 = vld [vmem:[%s11473_s8 + $0x58] sm:$0xf0] }
 0x512   :  { %v6258_v12 = vor.u32 %v6811_v46, %v6255_v39 }
 0x518   :  { %v1454_v40 = vpop.f32.mrf.mxu0 }
 0x51c   :  { %v1357_v23 = vpop.f32.mrf.mxu3 }
 0x51d   :  { %v1455_v15 = vadd.f32 %v1454_v40, %v1357_v23  ;;  %v6237_v23 = vld [vmem:[%s11473_s8 + $0x30] sm:$0xf]  ;;  %v6239_v40 = vld [vmem:[%s11473_s8 + $0x38] sm:$0xf0] }
 0x51f   :  { %v1480_v21 = vadd.f32 %v8428_v0, %v1455_v15 }
 0x520   :  { %v1456_v6 = vpop.f32.mrf.mxu0 }
 0x521   :  { %v8554_v17 = vadd.f32 %v7479_v50, %v1480_v21 }
 0x532   :  { %v1503_v28 = vpop.xlane.xlu2 %1502 }
 0x533   :  { %v1541_v58 = vmul.f32 %v8473_v57, %v1503_v28 }
 0x535   :  { %v8476_v26 = vsub.f32 %v1484_v33, %v1541_v58  ;;  %v1476_v33 = vadd.f32 %v8428_v0, %v1445_v44 }
 0x537   :  { %v1573_v42 = vmul.f32 %v8476_v26, %v8476_v26 }
 0x539   :  { %1589 = vadd.xlane.f32.xlu2 %v1573_v42 }
 0x53a   :  { %v1505_v13 = vpop.xlane.xlu0 %1504 }
 0x53b   :  { %v1542_v54 = vmul.f32 %v8473_v57, %v1505_v13  ;;  %v1459_v13 = vpop.f32.mrf.mxu0 }
 0x53d   :  { %v8482_v20 = vsub.f32 %v1485_v55, %v1542_v54  ;;  %v7475_v55 = vld [vmem:[%s11466_s0 + $0x40] sm:$0xff]  ;;  %v7480_v54 = vld [vmem:[%s11466_s0 + $0x68] sm:$0xff] }
 0x53e   :  { %v8502_v27 = vadd.f32 %v7475_v55, %v1476_v33  ;;  %v6813_v55 = vld [vmem:[%s11473_s8 + $0x64] sm:$0xf] }
 0x53f   :  { %v1574_v32 = vmul.f32 %v8482_v20, %v8482_v20 }
 0x541   :  { %1591 = vadd.xlane.f32.xlu0 %v1574_v32  ;;  %1516 = vadd.xlane.f32.xlu2 %v8489_v43  ;;  %v6269_v32 = vld [vmem:[%s11473_s8 + $0x70] sm:$0xf] }
 0x542   :  { %v1507_v22 = vpop.xlane.xlu1 %1506  ;;  %v6270_v33 = vor.u32 %v6816_v1, %v6269_v32 }
 0x543   :  { %v1543_v51 = vmul.f32 %v8473_v57, %v1507_v22  ;;  %v6815_v22 = vld [vmem:[%s11473_s8 + $0x74] sm:$0xf] }
 0x544   :  { %1977 = vmatpush.bf16.msra.mxu1 %v6270_v33 }
 0x545   :  { %v8495_v53 = vsub.f32 %v8442_v5, %v1543_v51  ;;  %v6271_v51 = vld [vmem:[%s11473_s8 + $0x78] sm:$0xf0] }
 0x546   :  { %v6274_v2 = vor.u32 %v6815_v22, %v6271_v51  ;;  %v6215_v22 = vld [vmem:[%s11473_s8 + $0x8] sm:$0xf0] }
 0x547   :  { %v1575_v35 = vmul.f32 %v8495_v53, %v8495_v53 }
 0x548   :  { %2026 = vmatpush.bf16.msrb.mxu2 %v6274_v2 }
 0x549   :  { %1593 = vadd.xlane.f32.xlu0 %v1575_v35  ;;  %1518 = vadd.xlane.f32.xlu2 %v8502_v27  ;;  %v6814_v35 = vld [vmem:[%s11473_s8 + $0x64] sm:$0xf0] }
 0x54a   :  { %v1509_v37 = vpop.xlane.xlu2 %1508  ;;  %v6262_v4 = vor.u32 %v6814_v35, %v6261_v29 }
 0x54b   :  { %v1544_v7 = vmul.f32 %v8473_v57, %v1509_v37  ;;  %v6263_v37 = vld [vmem:[%s11473_s8 + $0x68] sm:$0xf0] }
 0x54c   :  { %1978 = vmatpush.bf16.msra.mxu1 %v6262_v4 }
 0x54d   :  { %v8508_v5 = vsub.f32 %v8449_v38, %v1544_v7  ;;  %v6266_v7 = vor.u32 %v6813_v55, %v6263_v37 }
 0x54f   :  { %v1576_v49 = vmul.f32 %v8508_v5, %v8508_v5  ;;  %2027 = vmatpush.bf16.msrb.mxu2 %v6266_v7 }
 0x551   :  { %1520 = vadd.xlane.f32.xlu0 %v8513_v18  ;;  %1595 = vadd.xlane.f32.xlu1 %v1576_v49  ;;  %v6254_v49 = vor.u32 %v6812_v47, %v6253_v41 }
 0x552   :  { %v1511_v59 = vpop.xlane.xlu0 %1510 }
 0x553   :  { %v1545_v38 = vmul.f32 %v8473_v57, %v1511_v59  ;;  %1979 = vmatpush.bf16.msra.mxu1 %v6254_v49  ;;  %2028 = vmatpush.bf16.msrb.mxu2 %v6258_v12  ;;  %v6245_v59 = vld [vmem:[%s11473_s8 + $0x40] sm:$0xf] }
 0x555   :  { %v8521_v63 = vsub.f32 %v8456_v3, %v1545_v38  ;;  %v1479_v3 = vadd.f32 %v8428_v0, %v1452_v45  ;;  %v6809_v38 = vld [vmem:[%s11473_s8 + $0x44] sm:$0xf]  ;;  %v6246_v45 = vor.u32 %v6810_v9, %v6245_v59 }
 0x557   :  { %v1577_v25 = vmul.f32 %v8521_v63, %v8521_v63  ;;  %v8541_v16 = vadd.f32 %v7478_v14, %v1479_v3  ;;  %1980 = vmatpush.bf16.msra.mxu1 %v6246_v45  ;;  %v6806_v14 = vld [vmem:[%s11473_s8 + $0x24] sm:$0xf0] }
 0x559   :  { %1522 = vadd.xlane.f32.xlu0 %v8526_v48  ;;  %1597 = vadd.xlane.f32.xlu1 %v1577_v25  ;;  %v6250_v25 = vor.u32 %v6809_v38, %v6247_v62 }
 0x55a   :  { %v1513_v24 = vpop.xlane.xlu1 %1512 }
 0x55b   :  { %v1546_v30 = vmul.f32 %v8473_v57, %v1513_v24  ;;  %2029 = vmatpush.bf16.msrb.mxu2 %v6250_v25  ;;  %v6808_v24 = vld [vmem:[%s11473_s8 + $0x34] sm:$0xf0]  ;;  %v1461_v25 = vpop.f32.mrf.mxu0 }
 0x55c   :  { %v6238_v3 = vor.u32 %v6808_v24, %v6237_v23 }
 0x55d   :  { %v8534_v10 = vsub.f32 %v8463_v56, %v1546_v30  ;;  %v1359_v56 = vpop.f32.mrf.mxu3  ;;  %v6807_v30 = vld [vmem:[%s11473_s8 + $0x34] sm:$0xf] }
 0x55e   :  { %v1457_v28 = vadd.f32 %v1456_v6, %v1359_v56  ;;  %v6242_v15 = vor.u32 %v6807_v30, %v6239_v40  ;;  %1981 = vmatpush.bf16.msra.mxu1 %v6238_v3  ;;  %v6221_v6 = vld [vmem:[%s11473_s8 + $0x10] sm:$0xf] }
 0x55f   :  { %v1578_v8 = vmul.f32 %v8534_v10, %v8534_v10 }
 0x560   :  { %v1481_v60 = vadd.f32 %v8428_v0, %v1457_v28  ;;  %2030 = vmatpush.bf16.msrb.mxu2 %v6242_v15  ;;  %v6804_v28 = vld [vmem:[%s11473_s8 + $0x14] sm:$0xf0] }
 0x561   :  { %1599 = vadd.xlane.f32.xlu2 %v1578_v8  ;;  %1524 = vadd.xlane.f32.xlu1 %v8541_v16  ;;  %v6229_v8 = vld [vmem:[%s11473_s8 + $0x20] sm:$0xf]  ;;  %v6222_v50 = vor.u32 %v6804_v28, %v6221_v6 }
 0x562   :  { %v1515_v11 = vpop.xlane.xlu1 %1514  ;;  %v8561_v61 = vadd.f32 %v7480_v54, %v1481_v60  ;;  %v6230_v21 = vor.u32 %v6806_v14, %v6229_v8  ;;  %v6223_v60 = vld [vmem:[%s11473_s8 + $0x18] sm:$0xf0]  ;;  %v6213_v54 = vld [vmem:[%s11473_s8] sm:$0xf] }
 0x563   :  { %v1547_v31 = vmul.f32 %v8473_v57, %v1515_v11  ;;  %v6805_v11 = vld [vmem:[%s11473_s8 + $0x24] sm:$0xf]  ;;  %v8688_v28 = vld [vmem:[%s11471_s6] ss:$0 sm:$0xff] }
 0x564   :  { %1982 = vmatpush.bf16.msra.mxu1 %v6230_v21 }
 0x565   :  { %v8547_v19 = vsub.f32 %v8470_v36, %v1547_v31  ;;  %v1362_v42 = vpop.f32.mrf.mxu3  ;;  %v6231_v31 = vld [vmem:[%s11473_s8 + $0x28] sm:$0xf0] }
 0x566   :  { %v1460_v36 = vadd.f32 %v1459_v13, %v1362_v42  ;;  %v6234_v56 = vor.u32 %v6805_v11, %v6231_v31 }
 0x567   :  { %v1579_v58 = vmul.f32 %v8547_v19, %v8547_v19 }
 0x568   :  { %v1482_v34 = vadd.f32 %v8428_v0, %v1460_v36  ;;  %2031 = vmatpush.bf16.msrb.mxu2 %v6234_v56  ;;  %1983 = vmatpush.bf16.msra.mxu1 %v6222_v50 }
 0x569   :  { %1601 = vadd.xlane.f32.xlu2 %v1579_v58  ;;  %1526 = vadd.xlane.f32.xlu1 %v8554_v17  ;;  %v6803_v58 = vld [vmem:[%s11473_s8 + $0x14] sm:$0xf] }
 0x56a   :  { %v8568_v44 = vadd.f32 %v7481_v52, %v1482_v34  ;;  %v6226_v13 = vor.u32 %v6803_v58, %v6223_v60  ;;  %v6802_v34 = vld [vmem:[%s11473_s8 + $0x4] sm:$0xf0]  ;;  %v6801_v52 = vld [vmem:[%s11473_s8 + $0x4] sm:$0xf] }
 0x56b   :  { %v6214_v1 = vor.u32 %v6802_v34, %v6213_v54  ;;  %v6218_v33 = vor.u32 %v6801_v52, %v6215_v22 }
 0x56c   :  { %2032 = vmatpush.bf16.msrb.mxu2 %v6226_v13 }
 0x56d   :  { %1984 = vmatpush.bf16.msra.mxu1 %v6214_v1  ;;  %v1364_v9 = vpop.f32.mrf.mxu3 }
 0x56e   :  { %v1462_v30 = vadd.f32 %v1461_v25, %v1364_v9 }
 0x570   :  { %2033 = vmatpush.bf16.msrb.mxu2 %v6218_v33  ;;  %v1483_v31 = vadd.f32 %v8428_v0, %v1462_v30 }
 0x571   :  { %1528 = vadd.xlane.f32.xlu2 %v8561_v61 }
 0x579   :  { %1530 = vadd.xlane.f32.xlu2 %v8568_v44 }
 0x5ac   :  { %v1590_v42 = vpop.xlane.xlu2 %1589 }
 0x5ad   :  { %v1621_v36 = vmul.f32 %v1590_v42, %v8473_v57 }
 0x5af   :  { %v1637_v32 = vadd.f32 1e-12, %v1621_v36  ;;  %v7482_v36 = vld [vmem:[%s11466_s0 + $0x78] sm:$0xff] }
 0x5b0   :  { %v8699_v54 = vadd.f32 %v7482_v36, %v1483_v31 }
 0x5b1   :  { %7075 = vrsqrt.f32 %v1637_v32  ;;  %vm1659_vm3 = vweird.f32 %v1637_v32 }
 0x5b4   :  { %v1592_v51 = vpop.xlane.xlu0 %1591  ;;  %v1517_v2 = vpop.xlane.xlu2 %1516 }
 0x5b5   :  { %v1622_v29 = vmul.f32 %v1592_v51, %v8473_v57  ;;  %v1548_v35 = vmul.f32 %v8473_v57, %v1517_v2 }
 0x5b7   :  { %v7076_v55 = vpop.eup %7075  ;;  %v1638_v4 = vadd.f32 1e-12, %v1622_v29  ;;  %v8671_v37 = vsub.f32 %v8489_v43, %v1548_v35 }
 0x5b8   :  { %v1654_v7 = vmul.f32 %v7076_v55, %v1637_v32  ;;  %vm1660_vm2 = vweird.f32 %v7076_v55  ;;  %v8707_v32 = vld [vmem:[%s11472_s7] ss:$0 sm:$0xff] }
 0x5b9   :  { %7077 = vrsqrt.f32 %v1638_v4  ;;  %v1580_v41 = vmul.f32 %v8671_v37, %v8671_v37  ;;  %vm1661_vm4 = vmor %vm1659_vm3, %vm1660_vm2  ;;  %vm1669_vm6 = vweird.f32 %v1638_v4 }
 0x5ba   :  { %v1655_v47 = vmul.f32 %v7076_v55, %v1654_v7 }
 0x5bb   :  { %1603 = vadd.xlane.f32.xlu0 %v1580_v41 }
 0x5bc   :  { %v1656_v46 = vmul.f32 0.5, %v1655_v47  ;;  %v1594_v49 = vpop.xlane.xlu0 %1593  ;;  %v1519_v39 = vpop.xlane.xlu2 %1518 }
 0x5bd   :  { %v1623_v12 = vmul.f32 %v1594_v49, %v8473_v57  ;;  %v1549_v59 = vmul.f32 %v8473_v57, %v1519_v39 }
 0x5be   :  { %v1657_v38 = vsub.f32 1.5, %v1656_v46 }
 0x5bf   :  { %v7078_v45 = vpop.eup %7077  ;;  %v1639_v62 = vadd.f32 1e-12, %v1623_v12  ;;  %v8678_v43 = vsub.f32 %v8502_v27, %v1549_v59 }
 0x5c0   :  { %v1658_v23 = vmul.f32 %v7076_v55, %v1657_v38  ;;  %v1664_v24 = vmul.f32 %v7078_v45, %v1638_v4  ;;  %vm1670_vm5 = vweird.f32 %v7078_v45 }
 0x5c1   :  { %7079 = vrsqrt.f32 %v1639_v62  ;;  %v1581_v3 = vmul.f32 %v8678_v43, %v8678_v43  ;;  %vm1671_vm7 = vmor %vm1669_vm6, %vm1670_vm5  ;;  %vm1679_vm9 = vweird.f32 %v1639_v62 }
 0x5c2   :  { %v1665_v40 = vmul.f32 %v7078_v45, %v1664_v24  ;;  %v1662_v15 = vsel %vm1661_vm4, %v7076_v55, %v1658_v23 }
 0x5c3   :  { %1605 = vadd.xlane.f32.xlu0 %v1581_v3  ;;  %v1813_v58 = vmul.f32 %v1662_v15, %v8476_v26 }
 0x5c4   :  { %v1666_v8 = vmul.f32 0.5, %v1665_v40  ;;  %v1521_v14 = vpop.xlane.xlu0 %1520  ;;  %v1596_v11 = vpop.xlane.xlu1 %1595 }
 0x5c5   :  { %v1550_v27 = vmul.f32 %v8473_v57, %v1521_v14  ;;  %v1624_v21 = vmul.f32 %v1596_v11, %v8473_v57  ;;  %v1832_v52 = vmul.f32 %v8688_v28, %v1813_v58 }
 0x5c6   :  { %v1667_v56 = vsub.f32 1.5, %v1666_v8 }
 0x5c7   :  { %v7080_v6 = vpop.eup %7079  ;;  %v1640_v50 = vadd.f32 1e-12, %v1624_v21  ;;  %v8692_v60 = vsub.f32 %v8513_v18, %v1550_v27  ;;  %v8716_v7 = vadd.f32 %v8707_v32, %v1832_v52 }
 0x5c8   :  { %v1668_v42 = vmul.f32 %v7078_v45, %v1667_v56  ;;  %v1674_v13 = vmul.f32 %v7080_v6, %v1639_v62  ;;  %vm1680_vm8 = vweird.f32 %v7080_v6 }
 0x5c9   :  { %7081 = vrsqrt.f32 %v1640_v50  ;;  %v1582_v0 = vmul.f32 %v8692_v60, %v8692_v60  ;;  %vm1681_vm10 = vmor %vm1679_vm9, %vm1680_vm8  ;;  %vm1689_vm12 = vweird.f32 %v1640_v50 }
 0x5ca   :  { %v1672_v34 = vsel %vm1671_vm7, %v7078_v45, %v1668_v42  ;;  %v1675_v26 = vmul.f32 %v7080_v6, %v1674_v13 }
 0x5cb   :  { %v1814_v18 = vmul.f32 %v1672_v34, %v8482_v20  ;;  %1607 = vadd.xlane.f32.xlu1 %v1582_v0  ;;  %1532 = vadd.xlane.f32.xlu0 %v8699_v54 }
 0x5cc   :  { %v1676_v1 = vmul.f32 0.5, %v1675_v26  ;;  %v1523_v22 = vpop.xlane.xlu0 %1522  ;;  %v1598_v33 = vpop.xlane.xlu1 %1597 }
 0x5cd   :  { %v1833_v51 = vmul.f32 %v8688_v28, %v1814_v18  ;;  %v1551_v2 = vmul.f32 %v8473_v57, %v1523_v22  ;;  %v1625_v29 = vmul.f32 %v1598_v33, %v8473_v57 }
 0x5ce   :  { %v1677_v35 = vsub.f32 1.5, %v1676_v1 }
 0x5cf   :  { %v7082_v55 = vpop.eup %7081  ;;  %v1641_v20 = vadd.f32 1e-12, %v1625_v29  ;;  %v8713_v4 = vsub.f32 %v8526_v48, %v1551_v2  ;;  %v8719_v41 = vadd.f32 %v8707_v32, %v1833_v51 }
 0x5d0   :  { %v1678_v47 = vmul.f32 %v7080_v6, %v1677_v35  ;;  %v1684_v46 = vmul.f32 %v7082_v55, %v1640_v50  ;;  %vm1690_vm11 = vweird.f32 %v7082_v55 }
 0x5d1   :  { %7083 = vrsqrt.f32 %v1641_v20  ;;  %v1583_v49 = vmul.f32 %v8713_v4, %v8713_v4  ;;  %v1867_v39 = vpack.c.bf16 %v8719_v41, %v8716_v7  ;;  %vm1691_vm13 = vmor %vm1689_vm12, %vm1690_vm11  ;;  %vm1699_vm15 = vweird.f32 %v1641_v20 }
 0x5d2   :  { %v1685_v12 = vmul.f32 %v7082_v55, %v1684_v46  ;;  %v1682_v48 = vsel %vm1681_vm10, %v7080_v6, %v1678_v47 }
 0x5d3   :  { %1609 = vadd.xlane.f32.xlu1 %v1583_v49  ;;  %1985 = vmatmul.bf16.vlgmr.msra.gmra.mxu1 %v1867_v39  ;;  %v1815_v62 = vmul.f32 %v1682_v48, %v8495_v53 }
 0x5d4   :  { %v1686_v59 = vmul.f32 0.5, %v1685_v12  ;;  %2034 = vmatmul.bf16.vlgmr.msrb.gmra.mxu2 %v1867_v39  ;;  %v1525_v9 = vpop.xlane.xlu1 %1524  ;;  %v1600_v38 = vpop.xlane.xlu2 %1599 }
 0x5d5   :  { %v1552_v45 = vmul.f32 %v8473_v57, %v1525_v9  ;;  %v1626_v25 = vmul.f32 %v1600_v38, %v8473_v57  ;;  %v1834_v21 = vmul.f32 %v8688_v28, %v1815_v62  ;;  %v6824_v62 = vld [vmem:[%s11474_s10 + $0x38] sm:$0xff] }
 0x5d6   :  { %v1687_v23 = vsub.f32 1.5, %v1686_v59  ;;  %2511 = vmatpush.bf16.msrb.mxu3 %v6824_v62  ;;  %v6819_v62 = vld [vmem:[%s11474_s10 + $0x10] sm:$0xff] }
 0x5d7   :  { %v7084_v24 = vpop.eup %7083  ;;  %v1642_v30 = vadd.f32 1e-12, %v1626_v25  ;;  %v8728_v3 = vsub.f32 %v8541_v16, %v1552_v45  ;;  %v8738_v42 = vadd.f32 %v8707_v32, %v1834_v21 }
 0x5d8   :  { %v1688_v40 = vmul.f32 %v7082_v55, %v1687_v23  ;;  %v1694_v15 = vmul.f32 %v7084_v24, %v1641_v20  ;;  %vm1700_vm14 = vweird.f32 %v7084_v24 }
 0x5d9   :  { %7085 = vrsqrt.f32 %v1642_v30  ;;  %v1584_v8 = vmul.f32 %v8728_v3, %v8728_v3  ;;  %vm1701_vm1 = vmor %vm1699_vm15, %vm1700_vm14  ;;  %vm1709_vm3 = vweird.f32 %v1642_v30 }
 0x5da   :  { %v1692_v14 = vsel %vm1691_vm13, %v7082_v55, %v1688_v40  ;;  %v1695_v11 = vmul.f32 %v7084_v24, %v1694_v15 }
 0x5db   :  { %1611 = vadd.xlane.f32.xlu2 %v1584_v8  ;;  %v1816_v27 = vmul.f32 %v1692_v14, %v8508_v5  ;;  %v6823_v14 = vld [vmem:[%s11474_s10 + $0x30] sm:$0xff] }
 0x5dc   :  { %v1696_v31 = vmul.f32 0.5, %v1695_v11  ;;  %v1527_v16 = vpop.xlane.xlu1 %1526  ;;  %v1602_v56 = vpop.xlane.xlu2 %1601  ;;  %2512 = vmatpush.bf16.msrb.mxu3 %v6823_v14 }
 0x5dd   :  { %v1553_v53 = vmul.f32 %v8473_v57, %v1527_v16  ;;  %v1835_v6 = vmul.f32 %v8688_v28, %v1816_v27  ;;  %v1627_v59 = vmul.f32 %v1602_v56, %v8473_v57  ;;  %v6832_v16 = vld [vmem:[%s11474_s10 + $0x78] sm:$0xff] }
 0x5de   :  { %v1697_v58 = vsub.f32 1.5, %v1696_v31  ;;  %2560 = vmatpush.bf16.msra.mxu0 %v6832_v16 }
 0x5df   :  { %v7086_v50 = vpop.eup %7085  ;;  %v8741_v13 = vadd.f32 %v8707_v32, %v1835_v6  ;;  %v8744_v0 = vsub.f32 %v8554_v17, %v1553_v53  ;;  %v1643_v9 = vadd.f32 1e-12, %v1627_v59  ;;  %v6822_v53 = vld [vmem:[%s11474_s10 + $0x28] sm:$0xff]  ;;  %v6829_v59 = vld [vmem:[%s11474_s10 + $0x60] sm:$0xff] }
 0x5e0   :  { %v1698_v5 = vmul.f32 %v7084_v24, %v1697_v58  ;;  %v1704_v36 = vmul.f32 %v7086_v50, %v1642_v30  ;;  %vm1710_vm2 = vweird.f32 %v7086_v50  ;;  %2513 = vmatpush.bf16.msrb.mxu3 %v6822_v53 }
 0x5e1   :  { %v1868_v34 = vpack.c.bf16 %v8741_v13, %v8738_v42  ;;  %v1585_v26 = vmul.f32 %v8744_v0, %v8744_v0  ;;  %vm1711_vm4 = vmor %vm1709_vm3, %vm1710_vm2  ;;  %7087 = vrsqrt.f32 %v1643_v9  ;;  %vm1719_vm6 = vweird.f32 %v1643_v9 }
 0x5e2   :  { %v1705_v52 = vmul.f32 %v7086_v50, %v1704_v36  ;;  %v1702_v18 = vsel %vm1701_vm1, %v7084_v24, %v1698_v5 }
 0x5e3   :  { %1990 = vmatmul.bf16.gmra.mxu1 %v1868_v34  ;;  %1613 = vadd.xlane.f32.xlu0 %v1585_v26  ;;  %v1817_v2 = vmul.f32 %v1702_v18, %v8521_v63  ;;  %v6831_v26 = vld [vmem:[%s11474_s10 + $0x70] sm:$0xff] }
 0x5e4   :  { %v1706_v1 = vmul.f32 0.5, %v1705_v52  ;;  %2039 = vmatmul.bf16.gmra.mxu2 %v1868_v34  ;;  %v1529_v22 = vpop.xlane.xlu2 %1528  ;;  %2561 = vmatpush.bf16.msra.mxu0 %v6831_v26 }
 0x5e5   :  { %v1554_v17 = vmul.f32 %v8473_v57, %v1529_v22  ;;  %v1836_v47 = vmul.f32 %v8688_v28, %v1817_v2 }
 0x5e6   :  { %v1707_v33 = vsub.f32 1.5, %v1706_v1 }
 0x5e7   :  { %v8752_v51 = vsub.f32 %v8561_v61, %v1554_v17  ;;  %v8762_v39 = vadd.f32 %v8707_v32, %v1836_v47  ;;  %v7088_v38 = vpop.eup %7087 }
 0x5e8   :  { %v1708_v29 = vmul.f32 %v7086_v50, %v1707_v33  ;;  %v1714_v45 = vmul.f32 %v7088_v38, %v1643_v9  ;;  %vm1720_vm5 = vweird.f32 %v7088_v38  ;;  %v6821_v33 = vld [vmem:[%s11474_s10 + $0x20] sm:$0xff] }
 0x5e9   :  { %v1586_v35 = vmul.f32 %v8752_v51, %v8752_v51  ;;  %vm1721_vm7 = vmor %vm1719_vm6, %vm1720_vm5  ;;  %2514 = vmatpush.bf16.msrb.mxu3 %v6821_v33 }
 0x5ea   :  { %v1712_v55 = vsel %vm1711_vm4, %v7086_v50, %v1708_v29  ;;  %v1715_v25 = vmul.f32 %v7088_v38, %v1714_v45 }
 0x5eb   :  { %1615 = vadd.xlane.f32.xlu1 %v1586_v35  ;;  %v1818_v20 = vmul.f32 %v1712_v55, %v8534_v10 }
 0x5ec   :  { %v1531_v46 = vpop.xlane.xlu2 %1530  ;;  %v1716_v30 = vmul.f32 0.5, %v1715_v25 }
 0x5ed   :  { %v1555_v49 = vmul.f32 %v8473_v57, %v1531_v46  ;;  %v1837_v61 = vmul.f32 %v8688_v28, %v1818_v20  ;;  %v6820_v46 = vld [vmem:[%s11474_s10 + $0x18] sm:$0xff] }
 0x5ee   :  { %v1717_v40 = vsub.f32 1.5, %v1716_v30  ;;  %2515 = vmatpush.bf16.msrb.mxu3 %v6820_v46 }
 0x5ef   :  { %v8765_v63 = vadd.f32 %v8707_v32, %v1837_v61  ;;  %v8768_v12 = vsub.f32 %v8568_v44, %v1555_v49 }
 0x5f0   :  { %v1718_v21 = vmul.f32 %v7088_v38, %v1717_v40 }
 0x5f1   :  { %v1869_v48 = vpack.c.bf16 %v8765_v63, %v8762_v39  ;;  %v1587_v10 = vmul.f32 %v8768_v12, %v8768_v12 }
 0x5f2   :  { %v1722_v6 = vsel %vm1721_vm7, %v7088_v38, %v1718_v21  ;;  %2516 = vmatpush.bf16.msrb.mxu3 %v6819_v62 }
 0x5f3   :  { %1995 = vmatmul.bf16.gmra.mxu1 %v1869_v48  ;;  %1617 = vadd.xlane.f32.xlu2 %v1587_v10  ;;  %v1819_v17 = vmul.f32 %v1722_v6, %v8547_v19  ;;  %v6830_v19 = vld [vmem:[%s11474_s10 + $0x68] sm:$0xff] }
 0x5f4   :  { %2044 = vmatmul.bf16.gmra.mxu2 %v1869_v48  ;;  %2562 = vmatpush.bf16.msra.mxu0 %v6830_v19 }
 0x5f5   :  { %v1838_v47 = vmul.f32 %v8688_v28, %v1819_v17 }
 0x5f7   :  { %v8830_v45 = vadd.f32 %v8707_v32, %v1838_v47 }
 0x5f8   :  { %2563 = vmatpush.bf16.msra.mxu0 %v6829_v59 }
 0x62e   :  { %v1604_v23 = vpop.xlane.xlu0 %1603 }
 0x62f   :  { %v1628_v44 = vmul.f32 %v1604_v23, %v8473_v57 }
 0x631   :  { %v1644_v24 = vadd.f32 1e-12, %v1628_v44  ;;  %v1891_v44 = vld [vmem:[%s11475_s9] sm:$0x3] }
 0x633   :  { %7089 = vrsqrt.f32 %v1644_v24  ;;  %vm1729_vm9 = vweird.f32 %v1644_v24 }
 0x636   :  { %v1606_v15 = vpop.xlane.xlu0 %1605 }
 0x637   :  { %v1629_v8 = vmul.f32 %v1606_v15, %v8473_v57  ;;  %v8848_v15 = vperm.slane %v1891_v44, 0 }
 0x639   :  { %v7090_v11 = vpop.eup %7089  ;;  %v8783_v27 = vadd.f32 1e-12, %v1629_v8  ;;  %v6828_v8 = vld [vmem:[%s11474_s10 + $0x58] sm:$0xff] }
 0x63a   :  { %v1724_v31 = vmul.f32 %v7090_v11, %v1644_v24  ;;  %vm1730_vm8 = vweird.f32 %v7090_v11  ;;  %2564 = vmatpush.bf16.msra.mxu0 %v6828_v8 }
 0x63b   :  { %7091 = vrsqrt.f32 %v8783_v27  ;;  %vm1731_vm10 = vmor %vm1729_vm9, %vm1730_vm8  ;;  %vm1739_vm12 = vweird.f32 %v8783_v27 }
 0x63c   :  { %v1725_v56 = vmul.f32 %v7090_v11, %v1724_v31 }
 0x63e   :  { %v1726_v58 = vmul.f32 0.5, %v1725_v56  ;;  %v1608_v50 = vpop.xlane.xlu1 %1607  ;;  %v1533_v5 = vpop.xlane.xlu0 %1532 }
 0x63f   :  { %v1630_v36 = vmul.f32 %v1608_v50, %v8473_v57  ;;  %v1556_v34 = vmul.f32 %v8473_v57, %v1533_v5  ;;  %v6818_v50 = vld [vmem:[%s11474_s10 + $0x8] sm:$0xff] }
 0x640   :  { %v1727_v52 = vsub.f32 1.5, %v1726_v58  ;;  %2517 = vmatpush.bf16.msrb.mxu3 %v6818_v50 }
 0x641   :  { %v8797_v18 = vpop.eup %7091  ;;  %v8799_v1 = vadd.f32 1e-12, %v1630_v36  ;;  %v8802_v22 = vsub.f32 %v8699_v54, %v1556_v34 }
 0x642   :  { %v1728_v2 = vmul.f32 %v7090_v11, %v1727_v52  ;;  %v1734_v29 = vmul.f32 %v8797_v18, %v8783_v27  ;;  %vm1740_vm11 = vweird.f32 %v8797_v18  ;;  %v6827_v52 = vld [vmem:[%s11474_s10 + $0x50] sm:$0xff] }
 0x643   :  { %7093 = vrsqrt.f32 %v8799_v1  ;;  %v1588_v35 = vmul.f32 %v8802_v22, %v8802_v22  ;;  %vm8853_vm13 = vmor %vm1739_vm12, %vm1740_vm11  ;;  %vm1749_vm15 = vweird.f32 %v8799_v1  ;;  %2565 = vmatpush.bf16.msra.mxu0 %v6827_v52 }
 0x644   :  { %v1732_v54 = vsel %vm1731_vm10, %v7090_v11, %v1728_v2  ;;  %v1735_v55 = vmul.f32 %v8797_v18, %v1734_v29  ;;  %v6817_v2 = vld [vmem:[%s11474_s10] sm:$0xff] }
 0x645   :  { %1619 = vadd.xlane.f32.xlu0 %v1588_v35  ;;  %v1820_v20 = vmul.f32 %v1732_v54, %v8671_v37  ;;  %2518 = vmatpush.bf16.msrb.mxu3 %v6817_v2 }
 0x646   :  { %v1736_v49 = vmul.f32 0.5, %v1735_v55  ;;  %v1610_v61 = vpop.xlane.xlu1 %1609 }
 0x647   :  { %v1631_v48 = vmul.f32 %v1610_v61, %v8473_v57  ;;  %v1839_v10 = vmul.f32 %v8688_v28, %v1820_v20 }
 0x648   :  { %v1737_v9 = vsub.f32 1.5, %v1736_v49 }
 0x649   :  { %v7094_v37 = vpop.eup %7093  ;;  %v8827_v38 = vadd.f32 1e-12, %v1631_v48  ;;  %v8833_v25 = vadd.f32 %v8707_v32, %v1839_v10 }
 0x64a   :  { %v1744_v23 = vmul.f32 %v7094_v37, %v8799_v1  ;;  %v1738_v24 = vmul.f32 %v8797_v18, %v1737_v9  ;;  %vm1750_vm14 = vweird.f32 %v7094_v37  ;;  %v8882_v1 = vperm.slane %v1891_v44, 1 }
 0x64b   :  { %7095 = vrsqrt.f32 %v8827_v38  ;;  %v1870_v30 = vpack.c.bf16 %v8833_v25, %v8830_v45  ;;  %vm1751_vm1 = vmor %vm1749_vm15, %vm1750_vm14  ;;  %vm1759_vm3 = vweird.f32 %v8827_v38 }
 0x64c   :  { %v1745_v40 = vmul.f32 %v7094_v37, %v1744_v23  ;;  %v1742_v31 = vsel %vm8853_vm13, %v8797_v18, %v1738_v24 }
 0x64d   :  { %2000 = vmatmul.bf16.gmra.mxu1 %v1870_v30  ;;  %2049 = vmatmul.bf16.gmra.mxu2 %v1870_v30  ;;  %v1821_v34 = vmul.f32 %v1742_v31, %v8678_v43 }
 0x64e   :  { %v1746_v11 = vmul.f32 0.5, %v1745_v40  ;;  %v1612_v21 = vpop.xlane.xlu2 %1611  ;;  %v6825_v40 = vld [vmem:[%s11474_s10 + $0x40] sm:$0xff] }
 0x64f   :  { %v1632_v27 = vmul.f32 %v1612_v21, %v8473_v57  ;;  %v1840_v19 = vmul.f32 %v8688_v28, %v1821_v34 }
 0x650   :  { %v1747_v16 = vsub.f32 1.5, %v1746_v11  ;;  %v1986_v56 = vpop.f32.mrf.mxu1 }
 0x651   :  { %v8861_v53 = vpop.eup %7095  ;;  %v8863_v6 = vadd.f32 1e-12, %v1632_v27  ;;  %v8866_v58 = vadd.f32 %v1986_v56, %v8848_v15  ;;  %v8914_v24 = vadd.f32 %v8707_v32, %v1840_v19 }
 0x652   :  { %v1748_v5 = vmul.f32 %v7094_v37, %v1747_v16  ;;  %v1754_v36 = vmul.f32 %v8861_v53, %v8827_v38  ;;  %vm1760_vm2 = vweird.f32 %v8861_v53 }
 0x653   :  { %7097 = vrsqrt.f32 %v8863_v6  ;;  %v2075_v26 = vmul.f32 %v8866_v58, %v8866_v58  ;;  %vm8931_vm4 = vmor %vm1759_vm3, %vm1760_vm2  ;;  %vm1769_vm6 = vweird.f32 %v8863_v6 }
 0x654   :  { %v1752_v18 = vsel %vm1751_vm1, %v7094_v37, %v1748_v5  ;;  %v1755_v17 = vmul.f32 %v8861_v53, %v1754_v36 }
 0x655   :  { %v2107_v33 = vmul.f32 %v2075_v26, %v8866_v58  ;;  %v1822_v43 = vmul.f32 %v1752_v18, %v8692_v60  ;;  %v6826_v60 = vld [vmem:[%s11474_s10 + $0x48] sm:$0xff] }
 0x656   :  { %v1756_v29 = vmul.f32 0.5, %v1755_v17  ;;  %v1614_v35 = vpop.xlane.xlu0 %1613  ;;  %2566 = vmatpush.bf16.msra.mxu0 %v6826_v60 }
 0x657   :  { %v2139_v54 = vmul.f32 0.044715, %v2107_v33  ;;  %v2035_v55 = vpop.f32.mrf.mxu2  ;;  %v1633_v20 = vmul.f32 %v1614_v35, %v8473_v57  ;;  %v1841_v47 = vmul.f32 %v8688_v28, %v1822_v43 }
 0x658   :  { %v1757_v46 = vsub.f32 1.5, %v1756_v29  ;;  %v8896_v49 = vadd.f32 %v2035_v55, %v8882_v1  ;;  %v1988_v61 = vpop.f32.mrf.mxu1 }
 0x659   :  { %v8898_v48 = vpop.eup %7097  ;;  %v2171_v10 = vadd.f32 %v2139_v54, %v8866_v58  ;;  %v8901_v59 = vadd.f32 1e-12, %v1633_v20  ;;  %v8904_v9 = vadd.f32 %v1988_v61, %v8848_v15  ;;  %v8907_v37 = vadd.f32 %v8707_v32, %v1841_v47 }
 0x65a   :  { %v1764_v23 = vmul.f32 %v8898_v48, %v8863_v6  ;;  %v2076_v44 = vmul.f32 %v8896_v49, %v8896_v49  ;;  %v1758_v21 = vmul.f32 %v8861_v53, %v1757_v46  ;;  %2567 = vmatpush.bf16.msra.mxu0 %v6825_v40  ;;  %vm1770_vm5 = vweird.f32 %v8898_v48 }
 0x65b   :  { %v2203_v30 = vmul.f32 0.7978846, %v2171_v10  ;;  %7099 = vrsqrt.f32 %v8901_v59  ;;  %v2077_v62 = vmul.f32 %v8904_v9, %v8904_v9  ;;  %v1871_v11 = vpack.c.bf16 %v8907_v37, %v8914_v24  ;;  %vm8955_vm7 = vmor %vm1769_vm6, %vm1770_vm5 }
 0x65c   :  { %v1765_v8 = vmul.f32 %v8898_v48, %v1764_v23  ;;  %v2108_v14 = vmul.f32 %v2076_v44, %v8896_v49  ;;  %v1762_v38 = vsel %vm8931_vm4, %v8861_v53, %v1758_v21  ;;  %vm1779_vm8 = vweird.f32 %v8901_v59 }
 0x65d   :  { %v2109_v31 = vmul.f32 %v2077_v62, %v8904_v9  ;;  %7101 = vtanh.f32 %v2203_v30  ;;  %2005 = vmatmul.bf16.gmra.mxu1 %v1871_v11  ;;  %2054 = vmatmul.bf16.gmra.mxu2 %v1871_v11  ;;  %v1823_v46 = vmul.f32 %v1762_v38, %v8713_v4 }
 0x65e   :  { %v1766_v27 = vmul.f32 0.5, %v1765_v8  ;;  %v2140_v16 = vmul.f32 0.044715, %v2108_v14  ;;  %v1616_v56 = vpop.xlane.xlu1 %1615 }
 0x65f   :  { %v2141_v50 = vmul.f32 0.044715, %v2109_v31  ;;  %v2037_v5 = vpop.f32.mrf.mxu2  ;;  %v1634_v36 = vmul.f32 %v1616_v56, %v8473_v57  ;;  %v1842_v4 = vmul.f32 %v8688_v28, %v1823_v46 }
 0x660   :  { %v1767_v26 = vsub.f32 1.5, %v1766_v27  ;;  %v2172_v52 = vadd.f32 %v2140_v16, %v8896_v49  ;;  %v8938_v18 = vadd.f32 %v2037_v5, %v8882_v1  ;;  %v1991_v17 = vpop.f32.mrf.mxu1 }
 0x661   :  { %v8940_v33 = vpop.eup %7099  ;;  %v2173_v43 = vadd.f32 %v2141_v50, %v8904_v9  ;;  %v8946_v2 = vadd.f32 1e-12, %v1634_v36  ;;  %v8949_v29 = vadd.f32 %v1991_v17, %v8848_v15 }
 0x662   :  { %v1768_v35 = vmul.f32 %v8898_v48, %v1767_v26  ;;  %v2204_v19 = vmul.f32 0.7978846, %v2172_v52  ;;  %v1774_v54 = vmul.f32 %v8940_v33, %v8901_v59  ;;  %v2078_v20 = vmul.f32 %v8938_v18, %v8938_v18 }
 0x663   :  { %v2205_v53 = vmul.f32 0.7978846, %v2173_v43  ;;  %7103 = vrsqrt.f32 %v8946_v2  ;;  %v7102_v47 = vpop.eup %7101  ;;  %v2079_v10 = vmul.f32 %v8949_v29, %v8949_v29  ;;  %vm1780_vm9 = vweird.f32 %v8940_v33 }
 0x664   :  { %v1772_v60 = vsel %vm8955_vm7, %v8898_v48, %v1768_v35  ;;  %7105 = vtanh.f32 %v2204_v19  ;;  %v1775_v6 = vmul.f32 %v8940_v33, %v1774_v54  ;;  %v2110_v61 = vmul.f32 %v2078_v20, %v8938_v18  ;;  %vm9000_vm11 = vmor %vm1779_vm8, %vm1780_vm9 }
 0x665   :  { %7107 = vtanh.f32 %v2205_v53  ;;  %v2267_v44 = vadd.f32 1.0, %v7102_v47  ;;  %v2111_v62 = vmul.f32 %v2079_v10, %v8949_v29  ;;  %v1824_v8 = vmul.f32 %v1772_v60, %v8728_v3 }
 0x666   :  { %v1776_v23 = vmul.f32 0.5, %v1775_v6  ;;  %v2142_v30 = vmul.f32 0.044715, %v2110_v61  ;;  %v8988_v35 = vadd.f32 %v8707_v32, %v1842_v4  ;;  %vm1789_vm12 = vweird.f32 %v8946_v2 }
 0x667   :  { %v2040_v40 = vpop.f32.mrf.mxu2  ;;  %v2143_v27 = vmul.f32 0.044715, %v2111_v62  ;;  %v2299_v36 = vmul.f32 0.5, %v2267_v44  ;;  %v1843_v52 = vmul.f32 %v8688_v28, %v1824_v8 }
 0x668   :  { %v8973_v48 = vadd.f32 %v2040_v40, %v8882_v1  ;;  %v1993_v14 = vpop.f32.mrf.mxu1  ;;  %v1777_v21 = vsub.f32 1.5, %v1776_v23  ;;  %v2174_v31 = vadd.f32 %v2142_v30, %v8938_v18 }
 0x669   :  { %v7104_v11 = vpop.eup %7103  ;;  %v8982_v3 = vadd.f32 %v1993_v14, %v8848_v15  ;;  %v2175_v26 = vadd.f32 %v2143_v27, %v8949_v29  ;;  %v2331_v60 = vmul.f32 %v2299_v36, %v8866_v58  ;;  %v8996_v46 = vadd.f32 %v8707_v32, %v1843_v52 }
 0x66a   :  { %v7106_v16 = vpop.eup %7105  ;;  %v1784_v56 = vmul.f32 %v7104_v11, %v8946_v2  ;;  %v2080_v50 = vmul.f32 %v8973_v48, %v8973_v48  ;;  %v2206_v34 = vmul.f32 0.7978846, %v2174_v31  ;;  %v1778_v54 = vmul.f32 %v8940_v33, %v1777_v21 }
 0x66b   :  { %v7108_v5 = vpop.eup %7107  ;;  %v2268_v19 = vadd.f32 1.0, %v7106_v16  ;;  %v2081_v47 = vmul.f32 %v8982_v3, %v8982_v3  ;;  %vm1790_vm10 = vweird.f32 %v7104_v11  ;;  %v2207_v6 = vmul.f32 0.7978846, %v2175_v26 }
 0x66c   :  { %v2269_v17 = vadd.f32 1.0, %v7108_v5  ;;  %v1785_v38 = vmul.f32 %v7104_v11, %v1784_v56  ;;  %v2112_v43 = vmul.f32 %v2080_v50, %v8973_v48  ;;  %7109 = vtanh.f32 %v2206_v34  ;;  %vm1791_vm13 = vmor %vm1789_vm12, %vm1790_vm10 }
 0x66d   :  { %v2113_v62 = vmul.f32 %v2081_v47, %v8982_v3  ;;  %v1782_v40 = vsel %vm9000_vm11, %v8940_v33, %v1778_v54  ;;  %v1872_v8 = vpack.c.bf16 %v8996_v46, %v8988_v35  ;;  %7111 = vtanh.f32 %v2207_v6 }
 0x66e   :  { %v2301_v55 = vmul.f32 0.5, %v2269_v17  ;;  %v1786_v53 = vmul.f32 0.5, %v1785_v38  ;;  %v2144_v20 = vmul.f32 0.044715, %v2112_v43  ;;  %v1825_v36 = vmul.f32 %v1782_v40, %v8744_v0 }
 0x66f   :  { %v2042_v61 = vpop.f32.mrf.mxu2  ;;  %v2145_v27 = vmul.f32 0.044715, %v2113_v62  ;;  %2010 = vmatmul.bf16.gmra.mxu1 %v1872_v8  ;;  %2059 = vmatmul.bf16.gmra.mxu2 %v1872_v8 }
 0x670   :  { %v2333_v23 = vmul.f32 %v2301_v55, %v8904_v9  ;;  %v1787_v44 = vsub.f32 1.5, %v1786_v53  ;;  %v2176_v30 = vadd.f32 %v2144_v20, %v8973_v48  ;;  %v1996_v58 = vpop.f32.mrf.mxu1  ;;  %v9013_v59 = vadd.f32 %v2042_v61, %v8882_v1 }
 0x671   :  { %v9016_v14 = vadd.f32 %v1996_v58, %v8848_v15  ;;  %v2300_v9 = vmul.f32 0.5, %v2268_v19  ;;  %v2177_v2 = vadd.f32 %v2145_v27, %v8982_v3  ;;  %v1844_v6 = vmul.f32 %v8688_v28, %v1825_v36 }
 0x672   :  { %v2363_v4 = vpack.c.bf16 %v2333_v23, %v2331_v60  ;;  %v1788_v21 = vmul.f32 %v7104_v11, %v1787_v44  ;;  %v7110_v31 = vpop.eup %7109  ;;  %v2082_v33 = vmul.f32 %v9013_v59, %v9013_v59  ;;  %v2208_v5 = vmul.f32 0.7978846, %v2176_v30 }
 0x673   :  { %v2083_v16 = vmul.f32 %v9016_v14, %v9016_v14  ;;  %v2270_v56 = vadd.f32 1.0, %v7110_v31  ;;  %v2209_v38 = vmul.f32 0.7978846, %v2177_v2  ;;  %v7112_v47 = vpop.eup %7111  ;;  %v9051_v40 = vadd.f32 %v8707_v32, %v1844_v6 }
 0x674   :  { %v1792_v50 = vsel %vm1791_vm13, %v7104_v11, %v1788_v21  ;;  %2519 = vmatmul.bf16.vlgmr.msrb.gmra.mxu3 %v2363_v4  ;;  %v2114_v34 = vmul.f32 %v2082_v33, %v9013_v59  ;;  %v2332_v11 = vmul.f32 %v2300_v9, %v8896_v49  ;;  %7113 = vtanh.f32 %v2208_v5 }
 0x675   :  { %v2115_v26 = vmul.f32 %v2083_v16, %v9016_v14  ;;  %v1826_v52 = vmul.f32 %v1792_v50, %v8752_v51  ;;  %v2302_v17 = vmul.f32 0.5, %v2270_v56  ;;  %7115 = vtanh.f32 %v2209_v38 }
 0x676   :  { %v2146_v43 = vmul.f32 0.044715, %v2114_v34  ;;  %v2271_v62 = vadd.f32 1.0, %v7112_v47 }
 0x677   :  { %v2147_v19 = vmul.f32 0.044715, %v2115_v26  ;;  %v2045_v54 = vpop.f32.mrf.mxu2  ;;  %v1845_v55 = vmul.f32 %v8688_v28, %v1826_v52  ;;  %v2334_v53 = vmul.f32 %v2302_v17, %v8938_v18 }
 0x678   :  { %v9033_v0 = vadd.f32 %v2045_v54, %v8882_v1  ;;  %v1998_v20 = vpop.f32.mrf.mxu1  ;;  %v2178_v60 = vadd.f32 %v2146_v43, %v9013_v59  ;;  %v2303_v50 = vmul.f32 0.5, %v2271_v62 }
 0x679   :  { %v9037_v51 = vadd.f32 %v1998_v20, %v8848_v15  ;;  %v2364_v61 = vpack.c.bf16 %v2334_v53, %v2332_v11  ;;  %v2179_v10 = vadd.f32 %v2147_v19, %v9016_v14  ;;  %v9046_v44 = vadd.f32 %v8707_v32, %v1845_v55 }
 0x67a   :  { %v2084_v49 = vmul.f32 %v9033_v0, %v9033_v0  ;;  %v2210_v18 = vmul.f32 0.7978846, %v2178_v60  ;;  %v7114_v8 = vpop.eup %7113  ;;  %v2335_v19 = vmul.f32 %v2303_v50, %v8949_v29 }
 0x67b   :  { %v2085_v23 = vmul.f32 %v9037_v51, %v9037_v51  ;;  %2568 = vmatmul.bf16.vlgmr.msra.gmra.mxu0 %v2364_v61  ;;  %v2211_v9 = vmul.f32 0.7978846, %v2179_v10  ;;  %v1873_v31 = vpack.c.bf16 %v9046_v44, %v9051_v40  ;;  %v7116_v33 = vpop.eup %7115  ;;  %v2272_v2 = vadd.f32 1.0, %v7114_v8 }
 0x67c   :  { %v2116_v30 = vmul.f32 %v2084_v49, %v9033_v0  ;;  %7117 = vtanh.f32 %v2210_v18  ;;  %v2273_v36 = vadd.f32 1.0, %v7116_v33 }
 0x67d   :  { %v2117_v58 = vmul.f32 %v2085_v23, %v9037_v51  ;;  %7119 = vtanh.f32 %v2211_v9  ;;  %v2304_v11 = vmul.f32 0.5, %v2272_v2 }
 0x67e   :  { %v2148_v4 = vmul.f32 0.044715, %v2116_v30  ;;  %v2305_v17 = vmul.f32 0.5, %v2273_v36 }
 0x67f   :  { %v2149_v21 = vmul.f32 0.044715, %v2117_v58  ;;  %v2047_v27 = vpop.f32.mrf.mxu2  ;;  %2015 = vmatmul.bf16.gmra.mxu1 %v1873_v31  ;;  %2064 = vmatmul.bf16.gmra.mxu2 %v1873_v31  ;;  %v2336_v61 = vmul.f32 %v2304_v11, %v8973_v48 }
 0x680   :  { %v2180_v16 = vadd.f32 %v2148_v4, %v9033_v0  ;;  %v2048_v56 = vadd.f32 %v2047_v27, %v8882_v1  ;;  %v2337_v54 = vmul.f32 %v2305_v17, %v8982_v3 }
 0x681   :  { %v2181_v5 = vadd.f32 %v2149_v21, %v9037_v51 }
 0x682   :  { %v2212_v34 = vmul.f32 0.7978846, %v2180_v16  ;;  %v2086_v26 = vmul.f32 %v2048_v56, %v2048_v56  ;;  %v7118_v38 = vpop.eup %7117  ;;  %v2365_v20 = vpack.c.bf16 %v2337_v54, %v2335_v19 }
 0x683   :  { %v2213_v52 = vmul.f32 0.7978846, %v2181_v5  ;;  %v2274_v55 = vadd.f32 1.0, %v7118_v38  ;;  %v7120_v60 = vpop.eup %7119  ;;  %v1618_v5 = vpop.xlane.xlu2 %1617 }
 0x684   :  { %v2118_v43 = vmul.f32 %v2086_v26, %v2048_v56  ;;  %2524 = vmatmul.bf16.gmra.mxu3 %v2365_v20  ;;  %v2275_v29 = vadd.f32 1.0, %v7120_v60  ;;  %v1635_v36 = vmul.f32 %v1618_v5, %v8473_v57 }
 0x685   :  { %7121 = vtanh.f32 %v2213_v52  ;;  %v2306_v47 = vmul.f32 0.5, %v2274_v55 }
 0x686   :  { %7123 = vtanh.f32 %v2212_v34  ;;  %v2150_v53 = vmul.f32 0.044715, %v2118_v43  ;;  %v2307_v58 = vmul.f32 0.5, %v2275_v29  ;;  %v1651_v2 = vadd.f32 1e-12, %v1635_v36 }
 0x687   :  { %v2338_v10 = vmul.f32 %v2306_v47, %v9013_v59 }
 0x688   :  { %v2182_v6 = vadd.f32 %v2150_v53, %v2048_v56  ;;  %v2339_v21 = vmul.f32 %v2307_v58, %v9016_v14  ;;  %vm1799_vm15 = vweird.f32 %v1651_v2 }
 0x689   :  { %v2366_v23 = vpack.c.bf16 %v2338_v10, %v2336_v61 }
 0x68a   :  { %v2214_v49 = vmul.f32 0.7978846, %v2182_v6 }
 0x68b   :  { %v7122_v18 = vpop.eup %7121  ;;  %2573 = vmatmul.bf16.gmra.mxu0 %v2366_v23 }
 0x68c   :  { %v7124_v30 = vpop.eup %7123  ;;  %v2277_v3 = vadd.f32 1.0, %v7122_v18  ;;  %7125 = vtanh.f32 %v2214_v49 }
 0x68d   :  { %v2276_v8 = vadd.f32 1.0, %v7124_v30  ;;  %7127 = vrsqrt.f32 %v1651_v2 }
 0x68e   :  { %v2309_v62 = vmul.f32 0.5, %v2277_v3 }
 0x68f   :  { %v2308_v48 = vmul.f32 0.5, %v2276_v8 }
 0x690   :  { %v2341_v9 = vmul.f32 %v2309_v62, %v9037_v51 }
 0x691   :  { %v2340_v33 = vmul.f32 %v2308_v48, %v9033_v0 }
 0x692   :  { %v7126_v4 = vpop.eup %7125  ;;  %v2367_v27 = vpack.c.bf16 %v2341_v9, %v2339_v21 }
 0x693   :  { %v2278_v31 = vadd.f32 1.0, %v7126_v4  ;;  %v7128_v34 = vpop.eup %7127 }
 0x694   :  { %2529 = vmatmul.bf16.gmra.mxu3 %v2367_v27  ;;  %v1794_v51 = vmul.f32 %v7128_v34, %v1651_v2  ;;  %vm1800_vm14 = vweird.f32 %v7128_v34 }
 0x695   :  { %v2310_v59 = vmul.f32 0.5, %v2278_v31  ;;  %vm1801_vm1 = vmor %vm1799_vm15, %vm1800_vm14 }
 0x696   :  { %v1795_v26 = vmul.f32 %v7128_v34, %v1794_v51 }
 0x697   :  { %v2342_v16 = vmul.f32 %v2310_v59, %v2048_v56 }
 0x698   :  { %v1796_v17 = vmul.f32 0.5, %v1795_v26 }
 0x699   :  { %v2368_v50 = vpack.c.bf16 %v2342_v16, %v2340_v33 }
 0x69a   :  { %v1797_v43 = vsub.f32 1.5, %v1796_v17 }
 0x69b   :  { %2578 = vmatmul.bf16.gmra.mxu0 %v2368_v50 }
 0x69c   :  { %v1798_v56 = vmul.f32 %v7128_v34, %v1797_v43 }
 0x69e   :  { %v1802_v55 = vsel %vm1801_vm1, %v7128_v34, %v1798_v56 }
 0x69f   :  { %v1827_v47 = vmul.f32 %v1802_v55, %v8768_v12 }
 0x6a1   :  { %v1846_v49 = vmul.f32 %v8688_v28, %v1827_v47 }
 0x6a3   :  { %v9081_v58 = vadd.f32 %v8707_v32, %v1846_v49 }
 0x6b8   :  { %v1620_v52 = vpop.xlane.xlu0 %1619 }
 0x6b9   :  { %v1636_v14 = vmul.f32 %v1620_v52, %v8473_v57 }
 0x6bb   :  { %v1652_v38 = vadd.f32 1e-12, %v1636_v14 }
 0x6bd   :  { %7129 = vrsqrt.f32 %v1652_v38  ;;  %vm1809_vm3 = vweird.f32 %v1652_v38 }
 0x6c3   :  { %v7130_v0 = vpop.eup %7129 }
 0x6c4   :  { %v1804_v19 = vmul.f32 %v7130_v0, %v1652_v38  ;;  %vm1810_vm2 = vweird.f32 %v7130_v0 }
 0x6c5   :  { %vm1811_vm4 = vmor %vm1809_vm3, %vm1810_vm2 }
 0x6c6   :  { %v1805_v54 = vmul.f32 %v7130_v0, %v1804_v19 }
 0x6c8   :  { %v1806_v11 = vmul.f32 0.5, %v1805_v54 }
 0x6ca   :  { %v1807_v53 = vsub.f32 1.5, %v1806_v11  ;;  %v2001_v20 = vpop.f32.mrf.mxu1 }
 0x6cb   :  { %v9069_v60 = vadd.f32 %v2001_v20, %v8848_v15 }
 0x6cc   :  { %v1808_v6 = vmul.f32 %v7130_v0, %v1807_v53 }
 0x6cd   :  { %v2087_v61 = vmul.f32 %v9069_v60, %v9069_v60 }
 0x6ce   :  { %v1812_v10 = vsel %vm1811_vm4, %v7130_v0, %v1808_v6 }
 0x6cf   :  { %v2119_v18 = vmul.f32 %v2087_v61, %v9069_v60  ;;  %v1828_v23 = vmul.f32 %v1812_v10, %v8802_v22 }
 0x6d0   :  { %v2050_v29 = vpop.f32.mrf.mxu2 }
 0x6d1   :  { %v2151_v30 = vmul.f32 0.044715, %v2119_v18  ;;  %v9077_v12 = vadd.f32 %v2050_v29, %v8882_v1  ;;  %v1847_v3 = vmul.f32 %v8688_v28, %v1828_v23 }
 0x6d2   :  { %v2003_v62 = vpop.f32.mrf.mxu1 }
 0x6d3   :  { %v2183_v8 = vadd.f32 %v2151_v30, %v9069_v60  ;;  %v2088_v9 = vmul.f32 %v9077_v12, %v9077_v12  ;;  %v2004_v4 = vadd.f32 %v2003_v62, %v8848_v15  ;;  %v9088_v22 = vadd.f32 %v8707_v32, %v1847_v3 }
 0x6d5   :  { %v2215_v21 = vmul.f32 0.7978846, %v2183_v8  ;;  %v2120_v31 = vmul.f32 %v2088_v9, %v9077_v12  ;;  %v2089_v48 = vmul.f32 %v2004_v4, %v2004_v4  ;;  %v1874_v28 = vpack.c.bf16 %v9088_v22, %v9081_v58 }
 0x6d7   :  { %v2152_v27 = vmul.f32 0.044715, %v2120_v31  ;;  %v2121_v59 = vmul.f32 %v2089_v48, %v2004_v4  ;;  %2020 = vmatmul.bf16.gmra.mxu1 %v1874_v28  ;;  %2069 = vmatmul.bf16.gmra.mxu2 %v1874_v28  ;;  %7131 = vtanh.f32 %v2215_v21 }
 0x6d8   :  { %v2052_v33 = vpop.f32.mrf.mxu2 }
 0x6d9   :  { %v2184_v16 = vadd.f32 %v2152_v27, %v9077_v12  ;;  %v2153_v50 = vmul.f32 0.044715, %v2121_v59  ;;  %v2053_v5 = vadd.f32 %v2052_v33, %v8882_v1 }
 0x6da   :  { %v2006_v2 = vpop.f32.mrf.mxu1 }
 0x6db   :  { %v2185_v32 = vadd.f32 %v2153_v50, %v2004_v4  ;;  %v2090_v36 = vmul.f32 %v2053_v5, %v2053_v5  ;;  %v2216_v34 = vmul.f32 0.7978846, %v2184_v16  ;;  %v9096_v51 = vadd.f32 %v2006_v2, %v8848_v15 }
 0x6dd   :  { %v2217_v26 = vmul.f32 0.7978846, %v2185_v32  ;;  %v2122_v52 = vmul.f32 %v2090_v36, %v2053_v5  ;;  %v7132_v14 = vpop.eup %7131  ;;  %v2091_v17 = vmul.f32 %v9096_v51, %v9096_v51 }
 0x6de   :  { %v2279_v19 = vadd.f32 1.0, %v7132_v14 }
 0x6df   :  { %v2154_v38 = vmul.f32 0.044715, %v2122_v52  ;;  %7133 = vtanh.f32 %v2217_v26  ;;  %v2123_v43 = vmul.f32 %v2091_v17, %v9096_v51 }
 0x6e0   :  { %7135 = vtanh.f32 %v2216_v34  ;;  %v2055_v56 = vpop.f32.mrf.mxu2  ;;  %v2311_v10 = vmul.f32 0.5, %v2279_v19 }
 0x6e1   :  { %v2186_v0 = vadd.f32 %v2154_v38, %v2053_v5  ;;  %v2155_v54 = vmul.f32 0.044715, %v2123_v43  ;;  %v9102_v55 = vadd.f32 %v2055_v56, %v8882_v1 }
 0x6e2   :  { %v2008_v53 = vpop.f32.mrf.mxu1  ;;  %v2343_v21 = vmul.f32 %v2311_v10, %v9069_v60 }
 0x6e3   :  { %v2218_v11 = vmul.f32 0.7978846, %v2186_v0  ;;  %v2187_v20 = vadd.f32 %v2155_v54, %v9096_v51  ;;  %v2092_v47 = vmul.f32 %v9102_v55, %v9102_v55  ;;  %v9108_v6 = vadd.f32 %v2008_v53, %v8848_v15 }
 0x6e5   :  { %v7134_v61 = vpop.eup %7133  ;;  %7137 = vtanh.f32 %v2218_v11  ;;  %v2219_v18 = vmul.f32 0.7978846, %v2187_v20  ;;  %v2124_v23 = vmul.f32 %v2092_v47, %v9102_v55  ;;  %v2093_v29 = vmul.f32 %v9108_v6, %v9108_v6  ;;  %v9133_v20 = vld [vmem:[%s11476_s11] ss:$0 sm:$0xff] }
 0x6e6   :  { %v7136_v49 = vpop.eup %7135  ;;  %v2281_v30 = vadd.f32 1.0, %v7134_v61 }
 0x6e7   :  { %v2156_v3 = vmul.f32 0.044715, %v2124_v23  ;;  %v2125_v62 = vmul.f32 %v2093_v29, %v9108_v6  ;;  %7139 = vtanh.f32 %v2219_v18  ;;  %v2280_v31 = vadd.f32 1.0, %v7136_v49 }
 0x6e8   :  { %v2313_v8 = vmul.f32 0.5, %v2281_v30  ;;  %v2057_v9 = vpop.f32.mrf.mxu2 }
 0x6e9   :  { %v2188_v48 = vadd.f32 %v2156_v3, %v9102_v55  ;;  %v2157_v28 = vmul.f32 0.044715, %v2125_v62  ;;  %v9117_v27 = vadd.f32 %v2057_v9, %v8882_v1  ;;  %v2312_v34 = vmul.f32 0.5, %v2280_v31 }
 0x6ea   :  { %v2345_v59 = vmul.f32 %v2313_v8, %v2004_v4 }
 0x6eb   :  { %v7138_v33 = vpop.eup %7137  ;;  %v2189_v16 = vadd.f32 %v2157_v28, %v9108_v6  ;;  %v2094_v50 = vmul.f32 %v9117_v27, %v9117_v27  ;;  %v2220_v36 = vmul.f32 0.7978846, %v2188_v48  ;;  %v2344_v43 = vmul.f32 %v2312_v34, %v9077_v12 }
 0x6ec   :  { %v2369_v32 = vpack.c.bf16 %v2345_v59, %v2343_v21  ;;  %v2282_v2 = vadd.f32 1.0, %v7138_v33  ;;  %v2011_v38 = vpop.f32.mrf.mxu1 }
 0x6ed   :  { %v2221_v26 = vmul.f32 0.7978846, %v2189_v16  ;;  %v2126_v60 = vmul.f32 %v2094_v50, %v9117_v27  ;;  %v7140_v52 = vpop.eup %7139  ;;  %v9124_v4 = vadd.f32 %v2011_v38, %v8848_v15 }
 0x6ee   :  { %2534 = vmatmul.bf16.gmra.mxu3 %v2369_v32  ;;  %v2314_v14 = vmul.f32 0.5, %v2282_v2  ;;  %v2283_v19 = vadd.f32 1.0, %v7140_v52 }
 0x6ef   :  { %v2158_v17 = vmul.f32 0.044715, %v2126_v60  ;;  %7141 = vtanh.f32 %v2221_v26  ;;  %v2095_v54 = vmul.f32 %v9124_v4, %v9124_v4 }
 0x6f0   :  { %7143 = vtanh.f32 %v2220_v36  ;;  %v2346_v0 = vmul.f32 %v2314_v14, %v2053_v5  ;;  %v2315_v12 = vmul.f32 0.5, %v2283_v19 }
 0x6f1   :  { %v2190_v56 = vadd.f32 %v2158_v17, %v9117_v27  ;;  %v2127_v47 = vmul.f32 %v2095_v54, %v9124_v4 }
 0x6f2   :  { %v2370_v11 = vpack.c.bf16 %v2346_v0, %v2344_v43  ;;  %v2060_v10 = vpop.f32.mrf.mxu2  ;;  %v2347_v28 = vmul.f32 %v2315_v12, %v9096_v51 }
 0x6f3   :  { %v2222_v53 = vmul.f32 0.7978846, %v2190_v56  ;;  %v2159_v49 = vmul.f32 0.044715, %v2127_v47  ;;  %v9137_v18 = vadd.f32 %v2060_v10, %v8882_v1 }
 0x6f4   :  { %2583 = vmatmul.bf16.gmra.mxu0 %v2370_v11  ;;  %v2013_v30 = vpop.f32.mrf.mxu1 }
 0x6f5   :  { %v7142_v61 = vpop.eup %7141  ;;  %7145 = vtanh.f32 %v2222_v53  ;;  %v2191_v62 = vadd.f32 %v2159_v49, %v9124_v4  ;;  %v2096_v8 = vmul.f32 %v9137_v18, %v9137_v18  ;;  %v9144_v9 = vadd.f32 %v2013_v30, %v8848_v15 }
 0x6f6   :  { %v7144_v5 = vpop.eup %7143  ;;  %v2285_v29 = vadd.f32 1.0, %v7142_v61 }
 0x6f7   :  { %v2520_v23 = vpop.f32.mrf.mxu3  ;;  %v2284_v59 = vadd.f32 1.0, %v7144_v5  ;;  %v2223_v33 = vmul.f32 0.7978846, %v2191_v62  ;;  %v2128_v16 = vmul.f32 %v2096_v8, %v9137_v18  ;;  %v2097_v50 = vmul.f32 %v9144_v9, %v9144_v9 }
 0x6f8   :  { %v2521_v3 = vadd.f32 %v9133_v20, %v2520_v23  ;;  %v2569_v21 = vpop.f32.mrf.mxu0  ;;  %v2317_v31 = vmul.f32 0.5, %v2285_v29 }
 0x6f9   :  { %v2160_v34 = vmul.f32 0.044715, %v2128_v16  ;;  %v2129_v26 = vmul.f32 %v2097_v50, %v9144_v9  ;;  %v2316_v14 = vmul.f32 0.5, %v2284_v59  ;;  %7147 = vtanh.f32 %v2223_v33 }
 0x6fa   :  { %v2570_v48 = vadd.f32 %v2569_v21, %v2521_v3  ;;  %v2349_v32 = vmul.f32 %v2317_v31, %v9108_v6  ;;  %v2062_v52 = vpop.f32.mrf.mxu2 }
 0x6fb   :  { %v7146_v36 = vpop.eup %7145  ;;  %v2192_v17 = vadd.f32 %v2160_v34, %v9137_v18  ;;  %v2161_v38 = vmul.f32 0.044715, %v2129_v26  ;;  %v9158_v43 = vadd.f32 %v2062_v52, %v8882_v1  ;;  %v2348_v10 = vmul.f32 %v2316_v14, %v9102_v55 }
 0x6fc   :  { %v9152_v2 = vadd.f32 %v2570_v48, %v8716_v7  ;;  %v2371_v60 = vpack.c.bf16 %v2349_v32, %v2347_v28  ;;  %v2286_v51 = vadd.f32 1.0, %v7146_v36  ;;  %v2016_v7 = vpop.f32.mrf.mxu1 }
 0x6fd   :  { %v2224_v19 = vmul.f32 0.7978846, %v2192_v17  ;;  %v2193_v54 = vadd.f32 %v2161_v38, %v9144_v9  ;;  %v2098_v11 = vmul.f32 %v9158_v43, %v9158_v43  ;;  %v9165_v53 = vadd.f32 %v2016_v7, %v8848_v15 }
 0x6fe   :  { %2627 = vadd.xlane.f32.xlu1 %v9152_v2  ;;  %2539 = vmatmul.bf16.gmra.mxu3 %v2371_v60  ;;  %v2318_v56 = vmul.f32 0.5, %v2286_v51 }
 0x6ff   :  { %v2522_v6 = vpop.f32.mrf.mxu3  ;;  %v2225_v5 = vmul.f32 0.7978846, %v2193_v54  ;;  %v2130_v49 = vmul.f32 %v2098_v11, %v9158_v43  ;;  %v2099_v23 = vmul.f32 %v9165_v53, %v9165_v53  ;;  %7149 = vtanh.f32 %v2224_v19  ;;  %v7148_v3 = vpop.eup %7147 }
 0x700   :  { %v2523_v0 = vadd.f32 %v9133_v20, %v2522_v6  ;;  %v2571_v47 = vpop.f32.mrf.mxu0  ;;  %v2350_v12 = vmul.f32 %v2318_v56, %v9117_v27  ;;  %v2287_v28 = vadd.f32 1.0, %v7148_v3 }
 0x701   :  { %v2162_v62 = vmul.f32 0.044715, %v2130_v49  ;;  %v2131_v8 = vmul.f32 %v2099_v23, %v9165_v53  ;;  %7151 = vtanh.f32 %v2225_v5 }
 0x702   :  { %v2572_v61 = vadd.f32 %v2571_v47, %v2523_v0  ;;  %v2372_v29 = vpack.c.bf16 %v2350_v12, %v2348_v10  ;;  %v2065_v21 = vpop.f32.mrf.mxu2  ;;  %v2319_v14 = vmul.f32 0.5, %v2287_v28 }
 0x703   :  { %v2194_v55 = vadd.f32 %v2162_v62, %v9158_v43  ;;  %v2163_v27 = vmul.f32 0.044715, %v2131_v8  ;;  %v9179_v31 = vadd.f32 %v2065_v21, %v8882_v1 }
 0x704   :  { %v9173_v30 = vadd.f32 %v2572_v61, %v8719_v41  ;;  %2588 = vmatmul.bf16.gmra.mxu0 %v2372_v29  ;;  %v2018_v48 = vpop.f32.mrf.mxu1  ;;  %v2351_v61 = vmul.f32 %v2319_v14, %v9124_v4 }
 0x705   :  { %v2226_v59 = vmul.f32 0.7978846, %v2194_v55  ;;  %v2195_v41 = vadd.f32 %v2163_v27, %v9165_v53  ;;  %v2100_v33 = vmul.f32 %v9179_v31, %v9179_v31  ;;  %v9185_v16 = vadd.f32 %v2018_v48, %v8848_v15  ;;  %v7150_v50 = vpop.eup %7149 }
 0x706   :  { %2629 = vadd.xlane.f32.xlu2 %v9173_v30  ;;  %v2288_v56 = vadd.f32 1.0, %v7150_v50 }
 0x707   :  { %v7152_v36 = vpop.eup %7151  ;;  %v2227_v34 = vmul.f32 0.7978846, %v2195_v41  ;;  %v2132_v26 = vmul.f32 %v2100_v33, %v9179_v31  ;;  %v2101_v60 = vmul.f32 %v9185_v16, %v9185_v16  ;;  %7153 = vtanh.f32 %v2226_v59  ;;  %v2525_v52 = vpop.f32.mrf.mxu3 }
 0x708   :  { %v2574_v32 = vpop.f32.mrf.mxu0  ;;  %v2289_v51 = vadd.f32 1.0, %v7152_v36  ;;  %v2526_v6 = vadd.f32 %v9133_v20, %v2525_v52  ;;  %v2320_v21 = vmul.f32 0.5, %v2288_v56 }
 0x709   :  { %v2164_v17 = vmul.f32 0.044715, %v2132_v26  ;;  %v2133_v38 = vmul.f32 %v2101_v60, %v9185_v16  ;;  %7155 = vtanh.f32 %v2227_v34 }
 0x70a   :  { %v2067_v7 = vpop.f32.mrf.mxu2  ;;  %v2321_v0 = vmul.f32 0.5, %v2289_v51  ;;  %v2575_v11 = vadd.f32 %v2574_v32, %v2526_v6 }
 0x70b   :  { %v2196_v19 = vadd.f32 %v2164_v17, %v9179_v31  ;;  %v2165_v54 = vmul.f32 0.044715, %v2133_v38  ;;  %v2068_v47 = vadd.f32 %v2067_v7, %v8882_v1 }
 0x70c   :  { %v2353_v10 = vmul.f32 %v2321_v0, %v9144_v9  ;;  %v9198_v29 = vadd.f32 %v2575_v11, %v8738_v42  ;;  %v2352_v42 = vmul.f32 %v2320_v21, %v9137_v18 }
 0x70d   :  { %v7154_v12 = vpop.eup %7153  ;;  %v2228_v5 = vmul.f32 0.7978846, %v2196_v19  ;;  %v2197_v49 = vadd.f32 %v2165_v54, %v9185_v16  ;;  %v2102_v23 = vmul.f32 %v2068_v47, %v2068_v47 }
 0x70e   :  { %v2373_v3 = vpack.c.bf16 %v2353_v10, %v2351_v61  ;;  %v2290_v8 = vadd.f32 1.0, %v7154_v12  ;;  %2631 = vadd.xlane.f32.xlu0 %v9198_v29 }
 0x70f   :  { %v2229_v55 = vmul.f32 0.7978846, %v2197_v49  ;;  %v2134_v27 = vmul.f32 %v2102_v23, %v2068_v47  ;;  %v7156_v48 = vpop.eup %7155  ;;  %7157 = vtanh.f32 %v2228_v5  ;;  %v2527_v4 = vpop.f32.mrf.mxu3 }
 0x710   :  { %v2576_v62 = vpop.f32.mrf.mxu0  ;;  %2544 = vmatmul.bf16.gmra.mxu3 %v2373_v3  ;;  %v2322_v9 = vmul.f32 0.5, %v2290_v8  ;;  %v2528_v59 = vadd.f32 %v9133_v20, %v2527_v4  ;;  %v2291_v36 = vadd.f32 1.0, %v7156_v48 }
 0x711   :  { %v2166_v28 = vmul.f32 0.044715, %v2134_v27  ;;  %7159 = vtanh.f32 %v2229_v55 }
 0x712   :  { %v2354_v41 = vmul.f32 %v2322_v9, %v9158_v43  ;;  %v2577_v50 = vadd.f32 %v2576_v62, %v2528_v59  ;;  %v2323_v18 = vmul.f32 0.5, %v2291_v36 }
 0x713   :  { %v2198_v33 = vadd.f32 %v2166_v28, %v2068_v47 }
 0x714   :  { %v2374_v32 = vpack.c.bf16 %v2354_v41, %v2352_v42  ;;  %v9205_v26 = vadd.f32 %v2577_v50, %v8741_v13  ;;  %v2355_v0 = vmul.f32 %v2323_v18, %v9165_v53 }
 0x715   :  { %v2230_v34 = vmul.f32 0.7978846, %v2198_v33  ;;  %v7158_v60 = vpop.eup %7157 }
 0x716   :  { %2593 = vmatmul.bf16.gmra.mxu0 %v2374_v32  ;;  %2633 = vadd.xlane.f32.xlu1 %v9205_v26  ;;  %v2292_v6 = vadd.f32 1.0, %v7158_v60 }
 0x717   :  { %v7160_v52 = vpop.eup %7159  ;;  %7161 = vtanh.f32 %v2230_v34  ;;  %v2530_v51 = vpop.f32.mrf.mxu3 }
 0x718   :  { %v2579_v14 = vpop.f32.mrf.mxu0  ;;  %v2293_v17 = vadd.f32 1.0, %v7160_v52  ;;  %v2531_v43 = vadd.f32 %v9133_v20, %v2530_v51  ;;  %v2324_v61 = vmul.f32 0.5, %v2292_v6 }
 0x71a   :  { %v2325_v38 = vmul.f32 0.5, %v2293_v17  ;;  %v2580_v7 = vadd.f32 %v2579_v14, %v2531_v43  ;;  %v2356_v23 = vmul.f32 %v2324_v61, %v9179_v31 }
 0x71c   :  { %v2357_v13 = vmul.f32 %v2325_v38, %v9185_v16  ;;  %v9212_v19 = vadd.f32 %v2580_v7, %v8762_v39 }
 0x71d   :  { %v7162_v56 = vpop.eup %7161 }
 0x71e   :  { %v2375_v54 = vpack.c.bf16 %v2357_v13, %v2355_v0  ;;  %v2294_v11 = vadd.f32 1.0, %v7162_v56  ;;  %2635 = vadd.xlane.f32.xlu2 %v9212_v19 }
 0x71f   :  { %v2532_v10 = vpop.f32.mrf.mxu3 }
 0x720   :  { %2549 = vmatmul.bf16.gmra.mxu3 %v2375_v54  ;;  %v2326_v12 = vmul.f32 0.5, %v2294_v11  ;;  %v2533_v5 = vadd.f32 %v9133_v20, %v2532_v10  ;;  %v2581_v49 = vpop.f32.mrf.mxu0 }
 0x722   :  { %v2358_v53 = vmul.f32 %v2326_v12, %v2068_v47  ;;  %v2582_v3 = vadd.f32 %v2581_v49, %v2533_v5 }
 0x724   :  { %v2376_v16 = vpack.c.bf16 %v2358_v53, %v2356_v23  ;;  %v9218_v62 = vadd.f32 %v2582_v3, %v8765_v63 }
 0x726   :  { %2598 = vmatmul.bf16.gmra.mxu0 %v2376_v16  ;;  %2637 = vadd.xlane.f32.xlu0 %v9218_v62 }
 0x754   :  { %v2021_v39 = vpop.f32.mrf.mxu1 }
 0x755   :  { %v2022_v8 = vadd.f32 %v2021_v39, %v8848_v15 }
 0x757   :  { %v2103_v21 = vmul.f32 %v2022_v8, %v2022_v8 }
 0x759   :  { %v2135_v55 = vmul.f32 %v2103_v21, %v2022_v8 }
 0x75a   :  { %v2070_v27 = vpop.f32.mrf.mxu2 }
 0x75b   :  { %v2167_v48 = vmul.f32 0.044715, %v2135_v55  ;;  %v2071_v4 = vadd.f32 %v2070_v27, %v8882_v1 }
 0x75c   :  { %v2023_v9 = vpop.f32.mrf.mxu1 }
 0x75d   :  { %v2199_v31 = vadd.f32 %v2167_v48, %v2022_v8  ;;  %v2104_v47 = vmul.f32 %v2071_v4, %v2071_v4  ;;  %v2024_v28 = vadd.f32 %v2023_v9, %v8848_v15 }
 0x75f   :  { %v2231_v59 = vmul.f32 0.7978846, %v2199_v31  ;;  %v2136_v63 = vmul.f32 %v2104_v47, %v2071_v4  ;;  %v2105_v42 = vmul.f32 %v2024_v28, %v2024_v28 }
 0x761   :  { %v2168_v41 = vmul.f32 0.044715, %v2136_v63  ;;  %v2137_v33 = vmul.f32 %v2105_v42, %v2024_v28  ;;  %7163 = vtanh.f32 %v2231_v59 }
 0x762   :  { %v2072_v50 = vpop.f32.mrf.mxu2 }
 0x763   :  { %v2200_v32 = vadd.f32 %v2168_v41, %v2071_v4  ;;  %v2169_v36 = vmul.f32 0.044715, %v2137_v33  ;;  %v2073_v34 = vadd.f32 %v2072_v50, %v8882_v1 }
 0x765   :  { %v2232_v60 = vmul.f32 0.7978846, %v2200_v32  ;;  %v2201_v52 = vadd.f32 %v2169_v36, %v2024_v28  ;;  %v2106_v51 = vmul.f32 %v2073_v34, %v2073_v34 }
 0x767   :  { %v2233_v14 = vmul.f32 0.7978846, %v2201_v52  ;;  %v2138_v17 = vmul.f32 %v2106_v51, %v2073_v34  ;;  %7165 = vtanh.f32 %v2232_v60  ;;  %v7164_v18 = vpop.eup %7163 }
 0x768   :  { %v2295_v38 = vadd.f32 1.0, %v7164_v18 }
 0x769   :  { %v2170_v43 = vmul.f32 0.044715, %v2138_v17  ;;  %7167 = vtanh.f32 %v2233_v14 }
 0x76a   :  { %v2327_v56 = vmul.f32 0.5, %v2295_v38 }
 0x76b   :  { %v2202_v15 = vadd.f32 %v2170_v43, %v2073_v34 }
 0x76c   :  { %v2359_v53 = vmul.f32 %v2327_v56, %v2022_v8 }
 0x76d   :  { %v2234_v6 = vmul.f32 0.7978846, %v2202_v15  ;;  %v7166_v7 = vpop.eup %7165 }
 0x76e   :  { %v2296_v1 = vadd.f32 1.0, %v7166_v7 }
 0x76f   :  { %v7168_v0 = vpop.eup %7167  ;;  %7169 = vtanh.f32 %v2234_v6 }
 0x770   :  { %v2297_v13 = vadd.f32 1.0, %v7168_v0  ;;  %v2328_v39 = vmul.f32 0.5, %v2296_v1 }
 0x771   :  { %v2535_v54 = vpop.f32.mrf.mxu3  ;;  %v2628_v11 = vpop.xlane.xlu1 %2627 }
 0x772   :  { %v2536_v61 = vadd.f32 %v9133_v20, %v2535_v54  ;;  %v2584_v10 = vpop.f32.mrf.mxu0  ;;  %v2659_v12 = vmul.f32 %v2628_v11, %v8473_v57  ;;  %v2329_v5 = vmul.f32 0.5, %v2297_v13  ;;  %v2360_v59 = vmul.f32 %v2328_v39, %v2071_v4 }
 0x774   :  { %v2585_v49 = vadd.f32 %v2584_v10, %v2536_v61  ;;  %v9228_v23 = vsub.f32 %v9152_v2, %v2659_v12  ;;  %v2361_v3 = vmul.f32 %v2329_v5, %v2024_v28 }
 0x775   :  { %v7170_v16 = vpop.eup %7169 }
 0x776   :  { %v2691_v21 = vmul.f32 %v9228_v23, %v9228_v23  ;;  %v9233_v55 = vadd.f32 %v2585_v49, %v8830_v45  ;;  %v2377_v27 = vpack.c.bf16 %v2361_v3, %v2359_v53  ;;  %v2298_v48 = vadd.f32 1.0, %v7170_v16 }
 0x778   :  { %2707 = vadd.xlane.f32.xlu1 %v2691_v21  ;;  %2639 = vadd.xlane.f32.xlu0 %v9233_v55  ;;  %v2330_v9 = vmul.f32 0.5, %v2298_v48 }
 0x779   :  { %2554 = vmatmul.bf16.gmra.mxu3 %v2377_v27  ;;  %v2537_v31 = vpop.f32.mrf.mxu3  ;;  %v2630_v2 = vpop.xlane.xlu2 %2629 }
 0x77a   :  { %v2538_v8 = vadd.f32 %v9133_v20, %v2537_v31  ;;  %v2586_v47 = vpop.f32.mrf.mxu0  ;;  %v2660_v28 = vmul.f32 %v2630_v2, %v8473_v57  ;;  %v2362_v63 = vmul.f32 %v2330_v9, %v2073_v34  ;;  %v6854_v9 = vld [vmem:[%s11490_s23 + $0x16c] sm:$0xf]  ;;  %v6466_v2 = vld [vmem:[%s11490_s23 + $0x170] sm:$0xf] }
 0x77c   :  { %v2587_v42 = vadd.f32 %v2586_v47, %v2538_v8  ;;  %v2378_v41 = vpack.c.bf16 %v2362_v63, %v2360_v59  ;;  %v9239_v45 = vsub.f32 %v9173_v30, %v2660_v28  ;;  %v6856_v8 = vld [vmem:[%s11490_s23 + $0x178] sm:$0xf0]  ;;  %v6446_v59 = vld [vmem:[%s11490_s23 + $0x150] sm:$0xf] }
 0x77d   :  { %v6467_v28 = vor.u32 %v6856_v8, %v6466_v2  ;;  %v6852_v63 = vld [vmem:[%s11490_s23 + $0x158] sm:$0xf0]  ;;  %v6400_v2 = vld [vmem:[%s11490_s23 + $0xfc] sm:$0xf0]  ;;  %v6406_v8 = vld [vmem:[%s11490_s23 + $0xf8] sm:$0xf] }
 0x77e   :  { %2603 = vmatmul.bf16.gmra.mxu0 %v2378_v41  ;;  %v9242_v33 = vadd.f32 %v2587_v42, %v8833_v25  ;;  %v2692_v50 = vmul.f32 %v9239_v45, %v9239_v45  ;;  %v6851_v42 = vld [vmem:[%s11490_s23 + $0x154] sm:$0xf]  ;;  %v6447_v41 = vor.u32 %v6852_v63, %v6446_v59 }
 0x77f   :  { %3261 = vmatpush.bf16.msra.mxu3 %v6467_v28 }
 0x780   :  { %2641 = vadd.xlane.f32.xlu1 %v9242_v33  ;;  %2709 = vadd.xlane.f32.xlu2 %v2692_v50  ;;  %v6448_v50 = vld [vmem:[%s11490_s23 + $0x15c] sm:$0xf0] }
 0x781   :  { %v2540_v32 = vpop.f32.mrf.mxu3  ;;  %v2632_v60 = vpop.xlane.xlu0 %2631 }
 0x782   :  { %v2541_v36 = vadd.f32 %v9133_v20, %v2540_v32  ;;  %v2589_v4 = vpop.f32.mrf.mxu0  ;;  %v2661_v52 = vmul.f32 %v2632_v60, %v8473_v57  ;;  %v6454_v32 = vld [vmem:[%s11490_s23 + $0x158] sm:$0xf] }
 0x783   :  { %v6434_v60 = vld [vmem:[%s11490_s23 + $0x138] sm:$0xf] }
 0x784   :  { %v2590_v34 = vadd.f32 %v2589_v4, %v2541_v36  ;;  %v9254_v25 = vsub.f32 %v9198_v29, %v2661_v52  ;;  %v6853_v36 = vld [vmem:[%s11490_s23 + $0x160] sm:$0xf0]  ;;  %v6451_v4 = vor.u32 %v6851_v42, %v6448_v50 }
 0x785   :  { %v6849_v52 = vld [vmem:[%s11490_s23 + $0x140] sm:$0xf0] }
 0x786   :  { %v9250_v30 = vadd.f32 %v2590_v34, %v8914_v24  ;;  %v2693_v14 = vmul.f32 %v9254_v25, %v9254_v25  ;;  %v6455_v34 = vor.u32 %v6853_v36, %v6454_v32  ;;  %v6386_v36 = vld [vmem:[%s11490_s23 + $0xd8] sm:$0xf] }
 0x788   :  { %2643 = vadd.xlane.f32.xlu1 %v9250_v30  ;;  %2711 = vadd.xlane.f32.xlu2 %v2693_v14  ;;  %v6435_v14 = vor.u32 %v6849_v52, %v6434_v60  ;;  %v6836_v52 = vld [vmem:[%s11490_s23 + $0xdc] sm:$0xf] }
 0x789   :  { %v2542_v51 = vpop.f32.mrf.mxu3  ;;  %v2634_v15 = vpop.xlane.xlu1 %2633  ;;  %3262 = vmatpush.bf16.msra.mxu3 %v6455_v34 }
 0x78a   :  { %v2543_v17 = vadd.f32 %v9133_v20, %v2542_v51  ;;  %v2591_v18 = vpop.f32.mrf.mxu0  ;;  %v2662_v38 = vmul.f32 %v2634_v15, %v8473_v57  ;;  %v6848_v51 = vld [vmem:[%s11490_s23 + $0x13c] sm:$0xf] }
 0x78c   :  { %v2592_v43 = vadd.f32 %v2591_v18, %v2543_v17  ;;  %v9261_v24 = vsub.f32 %v9205_v26, %v2662_v38  ;;  %v6436_v17 = vld [vmem:[%s11490_s23 + $0x144] sm:$0xf0]  ;;  %v6442_v18 = vld [vmem:[%s11490_s23 + $0x140] sm:$0xf] }
 0x78d   :  { %v6439_v15 = vor.u32 %v6848_v51, %v6436_v17  ;;  %v6394_v51 = vld [vmem:[%s11490_s23 + $0xe0] sm:$0xf] }
 0x78e   :  { %v9264_v6 = vadd.f32 %v2592_v43, %v8907_v37  ;;  %v2694_v29 = vmul.f32 %v9261_v24, %v9261_v24  ;;  %v6850_v43 = vld [vmem:[%s11490_s23 + $0x148] sm:$0xf0] }
 0x78f   :  { %v6443_v38 = vor.u32 %v6850_v43, %v6442_v18  ;;  %v6838_v18 = vld [vmem:[%s11490_s23 + $0xe8] sm:$0xf0] }
 0x790   :  { %2713 = vadd.xlane.f32.xlu0 %v2694_v29  ;;  %2645 = vadd.xlane.f32.xlu2 %v9264_v6  ;;  %v6422_v29 = vld [vmem:[%s11490_s23 + $0x120] sm:$0xf]  ;;  %v6395_v43 = vor.u32 %v6838_v18, %v6394_v51 }
 0x791   :  { %v2636_v7 = vpop.xlane.xlu2 %2635  ;;  %3263 = vmatpush.bf16.msra.mxu3 %v6443_v38  ;;  %v6374_v38 = vld [vmem:[%s11490_s23 + $0xc0] sm:$0xf] }
 0x792   :  { %v2663_v56 = vmul.f32 %v2636_v7, %v8473_v57  ;;  %v6846_v7 = vld [vmem:[%s11490_s23 + $0x128] sm:$0xf0] }
 0x793   :  { %v2545_v0 = vpop.f32.mrf.mxu3  ;;  %v2594_v13 = vpop.f32.mrf.mxu0 }
 0x794   :  { %v2546_v54 = vadd.f32 %v9133_v20, %v2545_v0  ;;  %v9272_v11 = vsub.f32 %v9212_v19, %v2663_v56  ;;  %v6845_v0 = vld [vmem:[%s11490_s23 + $0x124] sm:$0xf]  ;;  %v6424_v56 = vld [vmem:[%s11490_s23 + $0x12c] sm:$0xf0] }
 0x796   :  { %v2595_v26 = vadd.f32 %v2594_v13, %v2546_v54  ;;  %v2695_v37 = vmul.f32 %v9272_v11, %v9272_v11  ;;  %v6423_v13 = vor.u32 %v6846_v7, %v6422_v29  ;;  %v6430_v54 = vld [vmem:[%s11490_s23 + $0x128] sm:$0xf]  ;;  %v6834_v29 = vld [vmem:[%s11490_s23 + $0xc8] sm:$0xf0]  ;;  %v6833_v7 = vld [vmem:[%s11490_s23 + $0xc4] sm:$0xf] }
 0x798   :  { %v9277_v1 = vadd.f32 %v2595_v26, %v8988_v35  ;;  %2715 = vadd.xlane.f32.xlu0 %v2695_v37  ;;  %v6847_v26 = vld [vmem:[%s11490_s23 + $0x130] sm:$0xf0]  ;;  %v6427_v37 = vor.u32 %v6845_v0, %v6424_v56 }
 0x799   :  { %v2638_v61 = vpop.xlane.xlu0 %2637 }
 0x79a   :  { %2647 = vadd.xlane.f32.xlu2 %v9277_v1  ;;  %v2664_v10 = vmul.f32 %v2638_v61, %v8473_v57  ;;  %v6431_v61 = vor.u32 %v6847_v26, %v6430_v54  ;;  %v6375_v54 = vor.u32 %v6834_v29, %v6374_v38  ;;  %v6376_v26 = vld [vmem:[%s11490_s23 + $0xcc] sm:$0xf0] }
 0x79b   :  { %v2547_v12 = vpop.f32.mrf.mxu3  ;;  %v2596_v5 = vpop.f32.mrf.mxu0 }
 0x79c   :  { %v2548_v49 = vadd.f32 %v9133_v20, %v2547_v12  ;;  %v9283_v19 = vsub.f32 %v9218_v62, %v2664_v10  ;;  %v6458_v62 = vld [vmem:[%s11490_s23 + $0x168] sm:$0xf]  ;;  %3264 = vmatpush.bf16.msra.mxu3 %v6431_v61  ;;  %v6843_v12 = vld [vmem:[%s11490_s23 + $0x110] sm:$0xf0] }
 0x79d   :  { %v6410_v10 = vld [vmem:[%s11490_s23 + $0x108] sm:$0xf]  ;;  %v6835_v61 = vld [vmem:[%s11490_s23 + $0xd0] sm:$0xf0] }
 0x79e   :  { %v2597_v53 = vadd.f32 %v2596_v5, %v2548_v49  ;;  %v2696_v3 = vmul.f32 %v9283_v19, %v9283_v19  ;;  %v6842_v5 = vld [vmem:[%s11490_s23 + $0x10c] sm:$0xf]  ;;  %v6411_v49 = vor.u32 %v6843_v12, %v6410_v10 }
 0x7a0   :  { %v9288_v35 = vadd.f32 %v2597_v53, %v8996_v46  ;;  %2717 = vadd.xlane.f32.xlu1 %v2696_v3  ;;  %v6855_v46 = vld [vmem:[%s11490_s23 + $0x170] sm:$0xf0]  ;;  %v6412_v53 = vld [vmem:[%s11490_s23 + $0x114] sm:$0xf0]  ;;  %v6418_v3 = vld [vmem:[%s11490_s23 + $0x110] sm:$0xf] }
 0x7a1   :  { %v6459_v31 = vor.u32 %v6855_v46, %v6458_v62  ;;  %v6840_v62 = vld [vmem:[%s11490_s23 + $0xf8] sm:$0xf0]  ;;  %v6839_v46 = vld [vmem:[%s11490_s23 + $0xf4] sm:$0xf] }
 0x7a2   :  { %2649 = vadd.xlane.f32.xlu0 %v9288_v35  ;;  %v6403_v42 = vor.u32 %v6839_v46, %v6400_v2 }
 0x7a3   :  { %v2550_v16 = vpop.f32.mrf.mxu3  ;;  %v2599_v21 = vpop.f32.mrf.mxu0  ;;  %3163 = vmatpush.bf16.msrb.mxu1 %v6459_v31 }
 0x7a4   :  { %v2551_v39 = vadd.f32 %v9133_v20, %v2550_v16  ;;  %v6844_v16 = vld [vmem:[%s11490_s23 + $0x118] sm:$0xf0] }
 0x7a6   :  { %v2600_v27 = vadd.f32 %v2599_v21, %v2551_v39  ;;  %v6415_v39 = vor.u32 %v6842_v5, %v6412_v53  ;;  %v6419_v21 = vor.u32 %v6844_v16, %v6418_v3  ;;  %v6379_v5 = vor.u32 %v6833_v7, %v6376_v26 }
 0x7a7   :  { %3164 = vmatpush.bf16.msrb.mxu1 %v6447_v41 }
 0x7a8   :  { %v9293_v48 = vadd.f32 %v2600_v27, %v9051_v40  ;;  %v6460_v40 = vld [vmem:[%s11490_s23 + $0x174] sm:$0xf0]  ;;  %3265 = vmatpush.bf16.msra.mxu3 %v6419_v21  ;;  %v6398_v27 = vld [vmem:[%s11490_s23 + $0xf0] sm:$0xf] }
 0x7a9   :  { %v6463_v47 = vor.u32 %v6854_v9, %v6460_v40  ;;  %v6399_v40 = vor.u32 %v6840_v62, %v6398_v27 }
 0x7aa   :  { %2651 = vadd.xlane.f32.xlu0 %v9293_v48 }
 0x7ab   :  { %3212 = vmatpush.bf16.msra.mxu2 %v6463_v47  ;;  %3165 = vmatpush.bf16.msrb.mxu1 %v6435_v14  ;;  %v6841_v47 = vld [vmem:[%s11490_s23 + $0x100] sm:$0xf0]  ;;  %v2552_v28 = vpop.f32.mrf.mxu3 }
 0x7ac   :  { %v6407_v41 = vor.u32 %v6841_v47, %v6406_v8  ;;  %v2553_v34 = vadd.f32 %v9133_v20, %v2552_v28 }
 0x7ae   :  { %3266 = vmatpush.bf16.msra.mxu3 %v6407_v41 }
 0x7af   :  { %3213 = vmatpush.bf16.msra.mxu2 %v6451_v4  ;;  %3166 = vmatpush.bf16.msrb.mxu1 %v6423_v13  ;;  %v6837_v4 = vld [vmem:[%s11490_s23 + $0xe0] sm:$0xf0] }
 0x7b0   :  { %v6387_v60 = vor.u32 %v6837_v4, %v6386_v36 }
 0x7b2   :  { %3267 = vmatpush.bf16.msra.mxu3 %v6395_v43 }
 0x7b3   :  { %3214 = vmatpush.bf16.msra.mxu2 %v6439_v15  ;;  %3167 = vmatpush.bf16.msrb.mxu1 %v6411_v49  ;;  %v2601_v15 = vpop.f32.mrf.mxu0 }
 0x7b4   :  { %v2602_v0 = vadd.f32 %v2601_v15, %v2553_v34 }
 0x7b6   :  { %v9458_v21 = vadd.f32 %v2602_v0, %v9046_v44 }
 0x7b7   :  { %3215 = vmatpush.bf16.msra.mxu2 %v6427_v37  ;;  %3168 = vmatpush.bf16.msrb.mxu1 %v6399_v40  ;;  %v6382_v37 = vld [vmem:[%s11490_s23 + $0xc8] sm:$0xf] }
 0x7b8   :  { %v6383_v49 = vor.u32 %v6835_v61, %v6382_v37 }
 0x7ba   :  { %3268 = vmatpush.bf16.msra.mxu3 %v6383_v49 }
 0x7bb   :  { %3216 = vmatpush.bf16.msra.mxu2 %v6415_v39  ;;  %3169 = vmatpush.bf16.msrb.mxu1 %v6387_v60 }
 0x7bf   :  { %3217 = vmatpush.bf16.msra.mxu2 %v6403_v42  ;;  %3170 = vmatpush.bf16.msrb.mxu1 %v6375_v54 }
 0x7eb   :  { %v2708_v9 = vpop.xlane.xlu1 %2707  ;;  %v2640_v31 = vpop.xlane.xlu0 %2639 }
 0x7ec   :  { %v2739_v59 = vmul.f32 %v2708_v9, %v8473_v57  ;;  %v2665_v63 = vmul.f32 %v2640_v31, %v8473_v57 }
 0x7ee   :  { %v9406_v50 = vadd.f32 1e-12, %v2739_v59  ;;  %v9409_v32 = vsub.f32 %v9233_v55, %v2665_v63  ;;  %v6388_v55 = vld [vmem:[%s11490_s23 + $0xe4] sm:$0xf0] }
 0x7ef   :  { %v6391_v17 = vor.u32 %v6836_v52, %v6388_v55 }
 0x7f0   :  { %7171 = vrsqrt.f32 %v9406_v50  ;;  %v2697_v14 = vmul.f32 %v9409_v32, %v9409_v32  ;;  %vm2777_vm6 = vweird.f32 %v9406_v50 }
 0x7f1   :  { %3218 = vmatpush.bf16.msra.mxu2 %v6391_v17 }
 0x7f2   :  { %2719 = vadd.xlane.f32.xlu1 %v2697_v14 }
 0x7f3   :  { %v2642_v13 = vpop.xlane.xlu1 %2641  ;;  %v2710_v56 = vpop.xlane.xlu2 %2709 }
 0x7f4   :  { %v2666_v10 = vmul.f32 %v2642_v13, %v8473_v57  ;;  %v2740_v12 = vmul.f32 %v2710_v56, %v8473_v57 }
 0x7f5   :  { %3219 = vmatpush.bf16.msra.mxu2 %v6379_v5 }
 0x7f6   :  { %v7172_v53 = vpop.eup %7171  ;;  %v2756_v3 = vadd.f32 1e-12, %v2740_v12  ;;  %v9454_v16 = vsub.f32 %v9242_v33, %v2666_v10 }
 0x7f7   :  { %v2772_v39 = vmul.f32 %v7172_v53, %v9406_v50  ;;  %vm2778_vm5 = vweird.f32 %v7172_v53 }
 0x7f8   :  { %7173 = vrsqrt.f32 %v2756_v3  ;;  %v2698_v27 = vmul.f32 %v9454_v16, %v9454_v16  ;;  %vm2779_vm7 = vmor %vm2777_vm6, %vm2778_vm5  ;;  %vm2787_vm9 = vweird.f32 %v2756_v3 }
 0x7f9   :  { %v2773_v62 = vmul.f32 %v7172_v53, %v2772_v39 }
 0x7fa   :  { %2653 = vadd.xlane.f32.xlu1 %v9458_v21  ;;  %2721 = vadd.xlane.f32.xlu2 %v2698_v27 }
 0x7fb   :  { %v2774_v46 = vmul.f32 0.5, %v2773_v62  ;;  %v2604_v9 = vpop.f32.mrf.mxu0  ;;  %v2644_v31 = vpop.xlane.xlu1 %2643 }
 0x7fc   :  { %v2555_v33 = vpop.f32.mrf.mxu3  ;;  %v2667_v2 = vmul.f32 %v2644_v31, %v8473_v57  ;;  %v2712_v63 = vpop.xlane.xlu2 %2711 }
 0x7fd   :  { %v2775_v40 = vsub.f32 1.5, %v2774_v46  ;;  %v2556_v8 = vadd.f32 %v9133_v20, %v2555_v33  ;;  %v2741_v36 = vmul.f32 %v2712_v63, %v8473_v57 }
 0x7fe   :  { %v7174_v47 = vpop.eup %7173  ;;  %v9466_v42 = vsub.f32 %v9250_v30, %v2667_v2 }
 0x7ff   :  { %v2776_v28 = vmul.f32 %v7172_v53, %v2775_v40  ;;  %v2782_v44 = vmul.f32 %v7174_v47, %v2756_v3  ;;  %v2605_v59 = vadd.f32 %v2604_v9, %v2556_v8  ;;  %v2757_v55 = vadd.f32 1e-12, %v2741_v36 }
 0x800   :  { %v2699_v34 = vmul.f32 %v9466_v42, %v9466_v42  ;;  %vm2788_vm8 = vweird.f32 %v7174_v47 }
 0x801   :  { %v2783_v41 = vmul.f32 %v7174_v47, %v2782_v44  ;;  %v9471_v4 = vadd.f32 %v2605_v59, %v9081_v58  ;;  %v2780_v60 = vsel %vm2779_vm7, %v7172_v53, %v2776_v28  ;;  %7175 = vrsqrt.f32 %v2757_v55  ;;  %v9480_v58 = vld [vmem:[%s11477_s12] ss:$0 sm:$0xff]  ;;  %vm2789_vm10 = vmor %vm2787_vm9, %vm2788_vm8 }
 0x802   :  { %2723 = vadd.xlane.f32.xlu2 %v2699_v34  ;;  %v2931_v14 = vmul.f32 %v2780_v60, %v9228_v23  ;;  %v9493_v23 = vld [vmem:[%s11478_s13] ss:$0 sm:$0xff]  ;;  %vm2797_vm12 = vweird.f32 %v2757_v55 }
 0x803   :  { %v2784_v52 = vmul.f32 0.5, %v2783_v41  ;;  %2655 = vadd.xlane.f32.xlu1 %v9471_v4  ;;  %v2606_v17 = vpop.f32.mrf.mxu0  ;;  %v2714_v15 = vpop.xlane.xlu0 %2713 }
 0x804   :  { %v2557_v30 = vpop.f32.mrf.mxu3  ;;  %v2646_v38 = vpop.xlane.xlu2 %2645  ;;  %v2742_v7 = vmul.f32 %v2714_v15, %v8473_v57  ;;  %v2950_v13 = vmul.f32 %v9480_v58, %v2931_v14 }
 0x805   :  { %v2785_v51 = vsub.f32 1.5, %v2784_v52  ;;  %v2558_v50 = vadd.f32 %v9133_v20, %v2557_v30  ;;  %v2668_v0 = vmul.f32 %v2646_v38, %v8473_v57 }
 0x806   :  { %v2758_v26 = vadd.f32 1e-12, %v2742_v7  ;;  %v9503_v12 = vadd.f32 %v9493_v23, %v2950_v13 }
 0x807   :  { %v2786_v18 = vmul.f32 %v7174_v47, %v2785_v51  ;;  %v2607_v43 = vadd.f32 %v2606_v17, %v2558_v50  ;;  %v7176_v54 = vpop.eup %7175  ;;  %v9496_v37 = vsub.f32 %v9264_v6, %v2668_v0 }
 0x808   :  { %v2792_v10 = vmul.f32 %v7176_v54, %v2757_v55  ;;  %7177 = vrsqrt.f32 %v2758_v26  ;;  %vm2798_vm11 = vweird.f32 %v7176_v54  ;;  %vm2807_vm15 = vweird.f32 %v2758_v26 }
 0x809   :  { %v2790_v29 = vsel %vm2789_vm10, %v7174_v47, %v2786_v18  ;;  %v9486_v20 = vadd.f32 %v2607_v43, %v9088_v22  ;;  %v2700_v22 = vmul.f32 %v9496_v37, %v9496_v37  ;;  %vm2799_vm13 = vmor %vm2797_vm12, %vm2798_vm11 }
 0x80a   :  { %v2932_v56 = vmul.f32 %v2790_v29, %v9239_v45  ;;  %v2793_v45 = vmul.f32 %v7176_v54, %v2792_v10 }
 0x80b   :  { %2657 = vadd.xlane.f32.xlu2 %v9486_v20  ;;  %2725 = vadd.xlane.f32.xlu0 %v2700_v22  ;;  %v2716_v6 = vpop.xlane.xlu0 %2715 }
 0x80c   :  { %v2951_v61 = vmul.f32 %v9480_v58, %v2932_v56  ;;  %v2794_v49 = vmul.f32 0.5, %v2793_v45  ;;  %v2743_v3 = vmul.f32 %v2716_v6, %v8473_v57 }
 0x80d   :  { %v2648_v39 = vpop.xlane.xlu2 %2647 }
 0x80e   :  { %v9506_v5 = vadd.f32 %v9493_v23, %v2951_v61  ;;  %v2795_v27 = vsub.f32 1.5, %v2794_v49  ;;  %v2669_v62 = vmul.f32 %v2648_v39, %v8473_v57  ;;  %v7178_v46 = vpop.eup %7177  ;;  %v2759_v9 = vadd.f32 1e-12, %v2743_v3 }
 0x80f   :  { %v2802_v33 = vmul.f32 %v7178_v46, %v2758_v26  ;;  %vm2808_vm14 = vweird.f32 %v7178_v46 }
 0x810   :  { %v2985_v53 = vpack.c.bf16 %v9506_v5, %v9503_v12  ;;  %v2796_v31 = vmul.f32 %v7176_v54, %v2795_v27  ;;  %v9513_v40 = vsub.f32 %v9277_v1, %v2669_v62  ;;  %7179 = vrsqrt.f32 %v2759_v9  ;;  %vm2809_vm1 = vmor %vm2807_vm15, %vm2808_vm14 }
 0x811   :  { %v2803_v2 = vmul.f32 %v7178_v46, %v2802_v33  ;;  %vm2817_vm3 = vweird.f32 %v2759_v9 }
 0x812   :  { %3171 = vmatmul.bf16.vlgmr.msrb.gmra.mxu1 %v2985_v53  ;;  %3220 = vmatmul.bf16.vlgmr.msra.gmra.mxu2 %v2985_v53  ;;  %v2701_v8 = vmul.f32 %v9513_v40, %v9513_v40  ;;  %v2800_v47 = vsel %vm2799_vm13, %v7176_v54, %v2796_v31 }
 0x813   :  { %3269 = vmatmul.bf16.vlgmr.msra.gmra.mxu3 %v2985_v53  ;;  %v2804_v28 = vmul.f32 0.5, %v2803_v2  ;;  %v2718_v44 = vpop.xlane.xlu1 %2717  ;;  %v2933_v60 = vmul.f32 %v2800_v47, %v9254_v25 }
 0x814   :  { %2727 = vadd.xlane.f32.xlu0 %v2701_v8  ;;  %v2744_v59 = vmul.f32 %v2718_v44, %v8473_v57 }
 0x815   :  { %v2650_v63 = vpop.xlane.xlu0 %2649  ;;  %v2805_v41 = vsub.f32 1.5, %v2804_v28  ;;  %v2952_v18 = vmul.f32 %v9480_v58, %v2933_v60 }
 0x816   :  { %v2670_v36 = vmul.f32 %v2650_v63, %v8473_v57  ;;  %v7180_v1 = vpop.eup %7179  ;;  %v2760_v34 = vadd.f32 1e-12, %v2744_v59 }
 0x817   :  { %v2806_v52 = vmul.f32 %v7178_v46, %v2805_v41  ;;  %v2812_v55 = vmul.f32 %v7180_v1, %v2759_v9  ;;  %v9530_v7 = vadd.f32 %v9493_v23, %v2952_v18  ;;  %vm2818_vm2 = vweird.f32 %v7180_v1 }
 0x818   :  { %v9521_v30 = vsub.f32 %v9288_v35, %v2670_v36  ;;  %7181 = vrsqrt.f32 %v2760_v34  ;;  %vm2819_vm4 = vmor %vm2817_vm3, %vm2818_vm2  ;;  %vm2827_vm6 = vweird.f32 %v2760_v34 }
 0x819   :  { %v2810_v51 = vsel %vm2809_vm1, %v7178_v46, %v2806_v52  ;;  %v2813_v50 = vmul.f32 %v7180_v1, %v2812_v55 }
 0x81a   :  { %v2702_v14 = vmul.f32 %v9521_v30, %v9521_v30  ;;  %v2934_v17 = vmul.f32 %v2810_v51, %v9261_v24 }
 0x81b   :  { %v2814_v43 = vmul.f32 0.5, %v2813_v50 }
 0x81c   :  { %2729 = vadd.xlane.f32.xlu1 %v2702_v14  ;;  %v2953_v15 = vmul.f32 %v9480_v58, %v2934_v17 }
 0x81d   :  { %v2652_v25 = vpop.xlane.xlu0 %2651  ;;  %v2815_v38 = vsub.f32 1.5, %v2814_v43 }
 0x81e   :  { %v2671_v35 = vmul.f32 %v2652_v25, %v8473_v57  ;;  %v7182_v29 = vpop.eup %7181  ;;  %v9533_v0 = vadd.f32 %v9493_v23, %v2953_v15 }
 0x81f   :  { %v2816_v13 = vmul.f32 %v7180_v1, %v2815_v38  ;;  %v2822_v24 = vmul.f32 %v7182_v29, %v2760_v34  ;;  %vm2828_vm5 = vweird.f32 %v7182_v29 }
 0x820   :  { %v9536_v56 = vsub.f32 %v9293_v48, %v2671_v35  ;;  %v2986_v54 = vpack.c.bf16 %v9533_v0, %v9530_v7  ;;  %vm2829_vm7 = vmor %vm2827_vm6, %vm2828_vm5 }
 0x821   :  { %v2823_v26 = vmul.f32 %v7182_v29, %v2822_v24  ;;  %v2820_v10 = vsel %vm2819_vm4, %v7180_v1, %v2816_v13 }
 0x822   :  { %v2703_v61 = vmul.f32 %v9536_v56, %v9536_v56  ;;  %3176 = vmatmul.bf16.gmra.mxu1 %v2986_v54  ;;  %3225 = vmatmul.bf16.gmra.mxu2 %v2986_v54  ;;  %v2935_v48 = vmul.f32 %v2820_v10, %v9272_v11 }
 0x823   :  { %v2824_v22 = vmul.f32 0.5, %v2823_v26  ;;  %3274 = vmatmul.bf16.gmra.mxu3 %v2986_v54 }
 0x824   :  { %2731 = vadd.xlane.f32.xlu2 %v2703_v61  ;;  %v2954_v3 = vmul.f32 %v9480_v58, %v2935_v48 }
 0x825   :  { %v2825_v45 = vsub.f32 1.5, %v2824_v22 }
 0x826   :  { %v9547_v27 = vadd.f32 %v9493_v23, %v2954_v3 }
 0x827   :  { %v2826_v49 = vmul.f32 %v7182_v29, %v2825_v45 }
 0x829   :  { %v2830_v6 = vsel %vm2829_vm7, %v7182_v29, %v2826_v49 }
 0x82a   :  { %v2936_v53 = vmul.f32 %v2830_v6, %v9283_v19 }
 0x82c   :  { %v2955_v39 = vmul.f32 %v9480_v58, %v2936_v53 }
 0x82e   :  { %v9550_v62 = vadd.f32 %v9493_v23, %v2955_v39 }
 0x830   :  { %v2987_v46 = vpack.c.bf16 %v9550_v62, %v9547_v27 }
 0x832   :  { %3181 = vmatmul.bf16.gmra.mxu1 %v2987_v46  ;;  %3230 = vmatmul.bf16.gmra.mxu2 %v2987_v46 }
 0x833   :  { %3279 = vmatmul.bf16.gmra.mxu3 %v2987_v46 }
 0x865   :  { %v2720_v11 = vpop.xlane.xlu1 %2719 }
 0x866   :  { %v2745_v9 = vmul.f32 %v2720_v11, %v8473_v57 }
 0x868   :  { %v2761_v19 = vadd.f32 1e-12, %v2745_v9 }
 0x86a   :  { %7183 = vrsqrt.f32 %v2761_v19  ;;  %vm2837_vm9 = vweird.f32 %v2761_v19 }
 0x86d   :  { %v2654_v31 = vpop.xlane.xlu1 %2653  ;;  %v2722_v33 = vpop.xlane.xlu2 %2721 }
 0x86e   :  { %v2672_v2 = vmul.f32 %v2654_v31, %v8473_v57  ;;  %v2746_v8 = vmul.f32 %v2722_v33, %v8473_v57 }
 0x870   :  { %v7184_v47 = vpop.eup %7183  ;;  %v9558_v28 = vsub.f32 %v9458_v21, %v2672_v2  ;;  %v2762_v44 = vadd.f32 1e-12, %v2746_v8 }
 0x871   :  { %v2832_v59 = vmul.f32 %v7184_v47, %v2761_v19  ;;  %vm2838_vm8 = vweird.f32 %v7184_v47 }
 0x872   :  { %7185 = vrsqrt.f32 %v2762_v44  ;;  %v2704_v63 = vmul.f32 %v9558_v28, %v9558_v28  ;;  %vm2839_vm10 = vmor %vm2837_vm9, %vm2838_vm8  ;;  %vm2847_vm12 = vweird.f32 %v2762_v44 }
 0x873   :  { %v2833_v41 = vmul.f32 %v7184_v47, %v2832_v59 }
 0x874   :  { %2733 = vadd.xlane.f32.xlu0 %v2704_v63 }
 0x875   :  { %v2834_v36 = vmul.f32 0.5, %v2833_v41  ;;  %v2724_v52 = vpop.xlane.xlu2 %2723 }
 0x876   :  { %v2656_v1 = vpop.xlane.xlu1 %2655  ;;  %v2747_v51 = vmul.f32 %v2724_v52, %v8473_v57 }
 0x877   :  { %v2835_v34 = vsub.f32 1.5, %v2834_v36  ;;  %v2673_v60 = vmul.f32 %v2656_v1, %v8473_v57 }
 0x878   :  { %v7186_v55 = vpop.eup %7185  ;;  %v2763_v17 = vadd.f32 1e-12, %v2747_v51 }
 0x879   :  { %v2836_v50 = vmul.f32 %v7184_v47, %v2835_v34  ;;  %v2842_v21 = vmul.f32 %v7186_v55, %v2762_v44  ;;  %v9565_v14 = vsub.f32 %v9471_v4, %v2673_v60  ;;  %vm2848_vm11 = vweird.f32 %v7186_v55  ;;  %v9592_v44 = vld [vmem:[%s11467_s3 + $0x3] sm:$0x7] }
 0x87a   :  { %7187 = vrsqrt.f32 %v2763_v17  ;;  %vm2849_vm13 = vmor %vm2847_vm12, %vm2848_vm11  ;;  %vm2857_vm15 = vweird.f32 %v2763_v17  ;;  %v9595_v41 = vperm.slane %v9592_v44, 2 }
 0x87b   :  { %v2843_v18 = vmul.f32 %v7186_v55, %v2842_v21  ;;  %v2705_v43 = vmul.f32 %v9565_v14, %v9565_v14  ;;  %v2840_v25 = vsel %vm2839_vm10, %v7184_v47, %v2836_v50 }
 0x87c   :  { %v2937_v13 = vmul.f32 %v2840_v25, %v9409_v32 }
 0x87d   :  { %v2844_v15 = vmul.f32 0.5, %v2843_v18  ;;  %2735 = vadd.xlane.f32.xlu1 %v2705_v43 }
 0x87e   :  { %v2658_v35 = vpop.xlane.xlu2 %2657  ;;  %v2726_v54 = vpop.xlane.xlu0 %2725  ;;  %v2956_v49 = vmul.f32 %v9480_v58, %v2937_v13 }
 0x87f   :  { %v2845_v38 = vsub.f32 1.5, %v2844_v15  ;;  %v2674_v29 = vmul.f32 %v2658_v35, %v8473_v57  ;;  %v2748_v22 = vmul.f32 %v2726_v54, %v8473_v57 }
 0x880   :  { %v7188_v24 = vpop.eup %7187 }
 0x881   :  { %v2846_v4 = vmul.f32 %v7186_v55, %v2845_v38  ;;  %v9572_v26 = vsub.f32 %v9486_v20, %v2674_v29  ;;  %v2852_v10 = vmul.f32 %v7188_v24, %v2763_v17  ;;  %v2764_v6 = vadd.f32 1e-12, %v2748_v22 }
 0x882   :  { %v9581_v20 = vadd.f32 %v9493_v23, %v2956_v49  ;;  %vm2858_vm14 = vweird.f32 %v7188_v24 }
 0x883   :  { %v2850_v61 = vsel %vm2849_vm13, %v7186_v55, %v2846_v4  ;;  %v2706_v45 = vmul.f32 %v9572_v26, %v9572_v26  ;;  %v2853_v32 = vmul.f32 %v7188_v24, %v2852_v10  ;;  %7189 = vrsqrt.f32 %v2764_v6  ;;  %vm2859_vm1 = vmor %vm2857_vm15, %vm2858_vm14 }
 0x884   :  { %v2938_v48 = vmul.f32 %v2850_v61, %v9454_v16  ;;  %vm2867_vm3 = vweird.f32 %v2764_v6 }
 0x885   :  { %2737 = vadd.xlane.f32.xlu2 %v2706_v45  ;;  %v2854_v3 = vmul.f32 0.5, %v2853_v32 }
 0x886   :  { %v2957_v53 = vmul.f32 %v9480_v58, %v2938_v48 }
 0x887   :  { %v2855_v11 = vsub.f32 1.5, %v2854_v3  ;;  %v2728_v16 = vpop.xlane.xlu0 %2727 }
 0x888   :  { %v9584_v39 = vadd.f32 %v9493_v23, %v2957_v53  ;;  %v2749_v9 = vmul.f32 %v2728_v16, %v8473_v57 }
 0x889   :  { %v7190_v19 = vpop.eup %7189  ;;  %v2856_v2 = vmul.f32 %v7188_v24, %v2855_v11 }
 0x88a   :  { %v2988_v46 = vpack.c.bf16 %v9584_v39, %v9581_v20  ;;  %v2862_v31 = vmul.f32 %v7190_v19, %v2764_v6  ;;  %v2765_v33 = vadd.f32 1e-12, %v2749_v9  ;;  %vm2868_vm2 = vweird.f32 %v7190_v19 }
 0x88b   :  { %v2860_v59 = vsel %vm2859_vm1, %v7188_v24, %v2856_v2  ;;  %vm2869_vm4 = vmor %vm2867_vm3, %vm2868_vm2 }
 0x88c   :  { %3186 = vmatmul.bf16.gmra.mxu1 %v2988_v46  ;;  %3235 = vmatmul.bf16.gmra.mxu2 %v2988_v46  ;;  %v2863_v8 = vmul.f32 %v7190_v19, %v2862_v31  ;;  %7191 = vrsqrt.f32 %v2765_v33  ;;  %v2939_v51 = vmul.f32 %v2860_v59, %v9466_v42  ;;  %vm2877_vm6 = vweird.f32 %v2765_v33 }
 0x88d   :  { %3284 = vmatmul.bf16.gmra.mxu3 %v2988_v46 }
 0x88e   :  { %v2864_v47 = vmul.f32 0.5, %v2863_v8  ;;  %v2958_v25 = vmul.f32 %v9480_v58, %v2939_v51 }
 0x88f   :  { %v2730_v63 = vpop.xlane.xlu1 %2729 }
 0x890   :  { %v2865_v36 = vsub.f32 1.5, %v2864_v47  ;;  %v2750_v1 = vmul.f32 %v2730_v63, %v8473_v57  ;;  %v9607_v42 = vadd.f32 %v9493_v23, %v2958_v25 }
 0x892   :  { %v7192_v34 = vpop.eup %7191  ;;  %v2866_v60 = vmul.f32 %v7190_v19, %v2865_v36  ;;  %v2766_v52 = vadd.f32 1e-12, %v2750_v1 }
 0x893   :  { %v2872_v50 = vmul.f32 %v7192_v34, %v2765_v33  ;;  %vm2878_vm5 = vweird.f32 %v7192_v34 }
 0x894   :  { %v2870_v17 = vsel %vm2869_vm4, %v7190_v19, %v2866_v60  ;;  %7193 = vrsqrt.f32 %v2766_v52  ;;  %vm2879_vm7 = vmor %vm2877_vm6, %vm2878_vm5  ;;  %vm2887_vm9 = vweird.f32 %v2766_v52 }
 0x895   :  { %v2873_v18 = vmul.f32 %v7192_v34, %v2872_v50  ;;  %v2940_v43 = vmul.f32 %v2870_v17, %v9496_v37 }
 0x896   :  { %v3270_v55 = vpop.f32.mrf.mxu3 }
 0x897   :  { %v3271_v21 = vadd.f32 %v3270_v55, %v9595_v41  ;;  %v2874_v15 = vmul.f32 0.5, %v2873_v18  ;;  %v2959_v38 = vmul.f32 %v9480_v58, %v2940_v43 }
 0x899   :  { %v2875_v35 = vsub.f32 1.5, %v2874_v15  ;;  %v9604_v29 = vadd.f32 %v9493_v23, %v2959_v38  ;;  %v3342_v22 = vpack.c.bf16 %v3271_v21, %v3271_v21  ;;  %v2732_v15 = vpop.xlane.xlu2 %2731 }
 0x89a   :  { %v7194_v13 = vpop.eup %7193  ;;  %v2751_v38 = vmul.f32 %v2732_v15, %v8473_v57 }
 0x89b   :  { %v2876_v24 = vmul.f32 %v7192_v34, %v2875_v35  ;;  %v2882_v54 = vmul.f32 %v7194_v13, %v2766_v52  ;;  %v2989_v37 = vpack.c.bf16 %v9604_v29, %v9607_v42  ;;  %vm2888_vm8 = vweird.f32 %v7194_v13 }
 0x89c   :  { %v3720_v53 = vunpack.c.l.b16 %v3342_v22  ;;  %vm2889_vm10 = vmor %vm2887_vm9, %vm2888_vm8  ;;  %v2767_v35 = vadd.f32 1e-12, %v2751_v38 }
 0x89d   :  { %v2883_v61 = vmul.f32 %v7194_v13, %v2882_v54  ;;  %3191 = vmatmul.bf16.gmra.mxu1 %v2989_v37  ;;  %3240 = vmatmul.bf16.gmra.mxu2 %v2989_v37  ;;  %v2880_v45 = vsel %vm2879_vm7, %v7192_v34, %v2876_v24 }
 0x89e   :  { %v3272_v4 = vpop.f32.mrf.mxu3  ;;  %3289 = vmatmul.bf16.gmra.mxu3 %v2989_v37  ;;  %v2941_v3 = vmul.f32 %v2880_v45, %v9513_v40  ;;  %7195 = vrsqrt.f32 %v2767_v35  ;;  %vm2897_vm12 = vweird.f32 %v2767_v35 }
 0x89f   :  { %v3273_v10 = vadd.f32 %v3272_v4, %v9595_v41  ;;  %v2884_v48 = vmul.f32 0.5, %v2883_v61 }
 0x8a0   :  { %v2960_v19 = vmul.f32 %v9480_v58, %v2941_v3 }
 0x8a1   :  { %v3343_v49 = vpack.c.bf16 %v3273_v10, %v3273_v10  ;;  %v2885_v32 = vsub.f32 1.5, %v2884_v48 }
 0x8a2   :  { %v9620_v8 = vadd.f32 %v9493_v23, %v2960_v19 }
 0x8a3   :  { %v3721_v6 = vunpack.c.l.b16 %v3343_v49  ;;  %v2886_v46 = vmul.f32 %v7194_v13, %v2885_v32 }
 0x8a4   :  { %11499 = vst [vmem:[#allocation2_spill] sm:$0xff] %v9620_v8  ;;  %v7196_v4 = vpop.eup %7195 }
 0x8a5   :  { %v9613_v11 = vpack.c.b16 %v3721_v6, %v3720_v53  ;;  %v2890_v16 = vsel %vm2889_vm10, %v7194_v13, %v2886_v46  ;;  %v9635_v13 = vpop.f32.mrf.mxu2  ;;  %v2892_v54 = vmul.f32 %v7196_v4, %v2767_v35  ;;  %vm2898_vm11 = vweird.f32 %v7196_v4 }
 0x8a6   :  { %v2942_v9 = vmul.f32 %v2890_v16, %v9521_v30  ;;  %v3275_v31 = vpop.f32.mrf.mxu3  ;;  %vm2899_vm13 = vmor %vm2897_vm12, %vm2898_vm11 }
 0x8a7   :  { %v3276_v33 = vadd.f32 %v3275_v31, %v9595_v41  ;;  %v2893_v37 = vmul.f32 %v7196_v4, %v2892_v54 }
 0x8a8   :  { %v2961_v2 = vmul.f32 %v9480_v58, %v2942_v9  ;;  %v9643_v9 = vpop.f32.mrf.mxu1 }
 0x8a9   :  { %v3344_v59 = vpack.c.bf16 %v3276_v33, %v3276_v33  ;;  %v2894_v45 = vmul.f32 0.5, %v2893_v37 }
 0x8aa   :  { %v9623_v40 = vadd.f32 %v9493_v23, %v2961_v2 }
 0x8ab   :  { %v3722_v1 = vunpack.c.l.b16 %v3344_v59  ;;  %v2895_v49 = vsub.f32 1.5, %v2894_v45 }
 0x8ac   :  { %11500 = vst [vmem:[#allocation3_spill] sm:$0xff] %v9623_v40  ;;  %v2990_v47 = vpack.c.bf16 %v9623_v40, %v9620_v8 }
 0x8ad   :  { %v9637_v24 = vpop.f32.mrf.mxu2  ;;  %v2896_v3 = vmul.f32 %v7196_v4, %v2895_v49 }
 0x8ae   :  { %3196 = vmatmul.bf16.gmra.mxu1 %v2990_v47  ;;  %3245 = vmatmul.bf16.gmra.mxu2 %v2990_v47  ;;  %v3277_v30 = vpop.f32.mrf.mxu3 }
 0x8af   :  { %3294 = vmatmul.bf16.gmra.mxu3 %v2990_v47  ;;  %v3278_v63 = vadd.f32 %v3277_v30, %v9595_v41  ;;  %v2900_v33 = vsel %vm2899_vm13, %v7196_v4, %v2896_v3 }
 0x8b1   :  { %v3345_v36 = vpack.c.bf16 %v3278_v63, %v3278_v63  ;;  %v2943_v63 = vmul.f32 %v2900_v33, %v9536_v56 }
 0x8b3   :  { %v3723_v34 = vunpack.c.l.b16 %v3345_v36 }
 0x8b5   :  { %v9628_v60 = vpack.c.b16 %v3723_v34, %v3722_v1  ;;  %v9640_v48 = vpop.f32.mrf.mxu2 }
 0x8b6   :  { %v3280_v52 = vpop.f32.mrf.mxu3 }
 0x8b7   :  { %v3281_v55 = vadd.f32 %v3280_v52, %v9595_v41 }
 0x8b9   :  { %v3346_v50 = vpack.c.bf16 %v3281_v55, %v3281_v55 }
 0x8bb   :  { %v3724_v18 = vunpack.c.l.b16 %v3346_v50 }
 0x8bd   :  { %v9645_v19 = vpop.f32.mrf.mxu2 }
 0x8be   :  { %v3282_v51 = vpop.f32.mrf.mxu3 }
 0x8bf   :  { %v3283_v21 = vadd.f32 %v3282_v51, %v9595_v41 }
 0x8c1   :  { %v3347_v17 = vpack.c.bf16 %v3283_v21, %v3283_v21  ;;  %v2962_v21 = vmul.f32 %v9480_v58, %v2943_v63 }
 0x8c3   :  { %v3725_v43 = vunpack.c.l.b16 %v3347_v17  ;;  %v9651_v17 = vpop.f32.mrf.mxu1  ;;  %v9657_v38 = vadd.f32 %v9493_v23, %v2962_v21 }
 0x8c5   :  { %v9632_v25 = vpack.c.b16 %v3725_v43, %v3724_v18  ;;  %v9653_v18 = vpop.f32.mrf.mxu2  ;;  %11501 = vst [vmem:[#allocation4_spill] sm:$0xff] %v9657_v38 }
 0x8e7   :  { %v2734_v61 = vpop.xlane.xlu0 %2733 }
 0x8e8   :  { %v2752_v10 = vmul.f32 %v2734_v61, %v8473_v57 }
 0x8ea   :  { %v2768_v22 = vadd.f32 1e-12, %v2752_v10  ;;  %v9664_v10 = vpop.f32.mrf.mxu1 }
 0x8ec   :  { %7197 = vrsqrt.f32 %v2768_v22  ;;  %vm2907_vm15 = vweird.f32 %v2768_v22 }
 0x8f0   :  { %v2736_v32 = vpop.xlane.xlu1 %2735 }
 0x8f1   :  { %v2753_v6 = vmul.f32 %v2736_v32, %v8473_v57 }
 0x8f2   :  { %v7198_v53 = vpop.eup %7197 }
 0x8f3   :  { %v2902_v46 = vmul.f32 %v7198_v53, %v2768_v22  ;;  %v2769_v16 = vadd.f32 1e-12, %v2753_v6  ;;  %vm2908_vm14 = vweird.f32 %v7198_v53  ;;  %v9666_v22 = vpop.f32.mrf.mxu2 }
 0x8f4   :  { %vm2909_vm1 = vmor %vm2907_vm15, %vm2908_vm14 }
 0x8f5   :  { %v2903_v31 = vmul.f32 %v7198_v53, %v2902_v46  ;;  %7199 = vrsqrt.f32 %v2769_v16  ;;  %vm2917_vm3 = vweird.f32 %v2769_v16 }
 0x8f7   :  { %v2904_v2 = vmul.f32 0.5, %v2903_v31 }
 0x8f8   :  { %v2738_v30 = vpop.xlane.xlu2 %2737 }
 0x8f9   :  { %v2905_v47 = vsub.f32 1.5, %v2904_v2  ;;  %v2754_v59 = vmul.f32 %v2738_v30, %v8473_v57  ;;  %v3179_v30 = vpop.f32.mrf.mxu1 }
 0x8fb   :  { %v7200_v36 = vpop.eup %7199  ;;  %v2906_v1 = vmul.f32 %v7198_v53, %v2905_v47  ;;  %v2770_v52 = vadd.f32 1e-12, %v2754_v59 }
 0x8fc   :  { %v2912_v34 = vmul.f32 %v7200_v36, %v2769_v16  ;;  %vm2918_vm2 = vweird.f32 %v7200_v36 }
 0x8fd   :  { %v2910_v55 = vsel %vm2909_vm1, %v7198_v53, %v2906_v1  ;;  %7201 = vrsqrt.f32 %v2770_v52  ;;  %vm2919_vm4 = vmor %vm2917_vm3, %vm2918_vm2  ;;  %vm2927_vm6 = vweird.f32 %v2770_v52 }
 0x8fe   :  { %v2913_v51 = vmul.f32 %v7200_v36, %v2912_v34  ;;  %v2944_v50 = vmul.f32 %v2910_v55, %v9558_v28 }
 0x900   :  { %v2914_v43 = vmul.f32 0.5, %v2913_v51  ;;  %v2963_v56 = vmul.f32 %v9480_v58, %v2944_v50 }
 0x902   :  { %v2915_v15 = vsub.f32 1.5, %v2914_v43  ;;  %v9660_v35 = vadd.f32 %v9493_v23, %v2963_v56 }
 0x903   :  { %v7202_v4 = vpop.eup %7201 }
 0x904   :  { %11502 = vst [vmem:[#allocation5_spill] sm:$0xff] %v9660_v35  ;;  %v2991_v28 = vpack.c.bf16 %v9660_v35, %v9657_v38  ;;  %v2916_v54 = vmul.f32 %v7200_v36, %v2915_v15  ;;  %v2922_v37 = vmul.f32 %v7202_v4, %v2770_v52  ;;  %vm2928_vm5 = vweird.f32 %v7202_v4  ;;  %v9686_v52 = vpop.f32.mrf.mxu1 }
 0x905   :  { %vm2929_vm7 = vmor %vm2927_vm6, %vm2928_vm5 }
 0x906   :  { %3201 = vmatmul.bf16.gmra.mxu1 %v2991_v28  ;;  %3250 = vmatmul.bf16.gmra.mxu2 %v2991_v28  ;;  %v2923_v61 = vmul.f32 %v7202_v4, %v2922_v37  ;;  %v2920_v45 = vsel %vm2919_vm4, %v7200_v36, %v2916_v54 }
 0x907   :  { %3299 = vmatmul.bf16.gmra.mxu3 %v2991_v28  ;;  %v2945_v6 = vmul.f32 %v2920_v45, %v9565_v14 }
 0x908   :  { %v2924_v49 = vmul.f32 0.5, %v2923_v61 }
 0x909   :  { %v2964_v31 = vmul.f32 %v9480_v58, %v2945_v6 }
 0x90a   :  { %v2925_v32 = vsub.f32 1.5, %v2924_v49 }
 0x90b   :  { %v9676_v59 = vadd.f32 %v9493_v23, %v2964_v31 }
 0x90c   :  { %v2926_v53 = vmul.f32 %v7202_v4, %v2925_v32  ;;  %v9692_v43 = vpop.f32.mrf.mxu1 }
 0x90d   :  { %11503 = vst [vmem:[#allocation6_spill] sm:$0xff] %v9676_v59 }
 0x90e   :  { %v2930_v3 = vsel %vm2929_vm7, %v7202_v4, %v2926_v53  ;;  %v9703_v53 = vperm.slane %v9592_v44, 1 }
 0x90f   :  { %v2946_v16 = vmul.f32 %v2930_v3, %v9572_v26  ;;  %v9671_v33 = vpop.f32.mrf.mxu2 }
 0x910   :  { %v3285_v46 = vpop.f32.mrf.mxu3 }
 0x911   :  { %v3286_v2 = vadd.f32 %v3285_v46, %v9595_v41  ;;  %v2965_v47 = vmul.f32 %v9480_v58, %v2946_v16 }
 0x913   :  { %v9679_v14 = vadd.f32 %v9493_v23, %v2965_v47  ;;  %v3348_v36 = vpack.c.bf16 %v3286_v2, %v3286_v2  ;;  %v3229_v47 = vadd.f32 %v9645_v19, %v9703_v53 }
 0x914   :  { %v9697_v28 = vpop.f32.mrf.mxu1 }
 0x915   :  { %11504 = vst [vmem:[#allocation7_spill] sm:$0xff] %v9679_v14  ;;  %v2992_v63 = vpack.c.bf16 %v9679_v14, %v9676_v59  ;;  %v3726_v55 = vunpack.c.l.b16 %v3348_v36 }
 0x917   :  { %3206 = vmatmul.bf16.gmra.mxu1 %v2992_v63  ;;  %3255 = vmatmul.bf16.gmra.mxu2 %v2992_v63  ;;  %v9684_v34 = vpop.f32.mrf.mxu2 }
 0x918   :  { %v3287_v26 = vpop.f32.mrf.mxu3  ;;  %3304 = vmatmul.bf16.gmra.mxu3 %v2992_v63 }
 0x919   :  { %v3288_v1 = vadd.f32 %v3287_v26, %v9595_v41  ;;  %v3227_v26 = vadd.f32 %v9640_v48, %v9703_v53 }
 0x91b   :  { %v3349_v58 = vpack.c.bf16 %v3288_v1, %v3288_v1 }
 0x91c   :  { %v9705_v3 = vpop.f32.mrf.mxu1 }
 0x91d   :  { %v3727_v51 = vunpack.c.l.b16 %v3349_v58 }
 0x91f   :  { %v9688_v50 = vpack.c.b16 %v3727_v51, %v3726_v55  ;;  %v3329_v55 = vpack.c.bf16 %v3229_v47, %v3229_v47 }
 0x920   :  { %v9690_v23 = vpop.f32.mrf.mxu2 }
 0x921   :  { %v3290_v21 = vpop.f32.mrf.mxu3  ;;  %v3434_v19 = vunpack.c.l.b16 %v3329_v55 }
 0x922   :  { %v3291_v56 = vadd.f32 %v3290_v21, %v9595_v41  ;;  %v9716_v21 = vperm.slane %v9592_v44, 0 }
 0x924   :  { %v3350_v54 = vpack.c.bf16 %v3291_v56, %v3291_v56  ;;  %v3192_v58 = vpop.f32.mrf.mxu1  ;;  %v3328_v56 = vpack.c.bf16 %v3227_v26, %v3227_v26 }
 0x926   :  { %v3728_v45 = vunpack.c.l.b16 %v3350_v54  ;;  %v3178_v54 = vadd.f32 %v9664_v10, %v9716_v21  ;;  %v3433_v48 = vunpack.c.l.b16 %v3328_v56 }
 0x928   :  { %v9695_v15 = vpop.f32.mrf.mxu2 }
 0x929   :  { %v3292_v4 = vpop.f32.mrf.mxu3 }
 0x92a   :  { %v3293_v37 = vadd.f32 %v3292_v4, %v9595_v41  ;;  %v3180_v4 = vadd.f32 %v3179_v30, %v9716_v21 }
 0x92c   :  { %v3351_v61 = vpack.c.bf16 %v3293_v37, %v3293_v37  ;;  %v3313_v37 = vpack.c.bf16 %v3180_v4, %v3180_v4 }
 0x92e   :  { %v3729_v49 = vunpack.c.l.b16 %v3351_v61  ;;  %v9723_v61 = vpack.c.b16 %v3434_v19, %v3433_v48  ;;  %v3394_v44 = vunpack.c.l.b16 %v3313_v37 }
 0x930   :  { %v9700_v6 = vpack.c.b16 %v3729_v49, %v3728_v45  ;;  %v3194_v45 = vpop.f32.mrf.mxu1  ;;  %v3312_v49 = vpack.c.bf16 %v3178_v54, %v3178_v54 }
 0x931   :  { %v3246_v32 = vpop.f32.mrf.mxu2 }
 0x932   :  { %v3247_v46 = vadd.f32 %v3246_v32, %v9703_v53  ;;  %v3195_v32 = vadd.f32 %v3194_v45, %v9716_v21 }
 0x934   :  { %v3336_v31 = vpack.c.bf16 %v3247_v46, %v3247_v46  ;;  %v3393_v46 = vunpack.c.l.b16 %v3312_v49 }
 0x936   :  { %v3441_v36 = vunpack.c.l.b16 %v3336_v31  ;;  %v9729_v30 = vpack.c.b16 %v3394_v44, %v3393_v46  ;;  %v3319_v31 = vpack.c.bf16 %v3195_v32, %v3195_v32  ;;  %v3239_v44 = vadd.f32 %v9684_v34, %v9703_v53 }
 0x938   :  { %v3400_v10 = vunpack.c.l.b16 %v3319_v31  ;;  %v9737_v26 = vpop.f32.mrf.mxu1 }
 0x939   :  { %v3248_v16 = vpop.f32.mrf.mxu2 }
 0x93a   :  { %v3249_v2 = vadd.f32 %v3248_v16, %v9703_v53  ;;  %v3193_v16 = vadd.f32 %v3192_v58, %v9716_v21 }
 0x93c   :  { %v3337_v63 = vpack.c.bf16 %v3249_v2, %v3249_v2  ;;  %v3318_v2 = vpack.c.bf16 %v3193_v16, %v3193_v16  ;;  %v3237_v16 = vadd.f32 %v9671_v33, %v9703_v53  ;;  %v3222_v33 = vadd.f32 %v9635_v13, %v9703_v53 }
 0x93e   :  { %v3442_v1 = vunpack.c.l.b16 %v3337_v63  ;;  %v3399_v47 = vunpack.c.l.b16 %v3318_v2  ;;  %v3332_v14 = vpack.c.bf16 %v3237_v16, %v3237_v16 }
 0x940   :  { %v9713_v51 = vpack.c.b16 %v3442_v1, %v3441_v36  ;;  %v9733_v63 = vpack.c.b16 %v3400_v10, %v3399_v47  ;;  %v9739_v36 = vpop.f32.mrf.mxu3  ;;  %v9741_v1 = vpop.f32.mrf.mxu1  ;;  %v3333_v10 = vpack.c.bf16 %v3239_v44, %v3239_v44 }
 0x942   :  { %3835 = vrot.lane.b32.xlu2 %v9713_v51, %s7499_s26 }
 0x948   :  { %v3297_v58 = vpop.f32.mrf.mxu3 }
 0x94a   :  { %3827 = vrot.lane.b32.xlu2 %v9723_v61, %s7499_s26 }
 0x952   :  { %3811 = vrot.lane.b32.xlu2 %v9729_v30, %s7499_s26 }
 0x95a   :  { %3817 = vrot.lane.b32.xlu2 %v9733_v63, %s7499_s26 }
 0x983   :  { %v9743_v55 = vpop.f32.mrf.mxu1 }
 0x989   :  { %v3251_v56 = vpop.f32.mrf.mxu2 }
 0x98a   :  { %v3300_v4 = vpop.f32.mrf.mxu3  ;;  %v3252_v54 = vadd.f32 %v3251_v56, %v9703_v53 }
 0x98b   :  { %v9745_v19 = vpop.f32.mrf.mxu1  ;;  %v3301_v38 = vadd.f32 %v3300_v4, %v9595_v41 }
 0x98c   :  { %v3338_v37 = vpack.c.bf16 %v3252_v54, %v3252_v54  ;;  %v3224_v54 = vadd.f32 %v9637_v24, %v9703_v53  ;;  %v3326_v24 = vpack.c.bf16 %v3222_v33, %v3222_v33 }
 0x98e   :  { %v3443_v31 = vunpack.c.l.b16 %v3338_v37  ;;  %v3327_v16 = vpack.c.bf16 %v3224_v54, %v3224_v54 }
 0x991   :  { %v3253_v48 = vpop.f32.mrf.mxu2 }
 0x992   :  { %v3254_v45 = vadd.f32 %v3253_v48, %v9703_v53  ;;  %v3302_v49 = vpop.f32.mrf.mxu3  ;;  %v3438_v48 = vunpack.c.l.b16 %v3333_v10 }
 0x994   :  { %v3339_v32 = vpack.c.bf16 %v3254_v45, %v3254_v45  ;;  %v3207_v46 = vpop.f32.mrf.mxu1 }
 0x995   :  { %v3208_v56 = vadd.f32 %v3207_v46, %v9716_v21  ;;  %v3303_v46 = vadd.f32 %v3302_v49, %v9595_v41 }
 0x996   :  { %v3444_v2 = vunpack.c.l.b16 %v3339_v32  ;;  %v3437_v32 = vunpack.c.l.b16 %v3332_v14  ;;  %v3432_v14 = vunpack.c.l.b16 %v3327_v16  ;;  %v3298_v16 = vadd.f32 %v3297_v58, %v9595_v41 }
 0x997   :  { %v3324_v44 = vpack.c.bf16 %v3208_v56, %v3208_v56  ;;  %v3185_v56 = vadd.f32 %v9692_v43, %v9716_v21 }
 0x998   :  { %v9753_v47 = vpack.c.b16 %v3444_v2, %v3443_v31  ;;  %v9763_v2 = vpack.c.b16 %v3438_v48, %v3437_v32  ;;  %v3355_v48 = vpack.c.bf16 %v3303_v46, %v3303_v46 }
 0x999   :  { %v3405_v40 = vunpack.c.l.b16 %v3324_v44  ;;  %v3244_v44 = vadd.f32 %v9695_v15, %v9703_v53  ;;  %v3296_v15 = vadd.f32 %v9739_v36, %v9595_v41 }
 0x99a   :  { %3837 = vrot.lane.b32.xlu1 %v9753_v47, %s7499_s26  ;;  %v3256_v34 = vpop.f32.mrf.mxu2 }
 0x99b   :  { %v3305_v45 = vpop.f32.mrf.mxu3  ;;  %v3257_v59 = vadd.f32 %v3256_v34, %v9703_v53  ;;  %v3352_v36 = vpack.c.bf16 %v3296_v15, %v3296_v15 }
 0x99c   :  { %v3209_v37 = vpop.f32.mrf.mxu1  ;;  %v3306_v10 = vadd.f32 %v3305_v45, %v9595_v41  ;;  %v3431_v45 = vunpack.c.l.b16 %v3326_v24  ;;  %v3242_v24 = vadd.f32 %v9690_v23, %v9703_v53 }
 0x99d   :  { %v3210_v31 = vadd.f32 %v3209_v37, %v9716_v21  ;;  %v3340_v49 = vpack.c.bf16 %v3257_v59, %v3257_v59  ;;  %v3315_v59 = vpack.c.bf16 %v3185_v56, %v3185_v56  ;;  %v3353_v56 = vpack.c.bf16 %v3298_v16, %v3298_v16 }
 0x99e   :  { %v3356_v32 = vpack.c.bf16 %v3306_v10, %v3306_v10  ;;  %v3733_v10 = vunpack.c.l.b16 %v3355_v48  ;;  %v3334_v23 = vpack.c.bf16 %v3242_v24, %v3242_v24  ;;  %v3200_v48 = vadd.f32 %v9741_v1, %v9716_v21 }
 0x99f   :  { %v3325_v35 = vpack.c.bf16 %v3210_v31, %v3210_v31  ;;  %v3354_v31 = vpack.c.bf16 %v3301_v38, %v3301_v38  ;;  %v3396_v58 = vunpack.c.l.b16 %v3315_v59  ;;  %v3731_v1 = vunpack.c.l.b16 %v3353_v56 }
 0x9a0   :  { %v3734_v38 = vunpack.c.l.b16 %v3356_v32  ;;  %v3321_v59 = vpack.c.bf16 %v3200_v48, %v3200_v48  ;;  %v3730_v16 = vunpack.c.l.b16 %v3352_v36  ;;  %v3205_v36 = vadd.f32 %v9745_v19, %v9716_v21 }
 0x9a1   :  { %v3406_v13 = vunpack.c.l.b16 %v3325_v35  ;;  %v3183_v35 = vadd.f32 %v9686_v52, %v9716_v21  ;;  %v3732_v8 = vunpack.c.l.b16 %v3354_v31 }
 0x9a2   :  { %3831 = vrot.lane.b32.xlu1 %v9763_v2, %s7499_s26  ;;  %v3258_v54 = vpop.f32.mrf.mxu2 }
 0x9a3   :  { %v9773_v37 = vpack.c.b16 %v3406_v13, %v3405_v40  ;;  %v3259_v34 = vadd.f32 %v3258_v54, %v9703_v53  ;;  %v3307_v33 = vpop.f32.mrf.mxu3  ;;  %v9783_v40 = vpack.c.b16 %v3432_v14, %v3431_v45  ;;  %v3445_v13 = vunpack.c.l.b16 %v3340_v49 }
 0x9a4   :  { %v3308_v4 = vadd.f32 %v3307_v33, %v9595_v41  ;;  %v3335_v33 = vpack.c.bf16 %v3244_v44, %v3244_v44  ;;  %v3742_v49 = vpack.c.b16 %v3733_v10, %v3732_v8  ;;  %v3198_v44 = vadd.f32 %v9737_v26, %v9716_v21 }
 0x9a5   :  { %v3341_v43 = vpack.c.bf16 %v3259_v34, %v3259_v34  ;;  %3823 = vrot.lane.b32.xlu2 %v9773_v37, %s7499_s26  ;;  %v3314_v34 = vpack.c.bf16 %v3183_v35, %v3183_v35  ;;  %v3232_v8 = vadd.f32 %v9653_v18, %v9703_v53  ;;  %v3498_v18 = vsel %vm553_vm0, %v9753_v47, 0 }
 0x9a6   :  { %v3357_v46 = vpack.c.bf16 %v3308_v4, %v3308_v4  ;;  %v3234_v4 = vadd.f32 %v9666_v22, %v9703_v53  ;;  %v3440_v35 = vunpack.c.l.b16 %v3335_v33  ;;  %v3320_v10 = vpack.c.bf16 %v3198_v44, %v3198_v44 }
 0x9a7   :  { %v3446_v52 = vunpack.c.l.b16 %v3341_v43  ;;  %v3395_v32 = vunpack.c.l.b16 %v3314_v34  ;;  %v3439_v43 = vunpack.c.l.b16 %v3334_v23  ;;  %v3741_v22 = vpack.c.b16 %v3731_v1, %v3730_v16 }
 0x9a8   :  { %v3735_v54 = vunpack.c.l.b16 %v3357_v46  ;;  %v3331_v46 = vpack.c.bf16 %v3234_v4, %v3234_v4  ;;  %v3330_v26 = vpack.c.bf16 %v3232_v8, %v3232_v8  ;;  %v3175_v53 = vadd.f32 %v9651_v17, %v9716_v21 }
 0x9a9   :  { %v3454_v14 = vpack.c.b16 %v3446_v52, %v3445_v13  ;;  %v9806_v31 = vpack.c.b16 %v3396_v58, %v3395_v32  ;;  %v3451_v24 = vpack.c.b16 %v3440_v35, %v3439_v43  ;;  %v3402_v13 = vunpack.c.l.b16 %v3321_v59 }
 0x9aa   :  { %3825 = vrot.lane.b32.xlu1 %v9783_v40, %s7499_s26  ;;  %v9792_v45 = vpack.c.b16 %v3735_v54, %v3734_v38  ;;  %v3436_v52 = vunpack.c.l.b16 %v3331_v46  ;;  %v3401_v15 = vunpack.c.l.b16 %v3320_v10  ;;  %v3173_v38 = vadd.f32 %v9643_v9, %v9716_v21 }
 0x9ab   :  { %3839 = vrot.lane.b32.xlu0 %v3454_v14, %s7499_s26  ;;  %v3501_v41 = vsel %vm553_vm0, %v3454_v14, 0  ;;  %v3435_v54 = vunpack.c.l.b16 %v3330_v26  ;;  %v3311_v33 = vpack.c.bf16 %v3175_v53, %v3175_v53  ;;  %v3495_v17 = vsel %vm553_vm0, %v9713_v51, 0 }
 0x9ac   :  { %3752 = vmatpush.bf16.msra.mxu1 %v9792_v45  ;;  %3503 = vmatpush.bf16.xpose.msrb.mxu0 %v3501_v41  ;;  %v9819_v34 = vpack.c.b16 %v3402_v13, %v3401_v15  ;;  %v3310_v14 = vpack.c.bf16 %v3173_v38, %v3173_v38  ;;  %v3190_v58 = vadd.f32 %v9705_v3, %v9716_v21  ;;  %v3492_v51 = vsel %vm553_vm0, %v3451_v24, 0 }
 0x9ad   :  { %4102 = vrot.lane.b32.xlu2 %v3742_v49, %s7499_s26  ;;  %v3449_v47 = vpack.c.b16 %v3436_v52, %v3435_v54  ;;  %v3392_v9 = vunpack.c.l.b16 %v3311_v33  ;;  %v3188_v23 = vadd.f32 %v9697_v28, %v9716_v21  ;;  %v3203_v32 = vadd.f32 %v9743_v55, %v9716_v21 }
 0x9ae   :  { %v3391_v56 = vunpack.c.l.b16 %v3310_v14  ;;  %v3480_v55 = vsel %vm553_vm0, %v9783_v40, 0 }
 0x9af   :  { %v3316_v41 = vpack.c.bf16 %v3188_v23, %v3188_v23  ;;  %v3322_v35 = vpack.c.bf16 %v3203_v32, %v3203_v32  ;;  %v3486_v21 = vsel %vm553_vm0, %v3449_v47, 0  ;;  %v7486_v32 = vld [vmem:[%s11468_s1 + $0x18] sm:$0xff] }
 0x9b0   :  { %3753 = vmatpush.bf16.msra.mxu1 %v3742_v49  ;;  %v3407_v48 = vpack.c.b16 %v3392_v9, %v3391_v56  ;;  %v3317_v49 = vpack.c.bf16 %v3190_v58, %v3190_v58  ;;  %v7483_v58 = vld [vmem:[%s11468_s1] sm:$0xff] }
 0x9b1   :  { %v3397_v28 = vunpack.c.l.b16 %v3316_v41  ;;  %v3403_v19 = vunpack.c.l.b16 %v3322_v35  ;;  %v7487_v35 = vld [vmem:[%s11468_s1 + $0x20] sm:$0xff] }
 0x9b2   :  { %3813 = vrot.lane.b32.xlu1 %v9806_v31, %s7499_s26  ;;  %v3398_v3 = vunpack.c.l.b16 %v3317_v49 }
 0x9b3   :  { %3833 = vrot.lane.b32.xlu0 %v3451_v24, %s7499_s26 }
 0x9b4   :  { %3754 = vmatpush.bf16.msra.mxu1 %v3741_v22  ;;  %3504 = vmatpush.bf16.xpose.msrb.mxu0 %v3498_v18  ;;  %v3410_v4 = vpack.c.b16 %v3398_v3, %v3397_v28  ;;  %v7485_v3 = vld [vmem:[%s11468_s1 + $0x10] sm:$0xff] }
 0x9b5   :  { %4092 = vrot.lane.b32.xlu2 %v9628_v60, %s7499_s26 }
 0x9b8   :  { %3755 = vmatpush.bf16.msra.mxu1 %v9700_v6 }
 0x9ba   :  { %3819 = vrot.lane.b32.xlu1 %v9819_v34, %s7499_s26 }
 0x9bb   :  { %3829 = vrot.lane.b32.xlu0 %v3449_v47, %s7499_s26 }
 0x9bc   :  { %3756 = vmatpush.bf16.msra.mxu1 %v9688_v50  ;;  %3505 = vmatpush.bf16.xpose.msrb.mxu0 %v3495_v17 }
 0x9c0   :  { %3757 = vmatpush.bf16.msra.mxu1 %v9632_v25 }
 0x9c2   :  { %4098 = vrot.lane.b32.xlu1 %v9700_v6, %s7499_s26  ;;  %v3323_v6 = vpack.c.bf16 %v3205_v36, %v3205_v36 }
 0x9c3   :  { %3809 = vrot.lane.b32.xlu0 %v3407_v48, %s7499_s26 }
 0x9c4   :  { %3758 = vmatpush.bf16.msra.mxu1 %v9628_v60  ;;  %3506 = vmatpush.bf16.xpose.msrb.mxu0 %v3492_v51  ;;  %v3489_v60 = vsel %vm553_vm0, %v9763_v2, 0  ;;  %v3404_v44 = vunpack.c.l.b16 %v3323_v6 }
 0x9c6   :  { %v3413_v1 = vpack.c.b16 %v3404_v44, %v3403_v19  ;;  %v7488_v19 = vld [vmem:[%s11468_s1 + $0x28] sm:$0xff] }
 0x9c8   :  { %3759 = vmatpush.bf16.msra.mxu1 %v9613_v11 }
 0x9ca   :  { %4096 = vrot.lane.b32.xlu1 %v9688_v50, %s7499_s26  ;;  %v3483_v50 = vsel %vm553_vm0, %v9723_v61, 0 }
 0x9cb   :  { %3815 = vrot.lane.b32.xlu0 %v3410_v4, %s7499_s26 }
 0x9cc   :  { %3507 = vmatpush.bf16.xpose.msrb.mxu0 %v3489_v60 }
 0x9d3   :  { %3821 = vrot.lane.b32.xlu0 %v3413_v1, %s7499_s26 }
 0x9d4   :  { %3508 = vmatpush.bf16.xpose.msrb.mxu0 %v3486_v21 }
 0x9db   :  { %4100 = vrot.lane.b32.xlu0 %v3741_v22, %s7499_s26 }
 0x9dc   :  { %3509 = vmatpush.bf16.xpose.msrb.mxu0 %v3483_v50  ;;  %v7489_v50 = vld [vmem:[%s11468_s1 + $0x30] sm:$0xff] }
 0x9e3   :  { %4094 = vrot.lane.b32.xlu0 %v9632_v25, %s7499_s26 }
 0x9e4   :  { %3510 = vmatpush.bf16.xpose.msrb.mxu0 %v3480_v55 }
 0x9eb   :  { %4104 = vrot.lane.b32.xlu0 %v9792_v45, %s7499_s26  ;;  %6484 = vmatmul.msk.bf16.vlgmr.msrb.gmra.mxu0 %vm553_vm0, %v3407_v48  ;;  %v3836_v45 = vpop.permute.xlu2 %3835  ;;  %v7484_v48 = vld [vmem:[%s11468_s1 + $0x8] sm:$0xff] }
 0x9f3   :  { %v3828_v16 = vpop.permute.xlu2 %3827 }
 0x9f4   :  { %v3869_v53 = vsel %vm553_vm0, %v3828_v16, 0 }
 0x9fb   :  { %6485 = vmatmul.msk.bf16.gmra.mxu0 %vm553_vm0, %v9729_v30  ;;  %v3881_v30 = vsel %vm553_vm0, %v3836_v45, 0  ;;  %v3812_v22 = vpop.permute.xlu2 %3811 }
 0xa03   :  { %v3818_v52 = vpop.permute.xlu2 %3817 }
 0xa0b   :  { %6486 = vmatmul.msk.bf16.gmra.mxu0 %vm553_vm0, %v9806_v31 }
 0xa0c   :  { %v3838_v2 = vpop.permute.xlu1 %3837 }
 0xa0d   :  { %v3884_v8 = vsel %vm553_vm0, %v3838_v2, 0 }
 0xa14   :  { %v3832_v46 = vpop.permute.xlu1 %3831 }
 0xa15   :  { %v3875_v10 = vsel %vm553_vm0, %v3832_v46, 0 }
 0xa1b   :  { %6487 = vmatmul.msk.bf16.gmra.mxu0 %vm553_vm0, %v3410_v4 }
 0xa1c   :  { %v3826_v26 = vpop.permute.xlu1 %3825 }
 0xa1d   :  { %v3840_v61 = vpop.permute.xlu0 %3839  ;;  %v3866_v54 = vsel %vm553_vm0, %v3826_v26, 0 }
 0xa1e   :  { %v3887_v25 = vsel %vm553_vm0, %v3840_v61, 0 }
 0xa1f   :  { %3889 = vmatpush.bf16.xpose.msrb.mxu2 %v3887_v25  ;;  %v7490_v25 = vld [vmem:[%s11468_s1 + $0x38] sm:$0xff] }
 0xa24   :  { %v3814_v15 = vpop.permute.xlu1 %3813 }
 0xa25   :  { %v3834_v40 = vpop.permute.xlu0 %3833 }
 0xa26   :  { %v3878_v59 = vsel %vm553_vm0, %v3834_v40, 0 }
 0xa27   :  { %3890 = vmatpush.bf16.xpose.msrb.mxu2 %v3884_v8 }
 0xa2b   :  { %6488 = vmatmul.msk.bf16.gmra.mxu0 %vm553_vm0, %v9733_v63 }
 0xa2c   :  { %v3820_v33 = vpop.permute.xlu1 %3819 }
 0xa2d   :  { %v3830_v43 = vpop.permute.xlu0 %3829 }
 0xa2e   :  { %v3872_v13 = vsel %vm553_vm0, %v3830_v43, 0 }
 0xa2f   :  { %3891 = vmatpush.bf16.xpose.msrb.mxu2 %v3881_v30 }
 0xa34   :  { %v4099_v17 = vpop.permute.xlu1 %4098 }
 0xa35   :  { %v3810_v31 = vpop.permute.xlu0 %3809 }
 0xa37   :  { %3892 = vmatpush.bf16.xpose.msrb.mxu2 %v3878_v59 }
 0xa3b   :  { %6489 = vmatmul.msk.bf16.gmra.mxu0 %vm553_vm0, %v9819_v34  ;;  %v3824_v34 = vpop.permute.xlu2 %3823 }
 0xa3c   :  { %v4097_v23 = vpop.permute.xlu1 %4096 }
 0xa3d   :  { %v3816_v24 = vpop.permute.xlu0 %3815 }
 0xa3f   :  { %3893 = vmatpush.bf16.xpose.msrb.mxu2 %v3875_v10 }
 0xa43   :  { %v4103_v14 = vpop.permute.xlu2 %4102 }
 0xa45   :  { %v9874_v63 = vpop.permute.xlu0 %3821 }
 0xa47   :  { %3894 = vmatpush.bf16.xpose.msrb.mxu2 %v3872_v13 }
 0xa4b   :  { %6490 = vmatmul.msk.bf16.gmra.mxu0 %vm553_vm0, %v3413_v1  ;;  %v4093_v41 = vpop.permute.xlu2 %4092 }
 0xa4d   :  { %v4101_v18 = vpop.permute.xlu0 %4100 }
 0xa4f   :  { %3895 = vmatpush.bf16.xpose.msrb.mxu2 %v3869_v53 }
 0xa55   :  { %v4095_v38 = vpop.permute.xlu0 %4094 }
 0xa57   :  { %3896 = vmatpush.bf16.xpose.msrb.mxu2 %v3866_v54 }
 0xa5b   :  { %6491 = vmatmul.msk.bf16.gmra.mxu0 %vm553_vm0, %v9773_v37 }
 0xa5d   :  { %v4105_v47 = vpop.permute.xlu0 %4104 }
 0xa5e   :  { %6492 = vmatmul.msk.bf16.vlgmr.msrb.gmra.mxu2 %vm553_vm0, %v3810_v31  ;;  %4114 = vmatpush.bf16.msrb.mxu3 %v4105_v47 }
 0xa62   :  { %4115 = vmatpush.bf16.msrb.mxu3 %v4103_v14 }
 0xa66   :  { %4116 = vmatpush.bf16.msrb.mxu3 %v4101_v18 }
 0xa68   :  { %v3512_v9 = vpop.f32.mrf.mxu0 }
 0xa69   :  { %v3513_v56 = vadd.f32 %v7483_v58, %v3512_v9 }
 0xa6a   :  { %4117 = vmatpush.bf16.msrb.mxu3 %v4099_v17 }
 0xa6b   :  { %3552 = vmax.xlane.f32.xlu2 %v3513_v56 }
 0xa6e   :  { %6493 = vmatmul.msk.bf16.gmra.mxu2 %vm553_vm0, %v3812_v22  ;;  %4118 = vmatpush.bf16.msrb.mxu3 %v4097_v23  ;;  %v7491_v23 = vld [vmem:[%s11468_s1 + $0x40] sm:$0xff] }
 0xa70   :  { %v3514_v37 = vpop.f32.mrf.mxu0 }
 0xa71   :  { %v3515_v49 = vadd.f32 %v7484_v48, %v3514_v37 }
 0xa72   :  { %4119 = vmatpush.bf16.msrb.mxu3 %v4095_v38 }
 0xa73   :  { %3554 = vmax.xlane.f32.xlu1 %v3515_v49 }
 0xa76   :  { %4120 = vmatpush.bf16.msrb.mxu3 %v4093_v41 }
 0xa78   :  { %v3517_v51 = vpop.f32.mrf.mxu0 }
 0xa79   :  { %v9893_v36 = vadd.f32 %v7485_v3, %v3517_v51  ;;  %v9978_v51 = vld [vmem:[%s11468_s1 + $0x48] sm:$0xff] }
 0xa7b   :  { %3556 = vmax.xlane.f32.xlu1 %v9893_v36 }
 0xa7e   :  { %6494 = vmatmul.msk.bf16.gmra.mxu2 %vm553_vm0, %v3814_v15 }
 0xa80   :  { %v3519_v28 = vpop.f32.mrf.mxu0 }
 0xa81   :  { %v9900_v4 = vadd.f32 %v7486_v32, %v3519_v28 }
 0xa83   :  { %3558 = vmax.xlane.f32.xlu0 %v9900_v4 }
 0xa88   :  { %v3522_v6 = vpop.f32.mrf.mxu0 }
 0xa89   :  { %v9906_v60 = vadd.f32 %v7487_v35, %v3522_v6  ;;  %v7493_v6 = vld [vmem:[%s11468_s1 + $0x50] sm:$0xff] }
 0xa8b   :  { %3560 = vmax.xlane.f32.xlu1 %v9906_v60 }
 0xa8e   :  { %6495 = vmatmul.msk.bf16.gmra.mxu2 %vm553_vm0, %v3816_v24 }
 0xa90   :  { %v3524_v44 = vpop.f32.mrf.mxu0 }
 0xa91   :  { %v9913_v1 = vadd.f32 %v7488_v19, %v3524_v44 }
 0xa93   :  { %3562 = vmax.xlane.f32.xlu1 %v9913_v1 }
 0xa98   :  { %v3527_v21 = vpop.f32.mrf.mxu0 }
 0xa99   :  { %v9919_v55 = vadd.f32 %v7489_v50, %v3527_v21 }
 0xa9b   :  { %3564 = vmax.xlane.f32.xlu2 %v9919_v55 }
 0xa9e   :  { %6496 = vmatmul.msk.bf16.gmra.mxu2 %vm553_vm0, %v3818_v52 }
 0xaa0   :  { %v3529_v61 = vpop.f32.mrf.mxu0 }
 0xaa1   :  { %v9926_v2 = vadd.f32 %v7490_v25, %v3529_v61 }
 0xaa3   :  { %3566 = vmax.xlane.f32.xlu2 %v9926_v2 }
 0xaae   :  { %6497 = vmatmul.msk.bf16.gmra.mxu2 %vm553_vm0, %v3820_v33  ;;  %v3532_v33 = vpop.f32.mrf.mxu0 }
 0xaaf   :  { %v9967_v37 = vadd.f32 %v7491_v23, %v3532_v33 }
 0xabe   :  { %6498 = vmatmul.msk.bf16.gmra.mxu2 %vm553_vm0, %v9874_v63 }
 0xace   :  { %6499 = vmatmul.msk.bf16.gmra.mxu2 %vm553_vm0, %v3824_v34 }
 0xade   :  { %v3553_v8 = vpop.xlane.xlu2 %3552 }
 0xadf   :  { %v3584_v43 = vsub.f32 %v3513_v56, %v3553_v8 }
 0xae1   :  { %v3898_v40 = vpop.f32.mrf.mxu2  ;;  %v3600_v59 = vmul.f32 1.442695, %v3584_v43 }
 0xae2   :  { %v9933_v45 = vadd.f32 %v7483_v58, %v3898_v40 }
 0xae4   :  { %3938 = vmax.xlane.f32.xlu1 %v9933_v45 }
 0xae6   :  { %v3555_v30 = vpop.xlane.xlu1 %3554 }
 0xae7   :  { %v3585_v31 = vsub.f32 %v3515_v49, %v3555_v30  ;;  %v3534_v49 = vpop.f32.mrf.mxu0 }
 0xae9   :  { %v3602_v16 = vmul.f32 1.442695, %v3585_v31  ;;  %v3900_v46 = vpop.f32.mrf.mxu2 }
 0xaea   :  { %v9936_v24 = vadd.f32 %v7484_v48, %v3900_v46 }
 0xaeb   :  { %7203 = vpow2.f32 %v3602_v16 }
 0xaec   :  { %3940 = vmax.xlane.f32.xlu0 %v9936_v24  ;;  %7205 = vpow2.f32 %v3600_v59 }
 0xaee   :  { %v3557_v14 = vpop.xlane.xlu1 %3556 }
 0xaef   :  { %v3586_v9 = vsub.f32 %v9893_v36, %v3557_v14  ;;  %v3537_v28 = vpop.f32.mrf.mxu0 }
 0xaf1   :  { %v9939_v10 = vpop.eup %7203  ;;  %v3903_v22 = vpop.f32.mrf.mxu2  ;;  %v3604_v58 = vmul.f32 1.442695, %v3586_v9 }
 0xaf2   :  { %3634 = vadd.xlane.f32.xlu1 %v9939_v10  ;;  %v9942_v26 = vpop.eup %7205  ;;  %v9945_v13 = vadd.f32 %v7485_v3, %v3903_v22  ;;  %v9981_v3 = vadd.f32 %v9978_v51, %v3534_v49 }
 0xaf3   :  { %7207 = vpow2.f32 %v3604_v58 }
 0xaf4   :  { %3632 = vadd.xlane.f32.xlu0 %v9942_v26 }
 0xaf7   :  { %v3539_v44 = vpop.f32.mrf.mxu0 }
 0xaf9   :  { %v3905_v63 = vpop.f32.mrf.mxu2  ;;  %v9983_v36 = vpop.eup %7207 }
 0xafa   :  { %v9947_v18 = vadd.f32 %v7486_v32, %v3905_v63 }
 0xafc   :  { %3944 = vmax.xlane.f32.xlu2 %v9947_v18  ;;  %3942 = vmax.xlane.f32.xlu0 %v9945_v13 }
 0xb01   :  { %v3908_v53 = vpop.f32.mrf.mxu2 }
 0xb02   :  { %v9951_v52 = vadd.f32 %v7487_v35, %v3908_v53 }
 0xb04   :  { %3946 = vmax.xlane.f32.xlu2 %v9951_v52 }
 0xb09   :  { %v3910_v15 = vpop.f32.mrf.mxu2 }
 0xb0a   :  { %v9954_v38 = vadd.f32 %v7488_v19, %v3910_v15  ;;  %v7494_v19 = vld [vmem:[%s11468_s1 + $0x58] sm:$0xff] }
 0xb0b   :  { %v9996_v21 = vadd.f32 %v7494_v19, %v3539_v44 }
 0xb0c   :  { %3948 = vmax.xlane.f32.xlu1 %v9954_v38 }
 0xb0e   :  { %v3565_v30 = vpop.xlane.xlu2 %3564 }
 0xb11   :  { %v3913_v54 = vpop.f32.mrf.mxu2 }
 0xb12   :  { %v9957_v34 = vadd.f32 %v7489_v50, %v3913_v54  ;;  %v9999_v50 = vpop.xlane.xlu1 %3560 }
 0xb14   :  { %3950 = vmax.xlane.f32.xlu2 %v9957_v34 }
 0xb19   :  { %v3915_v47 = vpop.f32.mrf.mxu2 }
 0xb1a   :  { %v9960_v17 = vadd.f32 %v7490_v25, %v3915_v47  ;;  %v3563_v61 = vpop.xlane.xlu1 %3562  ;;  %v3559_v25 = vpop.xlane.xlu0 %3558 }
 0xb1b   :  { %v3587_v22 = vsub.f32 %v9900_v4, %v3559_v25 }
 0xb1c   :  { %3952 = vmax.xlane.f32.xlu0 %v9960_v17 }
 0xb1d   :  { %v3606_v15 = vmul.f32 1.442695, %v3587_v22 }
 0xb21   :  { %v3918_v56 = vpop.f32.mrf.mxu2 }
 0xb22   :  { %v9969_v48 = vadd.f32 %v7491_v23, %v3918_v56 }
 0xb24   :  { %3954 = vmax.xlane.f32.xlu2 %v9969_v48  ;;  %3568 = vmax.xlane.f32.xlu0 %v9967_v37 }
 0xb29   :  { %v9973_v41 = vpop.f32.mrf.mxu2 }
 0xb2c   :  { %3570 = vmax.xlane.f32.xlu2 %v9981_v3  ;;  %3636 = vadd.xlane.f32.xlu0 %v9983_v36 }
 0xb31   :  { %v3923_v32 = vpop.f32.mrf.mxu2 }
 0xb32   :  { %v9990_v35 = vadd.f32 %v7493_v6, %v3923_v32 }
 0xb34   :  { %3958 = vmax.xlane.f32.xlu0 %v9990_v35 }
 0xb39   :  { %v3925_v44 = vpop.f32.mrf.mxu2 }
 0xb3c   :  { %3574 = vmax.xlane.f32.xlu0 %v9996_v21 }
 0xb57   :  { %v3939_v40 = vpop.xlane.xlu1 %3938 }
 0xb58   :  { %v3970_v8 = vsub.f32 %v9933_v45, %v3939_v40  ;;  %v10007_v45 = vpop.xlane.xlu2 %3566  ;;  %v10019_v40 = vadd.f32 %v7494_v19, %v3925_v44  ;;  %v10034_v19 = vpop.f32.mrf.mxu0 }
 0xb5a   :  { %v3986_v43 = vmul.f32 1.442695, %v3970_v8  ;;  %v10028_v8 = vadd.f32 %v7493_v6, %v3537_v28 }
 0xb5c   :  { %7209 = vpow2.f32 %v3986_v43 }
 0xb5f   :  { %v3941_v31 = vpop.xlane.xlu0 %3940 }
 0xb60   :  { %v3971_v59 = vsub.f32 %v9936_v24, %v3941_v31  ;;  %v3544_v22 = vpop.f32.mrf.mxu0 }
 0xb62   :  { %v10003_v16 = vpop.eup %7209  ;;  %v3988_v46 = vmul.f32 1.442695, %v3971_v59 }
 0xb63   :  { %4018 = vadd.xlane.f32.xlu1 %v10003_v16 }
 0xb64   :  { %7211 = vpow2.f32 %v3988_v46  ;;  %v3590_v46 = vsub.f32 %v9919_v55, %v3565_v30 }
 0xb65   :  { %v3635_v63 = vpop.xlane.xlu1 %3634 }
 0xb66   :  { %7213 = vrcp.f32 %v3635_v63  ;;  %v3612_v63 = vmul.f32 1.442695, %v3590_v46 }
 0xb67   :  { %v3633_v53 = vpop.xlane.xlu0 %3632 }
 0xb68   :  { %7215 = vrcp.f32 %v3633_v53 }
 0xb69   :  { %7217 = vpow2.f32 %v3606_v15  ;;  %v7496_v15 = vld [vmem:[%s11468_s1 + $0x68] sm:$0xff] }
 0xb6a   :  { %v10009_v54 = vpop.eup %7211 }
 0xb6b   :  { %4020 = vadd.xlane.f32.xlu2 %v10009_v54 }
 0xb6c   :  { %v7214_v24 = vpop.eup %7213 }
 0xb6d   :  { %v3681_v47 = vmul.f32 %v7214_v24, %v9939_v10  ;;  %v10054_v24 = vadd.f32 %v7496_v15, %v3544_v22 }
 0xb6e   :  { %v7216_v33 = vpop.eup %7215 }
 0xb6f   :  { %v3680_v14 = vmul.f32 %v7216_v33, %v9942_v26  ;;  %v3943_v4 = vpop.xlane.xlu0 %3942  ;;  %v3945_v56 = vpop.xlane.xlu2 %3944  ;;  %v3589_v26 = vsub.f32 %v9913_v1, %v3563_v61 }
 0xb70   :  { %v3972_v9 = vsub.f32 %v9945_v13, %v3943_v4  ;;  %v10015_v23 = vpop.eup %7217  ;;  %v3973_v32 = vsub.f32 %v9947_v18, %v3945_v56  ;;  %v3928_v1 = vpop.f32.mrf.mxu2 }
 0xb71   :  { %v3696_v58 = vpack.c.bf16 %v3681_v47, %v3680_v14  ;;  %v3610_v13 = vmul.f32 1.442695, %v3589_v26 }
 0xb72   :  { %v3990_v49 = vmul.f32 1.442695, %v3972_v9  ;;  %v3992_v25 = vmul.f32 1.442695, %v3973_v32 }
 0xb73   :  { %3638 = vadd.xlane.f32.xlu2 %v10015_v23  ;;  %3760 = vmatmul.bf16.vlgmr.msra.gmra.mxu1 %v3696_v58  ;;  %v3588_v58 = vsub.f32 %v9906_v60, %v9999_v50 }
 0xb74   :  { %7219 = vpow2.f32 %v3990_v49  ;;  %v7497_v49 = vld [vmem:[%s11468_s1 + $0x70] sm:$0xff] }
 0xb75   :  { %7221 = vpow2.f32 %v3992_v25  ;;  %v3608_v44 = vmul.f32 1.442695, %v3588_v58  ;;  %v10080_v25 = vadd.f32 %v9978_v51, %v9973_v41 }
 0xb76   :  { %7223 = vpow2.f32 %v3610_v13  ;;  %v7498_v13 = vld [vmem:[%s11468_s1 + $0x78] sm:$0xff] }
 0xb77   :  { %v3947_v18 = vpop.xlane.xlu2 %3946 }
 0xb78   :  { %v3974_v31 = vsub.f32 %v9951_v52, %v3947_v18  ;;  %v3930_v55 = vpop.f32.mrf.mxu2 }
 0xb7a   :  { %v10021_v10 = vpop.eup %7219  ;;  %v3994_v61 = vmul.f32 1.442695, %v3974_v31 }
 0xb7b   :  { %3960 = vmax.xlane.f32.xlu2 %v10019_v40  ;;  %4022 = vadd.xlane.f32.xlu0 %v10021_v10  ;;  %v10030_v43 = vpop.eup %7221 }
 0xb7c   :  { %4090 = vrot.lane.b32.xlu1 %v9613_v11, %s7499_s26  ;;  %v10040_v11 = vld [vmem:[%s11468_s1 + $0x60] sm:$0xff]  ;;  %v10045_v59 = vpop.eup %7223  ;;  %7225 = vpow2.f32 %v3994_v61  ;;  %v3547_v61 = vpop.f32.mrf.mxu0 }
 0xb7d   :  { %v10043_v28 = vadd.f32 %v10040_v11, %v3928_v1  ;;  %7227 = vpow2.f32 %v3612_v63  ;;  %v3591_v63 = vsub.f32 %v9926_v2, %v10007_v45 }
 0xb7f   :  { %v3949_v26 = vpop.xlane.xlu1 %3948 }
 0xb80   :  { %v3933_v9 = vpop.f32.mrf.mxu2  ;;  %v3975_v50 = vsub.f32 %v9954_v38, %v3949_v26  ;;  %v10094_v38 = vadd.f32 %v7497_v49, %v3547_v61 }
 0xb82   :  { %v10056_v47 = vpop.eup %7225  ;;  %v3996_v1 = vmul.f32 1.442695, %v3975_v50 }
 0xb83   :  { %3572 = vmax.xlane.f32.xlu2 %v10028_v8  ;;  %4024 = vadd.xlane.f32.xlu0 %v10030_v43  ;;  %v10061_v14 = vpop.eup %7227 }
 0xb84   :  { %v3549_v45 = vpop.f32.mrf.mxu0 }
 0xb87   :  { %v3951_v6 = vpop.xlane.xlu2 %3950 }
 0xb88   :  { %v3976_v52 = vsub.f32 %v9957_v34, %v3951_v6  ;;  %v3935_v60 = vpop.f32.mrf.mxu2 }
 0xb89   :  { %v10087_v18 = vadd.f32 %v7498_v13, %v3935_v60 }
 0xb8a   :  { %v3998_v53 = vmul.f32 1.442695, %v3976_v52 }
 0xb8b   :  { %3642 = vadd.xlane.f32.xlu2 %v10045_v59  ;;  %3962 = vmax.xlane.f32.xlu0 %v10043_v28 }
 0xb8c   :  { %7229 = vpow2.f32 %v3998_v53  ;;  %v3614_v53 = vmul.f32 1.442695, %v3591_v63 }
 0xb8f   :  { %v3953_v33 = vpop.xlane.xlu0 %3952 }
 0xb90   :  { %v3977_v34 = vsub.f32 %v9960_v17, %v3953_v33  ;;  %v10072_v17 = vadd.f32 %v7497_v49, %v3933_v9  ;;  %v10112_v33 = vadd.f32 %v10040_v11, %v10034_v19  ;;  %v10123_v49 = vadd.f32 %v7498_v13, %v3549_v45 }
 0xb92   :  { %v4000_v30 = vmul.f32 1.442695, %v3977_v34  ;;  %v10063_v4 = vpop.eup %7229 }
 0xb93   :  { %3578 = vmax.xlane.f32.xlu2 %v10054_v24  ;;  %4026 = vadd.xlane.f32.xlu0 %v10056_v47 }
 0xb94   :  { %7231 = vpow2.f32 %v4000_v30 }
 0xb95   :  { %7233 = vpow2.f32 %v3608_v44 }
 0xb96   :  { %7235 = vpow2.f32 %v3996_v1 }
 0xb97   :  { %v3955_v56 = vpop.xlane.xlu2 %3954  ;;  %v10105_v22 = vpop.xlane.xlu0 %3568 }
 0xb98   :  { %v3978_v34 = vsub.f32 %v9969_v48, %v3955_v56 }
 0xb9a   :  { %v10074_v32 = vpop.eup %7231 }
 0xb9b   :  { %3644 = vadd.xlane.f32.xlu0 %v10061_v14  ;;  %4030 = vadd.xlane.f32.xlu2 %v10063_v4  ;;  %v10091_v51 = vpop.eup %7233 }
 0xb9c   :  { %v10097_v46 = vpop.eup %7235 }
 0xb9f   :  { %v3571_v31 = vpop.xlane.xlu2 %3570  ;;  %v3637_v30 = vpop.xlane.xlu0 %3636 }
 0xba0   :  { %v3593_v41 = vsub.f32 %v9981_v3, %v3571_v31  ;;  %v10103_v3 = vadd.f32 %v7496_v15, %v3930_v55  ;;  %v4002_v15 = vmul.f32 1.442695, %v3978_v34 }
 0xba2   :  { %v3618_v6 = vmul.f32 1.442695, %v3593_v41 }
 0xba3   :  { %4032 = vadd.xlane.f32.xlu0 %v10074_v32  ;;  %3966 = vmax.xlane.f32.xlu2 %v10072_v17 }
 0xba4   :  { %7237 = vpow2.f32 %v3618_v6 }
 0xba5   :  { %7239 = vpow2.f32 %v3614_v53 }
 0xba6   :  { %3956 = vmax.xlane.f32.xlu1 %v10080_v25  ;;  %7241 = vpow2.f32 %v4002_v15 }
 0xba7   :  { %v3959_v9 = vpop.xlane.xlu0 %3958 }
 0xba8   :  { %v3980_v2 = vsub.f32 %v9990_v35, %v3959_v9 }
 0xbaa   :  { %v10100_v52 = vpop.eup %7237  ;;  %v4006_v19 = vmul.f32 1.442695, %v3980_v2 }
 0xbab   :  { %3968 = vmax.xlane.f32.xlu0 %v10087_v18  ;;  %v10116_v55 = vpop.eup %7239 }
 0xbac   :  { %v10119_v58 = vpop.eup %7241  ;;  %7243 = vpow2.f32 %v4006_v19 }
 0xbae   :  { %3640 = vadd.xlane.f32.xlu1 %v10091_v51 }
 0xbaf   :  { %v3575_v11 = vpop.xlane.xlu0 %3574 }
 0xbb0   :  { %v3595_v48 = vsub.f32 %v9996_v21, %v3575_v11 }
 0xbb2   :  { %v3622_v44 = vmul.f32 1.442695, %v3595_v48  ;;  %v10127_v60 = vpop.eup %7243 }
 0xbb3   :  { %3580 = vmax.xlane.f32.xlu0 %v10094_v38 }
 0xbb6   :  { %4028 = vadd.xlane.f32.xlu1 %v10097_v46 }
 0xbbb   :  { %3650 = vadd.xlane.f32.xlu0 %v10100_v52 }
 0xbbe   :  { %3964 = vmax.xlane.f32.xlu1 %v10103_v3 }
 0xbc6   :  { %3576 = vmax.xlane.f32.xlu1 %v10112_v33 }
 0xbce   :  { %3646 = vadd.xlane.f32.xlu1 %v10116_v55 }
 0xbd6   :  { %4034 = vadd.xlane.f32.xlu1 %v10119_v58  ;;  %v4019_v26 = vpop.xlane.xlu1 %4018 }
 0xbde   :  { %3582 = vmax.xlane.f32.xlu1 %v10123_v49  ;;  %v4021_v56 = vpop.xlane.xlu2 %4020 }
 0xbdf   :  { %7245 = vrcp.f32 %v4021_v56 }
 0xbe0   :  { %7247 = vrcp.f32 %v3637_v30 }
 0xbe1   :  { %7249 = vrcp.f32 %v4019_v26 }
 0xbe2   :  { %7251 = vpow2.f32 %v3622_v44 }
 0xbe5   :  { %v7246_v50 = vpop.eup %7245 }
 0xbe6   :  { %4038 = vadd.xlane.f32.xlu1 %v10127_v60  ;;  %v3639_v35 = vpop.xlane.xlu2 %3638  ;;  %v7248_v13 = vpop.eup %7247  ;;  %v4067_v1 = vmul.f32 %v7246_v50, %v10009_v54 }
 0xbe7   :  { %7253 = vrcp.f32 %v3639_v35  ;;  %v7250_v31 = vpop.eup %7249  ;;  %v3682_v53 = vmul.f32 %v7248_v13, %v9983_v36 }
 0xbe8   :  { %v10130_v21 = vpop.eup %7251  ;;  %v4066_v61 = vmul.f32 %v7250_v31, %v10003_v16  ;;  %v3592_v31 = vsub.f32 %v9967_v37, %v10105_v22 }
 0xbea   :  { %v4082_v15 = vpack.c.bf16 %v4067_v1, %v4066_v61 }
 0xbed   :  { %v7254_v41 = vpop.eup %7253 }
 0xbee   :  { %v4091_v6 = vpop.permute.xlu1 %4090  ;;  %v4023_v63 = vpop.xlane.xlu0 %4022  ;;  %3654 = vadd.xlane.f32.xlu1 %v10130_v21  ;;  %v3683_v34 = vmul.f32 %v7254_v41, %v10015_v23  ;;  %v3616_v41 = vmul.f32 1.442695, %v3592_v31 }
 0xbef   :  { %v3961_v30 = vpop.xlane.xlu2 %3960  ;;  %4121 = vmatpush.bf16.msrb.mxu3 %v4091_v6  ;;  %7255 = vrcp.f32 %v4023_v63 }
 0xbf0   :  { %v3697_v9 = vpack.c.bf16 %v3683_v34, %v3682_v53 }
 0xbf2   :  { %3765 = vmatmul.bf16.gmra.mxu1 %v3697_v9  ;;  %4122 = vmatmul.bf16.vlgmr.msrb.gmra.mxu3 %v4082_v15 }
 0xbf5   :  { %v7256_v19 = vpop.eup %7255 }
 0xbf6   :  { %v4025_v2 = vpop.xlane.xlu0 %4024  ;;  %v4068_v36 = vmul.f32 %v7256_v19, %v10021_v10 }
 0xbf7   :  { %7257 = vrcp.f32 %v4025_v2  ;;  %v3573_v54 = vpop.xlane.xlu2 %3572 }
 0xbf8   :  { %v3594_v16 = vsub.f32 %v10028_v8, %v3573_v54 }
 0xbfa   :  { %v3620_v45 = vmul.f32 1.442695, %v3594_v16 }
 0xbfc   :  { %7259 = vpow2.f32 %v3620_v45 }
 0xbfd   :  { %v7258_v11 = vpop.eup %7257 }
 0xbfe   :  { %v4069_v23 = vmul.f32 %v7258_v11, %v10030_v43  ;;  %v3963_v44 = vpop.xlane.xlu0 %3962 }
 0xbff   :  { %v3643_v35 = vpop.xlane.xlu2 %3642  ;;  %v3982_v16 = vsub.f32 %v10043_v28, %v3963_v44 }
 0xc00   :  { %v4083_v48 = vpack.c.bf16 %v4069_v23, %v4068_v36 }
 0xc01   :  { %v4010_v45 = vmul.f32 1.442695, %v3982_v16 }
 0xc02   :  { %v10140_v56 = vpop.eup %7259  ;;  %4127 = vmatmul.bf16.gmra.mxu3 %v4083_v48 }
 0xc03   :  { %3652 = vadd.xlane.f32.xlu0 %v10140_v56 }
 0xc06   :  { %v4027_v26 = vpop.xlane.xlu0 %4026 }
 0xc07   :  { %v3579_v10 = vpop.xlane.xlu2 %3578 }
 0xc08   :  { %v3597_v44 = vsub.f32 %v10054_v24, %v3579_v10 }
 0xc0e   :  { %v10146_v1 = vpop.xlane.xlu0 %3644 }
 0xc0f   :  { %v4031_v9 = vpop.xlane.xlu2 %4030 }
 0xc16   :  { %v4033_v53 = vpop.xlane.xlu0 %4032 }
 0xc19   :  { %v3957_v50 = vpop.xlane.xlu1 %3956 }
 0xc1a   :  { %v3979_v8 = vsub.f32 %v10080_v25, %v3957_v50  ;;  %v3981_v25 = vsub.f32 %v10019_v40, %v3961_v30 }
 0xc1c   :  { %v4004_v13 = vmul.f32 1.442695, %v3979_v8  ;;  %v4008_v15 = vmul.f32 1.442695, %v3981_v25 }
 0xc1e   :  { %7261 = vpow2.f32 %v4004_v13  ;;  %v3969_v11 = vpop.xlane.xlu0 %3968 }
 0xc1f   :  { %7263 = vrcp.f32 %v3643_v35  ;;  %v3626_v35 = vmul.f32 1.442695, %v3597_v44 }
 0xc21   :  { %v3641_v43 = vpop.xlane.xlu1 %3640 }
 0xc22   :  { %7265 = vrcp.f32 %v3641_v43 }
 0xc23   :  { %7267 = vpow2.f32 %v3616_v41 }
 0xc24   :  { %v10148_v61 = vpop.eup %7261  ;;  %7269 = vrcp.f32 %v4027_v26  ;;  %v3967_v26 = vpop.xlane.xlu2 %3966 }
 0xc25   :  { %4036 = vadd.xlane.f32.xlu2 %v10148_v61  ;;  %v7264_v6 = vpop.eup %7263 }
 0xc26   :  { %v3685_v34 = vmul.f32 %v7264_v6, %v10045_v59  ;;  %v3581_v31 = vpop.xlane.xlu0 %3580 }
 0xc28   :  { %v7266_v63 = vpop.eup %7265 }
 0xc29   :  { %v4029_v37 = vpop.xlane.xlu1 %4028  ;;  %v3684_v22 = vmul.f32 %v7266_v63, %v10091_v51  ;;  %v10154_v54 = vpop.eup %7267 }
 0xc2a   :  { %7271 = vrcp.f32 %v4029_v37  ;;  %v7270_v40 = vpop.eup %7269 }
 0xc2b   :  { %v3698_v2 = vpack.c.bf16 %v3685_v34, %v3684_v22  ;;  %7273 = vpow2.f32 %v4008_v15  ;;  %v4070_v51 = vmul.f32 %v7270_v40, %v10056_v47  ;;  %v3984_v47 = vsub.f32 %v10072_v17, %v3967_v26  ;;  %v6864_v40 = vld [vmem:[%s11469_s4 + $0x78] sm:$0xff] }
 0xc2c   :  { %7275 = vpow2.f32 %v4010_v45  ;;  %v3985_v17 = vsub.f32 %v10087_v18, %v3969_v11  ;;  %4223 = vmatpush.bf16.msra.mxu0 %v6864_v40 }
 0xc2d   :  { %3648 = vadd.xlane.f32.xlu2 %v10154_v54  ;;  %3770 = vmatmul.bf16.gmra.mxu1 %v3698_v2  ;;  %v4014_v8 = vmul.f32 1.442695, %v3984_v47 }
 0xc2e   :  { %v4016_v25 = vmul.f32 1.442695, %v3985_v17  ;;  %v3651_v47 = vpop.xlane.xlu0 %3650 }
 0xc30   :  { %v7272_v30 = vpop.eup %7271 }
 0xc31   :  { %v3965_v19 = vpop.xlane.xlu1 %3964  ;;  %v4071_v59 = vmul.f32 %v7272_v30, %v10097_v46  ;;  %v10161_v48 = vpop.eup %7273 }
 0xc32   :  { %v3983_v36 = vsub.f32 %v10103_v3, %v3965_v19  ;;  %v10167_v50 = vpop.eup %7275  ;;  %v6862_v19 = vld [vmem:[%s11469_s4 + $0x68] sm:$0xff] }
 0xc33   :  { %v4084_v23 = vpack.c.bf16 %v4071_v59, %v4070_v51 }
 0xc34   :  { %v4012_v28 = vmul.f32 1.442695, %v3983_v36 }
 0xc35   :  { %4132 = vmatmul.bf16.gmra.mxu3 %v4084_v23  ;;  %4040 = vadd.xlane.f32.xlu2 %v10161_v48 }
 0xc36   :  { %7277 = vpow2.f32 %v4012_v28 }
 0xc37   :  { %7279 = vrcp.f32 %v4033_v53 }
 0xc38   :  { %7281 = vrcp.f32 %v4031_v9 }
 0xc39   :  { %v3577_v46 = vpop.xlane.xlu1 %3576  ;;  %7283 = vpow2.f32 %v3626_v35 }
 0xc3a   :  { %v3596_v3 = vsub.f32 %v10112_v33, %v3577_v46  ;;  %v3598_v33 = vsub.f32 %v10094_v38, %v3581_v31 }
 0xc3c   :  { %v10169_v13 = vpop.eup %7277  ;;  %v3624_v43 = vmul.f32 1.442695, %v3596_v3  ;;  %v3628_v37 = vmul.f32 1.442695, %v3598_v33 }
 0xc3d   :  { %v7280_v24 = vpop.eup %7279  ;;  %4042 = vadd.xlane.f32.xlu2 %v10167_v50  ;;  %4044 = vadd.xlane.f32.xlu0 %v10169_v13 }
 0xc3e   :  { %7285 = vpow2.f32 %v3624_v43  ;;  %v7282_v10 = vpop.eup %7281  ;;  %v4073_v41 = vmul.f32 %v7280_v24, %v10074_v32 }
 0xc3f   :  { %7287 = vpow2.f32 %v4014_v8  ;;  %v4072_v63 = vmul.f32 %v7282_v10, %v10063_v4  ;;  %v10178_v53 = vpop.eup %7283 }
 0xc40   :  { %7289 = vrcp.f32 %v10146_v1 }
 0xc41   :  { %v3647_v6 = vpop.xlane.xlu1 %3646  ;;  %v4085_v18 = vpack.c.bf16 %v4073_v41, %v4072_v63 }
 0xc42   :  { %7291 = vrcp.f32 %v3647_v6 }
 0xc43   :  { %7293 = vpow2.f32 %v4016_v25 }
 0xc44   :  { %v10180_v22 = vpop.eup %7285  ;;  %7295 = vpow2.f32 %v3628_v37 }
 0xc45   :  { %v10182_v34 = vpop.eup %7287  ;;  %3656 = vadd.xlane.f32.xlu1 %v10180_v22  ;;  %3658 = vadd.xlane.f32.xlu2 %v10178_v53 }
 0xc46   :  { %v7290_v38 = vpop.eup %7289  ;;  %4137 = vmatmul.bf16.gmra.mxu3 %v4085_v18  ;;  %4046 = vadd.xlane.f32.xlu0 %v10182_v34 }
 0xc47   :  { %v3686_v1 = vmul.f32 %v7290_v38, %v10061_v14 }
 0xc48   :  { %v7292_v32 = vpop.eup %7291 }
 0xc49   :  { %v4035_v4 = vpop.xlane.xlu1 %4034  ;;  %v3687_v15 = vmul.f32 %v7292_v32, %v10116_v55  ;;  %v10189_v2 = vpop.eup %7293  ;;  %v6863_v55 = vld [vmem:[%s11469_s4 + $0x70] sm:$0xff] }
 0xc4a   :  { %v10191_v16 = vpop.eup %7295  ;;  %4224 = vmatpush.bf16.msra.mxu0 %v6863_v55 }
 0xc4b   :  { %v3699_v9 = vpack.c.bf16 %v3687_v15, %v3686_v1 }
 0xc4d   :  { %4048 = vadd.xlane.f32.xlu1 %v10189_v2  ;;  %3775 = vmatmul.bf16.gmra.mxu1 %v3699_v9 }
 0xc4e   :  { %3660 = vadd.xlane.f32.xlu2 %v10191_v16  ;;  %4225 = vmatpush.bf16.msra.mxu0 %v6862_v19 }
 0xc51   :  { %v3583_v30 = vpop.xlane.xlu1 %3582 }
 0xc52   :  { %v3599_v14 = vsub.f32 %v10123_v49, %v3583_v30  ;;  %v6861_v49 = vld [vmem:[%s11469_s4 + $0x60] sm:$0xff] }
 0xc53   :  { %4226 = vmatpush.bf16.msra.mxu0 %v6861_v49 }
 0xc54   :  { %v3630_v45 = vmul.f32 1.442695, %v3599_v14 }
 0xc56   :  { %7297 = vpow2.f32 %v3630_v45 }
 0xc57   :  { %7299 = vrcp.f32 %v4035_v4 }
 0xc59   :  { %v4039_v43 = vpop.xlane.xlu1 %4038 }
 0xc5c   :  { %v10205_v51 = vpop.eup %7297 }
 0xc5d   :  { %3662 = vadd.xlane.f32.xlu0 %v10205_v51  ;;  %v7300_v35 = vpop.eup %7299 }
 0xc5e   :  { %v4074_v8 = vmul.f32 %v7300_v35, %v10119_v58  ;;  %v6860_v58 = vld [vmem:[%s11469_s4 + $0x58] sm:$0xff] }
 0xc5f   :  { %4320 = vmatpush.bf16.msrb.mxu1 %v6860_v58 }
 0xc75   :  { %v4123_v59 = vpop.f32.mrf.mxu3 }
 0xc76   :  { %v3653_v25 = vpop.xlane.xlu0 %3652 }
 0xc7d   :  { %v4125_v11 = vpop.f32.mrf.mxu3 }
 0xc7e   :  { %v4163_v36 = vpack.c.bf16 %v4125_v11, %v4123_v59 }
 0xc80   :  { %6516 = vmatmul.msk.bf16.vlgmr.msra.gmra.mxu0 %vm553_vm0, %v4163_v36 }
 0xc85   :  { %v4128_v23 = vpop.f32.mrf.mxu3 }
 0xc8d   :  { %v4130_v26 = vpop.f32.mrf.mxu3 }
 0xc8e   :  { %v4164_v28 = vpack.c.bf16 %v4130_v26, %v4128_v23 }
 0xc90   :  { %6517 = vmatmul.msk.bf16.gmra.mxu0 %vm553_vm0, %v4164_v28  ;;  %v6857_v28 = vld [vmem:[%s11469_s4 + $0x40] sm:$0xff] }
 0xc98   :  { %v4037_v44 = vpop.xlane.xlu2 %4036 }
 0xc99   :  { %7301 = vrcp.f32 %v4037_v44 }
 0xc9a   :  { %7303 = vrcp.f32 %v3651_v47 }
 0xc9f   :  { %v7302_v46 = vpop.eup %7301 }
 0xca0   :  { %v3649_v3 = vpop.xlane.xlu2 %3648  ;;  %v4075_v31 = vmul.f32 %v7302_v46, %v10148_v61  ;;  %v7304_v17 = vpop.eup %7303 }
 0xca1   :  { %7305 = vrcp.f32 %v3649_v3  ;;  %v3689_v6 = vmul.f32 %v7304_v17, %v10100_v52  ;;  %v3655_v61 = vpop.xlane.xlu1 %3654 }
 0xca2   :  { %v4086_v24 = vpack.c.bf16 %v4075_v31, %v4074_v8  ;;  %7307 = vrcp.f32 %v4039_v43 }
 0xca4   :  { %4142 = vmatmul.bf16.gmra.mxu3 %v4086_v24 }
 0xca7   :  { %v7306_v10 = vpop.eup %7305 }
 0xca8   :  { %v4041_v33 = vpop.xlane.xlu2 %4040  ;;  %v3688_v41 = vmul.f32 %v7306_v10, %v10154_v54  ;;  %v7308_v37 = vpop.eup %7307 }
 0xca9   :  { %7309 = vrcp.f32 %v4041_v33  ;;  %v4076_v32 = vmul.f32 %v7308_v37, %v10127_v60  ;;  %v6859_v60 = vld [vmem:[%s11469_s4 + $0x50] sm:$0xff] }
 0xcaa   :  { %v3700_v63 = vpack.c.bf16 %v3689_v6, %v3688_v41  ;;  %7311 = vrcp.f32 %v3653_v25  ;;  %4321 = vmatpush.bf16.msrb.mxu1 %v6859_v60  ;;  %v3761_v6 = vpop.f32.mrf.mxu1 }
 0xcab   :  { %7313 = vrcp.f32 %v3655_v61 }
 0xcac   :  { %3780 = vmatmul.bf16.gmra.mxu1 %v3700_v63 }
 0xcaf   :  { %v7310_v18 = vpop.eup %7309 }
 0xcb0   :  { %v4043_v38 = vpop.xlane.xlu2 %4042  ;;  %v4077_v54 = vmul.f32 %v7310_v18, %v10161_v48  ;;  %v4045_v52 = vpop.xlane.xlu0 %4044 }
 0xcb1   :  { %v7312_v1 = vpop.eup %7311  ;;  %7315 = vrcp.f32 %v4045_v52 }
 0xcb2   :  { %v4087_v4 = vpack.c.bf16 %v4077_v54, %v4076_v32  ;;  %v7314_v15 = vpop.eup %7313  ;;  %7317 = vrcp.f32 %v4043_v38  ;;  %v3690_v9 = vmul.f32 %v7312_v1, %v10140_v56 }
 0xcb3   :  { %v3691_v14 = vmul.f32 %v7314_v15, %v10130_v21  ;;  %v6858_v21 = vld [vmem:[%s11469_s4 + $0x48] sm:$0xff] }
 0xcb4   :  { %4147 = vmatmul.bf16.gmra.mxu3 %v4087_v4  ;;  %4322 = vmatpush.bf16.msrb.mxu1 %v6858_v21 }
 0xcb5   :  { %v3701_v19 = vpack.c.bf16 %v3691_v14, %v3690_v9 }
 0xcb7   :  { %v7316_v45 = vpop.eup %7315 }
 0xcb8   :  { %v3657_v40 = vpop.xlane.xlu1 %3656  ;;  %v4133_v30 = vpop.f32.mrf.mxu3  ;;  %v4079_v59 = vmul.f32 %v7316_v45, %v10169_v13  ;;  %4323 = vmatpush.bf16.msrb.mxu1 %v6857_v28 }
 0xcb9   :  { %v3659_v55 = vpop.xlane.xlu2 %3658  ;;  %v7318_v49 = vpop.eup %7317  ;;  %7319 = vrcp.f32 %v3657_v40 }
 0xcba   :  { %7321 = vrcp.f32 %v3659_v55  ;;  %v4078_v48 = vmul.f32 %v7318_v49, %v10167_v50  ;;  %v4047_v50 = vpop.xlane.xlu0 %4046 }
 0xcbc   :  { %3785 = vmatmul.bf16.gmra.mxu1 %v3701_v19  ;;  %v4088_v26 = vpack.c.bf16 %v4079_v59, %v4078_v48 }
 0xcbf   :  { %v7320_v36 = vpop.eup %7319 }
 0xcc0   :  { %v4135_v56 = vpop.f32.mrf.mxu3  ;;  %v4049_v23 = vpop.xlane.xlu1 %4048  ;;  %v3692_v13 = vmul.f32 %v7320_v36, %v10180_v22 }
 0xcc1   :  { %v4165_v11 = vpack.c.bf16 %v4135_v56, %v4133_v30  ;;  %v7322_v44 = vpop.eup %7321  ;;  %7323 = vrcp.f32 %v4049_v23  ;;  %v3661_v8 = vpop.xlane.xlu2 %3660 }
 0xcc2   :  { %v3693_v47 = vmul.f32 %v7322_v44, %v10178_v53  ;;  %7325 = vrcp.f32 %v4047_v50 }
 0xcc3   :  { %6518 = vmatmul.msk.bf16.gmra.mxu0 %vm553_vm0, %v4165_v11  ;;  %7327 = vrcp.f32 %v3661_v8 }
 0xcc4   :  { %4152 = vmatmul.bf16.gmra.mxu3 %v4088_v26  ;;  %v3702_v46 = vpack.c.bf16 %v3693_v47, %v3692_v13 }
 0xcc7   :  { %v7324_v3 = vpop.eup %7323 }
 0xcc8   :  { %v7326_v31 = vpop.eup %7325  ;;  %v4081_v43 = vmul.f32 %v7324_v3, %v10189_v2  ;;  %v3763_v2 = vpop.f32.mrf.mxu1 }
 0xcc9   :  { %v4138_v35 = vpop.f32.mrf.mxu3  ;;  %v4080_v17 = vmul.f32 %v7326_v31, %v10182_v34  ;;  %v7328_v53 = vpop.eup %7327  ;;  %v3801_v37 = vpack.c.bf16 %v3763_v2, %v3761_v6 }
 0xcca   :  { %v3694_v25 = vmul.f32 %v7328_v53, %v10191_v16 }
 0xccb   :  { %v4089_v22 = vpack.c.bf16 %v4081_v43, %v4080_v17 }
 0xccc   :  { %3790 = vmatmul.bf16.gmra.mxu1 %v3702_v46 }
 0xcd0   :  { %v3663_v24 = vpop.xlane.xlu0 %3662  ;;  %v3766_v61 = vpop.f32.mrf.mxu1 }
 0xcd1   :  { %v4140_v10 = vpop.f32.mrf.mxu3  ;;  %7329 = vrcp.f32 %v3663_v24 }
 0xcd2   :  { %v4166_v33 = vpack.c.bf16 %v4140_v10, %v4138_v35  ;;  %v10258_v35 = vld [vmem:[%s11470_s5 + $0x1] ss:$0 sm:$0xff] }
 0xcd4   :  { %6519 = vmatmul.msk.bf16.gmra.mxu0 %vm553_vm0, %v4166_v33  ;;  %4157 = vmatmul.bf16.gmra.mxu3 %v4089_v22 }
 0xcd7   :  { %v7330_v41 = vpop.eup %7329 }
 0xcd8   :  { %v3695_v63 = vmul.f32 %v7330_v41, %v10205_v51  ;;  %v3768_v34 = vpop.f32.mrf.mxu1 }
 0xcd9   :  { %v3802_v18 = vpack.c.bf16 %v3768_v34, %v3766_v61 }
 0xcda   :  { %v3703_v58 = vpack.c.bf16 %v3695_v63, %v3694_v25 }
 0xcdc   :  { %3795 = vmatmul.bf16.gmra.mxu1 %v3703_v58 }
 0xce0   :  { %v3771_v38 = vpop.f32.mrf.mxu1 }
 0xce8   :  { %v3773_v32 = vpop.f32.mrf.mxu1 }
 0xce9   :  { %v3803_v54 = vpack.c.bf16 %v3773_v32, %v3771_v38 }
 0xcec   :  { %6540 = vmatmul.msk.bf16.vlgmr.msrb.gmra.mxu1 %vm553_vm0, %v3801_v37 }
 0xcf0   :  { %v3776_v52 = vpop.f32.mrf.mxu1 }
 0xcf8   :  { %v3778_v16 = vpop.f32.mrf.mxu1 }
 0xcf9   :  { %v3804_v4 = vpack.c.bf16 %v3778_v16, %v3776_v52 }
 0xcfc   :  { %6541 = vmatmul.msk.bf16.gmra.mxu1 %vm553_vm0, %v3802_v18 }
 0xcfd   :  { %v4228_v28 = vpop.f32.mrf.mxu0 }
 0xd05   :  { %v4230_v46 = vpop.f32.mrf.mxu0 }
 0xd0c   :  { %6542 = vmatmul.msk.bf16.gmra.mxu1 %vm553_vm0, %v3803_v54 }
 0xd0d   :  { %v4233_v10 = vpop.f32.mrf.mxu0 }
 0xd15   :  { %v4235_v25 = vpop.f32.mrf.mxu0 }
 0xd1c   :  { %6543 = vmatmul.msk.bf16.gmra.mxu1 %vm553_vm0, %v3804_v4 }
 0xd27   :  { %v4143_v51 = vpop.f32.mrf.mxu3 }
 0xd29   :  { %v3781_v1 = vpop.f32.mrf.mxu1 }
 0xd2f   :  { %v4145_v15 = vpop.f32.mrf.mxu3 }
 0xd30   :  { %v4167_v9 = vpack.c.bf16 %v4145_v15, %v4143_v51 }
 0xd31   :  { %v3783_v40 = vpop.f32.mrf.mxu1 }
 0xd32   :  { %v3805_v30 = vpack.c.bf16 %v3783_v40, %v3781_v1  ;;  %6520 = vmatmul.msk.bf16.gmra.mxu0 %vm553_vm0, %v4167_v9 }
 0xd34   :  { %6544 = vmatmul.msk.bf16.gmra.mxu1 %vm553_vm0, %v3805_v30 }
 0xd37   :  { %v4148_v14 = vpop.f32.mrf.mxu3 }
 0xd39   :  { %v3786_v45 = vpop.f32.mrf.mxu1 }
 0xd3f   :  { %v4150_v55 = vpop.f32.mrf.mxu3 }
 0xd40   :  { %v4168_v19 = vpack.c.bf16 %v4150_v55, %v4148_v14  ;;  %v4238_v61 = vpop.f32.mrf.mxu0 }
 0xd41   :  { %v3788_v49 = vpop.f32.mrf.mxu1 }
 0xd42   :  { %v3806_v60 = vpack.c.bf16 %v3788_v49, %v3786_v45  ;;  %6521 = vmatmul.msk.bf16.gmra.mxu0 %vm553_vm0, %v4168_v19 }
 0xd44   :  { %6545 = vmatmul.msk.bf16.gmra.mxu1 %vm553_vm0, %v3806_v60 }
 0xd47   :  { %v4153_v48 = vpop.f32.mrf.mxu3 }
 0xd48   :  { %v4240_v32 = vpop.f32.mrf.mxu0 }
 0xd49   :  { %v3791_v59 = vpop.f32.mrf.mxu1 }
 0xd4f   :  { %v4155_v21 = vpop.f32.mrf.mxu3 }
 0xd50   :  { %v4169_v56 = vpack.c.bf16 %v4155_v21, %v4153_v48 }
 0xd51   :  { %v3793_v11 = vpop.f32.mrf.mxu1  ;;  %v4243_v4 = vpop.f32.mrf.mxu0 }
 0xd52   :  { %v3807_v36 = vpack.c.bf16 %v3793_v11, %v3791_v59  ;;  %6522 = vmatmul.msk.bf16.gmra.mxu0 %vm553_vm0, %v4169_v56 }
 0xd54   :  { %6546 = vmatmul.msk.bf16.gmra.mxu1 %vm553_vm0, %v3807_v36 }
 0xd57   :  { %v4158_v23 = vpop.f32.mrf.mxu3 }
 0xd59   :  { %v3796_v26 = vpop.f32.mrf.mxu1  ;;  %v4245_v9 = vpop.f32.mrf.mxu0 }
 0xd5f   :  { %v4160_v44 = vpop.f32.mrf.mxu3 }
 0xd60   :  { %v4170_v50 = vpack.c.bf16 %v4160_v44, %v4158_v23 }
 0xd61   :  { %v3798_v13 = vpop.f32.mrf.mxu1 }
 0xd62   :  { %v3808_v47 = vpack.c.bf16 %v3798_v13, %v3796_v26  ;;  %6523 = vmatmul.msk.bf16.gmra.mxu0 %vm553_vm0, %v4170_v50 }
 0xd64   :  { %6547 = vmatmul.msk.bf16.gmra.mxu1 %vm553_vm0, %v3808_v47 }
 0xd69   :  { %v4325_v3 = vpop.f32.mrf.mxu1 }
 0xd6a   :  { %v4326_v8 = vadd.f32 %v4325_v3, %v4228_v28 }
 0xd6c   :  { %v4370_v31 = vadd.f32 %v10258_v35, %v4326_v8 }
 0xd6e   :  { %v4386_v43 = vadd.f32 %v4370_v31, %v9503_v12 }
 0xd70   :  { %4406 = vadd.xlane.f32.xlu1 %v4386_v43 }
 0xd71   :  { %v4327_v24 = vpop.f32.mrf.mxu1 }
 0xd72   :  { %v4328_v17 = vadd.f32 %v4327_v24, %v4230_v46 }
 0xd74   :  { %v4371_v33 = vadd.f32 %v10258_v35, %v4328_v17 }
 0xd76   :  { %v4387_v22 = vadd.f32 %v4371_v33, %v9506_v5 }
 0xd78   :  { %4408 = vadd.xlane.f32.xlu2 %v4387_v22 }
 0xd79   :  { %v4330_v53 = vpop.f32.mrf.mxu1 }
 0xd7a   :  { %v4331_v41 = vadd.f32 %v4330_v53, %v4233_v10 }
 0xd7c   :  { %v4372_v6 = vadd.f32 %v10258_v35, %v4331_v41 }
 0xd7e   :  { %v4388_v63 = vadd.f32 %v4372_v6, %v9530_v7 }
 0xd80   :  { %4410 = vadd.xlane.f32.xlu0 %v4388_v63 }
 0xd81   :  { %v4332_v58 = vpop.f32.mrf.mxu1 }
 0xd82   :  { %v4333_v2 = vadd.f32 %v4332_v58, %v4235_v25 }
 0xd84   :  { %v4373_v12 = vadd.f32 %v10258_v35, %v4333_v2 }
 0xd86   :  { %v4389_v37 = vadd.f32 %v4373_v12, %v9533_v0 }
 0xd88   :  { %4412 = vadd.xlane.f32.xlu1 %v4389_v37 }
 0xd89   :  { %v4335_v34 = vpop.f32.mrf.mxu1 }
 0xd8a   :  { %v4336_v18 = vadd.f32 %v4335_v34, %v4238_v61 }
 0xd8c   :  { %v4374_v5 = vadd.f32 %v10258_v35, %v4336_v18 }
 0xd8e   :  { %v4390_v38 = vadd.f32 %v4374_v5, %v9547_v27 }
 0xd90   :  { %4414 = vadd.xlane.f32.xlu2 %v4390_v38 }
 0xd91   :  { %v4337_v54 = vpop.f32.mrf.mxu1 }
 0xd92   :  { %v4338_v52 = vadd.f32 %v4337_v54, %v4240_v32  ;;  %v11506_v32 = vld [vmem:[#allocation3_spill] sm:$0xff] }
 0xd94   :  { %v4375_v7 = vadd.f32 %v10258_v35, %v4338_v52 }
 0xd96   :  { %v10272_v16 = vadd.f32 %v4375_v7, %v9550_v62 }
 0xd98   :  { %4416 = vadd.xlane.f32.xlu0 %v10272_v16 }
 0xd99   :  { %v4340_v0 = vpop.f32.mrf.mxu1 }
 0xd9a   :  { %v4341_v51 = vadd.f32 %v4340_v0, %v4243_v4 }
 0xd9c   :  { %v4376_v1 = vadd.f32 %v10258_v35, %v4341_v51 }
 0xd9e   :  { %v10277_v15 = vadd.f32 %v4376_v1, %v9581_v20 }
 0xda0   :  { %4418 = vadd.xlane.f32.xlu0 %v10277_v15 }
 0xda1   :  { %v4342_v27 = vpop.f32.mrf.mxu1 }
 0xda2   :  { %v4343_v55 = vadd.f32 %v4342_v27, %v4245_v9  ;;  %v11507_v9 = vld [vmem:[#allocation4_spill] sm:$0xff] }
 0xda4   :  { %v4377_v20 = vadd.f32 %v10258_v35, %v4343_v55 }
 0xda6   :  { %v10292_v36 = vadd.f32 %v4377_v20, %v9584_v39 }
 0xdaf   :  { %v4248_v30 = vpop.f32.mrf.mxu0 }
 0xdb1   :  { %v4345_v40 = vpop.f32.mrf.mxu1 }
 0xdb2   :  { %v4346_v56 = vadd.f32 %v4345_v40, %v4248_v30 }
 0xdb4   :  { %v4378_v26 = vadd.f32 %v10258_v35, %v4346_v56  ;;  %v6879_v56 = vld [vmem:[%s11473_s8 + $0xf4] sm:$0xf] }
 0xdb6   :  { %v10302_v3 = vadd.f32 %v4378_v26, %v9607_v42 }
 0xdb7   :  { %v4250_v59 = vpop.f32.mrf.mxu0 }
 0xdb9   :  { %v4347_v49 = vpop.f32.mrf.mxu1 }
 0xdba   :  { %v4348_v47 = vadd.f32 %v4347_v49, %v4250_v59  ;;  %v6880_v59 = vld [vmem:[%s11473_s8 + $0xf4] sm:$0xf0] }
 0xdbc   :  { %v4379_v8 = vadd.f32 %v10258_v35, %v4348_v47 }
 0xdbe   :  { %v10310_v10 = vadd.f32 %v4379_v8, %v9604_v29  ;;  %v6610_v8 = vld [vmem:[%s11473_s8 + $0xd0] sm:$0xf] }
 0xdbf   :  { %v4253_v13 = vpop.f32.mrf.mxu0 }
 0xdc1   :  { %v4350_v44 = vpop.f32.mrf.mxu1 }
 0xdc2   :  { %v4351_v17 = vadd.f32 %v4350_v44, %v4253_v13  ;;  %v6878_v44 = vld [vmem:[%s11473_s8 + $0xe4] sm:$0xf0]  ;;  %v6877_v13 = vld [vmem:[%s11473_s8 + $0xe4] sm:$0xf] }
 0xdc4   :  { %v4380_v53 = vadd.f32 %v10258_v35, %v4351_v17 }
 0xdc7   :  { %v4255_v42 = vpop.f32.mrf.mxu0 }
 0xdc9   :  { %v4352_v24 = vpop.f32.mrf.mxu1 }
 0xdca   :  { %v4353_v25 = vadd.f32 %v4352_v24, %v4255_v42  ;;  %v6875_v24 = vld [vmem:[%s11473_s8 + $0xd4] sm:$0xf] }
 0xdcf   :  { %v4258_v12 = vpop.f32.mrf.mxu0 }
 0xdd1   :  { %v4355_v2 = vpop.f32.mrf.mxu1 }
 0xdd2   :  { %v4356_v5 = vadd.f32 %v4355_v2, %v4258_v12  ;;  %v6594_v2 = vld [vmem:[%s11473_s8 + $0xb0] sm:$0xf]  ;;  %v6872_v12 = vld [vmem:[%s11473_s8 + $0xb4] sm:$0xf0] }
 0xdd4   :  { %v4382_v4 = vadd.f32 %v10258_v35, %v4356_v5 }
 0xdd6   :  { %v10344_v40 = vadd.f32 %v4382_v4, %v11507_v9  ;;  %v6588_v4 = vld [vmem:[%s11473_s8 + $0xa8] sm:$0xf0]  ;;  %v6868_v9 = vld [vmem:[%s11473_s8 + $0x94] sm:$0xf0] }
 0xdd7   :  { %v4260_v51 = vpop.f32.mrf.mxu0 }
 0xdd9   :  { %v4357_v52 = vpop.f32.mrf.mxu1 }
 0xdda   :  { %v4358_v1 = vadd.f32 %v4357_v52, %v4260_v51  ;;  %v6869_v52 = vld [vmem:[%s11473_s8 + $0xa4] sm:$0xf] }
 0xddb   :  { %v6591_v51 = vor.u32 %v6869_v52, %v6588_v4 }
 0xddc   :  { %v4383_v30 = vadd.f32 %v10258_v35, %v4358_v1 }
 0xde3   :  { %v4407_v14 = vpop.xlane.xlu1 %4406 }
 0xde4   :  { %v4438_v62 = vmul.f32 %v4407_v14, %v8473_v57  ;;  %v4360_v14 = vpop.f32.mrf.mxu1 }
 0xde6   :  { %v10281_v45 = vsub.f32 %v4386_v43, %v4438_v62  ;;  %v4263_v62 = vpop.f32.mrf.mxu0 }
 0xde7   :  { %v4361_v55 = vadd.f32 %v4360_v14, %v4263_v62 }
 0xde8   :  { %v4470_v19 = vmul.f32 %v10281_v45, %v10281_v45 }
 0xdea   :  { %4486 = vadd.xlane.f32.xlu1 %v4470_v19  ;;  %v11508_v19 = vld [vmem:[#allocation5_spill] sm:$0xff] }
 0xdeb   :  { %v4409_v60 = vpop.xlane.xlu2 %4408  ;;  %v10349_v49 = vadd.f32 %v4383_v30, %v11508_v19  ;;  %v6867_v30 = vld [vmem:[%s11473_s8 + $0x94] sm:$0xf] }
 0xdec   :  { %v4439_v48 = vmul.f32 %v4409_v60, %v8473_v57  ;;  %v11509_v60 = vld [vmem:[#allocation6_spill] sm:$0xff] }
 0xdee   :  { %v10287_v21 = vsub.f32 %v4387_v22, %v4439_v48  ;;  %v6626_v48 = vld [vmem:[%s11473_s8 + $0xf0] sm:$0xf] }
 0xdf0   :  { %v4471_v11 = vmul.f32 %v10287_v21, %v10287_v21 }
 0xdf2   :  { %4488 = vadd.xlane.f32.xlu2 %v4471_v11  ;;  %4420 = vadd.xlane.f32.xlu1 %v10292_v36  ;;  %v6627_v11 = vor.u32 %v6880_v59, %v6626_v48  ;;  %v6865_v48 = vld [vmem:[%s11473_s8 + $0x84] sm:$0xf] }
 0xdf3   :  { %v4411_v23 = vpop.xlane.xlu0 %4410 }
 0xdf4   :  { %v4440_v28 = vmul.f32 %v4411_v23, %v8473_v57  ;;  %v6628_v23 = vld [vmem:[%s11473_s8 + $0xf8] sm:$0xf0]  ;;  %4876 = vmatpush.bf16.msra.mxu2 %v6627_v11 }
 0xdf5   :  { %v6631_v26 = vor.u32 %v6879_v56, %v6628_v23  ;;  %v6572_v56 = vld [vmem:[%s11473_s8 + $0x88] sm:$0xf0] }
 0xdf6   :  { %v10297_v50 = vsub.f32 %v4388_v63, %v4440_v28  ;;  %v11505_v63 = vld [vmem:[#allocation2_spill] sm:$0xff] }
 0xdf7   :  { %v10320_v58 = vadd.f32 %v4380_v53, %v11505_v63  ;;  %4925 = vmatpush.bf16.msra.mxu3 %v6631_v26  ;;  %v6618_v28 = vld [vmem:[%s11473_s8 + $0xe0] sm:$0xf]  ;;  %v6874_v53 = vld [vmem:[%s11473_s8 + $0xc4] sm:$0xf0]  ;;  %v6604_v63 = vld [vmem:[%s11473_s8 + $0xc8] sm:$0xf0]  ;;  %v6575_v26 = vor.u32 %v6865_v48, %v6572_v56 }
 0xdf8   :  { %v4472_v46 = vmul.f32 %v10297_v50, %v10297_v50  ;;  %v6619_v47 = vor.u32 %v6878_v44, %v6618_v28 }
 0xdfa   :  { %4490 = vadd.xlane.f32.xlu2 %v4472_v46  ;;  %4422 = vadd.xlane.f32.xlu1 %v10302_v3  ;;  %v6620_v46 = vld [vmem:[%s11473_s8 + $0xe8] sm:$0xf0] }
 0xdfb   :  { %v4413_v39 = vpop.xlane.xlu1 %4412  ;;  %4877 = vmatpush.bf16.msra.mxu2 %v6619_v47 }
 0xdfc   :  { %v4441_v31 = vmul.f32 %v4413_v39, %v8473_v57  ;;  %v6623_v39 = vor.u32 %v6877_v13, %v6620_v46 }
 0xdfe   :  { %v10307_v43 = vsub.f32 %v4389_v37, %v4441_v31  ;;  %v4381_v37 = vadd.f32 %v10258_v35, %v4353_v25  ;;  %4926 = vmatpush.bf16.msra.mxu3 %v6623_v39  ;;  %v6876_v31 = vld [vmem:[%s11473_s8 + $0xd4] sm:$0xf0] }
 0xdff   :  { %v6611_v17 = vor.u32 %v6876_v31, %v6610_v8 }
 0xe00   :  { %v4473_v33 = vmul.f32 %v10307_v43, %v10307_v43  ;;  %v10333_v54 = vadd.f32 %v4381_v37, %v11506_v32  ;;  %v6595_v37 = vor.u32 %v6872_v12, %v6594_v2  ;;  %v6870_v32 = vld [vmem:[%s11473_s8 + $0xa4] sm:$0xf0] }
 0xe01   :  { %4878 = vmatpush.bf16.msra.mxu2 %v6611_v17 }
 0xe02   :  { %4424 = vadd.xlane.f32.xlu2 %v10310_v10  ;;  %4492 = vadd.xlane.f32.xlu0 %v4473_v33  ;;  %v6612_v33 = vld [vmem:[%s11473_s8 + $0xd8] sm:$0xf0] }
 0xe03   :  { %v4415_v22 = vpop.xlane.xlu2 %4414  ;;  %v6615_v42 = vor.u32 %v6875_v24, %v6612_v33 }
 0xe04   :  { %v4442_v41 = vmul.f32 %v4415_v22, %v8473_v57  ;;  %v6602_v22 = vld [vmem:[%s11473_s8 + $0xc0] sm:$0xf] }
 0xe05   :  { %4927 = vmatpush.bf16.msra.mxu3 %v6615_v42  ;;  %v6603_v25 = vor.u32 %v6874_v53, %v6602_v22  ;;  %v4362_v53 = vpop.f32.mrf.mxu1 }
 0xe06   :  { %v10317_v6 = vsub.f32 %v4390_v38, %v4442_v41  ;;  %v6873_v41 = vld [vmem:[%s11473_s8 + $0xc4] sm:$0xf] }
 0xe07   :  { %4879 = vmatpush.bf16.msra.mxu2 %v6603_v25 }
 0xe08   :  { %v4474_v29 = vmul.f32 %v10317_v6, %v10317_v6 }
 0xe0a   :  { %4426 = vadd.xlane.f32.xlu2 %v10320_v58  ;;  %4494 = vadd.xlane.f32.xlu0 %v4474_v29  ;;  %v6607_v29 = vor.u32 %v6873_v41, %v6604_v63 }
 0xe0b   :  { %v4417_v61 = vpop.xlane.xlu0 %4416  ;;  %4880 = vmatpush.bf16.msra.mxu2 %v6595_v37 }
 0xe0c   :  { %v4443_v34 = vmul.f32 %v4417_v61, %v8473_v57  ;;  %4928 = vmatpush.bf16.msra.mxu3 %v6607_v29  ;;  %v6871_v61 = vld [vmem:[%s11473_s8 + $0xb4] sm:$0xf]  ;;  %v4265_v29 = vpop.f32.mrf.mxu0 }
 0xe0e   :  { %v10328_v18 = vsub.f32 %v10272_v16, %v4443_v34  ;;  %v6596_v34 = vld [vmem:[%s11473_s8 + $0xb8] sm:$0xf0] }
 0xe0f   :  { %v6599_v5 = vor.u32 %v6871_v61, %v6596_v34  ;;  %v4363_v61 = vadd.f32 %v4362_v53, %v4265_v29 }
 0xe10   :  { %v4475_v38 = vmul.f32 %v10328_v18, %v10328_v18 }
 0xe11   :  { %4929 = vmatpush.bf16.msra.mxu3 %v6599_v5 }
 0xe12   :  { %4496 = vadd.xlane.f32.xlu1 %v4475_v38  ;;  %4428 = vadd.xlane.f32.xlu0 %v10333_v54  ;;  %v6586_v38 = vld [vmem:[%s11473_s8 + $0xa0] sm:$0xf] }
 0xe13   :  { %v4419_v7 = vpop.xlane.xlu0 %4418 }
 0xe14   :  { %v4444_v0 = vmul.f32 %v4419_v7, %v8473_v57  ;;  %v6587_v7 = vor.u32 %v6870_v32, %v6586_v38 }
 0xe15   :  { %4930 = vmatpush.bf16.msra.mxu3 %v6591_v51 }
 0xe16   :  { %v10339_v16 = vsub.f32 %v10277_v15, %v4444_v0  ;;  %v4384_v15 = vadd.f32 %v10258_v35, %v4361_v55  ;;  %4881 = vmatpush.bf16.msra.mxu2 %v6587_v7  ;;  %v6580_v55 = vld [vmem:[%s11473_s8 + $0x98] sm:$0xf0] }
 0xe17   :  { %v6583_v19 = vor.u32 %v6867_v30, %v6580_v55  ;;  %v11510_v55 = vld [vmem:[#allocation7_spill] sm:$0xff] }
 0xe18   :  { %v4476_v27 = vmul.f32 %v10339_v16, %v10339_v16  ;;  %v10354_v20 = vadd.f32 %v4384_v15, %v11509_v60  ;;  %v6570_v15 = vld [vmem:[%s11473_s8 + $0x80] sm:$0xf]  ;;  %v6866_v60 = vld [vmem:[%s11473_s8 + $0x84] sm:$0xf0] }
 0xe19   :  { %4931 = vmatpush.bf16.msra.mxu3 %v6583_v19  ;;  %v6571_v59 = vor.u32 %v6866_v60, %v6570_v15 }
 0xe1a   :  { %4498 = vadd.xlane.f32.xlu1 %v4476_v27  ;;  %4430 = vadd.xlane.f32.xlu0 %v10344_v40  ;;  %v6578_v27 = vld [vmem:[%s11473_s8 + $0x90] sm:$0xf] }
 0xe1b   :  { %v6579_v62 = vor.u32 %v6868_v9, %v6578_v27 }
 0xe1d   :  { %4882 = vmatpush.bf16.msra.mxu2 %v6579_v62  ;;  %4932 = vmatpush.bf16.msra.mxu3 %v6575_v26 }
 0xe21   :  { %4883 = vmatpush.bf16.msra.mxu2 %v6571_v59 }
 0xe22   :  { %4432 = vadd.xlane.f32.xlu1 %v10349_v49 }
 0xe2a   :  { %4434 = vadd.xlane.f32.xlu1 %v10354_v20 }
 0xe5d   :  { %v4487_v0 = vpop.xlane.xlu1 %4486 }
 0xe5e   :  { %v4518_v1 = vmul.f32 %v4487_v0, %v8473_v57 }
 0xe60   :  { %v4534_v14 = vadd.f32 1e-12, %v4518_v1  ;;  %v10474_v1 = vld [vmem:[%s11471_s6 + $0x1] ss:$0 sm:$0xff] }
 0xe62   :  { %7331 = vrsqrt.f32 %v4534_v14  ;;  %vm4556_vm8 = vweird.f32 %v4534_v14 }
 0xe65   :  { %v4489_v11 = vpop.xlane.xlu2 %4488  ;;  %v4421_v23 = vpop.xlane.xlu1 %4420 }
 0xe66   :  { %v4519_v28 = vmul.f32 %v4489_v11, %v8473_v57  ;;  %v4445_v44 = vmul.f32 %v4421_v23, %v8473_v57 }
 0xe68   :  { %v7332_v13 = vpop.eup %7331  ;;  %v4535_v47 = vadd.f32 1e-12, %v4519_v28  ;;  %v10457_v46 = vsub.f32 %v10292_v36, %v4445_v44 }
 0xe69   :  { %v4551_v39 = vmul.f32 %v7332_v13, %v4534_v14  ;;  %vm4557_vm0 = vweird.f32 %v7332_v13 }
 0xe6a   :  { %7333 = vrsqrt.f32 %v4535_v47  ;;  %v4477_v8 = vmul.f32 %v10457_v46, %v10457_v46  ;;  %vm4558_vm9 = vmor %vm4556_vm8, %vm4557_vm0  ;;  %vm4566_vm11 = vweird.f32 %v4535_v47 }
 0xe6b   :  { %v4552_v31 = vmul.f32 %v7332_v13, %v4551_v39 }
 0xe6c   :  { %4500 = vadd.xlane.f32.xlu2 %v4477_v8 }
 0xe6d   :  { %v4553_v24 = vmul.f32 0.5, %v4552_v31  ;;  %v4491_v17 = vpop.xlane.xlu2 %4490  ;;  %v4423_v33 = vpop.xlane.xlu1 %4422 }
 0xe6e   :  { %v4520_v42 = vmul.f32 %v4491_v17, %v8473_v57  ;;  %v4446_v22 = vmul.f32 %v4423_v33, %v8473_v57 }
 0xe6f   :  { %v4554_v41 = vsub.f32 1.5, %v4553_v24 }
 0xe70   :  { %v7334_v25 = vpop.eup %7333  ;;  %v4536_v63 = vadd.f32 1e-12, %v4520_v42  ;;  %v10464_v36 = vsub.f32 %v10302_v3, %v4446_v22  ;;  %v4385_v3 = vadd.f32 %v10258_v35, %v4363_v61 }
 0xe71   :  { %v4555_v2 = vmul.f32 %v7332_v13, %v4554_v41  ;;  %v4561_v12 = vmul.f32 %v7334_v25, %v4535_v47  ;;  %vm4567_vm10 = vweird.f32 %v7334_v25 }
 0xe72   :  { %7335 = vrsqrt.f32 %v4536_v63  ;;  %v4478_v37 = vmul.f32 %v10464_v36, %v10464_v36  ;;  %vm4568_vm12 = vmor %vm4566_vm11, %vm4567_vm10  ;;  %v10483_v19 = vadd.f32 %v4385_v3, %v11510_v55  ;;  %vm4576_vm14 = vweird.f32 %v4536_v63 }
 0xe73   :  { %v4562_v34 = vmul.f32 %v7334_v25, %v4561_v12  ;;  %v4559_v5 = vsel %vm4558_vm9, %v7332_v13, %v4555_v2 }
 0xe74   :  { %4502 = vadd.xlane.f32.xlu2 %v4478_v37  ;;  %v4710_v27 = vmul.f32 %v4559_v5, %v10281_v45  ;;  %v10488_v45 = vld [vmem:[%s11472_s7 + $0x1] ss:$0 sm:$0xff] }
 0xe75   :  { %v4563_v38 = vmul.f32 0.5, %v4562_v34  ;;  %v4425_v32 = vpop.xlane.xlu2 %4424  ;;  %v4493_v52 = vpop.xlane.xlu0 %4492 }
 0xe76   :  { %v4447_v7 = vmul.f32 %v4425_v32, %v8473_v57  ;;  %v4521_v4 = vmul.f32 %v4493_v52, %v8473_v57 }
 0xe77   :  { %v4564_v0 = vsub.f32 1.5, %v4563_v38 }
 0xe78   :  { %v7336_v51 = vpop.eup %7335  ;;  %v10478_v9 = vsub.f32 %v10310_v10, %v4447_v7  ;;  %v4537_v30 = vadd.f32 1e-12, %v4521_v4  ;;  %v4729_v10 = vmul.f32 %v10474_v1, %v4710_v27 }
 0xe79   :  { %v4565_v14 = vmul.f32 %v7334_v25, %v4564_v0  ;;  %v4571_v35 = vmul.f32 %v7336_v51, %v4536_v63  ;;  %vm4577_vm13 = vweird.f32 %v7336_v51 }
 0xe7a   :  { %7337 = vrsqrt.f32 %v4537_v30  ;;  %v4479_v62 = vmul.f32 %v10478_v9, %v10478_v9  ;;  %v10497_v47 = vadd.f32 %v10488_v45, %v4729_v10  ;;  %vm4578_vm15 = vmor %vm4576_vm14, %vm4577_vm13  ;;  %vm4586_vm2 = vweird.f32 %v4537_v30 }
 0xe7b   :  { %v4569_v15 = vsel %vm4568_vm12, %v7334_v25, %v4565_v14  ;;  %v4572_v60 = vmul.f32 %v7336_v51, %v4571_v35 }
 0xe7c   :  { %v4711_v48 = vmul.f32 %v4569_v15, %v10287_v21  ;;  %4504 = vadd.xlane.f32.xlu0 %v4479_v62  ;;  %4436 = vadd.xlane.f32.xlu2 %v10483_v19 }
 0xe7d   :  { %v4573_v59 = vmul.f32 0.5, %v4572_v60  ;;  %v4427_v56 = vpop.xlane.xlu2 %4426  ;;  %v4495_v11 = vpop.xlane.xlu0 %4494 }
 0xe7e   :  { %v4730_v23 = vmul.f32 %v10474_v1, %v4711_v48  ;;  %v4448_v26 = vmul.f32 %v4427_v56, %v8473_v57  ;;  %v4522_v28 = vmul.f32 %v4495_v11, %v8473_v57 }
 0xe7f   :  { %v4574_v44 = vsub.f32 1.5, %v4573_v59 }
 0xe80   :  { %v7338_v13 = vpop.eup %7337  ;;  %v10500_v39 = vadd.f32 %v10488_v45, %v4730_v23  ;;  %v10503_v21 = vsub.f32 %v10320_v58, %v4448_v26  ;;  %v4538_v8 = vadd.f32 1e-12, %v4522_v28 }
 0xe81   :  { %v4575_v31 = vmul.f32 %v7336_v51, %v4574_v44  ;;  %v4581_v24 = vmul.f32 %v7338_v13, %v4537_v30  ;;  %vm4587_vm1 = vweird.f32 %v7338_v13 }
 0xe82   :  { %7339 = vrsqrt.f32 %v4538_v8  ;;  %v4480_v17 = vmul.f32 %v10503_v21, %v10503_v21  ;;  %v4764_v33 = vpack.c.bf16 %v10500_v39, %v10497_v47  ;;  %vm4588_vm3 = vmor %vm4586_vm2, %vm4587_vm1  ;;  %vm4596_vm5 = vweird.f32 %v4538_v8 }
 0xe83   :  { %v4582_v42 = vmul.f32 %v7338_v13, %v4581_v24  ;;  %v4579_v22 = vsel %vm4578_vm15, %v7336_v51, %v4575_v31 }
 0xe84   :  { %4506 = vadd.xlane.f32.xlu0 %v4480_v17  ;;  %4884 = vmatmul.bf16.vlgmr.msra.gmra.mxu2 %v4764_v33  ;;  %v4712_v61 = vmul.f32 %v4579_v22, %v10297_v50 }
 0xe85   :  { %v4583_v53 = vmul.f32 0.5, %v4582_v42  ;;  %4933 = vmatmul.bf16.vlgmr.msra.gmra.mxu3 %v4764_v33  ;;  %v4429_v58 = vpop.xlane.xlu0 %4428  ;;  %v4497_v41 = vpop.xlane.xlu1 %4496 }
 0xe86   :  { %v4449_v25 = vmul.f32 %v4429_v58, %v8473_v57  ;;  %v4523_v29 = vmul.f32 %v4497_v41, %v8473_v57  ;;  %v4731_v7 = vmul.f32 %v10474_v1, %v4712_v61 }
 0xe87   :  { %v4584_v2 = vsub.f32 1.5, %v4583_v53 }
 0xe88   :  { %v7340_v12 = vpop.eup %7339  ;;  %v10513_v63 = vsub.f32 %v10333_v54, %v4449_v25  ;;  %v4539_v37 = vadd.f32 1e-12, %v4523_v29  ;;  %v10525_v35 = vadd.f32 %v10488_v45, %v4731_v7 }
 0xe89   :  { %v4585_v34 = vmul.f32 %v7338_v13, %v4584_v2  ;;  %v4591_v5 = vmul.f32 %v7340_v12, %v4538_v8  ;;  %vm4597_vm4 = vweird.f32 %v7340_v12 }
 0xe8a   :  { %7341 = vrsqrt.f32 %v4539_v37  ;;  %v4481_v38 = vmul.f32 %v10513_v63, %v10513_v63  ;;  %vm4598_vm6 = vmor %vm4596_vm5, %vm4597_vm4  ;;  %vm4606_vm0 = vweird.f32 %v4539_v37 }
 0xe8b   :  { %v4589_v32 = vsel %vm4588_vm3, %v7338_v13, %v4585_v34  ;;  %v4592_v52 = vmul.f32 %v7340_v12, %v4591_v5 }
 0xe8c   :  { %v4713_v3 = vmul.f32 %v4589_v32, %v10307_v43  ;;  %4508 = vadd.xlane.f32.xlu1 %v4481_v38 }
 0xe8d   :  { %v4593_v50 = vmul.f32 0.5, %v4592_v52  ;;  %v4431_v4 = vpop.xlane.xlu0 %4430  ;;  %v4499_v54 = vpop.xlane.xlu1 %4498 }
 0xe8e   :  { %v4450_v0 = vmul.f32 %v4431_v4, %v8473_v57  ;;  %v4732_v51 = vmul.f32 %v10474_v1, %v4713_v3  ;;  %v4524_v53 = vmul.f32 %v4499_v54, %v8473_v57 }
 0xe8f   :  { %v4594_v27 = vsub.f32 1.5, %v4593_v50 }
 0xe90   :  { %v7342_v30 = vpop.eup %7341  ;;  %v10522_v14 = vsub.f32 %v10344_v40, %v4450_v0  ;;  %v10528_v43 = vadd.f32 %v10488_v45, %v4732_v51  ;;  %v4540_v58 = vadd.f32 1e-12, %v4524_v53  ;;  %v6888_v51 = vld [vmem:[%s11474_s10 + $0xb8] sm:$0xff] }
 0xe91   :  { %v4595_v62 = vmul.f32 %v7340_v12, %v4594_v27  ;;  %v4601_v55 = vmul.f32 %v7342_v30, %v4539_v37  ;;  %vm4607_vm7 = vweird.f32 %v7342_v30  ;;  %v6896_v27 = vld [vmem:[%s11474_s10 + $0xf8] sm:$0xff]  ;;  %5412 = vmatpush.bf16.msrb.mxu0 %v6888_v51  ;;  %v6891_v51 = vld [vmem:[%s11474_s10 + $0xd0] sm:$0xff] }
 0xe92   :  { %v4765_v15 = vpack.c.bf16 %v10528_v43, %v10525_v35  ;;  %v4482_v60 = vmul.f32 %v10522_v14, %v10522_v14  ;;  %vm4608_vm8 = vmor %vm4606_vm0, %vm4607_vm7  ;;  %7343 = vrsqrt.f32 %v4540_v58  ;;  %vm4616_vm10 = vweird.f32 %v4540_v58  ;;  %5461 = vmatpush.bf16.msra.mxu1 %v6896_v27 }
 0xe93   :  { %v4602_v10 = vmul.f32 %v7342_v30, %v4601_v55  ;;  %v4599_v40 = vsel %vm4598_vm6, %v7340_v12, %v4595_v62 }
 0xe94   :  { %4889 = vmatmul.bf16.gmra.mxu2 %v4765_v15  ;;  %4510 = vadd.xlane.f32.xlu2 %v4482_v60  ;;  %v4714_v23 = vmul.f32 %v4599_v40, %v10317_v6 }
 0xe95   :  { %v4603_v48 = vmul.f32 0.5, %v4602_v10  ;;  %4938 = vmatmul.bf16.gmra.mxu3 %v4765_v15  ;;  %v4433_v59 = vpop.xlane.xlu1 %4432 }
 0xe96   :  { %v4451_v56 = vmul.f32 %v4433_v59, %v8473_v57  ;;  %v4733_v31 = vmul.f32 %v10474_v1, %v4714_v23 }
 0xe97   :  { %v4604_v11 = vsub.f32 1.5, %v4603_v48 }
 0xe98   :  { %v10537_v26 = vsub.f32 %v10349_v49, %v4451_v56  ;;  %v10549_v33 = vadd.f32 %v10488_v45, %v4733_v31  ;;  %v6887_v56 = vld [vmem:[%s11474_s10 + $0xb0] sm:$0xff]  ;;  %v6886_v31 = vld [vmem:[%s11474_s10 + $0xa8] sm:$0xff] }
 0xe99   :  { %v4605_v28 = vmul.f32 %v7342_v30, %v4604_v11  ;;  %v6895_v11 = vld [vmem:[%s11474_s10 + $0xf0] sm:$0xff]  ;;  %5413 = vmatpush.bf16.msrb.mxu0 %v6887_v56  ;;  %v6882_v56 = vld [vmem:[%s11474_s10 + $0x88] sm:$0xff] }
 0xe9a   :  { %v4483_v44 = vmul.f32 %v10537_v26, %v10537_v26  ;;  %5462 = vmatpush.bf16.msra.mxu1 %v6895_v11  ;;  %v6890_v11 = vld [vmem:[%s11474_s10 + $0xc8] sm:$0xff] }
 0xe9b   :  { %v4609_v13 = vsel %vm4608_vm8, %v7342_v30, %v4605_v28 }
 0xe9c   :  { %v4715_v8 = vmul.f32 %v4609_v13, %v10328_v18  ;;  %4512 = vadd.xlane.f32.xlu0 %v4483_v44 }
 0xe9d   :  { %v4435_v24 = vpop.xlane.xlu1 %4434  ;;  %5414 = vmatpush.bf16.msrb.mxu0 %v6886_v31 }
 0xe9e   :  { %v4452_v17 = vmul.f32 %v4435_v24, %v8473_v57  ;;  %v4734_v6 = vmul.f32 %v10474_v1, %v4715_v8  ;;  %v6894_v24 = vld [vmem:[%s11474_s10 + $0xe8] sm:$0xff] }
 0xe9f   :  { %5463 = vmatpush.bf16.msra.mxu1 %v6894_v24 }
 0xea0   :  { %v10546_v49 = vsub.f32 %v10354_v20, %v4452_v17  ;;  %v10552_v42 = vadd.f32 %v10488_v45, %v4734_v6  ;;  %v7344_v20 = vpop.eup %7343 }
 0xea1   :  { %v4611_v41 = vmul.f32 %v7344_v20, %v4540_v58  ;;  %vm4617_vm9 = vweird.f32 %v7344_v20 }
 0xea2   :  { %v4766_v18 = vpack.c.bf16 %v10552_v42, %v10549_v33  ;;  %v4484_v22 = vmul.f32 %v10546_v49, %v10546_v49  ;;  %vm4618_vm11 = vmor %vm4616_vm10, %vm4617_vm9 }
 0xea3   :  { %v4612_v25 = vmul.f32 %v7344_v20, %v4611_v41 }
 0xea4   :  { %4894 = vmatmul.bf16.gmra.mxu2 %v4766_v18  ;;  %4514 = vadd.xlane.f32.xlu1 %v4484_v22 }
 0xea5   :  { %4943 = vmatmul.bf16.gmra.mxu3 %v4766_v18  ;;  %v4613_v61 = vmul.f32 0.5, %v4612_v25  ;;  %v6885_v25 = vld [vmem:[%s11474_s10 + $0xa0] sm:$0xff] }
 0xea6   :  { %5415 = vmatpush.bf16.msrb.mxu0 %v6885_v25 }
 0xea7   :  { %v4614_v37 = vsub.f32 1.5, %v4613_v61 }
 0xea9   :  { %v4615_v52 = vmul.f32 %v7344_v20, %v4614_v37 }
 0xeab   :  { %v4619_v50 = vsel %vm4618_vm11, %v7344_v20, %v4615_v52 }
 0xeac   :  { %v4716_v60 = vmul.f32 %v4619_v50, %v10339_v16 }
 0xeae   :  { %v4735_v44 = vmul.f32 %v10474_v1, %v4716_v60 }
 0xeb0   :  { %v10597_v53 = vadd.f32 %v10488_v45, %v4735_v44 }
 0xedf   :  { %v4501_v29 = vpop.xlane.xlu2 %4500 }
 0xee0   :  { %v4525_v2 = vmul.f32 %v4501_v29, %v8473_v57  ;;  %v6893_v29 = vld [vmem:[%s11474_s10 + $0xe0] sm:$0xff] }
 0xee1   :  { %5464 = vmatpush.bf16.msra.mxu1 %v6893_v29 }
 0xee2   :  { %v4541_v12 = vadd.f32 1e-12, %v4525_v2 }
 0xee4   :  { %7345 = vrsqrt.f32 %v4541_v12  ;;  %vm4626_vm13 = vweird.f32 %v4541_v12 }
 0xee7   :  { %v4503_v34 = vpop.xlane.xlu2 %4502 }
 0xee8   :  { %v4526_v5 = vmul.f32 %v4503_v34, %v8473_v57 }
 0xeea   :  { %v7346_v38 = vpop.eup %7345  ;;  %v4542_v32 = vadd.f32 1e-12, %v4526_v5  ;;  %v6884_v5 = vld [vmem:[%s11474_s10 + $0x98] sm:$0xff] }
 0xeeb   :  { %v4621_v3 = vmul.f32 %v7346_v38, %v4541_v12  ;;  %vm4627_vm12 = vweird.f32 %v7346_v38  ;;  %5416 = vmatpush.bf16.msrb.mxu0 %v6884_v5 }
 0xeec   :  { %7347 = vrsqrt.f32 %v4542_v32  ;;  %vm4628_vm14 = vmor %vm4626_vm13, %vm4627_vm12  ;;  %vm4636_vm1 = vweird.f32 %v4542_v32 }
 0xeed   :  { %v4622_v7 = vmul.f32 %v7346_v38, %v4621_v3 }
 0xeef   :  { %v4623_v4 = vmul.f32 0.5, %v4622_v7  ;;  %v4505_v54 = vpop.xlane.xlu0 %4504  ;;  %v4437_v0 = vpop.xlane.xlu2 %4436  ;;  %v6567_v7 = vld [vmem:[%s11475_s9 + $0x2] sm:$0x3] }
 0xef0   :  { %v4527_v30 = vmul.f32 %v4505_v54, %v8473_v57  ;;  %v4453_v62 = vmul.f32 %v4437_v0, %v8473_v57  ;;  %v10637_v27 = vperm.slane %v6567_v7, 0 }
 0xef1   :  { %v4624_v55 = vsub.f32 1.5, %v4623_v4 }
 0xef2   :  { %v7348_v15 = vpop.eup %7347  ;;  %v10570_v10 = vadd.f32 1e-12, %v4527_v30  ;;  %v10573_v40 = vsub.f32 %v10483_v19, %v4453_v62 }
 0xef3   :  { %v4625_v48 = vmul.f32 %v7346_v38, %v4624_v55  ;;  %v4631_v59 = vmul.f32 %v7348_v15, %v4542_v32  ;;  %vm4637_vm15 = vweird.f32 %v7348_v15  ;;  %v10640_v55 = vperm.slane %v6567_v7, 1 }
 0xef4   :  { %7349 = vrsqrt.f32 %v10570_v10  ;;  %v4485_v16 = vmul.f32 %v10573_v40, %v10573_v40  ;;  %vm4638_vm2 = vmor %vm4636_vm1, %vm4637_vm15  ;;  %vm4646_vm4 = vweird.f32 %v10570_v10 }
 0xef5   :  { %v4629_v23 = vsel %vm4628_vm14, %v7346_v38, %v4625_v48  ;;  %v4632_v19 = vmul.f32 %v7348_v15, %v4631_v59  ;;  %v6892_v38 = vld [vmem:[%s11474_s10 + $0xd8] sm:$0xff] }
 0xef6   :  { %v4717_v28 = vmul.f32 %v4629_v23, %v10457_v46  ;;  %4516 = vadd.xlane.f32.xlu2 %v4485_v16  ;;  %5465 = vmatpush.bf16.msra.mxu1 %v6892_v38 }
 0xef7   :  { %v4633_v13 = vmul.f32 0.5, %v4632_v19  ;;  %v4507_v8 = vpop.xlane.xlu0 %4506 }
 0xef8   :  { %v4528_v17 = vmul.f32 %v4507_v8, %v8473_v57  ;;  %v4736_v6 = vmul.f32 %v10474_v1, %v4717_v28 }
 0xef9   :  { %v4634_v18 = vsub.f32 1.5, %v4633_v13 }
 0xefa   :  { %v7350_v46 = vpop.eup %7349  ;;  %v10594_v22 = vadd.f32 1e-12, %v4528_v17  ;;  %v10600_v58 = vadd.f32 %v10488_v45, %v4736_v6  ;;  %5466 = vmatpush.bf16.msra.mxu1 %v6891_v51 }
 0xefb   :  { %v4635_v20 = vmul.f32 %v7348_v15, %v4634_v18  ;;  %v4641_v41 = vmul.f32 %v7350_v46, %v10570_v10  ;;  %vm4647_vm3 = vweird.f32 %v7350_v46 }
 0xefc   :  { %7351 = vrsqrt.f32 %v10594_v22  ;;  %v4767_v2 = vpack.c.bf16 %v10600_v58, %v10597_v53  ;;  %vm4648_vm5 = vmor %vm4646_vm4, %vm4647_vm3  ;;  %vm4656_vm7 = vweird.f32 %v10594_v22 }
 0xefd   :  { %v4642_v12 = vmul.f32 %v7350_v46, %v4641_v41  ;;  %v4639_v61 = vsel %vm4638_vm2, %v7348_v15, %v4635_v20  ;;  %v6889_v20 = vld [vmem:[%s11474_s10 + $0xc0] sm:$0xff] }
 0xefe   :  { %4899 = vmatmul.bf16.gmra.mxu2 %v4767_v2  ;;  %4948 = vmatmul.bf16.gmra.mxu3 %v4767_v2  ;;  %v4718_v52 = vmul.f32 %v4639_v61, %v10464_v36  ;;  %v6883_v36 = vld [vmem:[%s11474_s10 + $0x90] sm:$0xff] }
 0xeff   :  { %v4643_v37 = vmul.f32 0.5, %v4642_v12  ;;  %v4509_v34 = vpop.xlane.xlu1 %4508  ;;  %5417 = vmatpush.bf16.msrb.mxu0 %v6883_v36  ;;  %5467 = vmatpush.bf16.msra.mxu1 %v6890_v11 }
 0xf00   :  { %v4529_v32 = vmul.f32 %v4509_v34, %v8473_v57  ;;  %v4737_v15 = vmul.f32 %v10474_v1, %v4718_v52 }
 0xf01   :  { %v4644_v3 = vsub.f32 1.5, %v4643_v37 }
 0xf02   :  { %v10623_v50 = vpop.eup %7351  ;;  %v10625_v4 = vadd.f32 1e-12, %v4529_v32  ;;  %v10659_v44 = vadd.f32 %v10488_v45, %v4737_v15 }
 0xf03   :  { %v4645_v54 = vmul.f32 %v7350_v46, %v4644_v3  ;;  %v4651_v0 = vmul.f32 %v10623_v50, %v10594_v22  ;;  %5418 = vmatpush.bf16.msrb.mxu0 %v6882_v56  ;;  %5468 = vmatpush.bf16.msra.mxu1 %v6889_v20  ;;  %vm4657_vm6 = vweird.f32 %v10623_v50 }
 0xf04   :  { %7353 = vrsqrt.f32 %v10625_v4  ;;  %vm10690_vm0 = vmor %vm4656_vm7, %vm4657_vm6  ;;  %vm4666_vm9 = vweird.f32 %v10625_v4 }
 0xf05   :  { %v4649_v30 = vsel %vm4648_vm5, %v7350_v46, %v4645_v54  ;;  %v4652_v62 = vmul.f32 %v10623_v50, %v4651_v0  ;;  %v6881_v46 = vld [vmem:[%s11474_s10 + $0x80] sm:$0xff] }
 0xf06   :  { %v4719_v60 = vmul.f32 %v4649_v30, %v10478_v9 }
 0xf07   :  { %v4653_v10 = vmul.f32 0.5, %v4652_v62  ;;  %v4885_v48 = vpop.f32.mrf.mxu2  ;;  %v4511_v59 = vpop.xlane.xlu2 %4510  ;;  %5419 = vmatpush.bf16.msrb.mxu0 %v6881_v46 }
 0xf08   :  { %v10651_v16 = vadd.f32 %v4885_v48, %v10637_v27  ;;  %v4934_v23 = vpop.f32.mrf.mxu3  ;;  %v4530_v19 = vmul.f32 %v4511_v59, %v8473_v57  ;;  %v4738_v28 = vmul.f32 %v10474_v1, %v4719_v60 }
 0xf09   :  { %v10656_v9 = vadd.f32 %v4934_v23, %v10640_v55  ;;  %v4654_v8 = vsub.f32 1.5, %v4653_v10 }
 0xf0a   :  { %v7354_v13 = vpop.eup %7353  ;;  %v4974_v31 = vmul.f32 %v10651_v16, %v10651_v16  ;;  %v10663_v24 = vadd.f32 1e-12, %v4530_v19  ;;  %v10666_v17 = vadd.f32 %v10488_v45, %v4738_v28 }
 0xf0b   :  { %v4661_v6 = vmul.f32 %v7354_v13, %v10625_v4  ;;  %v4975_v18 = vmul.f32 %v10656_v9, %v10656_v9  ;;  %v4655_v12 = vmul.f32 %v10623_v50, %v4654_v8  ;;  %vm4667_vm8 = vweird.f32 %v7354_v13 }
 0xf0c   :  { %v5006_v41 = vmul.f32 %v4974_v31, %v10651_v16  ;;  %7355 = vrsqrt.f32 %v10663_v24  ;;  %v4768_v25 = vpack.c.bf16 %v10666_v17, %v10659_v44  ;;  %vm4668_vm10 = vmor %vm4666_vm9, %vm4667_vm8  ;;  %vm4676_vm12 = vweird.f32 %v10663_v24 }
 0xf0d   :  { %v4662_v29 = vmul.f32 %v7354_v13, %v4661_v6  ;;  %v5007_v2 = vmul.f32 %v4975_v18, %v10656_v9  ;;  %v4659_v30 = vsel %vm10690_vm0, %v10623_v50, %v4655_v12 }
 0xf0e   :  { %v5038_v61 = vmul.f32 0.044715, %v5006_v41  ;;  %4904 = vmatmul.bf16.gmra.mxu2 %v4768_v25  ;;  %4953 = vmatmul.bf16.gmra.mxu3 %v4768_v25  ;;  %v4720_v11 = vmul.f32 %v4659_v30, %v10503_v21 }
 0xf0f   :  { %v4663_v37 = vmul.f32 0.5, %v4662_v29  ;;  %v5039_v34 = vmul.f32 0.044715, %v5007_v2  ;;  %v4887_v5 = vpop.f32.mrf.mxu2  ;;  %v4513_v38 = vpop.xlane.xlu0 %4512 }
 0xf10   :  { %v5070_v32 = vadd.f32 %v5038_v61, %v10651_v16  ;;  %v10687_v52 = vadd.f32 %v4887_v5, %v10637_v27  ;;  %v4936_v3 = vpop.f32.mrf.mxu3  ;;  %v4531_v7 = vmul.f32 %v4513_v38, %v8473_v57  ;;  %v4739_v61 = vmul.f32 %v10474_v1, %v4720_v11 }
 0xf11   :  { %v4664_v0 = vsub.f32 1.5, %v4663_v37  ;;  %v5071_v36 = vadd.f32 %v5039_v34, %v10656_v9  ;;  %v10696_v51 = vadd.f32 %v4936_v3, %v10640_v55 }
 0xf12   :  { %v10698_v22 = vpop.eup %7355  ;;  %v5102_v62 = vmul.f32 0.7978846, %v5070_v32  ;;  %v4976_v15 = vmul.f32 %v10687_v52, %v10687_v52  ;;  %v10705_v60 = vadd.f32 1e-12, %v4531_v7 }
 0xf13   :  { %v4665_v10 = vmul.f32 %v7354_v13, %v4664_v0  ;;  %v5103_v48 = vmul.f32 0.7978846, %v5071_v36  ;;  %v4671_v59 = vmul.f32 %v10698_v22, %v10663_v24  ;;  %v4977_v50 = vmul.f32 %v10696_v51, %v10696_v51 }
 0xf14   :  { %7357 = vtanh.f32 %v5102_v62  ;;  %v5008_v56 = vmul.f32 %v4976_v15, %v10687_v52  ;;  %vm4677_vm11 = vweird.f32 %v10698_v22  ;;  %v10745_v15 = vadd.f32 %v10488_v45, %v4739_v61 }
 0xf15   :  { %v4669_v23 = vsel %vm4668_vm10, %v7354_v13, %v4665_v10  ;;  %7359 = vtanh.f32 %v5103_v48  ;;  %v4672_v19 = vmul.f32 %v10698_v22, %v4671_v59  ;;  %v5009_v8 = vmul.f32 %v4977_v50, %v10696_v51  ;;  %vm10740_vm13 = vmor %vm4676_vm12, %vm4677_vm11 }
 0xf16   :  { %v4721_v28 = vmul.f32 %v4669_v23, %v10513_v63  ;;  %v5040_v4 = vmul.f32 0.044715, %v5008_v56  ;;  %7361 = vrsqrt.f32 %v10705_v60  ;;  %vm4686_vm15 = vweird.f32 %v10705_v60 }
 0xf17   :  { %v4673_v31 = vmul.f32 0.5, %v4672_v19  ;;  %v4890_v6 = vpop.f32.mrf.mxu2  ;;  %v5041_v46 = vmul.f32 0.044715, %v5009_v8 }
 0xf18   :  { %v5072_v18 = vadd.f32 %v5040_v4, %v10687_v52  ;;  %v10720_v20 = vadd.f32 %v4890_v6, %v10637_v27  ;;  %v4939_v21 = vpop.f32.mrf.mxu3  ;;  %v4740_v63 = vmul.f32 %v10474_v1, %v4721_v28 }
 0xf19   :  { %v4674_v13 = vsub.f32 1.5, %v4673_v31  ;;  %v10723_v41 = vadd.f32 %v4939_v21, %v10640_v55  ;;  %v5073_v2 = vadd.f32 %v5041_v46, %v10696_v51 }
 0xf1a   :  { %v7358_v25 = vpop.eup %7357  ;;  %v5104_v29 = vmul.f32 0.7978846, %v5072_v18  ;;  %v4978_v12 = vmul.f32 %v10720_v20, %v10720_v20  ;;  %v10736_v54 = vadd.f32 %v10488_v45, %v4740_v63 }
 0xf1b   :  { %v7360_v37 = vpop.eup %7359  ;;  %v5166_v34 = vadd.f32 1.0, %v7358_v25  ;;  %v4675_v5 = vmul.f32 %v10698_v22, %v4674_v13  ;;  %v4979_v38 = vmul.f32 %v10723_v41, %v10723_v41  ;;  %v5105_v3 = vmul.f32 0.7978846, %v5073_v2 }
 0xf1c   :  { %v7362_v32 = vpop.eup %7361  ;;  %7363 = vtanh.f32 %v5104_v29  ;;  %v5010_v7 = vmul.f32 %v4978_v12, %v10720_v20  ;;  %v5167_v36 = vadd.f32 1.0, %v7360_v37  ;;  %v4769_v11 = vpack.c.bf16 %v10736_v54, %v10745_v15 }
 0xf1d   :  { %v4681_v0 = vmul.f32 %v7362_v32, %v10705_v60  ;;  %7365 = vtanh.f32 %v5105_v3  ;;  %v4679_v10 = vsel %vm10740_vm13, %v10698_v22, %v4675_v5  ;;  %v5011_v59 = vmul.f32 %v4979_v38, %v10723_v41 }
 0xf1e   :  { %v5042_v62 = vmul.f32 0.044715, %v5010_v7  ;;  %v5198_v56 = vmul.f32 0.5, %v5166_v34  ;;  %v5199_v31 = vmul.f32 0.5, %v5167_v36  ;;  %v4722_v6 = vmul.f32 %v4679_v10, %v10522_v14  ;;  %4909 = vmatmul.bf16.gmra.mxu2 %v4769_v11  ;;  %4958 = vmatmul.bf16.gmra.mxu3 %v4769_v11 }
 0xf1f   :  { %v4682_v48 = vmul.f32 %v7362_v32, %v4681_v0  ;;  %v4892_v24 = vpop.f32.mrf.mxu2  ;;  %v5043_v28 = vmul.f32 0.044715, %v5011_v59  ;;  %vm4687_vm14 = vweird.f32 %v7362_v32 }
 0xf20   :  { %v5074_v50 = vadd.f32 %v5042_v62, %v10720_v20  ;;  %v4941_v23 = vpop.f32.mrf.mxu3  ;;  %v10755_v4 = vadd.f32 %v4892_v24, %v10637_v27  ;;  %v5230_v29 = vmul.f32 %v5198_v56, %v10651_v16  ;;  %v5231_v34 = vmul.f32 %v5199_v31, %v10656_v9  ;;  %vm4688_vm1 = vmor %vm4686_vm15, %vm4687_vm14 }
 0xf21   :  { %v4683_v19 = vmul.f32 0.5, %v4682_v48  ;;  %v10758_v8 = vadd.f32 %v4941_v23, %v10640_v55  ;;  %v5075_v13 = vadd.f32 %v5043_v28, %v10723_v41  ;;  %v4741_v3 = vmul.f32 %v10474_v1, %v4722_v6 }
 0xf22   :  { %v7364_v22 = vpop.eup %7363  ;;  %v5106_v18 = vmul.f32 0.7978846, %v5074_v50  ;;  %v4980_v63 = vmul.f32 %v10755_v4, %v10755_v4 }
 0xf23   :  { %v5168_v46 = vadd.f32 1.0, %v7364_v22  ;;  %v4684_v21 = vsub.f32 1.5, %v4683_v19  ;;  %v7366_v25 = vpop.eup %7365  ;;  %v4981_v2 = vmul.f32 %v10758_v8, %v10758_v8  ;;  %v5107_v37 = vmul.f32 0.7978846, %v5075_v13 }
 0xf24   :  { %v5169_v12 = vadd.f32 1.0, %v7366_v25  ;;  %v5012_v5 = vmul.f32 %v4980_v63, %v10755_v4  ;;  %7367 = vtanh.f32 %v5106_v18  ;;  %v10790_v19 = vadd.f32 %v10488_v45, %v4741_v3 }
 0xf25   :  { %v5200_v14 = vmul.f32 0.5, %v5168_v46  ;;  %v4685_v61 = vmul.f32 %v7362_v32, %v4684_v21  ;;  %v5013_v38 = vmul.f32 %v4981_v2, %v10758_v8  ;;  %7369 = vtanh.f32 %v5107_v37 }
 0xf26   :  { %v5201_v60 = vmul.f32 0.5, %v5169_v12  ;;  %v5044_v30 = vmul.f32 0.044715, %v5012_v5 }
 0xf27   :  { %v5232_v16 = vmul.f32 %v5200_v14, %v10687_v52  ;;  %v4689_v7 = vsel %vm4688_vm1, %v7362_v32, %v4685_v61  ;;  %v4895_v0 = vpop.f32.mrf.mxu2  ;;  %v5045_v62 = vmul.f32 0.044715, %v5013_v38 }
 0xf28   :  { %v4723_v36 = vmul.f32 %v4689_v7, %v10537_v26  ;;  %v4944_v9 = vpop.f32.mrf.mxu3  ;;  %v5233_v48 = vmul.f32 %v5201_v60, %v10696_v51  ;;  %v10777_v59 = vadd.f32 %v4895_v0, %v10637_v27  ;;  %v5076_v52 = vadd.f32 %v5044_v30, %v10755_v4 }
 0xf29   :  { %v5262_v10 = vpack.c.bf16 %v5232_v16, %v5230_v29  ;;  %v10780_v24 = vadd.f32 %v4944_v9, %v10640_v55  ;;  %v5077_v32 = vadd.f32 %v5045_v62, %v10758_v8 }
 0xf2a   :  { %v4742_v56 = vmul.f32 %v10474_v1, %v4723_v36  ;;  %v5263_v26 = vpack.c.bf16 %v5233_v48, %v5231_v34  ;;  %v4982_v50 = vmul.f32 %v10777_v59, %v10777_v59  ;;  %v5108_v51 = vmul.f32 0.7978846, %v5076_v52  ;;  %v7368_v22 = vpop.eup %7367 }
 0xf2b   :  { %v4983_v11 = vmul.f32 %v10780_v24, %v10780_v24  ;;  %5420 = vmatmul.bf16.vlgmr.msrb.gmra.mxu0 %v5262_v10  ;;  %v5109_v23 = vmul.f32 0.7978846, %v5077_v32  ;;  %v7370_v18 = vpop.eup %7369  ;;  %v5170_v61 = vadd.f32 1.0, %v7368_v22 }
 0xf2c   :  { %v10793_v28 = vadd.f32 %v10488_v45, %v4742_v56  ;;  %v5014_v31 = vmul.f32 %v4982_v50, %v10777_v59  ;;  %5469 = vmatmul.bf16.vlgmr.msra.gmra.mxu1 %v5263_v26  ;;  %7371 = vtanh.f32 %v5108_v51  ;;  %v5171_v34 = vadd.f32 1.0, %v7370_v18 }
 0xf2d   :  { %v5015_v6 = vmul.f32 %v4983_v11, %v10780_v24  ;;  %7373 = vtanh.f32 %v5109_v23  ;;  %v5202_v30 = vmul.f32 0.5, %v5170_v61 }
 0xf2e   :  { %v4770_v46 = vpack.c.bf16 %v10793_v28, %v10790_v19  ;;  %v5046_v21 = vmul.f32 0.044715, %v5014_v31  ;;  %v5203_v10 = vmul.f32 0.5, %v5171_v34 }
 0xf2f   :  { %v5047_v13 = vmul.f32 0.044715, %v5015_v6  ;;  %v4897_v63 = vpop.f32.mrf.mxu2  ;;  %v5234_v50 = vmul.f32 %v5202_v30, %v10720_v20 }
 0xf30   :  { %v4898_v25 = vadd.f32 %v4897_v63, %v10637_v27  ;;  %v4946_v29 = vpop.f32.mrf.mxu3  ;;  %v5078_v2 = vadd.f32 %v5046_v21, %v10777_v59  ;;  %4914 = vmatmul.bf16.gmra.mxu2 %v4770_v46  ;;  %4963 = vmatmul.bf16.gmra.mxu3 %v4770_v46  ;;  %v5235_v23 = vmul.f32 %v5203_v10, %v10723_v41 }
 0xf31   :  { %v5079_v14 = vadd.f32 %v5047_v13, %v10780_v24  ;;  %v4947_v12 = vadd.f32 %v4946_v29, %v10640_v55 }
 0xf32   :  { %v4984_v37 = vmul.f32 %v4898_v25, %v4898_v25  ;;  %v5110_v5 = vmul.f32 0.7978846, %v5078_v2  ;;  %v7372_v16 = vpop.eup %7371 }
 0xf33   :  { %v5111_v38 = vmul.f32 0.7978846, %v5079_v14  ;;  %v4985_v3 = vmul.f32 %v4947_v12, %v4947_v12  ;;  %v7374_v7 = vpop.eup %7373  ;;  %v5172_v36 = vadd.f32 1.0, %v7372_v16 }
 0xf34   :  { %v5016_v60 = vmul.f32 %v4984_v37, %v4898_v25  ;;  %7375 = vtanh.f32 %v5110_v5  ;;  %v5173_v9 = vadd.f32 1.0, %v7374_v7 }
 0xf35   :  { %v5017_v0 = vmul.f32 %v4985_v3, %v4947_v12  ;;  %7377 = vtanh.f32 %v5111_v38  ;;  %v5204_v52 = vmul.f32 0.5, %v5172_v36 }
 0xf36   :  { %v5048_v62 = vmul.f32 0.044715, %v5016_v60  ;;  %v5205_v56 = vmul.f32 0.5, %v5173_v9  ;;  %v4515_v60 = vpop.xlane.xlu1 %4514 }
 0xf37   :  { %v5049_v48 = vmul.f32 0.044715, %v5017_v0  ;;  %v5236_v11 = vmul.f32 %v5204_v52, %v10755_v4  ;;  %v4532_v7 = vmul.f32 %v4515_v60, %v8473_v57 }
 0xf38   :  { %v5080_v32 = vadd.f32 %v5048_v62, %v4898_v25  ;;  %v5237_v22 = vmul.f32 %v5205_v56, %v10758_v8 }
 0xf39   :  { %v5081_v26 = vadd.f32 %v5049_v48, %v4947_v12  ;;  %v5264_v6 = vpack.c.bf16 %v5236_v11, %v5234_v50  ;;  %v4548_v0 = vadd.f32 1e-12, %v4532_v7 }
 0xf3a   :  { %v5112_v51 = vmul.f32 0.7978846, %v5080_v32  ;;  %v7376_v18 = vpop.eup %7375  ;;  %v5265_v46 = vpack.c.bf16 %v5237_v22, %v5235_v23 }
 0xf3b   :  { %v5113_v31 = vmul.f32 0.7978846, %v5081_v26  ;;  %v7378_v21 = vpop.eup %7377  ;;  %5425 = vmatmul.bf16.gmra.mxu0 %v5264_v6  ;;  %v5174_v13 = vadd.f32 1.0, %v7376_v18  ;;  %vm4696_vm3 = vweird.f32 %v4548_v0 }
 0xf3c   :  { %7379 = vtanh.f32 %v5112_v51  ;;  %5474 = vmatmul.bf16.gmra.mxu1 %v5265_v46  ;;  %v5175_v63 = vadd.f32 1.0, %v7378_v21 }
 0xf3d   :  { %7381 = vtanh.f32 %v5113_v31  ;;  %v5206_v4 = vmul.f32 0.5, %v5174_v13 }
 0xf3e   :  { %v5207_v61 = vmul.f32 0.5, %v5175_v63  ;;  %7383 = vrsqrt.f32 %v4548_v0 }
 0xf3f   :  { %v5238_v8 = vmul.f32 %v5206_v4, %v10777_v59 }
 0xf40   :  { %v5239_v5 = vmul.f32 %v5207_v61, %v10780_v24 }
 0xf42   :  { %v7380_v29 = vpop.eup %7379 }
 0xf43   :  { %v7382_v20 = vpop.eup %7381  ;;  %v5176_v2 = vadd.f32 1.0, %v7380_v29 }
 0xf44   :  { %v5177_v14 = vadd.f32 1.0, %v7382_v20  ;;  %v7384_v36 = vpop.eup %7383 }
 0xf45   :  { %v5208_v41 = vmul.f32 0.5, %v5176_v2  ;;  %v4691_v30 = vmul.f32 %v7384_v36, %v4548_v0  ;;  %vm4697_vm2 = vweird.f32 %v7384_v36 }
 0xf46   :  { %v5209_v37 = vmul.f32 0.5, %v5177_v14  ;;  %vm4698_vm4 = vmor %vm4696_vm3, %vm4697_vm2 }
 0xf47   :  { %v5240_v34 = vmul.f32 %v5208_v41, %v4898_v25  ;;  %v4692_v62 = vmul.f32 %v7384_v36, %v4691_v30 }
 0xf48   :  { %v5241_v38 = vmul.f32 %v5209_v37, %v4947_v12 }
 0xf49   :  { %v5266_v3 = vpack.c.bf16 %v5240_v34, %v5238_v8  ;;  %v4693_v25 = vmul.f32 0.5, %v4692_v62 }
 0xf4a   :  { %v5267_v16 = vpack.c.bf16 %v5241_v38, %v5239_v5 }
 0xf4b   :  { %5430 = vmatmul.bf16.gmra.mxu0 %v5266_v3  ;;  %v4694_v24 = vsub.f32 1.5, %v4693_v25 }
 0xf4c   :  { %5479 = vmatmul.bf16.gmra.mxu1 %v5267_v16 }
 0xf4d   :  { %v4695_v48 = vmul.f32 %v7384_v36, %v4694_v24 }
 0xf4f   :  { %v4699_v56 = vsel %vm4698_vm4, %v7384_v36, %v4695_v48 }
 0xf50   :  { %v4724_v11 = vmul.f32 %v4699_v56, %v10546_v49 }
 0xf52   :  { %v4743_v31 = vmul.f32 %v10474_v1, %v4724_v11 }
 0xf69   :  { %v4517_v9 = vpop.xlane.xlu2 %4516 }
 0xf6a   :  { %v4533_v10 = vmul.f32 %v4517_v9, %v8473_v57 }
 0xf6c   :  { %v4549_v59 = vadd.f32 1e-12, %v4533_v10 }
 0xf6e   :  { %7385 = vrsqrt.f32 %v4549_v59  ;;  %vm4706_vm6 = vweird.f32 %v4549_v59 }
 0xf74   :  { %v7386_v12 = vpop.eup %7385 }
 0xf75   :  { %v4701_v52 = vmul.f32 %v7386_v12, %v4549_v59  ;;  %vm4707_vm5 = vweird.f32 %v7386_v12 }
 0xf76   :  { %vm4708_vm7 = vmor %vm4706_vm6, %vm4707_vm5 }
 0xf77   :  { %v4702_v32 = vmul.f32 %v7386_v12, %v4701_v52 }
 0xf79   :  { %v4703_v26 = vmul.f32 0.5, %v4702_v32 }
 0xf7b   :  { %v4704_v50 = vsub.f32 1.5, %v4703_v26 }
 0xf7d   :  { %v4705_v51 = vmul.f32 %v7386_v12, %v4704_v50 }
 0xf7f   :  { %v4709_v23 = vsel %vm4708_vm7, %v7386_v12, %v4705_v51 }
 0xf80   :  { %v4725_v22 = vmul.f32 %v4709_v23, %v10573_v40  ;;  %v10826_v40 = vadd.f32 %v10488_v45, %v4743_v31 }
 0xf81   :  { %v4900_v6 = vpop.f32.mrf.mxu2  ;;  %v4949_v18 = vpop.f32.mrf.mxu3 }
 0xf82   :  { %v10815_v46 = vadd.f32 %v4900_v6, %v10637_v27  ;;  %v10818_v21 = vadd.f32 %v4949_v18, %v10640_v55  ;;  %v4744_v13 = vmul.f32 %v10474_v1, %v4725_v22 }
 0xf84   :  { %v4986_v49 = vmul.f32 %v10815_v46, %v10815_v46  ;;  %v4987_v63 = vmul.f32 %v10818_v21, %v10818_v21  ;;  %v10829_v29 = vadd.f32 %v10488_v45, %v4744_v13 }
 0xf86   :  { %v5018_v20 = vmul.f32 %v4986_v49, %v10815_v46  ;;  %v5019_v2 = vmul.f32 %v4987_v63, %v10818_v21  ;;  %v4771_v4 = vpack.c.bf16 %v10829_v29, %v10826_v40 }
 0xf88   :  { %v5050_v1 = vmul.f32 0.044715, %v5018_v20  ;;  %v5051_v14 = vmul.f32 0.044715, %v5019_v2  ;;  %4919 = vmatmul.bf16.gmra.mxu2 %v4771_v4  ;;  %4968 = vmatmul.bf16.gmra.mxu3 %v4771_v4 }
 0xf89   :  { %v4902_v61 = vpop.f32.mrf.mxu2  ;;  %v4951_v41 = vpop.f32.mrf.mxu3 }
 0xf8a   :  { %v5082_v37 = vadd.f32 %v5050_v1, %v10815_v46  ;;  %v5083_v8 = vadd.f32 %v5051_v14, %v10818_v21  ;;  %v4903_v45 = vadd.f32 %v4902_v61, %v10637_v27  ;;  %v4952_v34 = vadd.f32 %v4951_v41, %v10640_v55 }
 0xf8c   :  { %v5114_v5 = vmul.f32 0.7978846, %v5082_v37  ;;  %v5115_v38 = vmul.f32 0.7978846, %v5083_v8  ;;  %v4988_v3 = vmul.f32 %v4903_v45, %v4903_v45  ;;  %v4989_v16 = vmul.f32 %v4952_v34, %v4952_v34 }
 0xf8e   :  { %v5020_v60 = vmul.f32 %v4988_v3, %v4903_v45  ;;  %v5021_v7 = vmul.f32 %v4989_v16, %v4952_v34  ;;  %7387 = vtanh.f32 %v5114_v5 }
 0xf8f   :  { %7389 = vtanh.f32 %v5115_v38 }
 0xf90   :  { %v5052_v0 = vmul.f32 0.044715, %v5020_v60  ;;  %v5053_v36 = vmul.f32 0.044715, %v5021_v7 }
 0xf91   :  { %v4905_v30 = vpop.f32.mrf.mxu2  ;;  %v4954_v62 = vpop.f32.mrf.mxu3 }
 0xf92   :  { %v5084_v9 = vadd.f32 %v5052_v0, %v4903_v45  ;;  %v5085_v10 = vadd.f32 %v5053_v36, %v4952_v34  ;;  %v10840_v59 = vadd.f32 %v4905_v30, %v10637_v27  ;;  %v10843_v25 = vadd.f32 %v4954_v62, %v10640_v55 }
 0xf94   :  { %v5116_v24 = vmul.f32 0.7978846, %v5084_v9  ;;  %v5117_v12 = vmul.f32 0.7978846, %v5085_v10  ;;  %v4990_v48 = vmul.f32 %v10840_v59, %v10840_v59  ;;  %v4991_v52 = vmul.f32 %v10843_v25, %v10843_v25  ;;  %v7388_v32 = vpop.eup %7387 }
 0xf95   :  { %v7390_v56 = vpop.eup %7389  ;;  %v5178_v31 = vadd.f32 1.0, %v7388_v32 }
 0xf96   :  { %7391 = vtanh.f32 %v5116_v24  ;;  %v5022_v26 = vmul.f32 %v4990_v48, %v10840_v59  ;;  %v5023_v50 = vmul.f32 %v4991_v52, %v10843_v25  ;;  %v5179_v6 = vadd.f32 1.0, %v7390_v56 }
 0xf97   :  { %7393 = vtanh.f32 %v5117_v12  ;;  %v5210_v37 = vmul.f32 0.5, %v5178_v31 }
 0xf98   :  { %v5054_v11 = vmul.f32 0.044715, %v5022_v26  ;;  %v5055_v51 = vmul.f32 0.044715, %v5023_v50  ;;  %v5211_v3 = vmul.f32 0.5, %v5179_v6 }
 0xf99   :  { %v4907_v23 = vpop.f32.mrf.mxu2  ;;  %v4956_v22 = vpop.f32.mrf.mxu3  ;;  %v5242_v36 = vmul.f32 %v5210_v37, %v10815_v46  ;;  %v10872_v46 = vld [vmem:[%s11476_s11 + $0x1] ss:$0 sm:$0xff] }
 0xf9a   :  { %v5086_v18 = vadd.f32 %v5054_v11, %v10840_v59  ;;  %v5087_v13 = vadd.f32 %v5055_v51, %v10843_v25  ;;  %v10854_v49 = vadd.f32 %v4907_v23, %v10637_v27  ;;  %v10857_v63 = vadd.f32 %v4956_v22, %v10640_v55 }
 0xf9b   :  { %v5243_v10 = vmul.f32 %v5211_v3, %v10818_v21 }
 0xf9c   :  { %v7392_v20 = vpop.eup %7391  ;;  %v5118_v2 = vmul.f32 0.7978846, %v5086_v18  ;;  %v5119_v4 = vmul.f32 0.7978846, %v5087_v13  ;;  %v4992_v1 = vmul.f32 %v10854_v49, %v10854_v49  ;;  %v4993_v14 = vmul.f32 %v10857_v63, %v10857_v63 }
 0xf9d   :  { %v7394_v61 = vpop.eup %7393  ;;  %v5180_v41 = vadd.f32 1.0, %v7392_v20 }
 0xf9e   :  { %v5024_v8 = vmul.f32 %v4992_v1, %v10854_v49  ;;  %v5025_v5 = vmul.f32 %v4993_v14, %v10857_v63  ;;  %v5181_v38 = vadd.f32 1.0, %v7394_v61  ;;  %7395 = vtanh.f32 %v5118_v2 }
 0xf9f   :  { %v5212_v16 = vmul.f32 0.5, %v5180_v41  ;;  %7397 = vtanh.f32 %v5119_v4 }
 0xfa0   :  { %v5056_v60 = vmul.f32 0.044715, %v5024_v8  ;;  %v5057_v7 = vmul.f32 0.044715, %v5025_v5  ;;  %v5213_v0 = vmul.f32 0.5, %v5181_v38 }
 0xfa1   :  { %v5244_v30 = vmul.f32 %v5212_v16, %v4903_v45  ;;  %v4910_v26 = vpop.f32.mrf.mxu2  ;;  %v4959_v50 = vpop.f32.mrf.mxu3 }
 0xfa2   :  { %v5088_v62 = vadd.f32 %v5056_v60, %v10854_v49  ;;  %v5089_v9 = vadd.f32 %v5057_v7, %v10857_v63  ;;  %v5245_v24 = vmul.f32 %v5213_v0, %v4952_v34  ;;  %v10875_v11 = vadd.f32 %v4910_v26, %v10637_v27 }
 0xfa3   :  { %v5268_v12 = vpack.c.bf16 %v5244_v30, %v5242_v36  ;;  %v10878_v21 = vadd.f32 %v4959_v50, %v10640_v55 }
 0xfa4   :  { %v5120_v48 = vmul.f32 0.7978846, %v5088_v62  ;;  %v5121_v52 = vmul.f32 0.7978846, %v5089_v9  ;;  %v5269_v32 = vpack.c.bf16 %v5245_v24, %v5243_v10  ;;  %v7396_v56 = vpop.eup %7395  ;;  %v4994_v34 = vmul.f32 %v10875_v11, %v10875_v11 }
 0xfa5   :  { %5435 = vmatmul.bf16.gmra.mxu0 %v5268_v12  ;;  %v7398_v45 = vpop.eup %7397  ;;  %v4995_v51 = vmul.f32 %v10878_v21, %v10878_v21  ;;  %v5182_v31 = vadd.f32 1.0, %v7396_v56 }
 0xfa6   :  { %7399 = vtanh.f32 %v5120_v48  ;;  %5484 = vmatmul.bf16.gmra.mxu1 %v5269_v32  ;;  %v5183_v6 = vadd.f32 1.0, %v7398_v45  ;;  %v5026_v18 = vmul.f32 %v4994_v34, %v10875_v11 }
 0xfa7   :  { %7401 = vtanh.f32 %v5121_v52  ;;  %v5027_v13 = vmul.f32 %v4995_v51, %v10878_v21  ;;  %v5214_v5 = vmul.f32 0.5, %v5182_v31 }
 0xfa8   :  { %v5421_v23 = vpop.f32.mrf.mxu0  ;;  %v5058_v1 = vmul.f32 0.044715, %v5026_v18  ;;  %v5215_v38 = vmul.f32 0.5, %v5183_v6 }
 0xfa9   :  { %v5422_v22 = vadd.f32 %v10872_v46, %v5421_v23  ;;  %v5470_v20 = vpop.f32.mrf.mxu1  ;;  %v5059_v14 = vmul.f32 0.044715, %v5027_v13  ;;  %v4912_v41 = vpop.f32.mrf.mxu2  ;;  %v5246_v48 = vmul.f32 %v5214_v5, %v10840_v59 }
 0xfaa   :  { %v4961_v37 = vpop.f32.mrf.mxu3  ;;  %v5090_v3 = vadd.f32 %v5058_v1, %v10875_v11  ;;  %v10892_v60 = vadd.f32 %v4912_v41, %v10637_v27  ;;  %v5247_v45 = vmul.f32 %v5215_v38, %v10843_v25 }
 0xfab   :  { %v10887_v2 = vadd.f32 %v5470_v20, %v5422_v22  ;;  %v5091_v16 = vadd.f32 %v5059_v14, %v10878_v21  ;;  %v10895_v7 = vadd.f32 %v4961_v37, %v10640_v55 }
 0xfac   :  { %v7400_v4 = vpop.eup %7399  ;;  %v5122_v30 = vmul.f32 0.7978846, %v5090_v3  ;;  %v4996_v9 = vmul.f32 %v10892_v60, %v10892_v60 }
 0xfad   :  { %v7402_v61 = vpop.eup %7401  ;;  %v5184_v8 = vadd.f32 1.0, %v7400_v4  ;;  %v5123_v62 = vmul.f32 0.7978846, %v5091_v16  ;;  %v4997_v10 = vmul.f32 %v10895_v7, %v10895_v7 }
 0xfae   :  { %v5185_v36 = vadd.f32 1.0, %v7402_v61  ;;  %v5028_v56 = vmul.f32 %v4996_v9, %v10892_v60  ;;  %7403 = vtanh.f32 %v5122_v30 }
 0xfaf   :  { %v5216_v0 = vmul.f32 0.5, %v5184_v8  ;;  %v5029_v26 = vmul.f32 %v4997_v10, %v10895_v7  ;;  %7405 = vtanh.f32 %v5123_v62 }
 0xfb0   :  { %v5423_v24 = vpop.f32.mrf.mxu0  ;;  %v5217_v32 = vmul.f32 0.5, %v5185_v36  ;;  %v5060_v22 = vmul.f32 0.044715, %v5028_v56 }
 0xfb1   :  { %v5424_v12 = vadd.f32 %v10872_v46, %v5423_v24  ;;  %v5248_v52 = vmul.f32 %v5216_v0, %v10854_v49  ;;  %v5472_v50 = vpop.f32.mrf.mxu1  ;;  %v5061_v31 = vmul.f32 0.044715, %v5029_v26 }
 0xfb2   :  { %v5249_v23 = vmul.f32 %v5217_v32, %v10857_v63  ;;  %v5092_v18 = vadd.f32 %v5060_v22, %v10892_v60 }
 0xfb3   :  { %v10907_v34 = vadd.f32 %v5472_v50, %v5424_v12  ;;  %v5270_v51 = vpack.c.bf16 %v5248_v52, %v5246_v48  ;;  %v4915_v59 = vpop.f32.mrf.mxu2  ;;  %v4964_v6 = vpop.f32.mrf.mxu3  ;;  %v5093_v13 = vadd.f32 %v5061_v31, %v10895_v7 }
 0xfb4   :  { %v5271_v49 = vpack.c.bf16 %v5249_v23, %v5247_v45  ;;  %v10913_v20 = vadd.f32 %v4915_v59, %v10637_v27  ;;  %v10916_v25 = vadd.f32 %v4964_v6, %v10640_v55  ;;  %v5124_v4 = vmul.f32 0.7978846, %v5092_v18  ;;  %v7404_v61 = vpop.eup %7403 }
 0xfb5   :  { %5440 = vmatmul.bf16.gmra.mxu0 %v5270_v51  ;;  %v5125_v63 = vmul.f32 0.7978846, %v5093_v13  ;;  %v7406_v41 = vpop.eup %7405  ;;  %v5186_v9 = vadd.f32 1.0, %v7404_v61 }
 0xfb6   :  { %5489 = vmatmul.bf16.gmra.mxu1 %v5271_v49  ;;  %v4998_v1 = vmul.f32 %v10913_v20, %v10913_v20  ;;  %v4999_v14 = vmul.f32 %v10916_v25, %v10916_v25  ;;  %7407 = vtanh.f32 %v5124_v4  ;;  %v5187_v10 = vadd.f32 1.0, %v7406_v41 }
 0xfb7   :  { %7409 = vtanh.f32 %v5125_v63  ;;  %v5218_v22 = vmul.f32 0.5, %v5186_v9 }
 0xfb8   :  { %v5030_v37 = vmul.f32 %v4998_v1, %v10913_v20  ;;  %v5031_v8 = vmul.f32 %v4999_v14, %v10916_v25  ;;  %v5426_v5 = vpop.f32.mrf.mxu0  ;;  %v5219_v18 = vmul.f32 0.5, %v5187_v10 }
 0xfb9   :  { %v5427_v38 = vadd.f32 %v10872_v46, %v5426_v5  ;;  %v5475_v3 = vpop.f32.mrf.mxu1 }
 0xfba   :  { %v5062_v16 = vmul.f32 0.044715, %v5030_v37  ;;  %v5063_v0 = vmul.f32 0.044715, %v5031_v8  ;;  %v5250_v37 = vmul.f32 %v5218_v22, %v10875_v11 }
 0xfbb   :  { %v10925_v36 = vadd.f32 %v5475_v3, %v5427_v38  ;;  %v4917_v30 = vpop.f32.mrf.mxu2  ;;  %v4966_v62 = vpop.f32.mrf.mxu3  ;;  %v5251_v3 = vmul.f32 %v5219_v18, %v10878_v21 }
 0xfbc   :  { %v5094_v24 = vadd.f32 %v5062_v16, %v10913_v20  ;;  %v5095_v12 = vadd.f32 %v5063_v0, %v10916_v25  ;;  %v4918_v48 = vadd.f32 %v4917_v30, %v10637_v27  ;;  %v4967_v52 = vadd.f32 %v4966_v62, %v10640_v55  ;;  %v7408_v32 = vpop.eup %7407 }
 0xfbd   :  { %v7410_v45 = vpop.eup %7409  ;;  %v5188_v23 = vadd.f32 1.0, %v7408_v32 }
 0xfbe   :  { %v5126_v56 = vmul.f32 0.7978846, %v5094_v24  ;;  %v5000_v26 = vmul.f32 %v4918_v48, %v4918_v48  ;;  %v5001_v50 = vmul.f32 %v4967_v52, %v4967_v52  ;;  %v5127_v51 = vmul.f32 0.7978846, %v5095_v12 }
 0xfbf   :  { %v5189_v49 = vadd.f32 1.0, %v7410_v45  ;;  %v5220_v63 = vmul.f32 0.5, %v5188_v23 }
 0xfc0   :  { %v5032_v31 = vmul.f32 %v5000_v26, %v4918_v48  ;;  %v5033_v59 = vmul.f32 %v5001_v50, %v4967_v52  ;;  %v5428_v6 = vpop.f32.mrf.mxu0  ;;  %7411 = vtanh.f32 %v5126_v56 }
 0xfc1   :  { %v5429_v13 = vadd.f32 %v10872_v46, %v5428_v6  ;;  %v5477_v4 = vpop.f32.mrf.mxu1  ;;  %v5221_v61 = vmul.f32 0.5, %v5189_v49  ;;  %7413 = vtanh.f32 %v5127_v51  ;;  %v5252_v8 = vmul.f32 %v5220_v63, %v10892_v60 }
 0xfc2   :  { %v5064_v1 = vmul.f32 0.044715, %v5032_v31  ;;  %v5065_v14 = vmul.f32 0.044715, %v5033_v59 }
 0xfc3   :  { %v10932_v41 = vadd.f32 %v5477_v4, %v5429_v13  ;;  %v5253_v16 = vmul.f32 %v5221_v61, %v10895_v7  ;;  %v5272_v0 = vpack.c.bf16 %v5252_v8, %v5250_v37 }
 0xfc4   :  { %v5096_v5 = vadd.f32 %v5064_v1, %v4918_v48  ;;  %v5097_v38 = vadd.f32 %v5065_v14, %v4967_v52 }
 0xfc5   :  { %v5273_v9 = vpack.c.bf16 %v5253_v16, %v5251_v3  ;;  %5445 = vmatmul.bf16.gmra.mxu0 %v5272_v0 }
 0xfc6   :  { %v5128_v30 = vmul.f32 0.7978846, %v5096_v5  ;;  %v5129_v62 = vmul.f32 0.7978846, %v5097_v38  ;;  %v7412_v10 = vpop.eup %7411 }
 0xfc7   :  { %5494 = vmatmul.bf16.gmra.mxu1 %v5273_v9  ;;  %v7414_v12 = vpop.eup %7413  ;;  %v5190_v56 = vadd.f32 1.0, %v7412_v10 }
 0xfc8   :  { %7415 = vtanh.f32 %v5128_v30  ;;  %v5431_v24 = vpop.f32.mrf.mxu0  ;;  %v5191_v21 = vadd.f32 1.0, %v7414_v12 }
 0xfc9   :  { %7417 = vtanh.f32 %v5129_v62  ;;  %v5432_v11 = vadd.f32 %v10872_v46, %v5431_v24  ;;  %v5480_v60 = vpop.f32.mrf.mxu1  ;;  %v5222_v45 = vmul.f32 0.5, %v5190_v56 }
 0xfca   :  { %v5223_v23 = vmul.f32 0.5, %v5191_v21 }
 0xfcb   :  { %v10939_v32 = vadd.f32 %v5480_v60, %v5432_v11  ;;  %v5254_v59 = vmul.f32 %v5222_v45, %v10913_v20 }
 0xfcc   :  { %v5255_v49 = vmul.f32 %v5223_v23, %v10916_v25 }
 0xfce   :  { %v7416_v26 = vpop.eup %7415 }
 0xfcf   :  { %v7418_v7 = vpop.eup %7417  ;;  %v5192_v50 = vadd.f32 1.0, %v7416_v26 }
 0xfd0   :  { %v5193_v51 = vadd.f32 1.0, %v7418_v7  ;;  %v10947_v60 = vpop.f32.mrf.mxu0 }
 0xfd1   :  { %v5224_v22 = vmul.f32 0.5, %v5192_v50  ;;  %v10949_v26 = vpop.f32.mrf.mxu1 }
 0xfd2   :  { %v5225_v31 = vmul.f32 0.5, %v5193_v51 }
 0xfd3   :  { %v5256_v6 = vmul.f32 %v5224_v22, %v4918_v48 }
 0xfd4   :  { %v5257_v18 = vmul.f32 %v5225_v31, %v4967_v52 }
 0xfd5   :  { %v5274_v13 = vpack.c.bf16 %v5256_v6, %v5254_v59 }
 0xfd6   :  { %v5275_v4 = vpack.c.bf16 %v5257_v18, %v5255_v49 }
 0xfd7   :  { %5450 = vmatmul.bf16.gmra.mxu0 %v5274_v13 }
 0xfd8   :  { %5499 = vmatmul.bf16.gmra.mxu1 %v5275_v4 }
0x100b   :  { %v4920_v63 = vpop.f32.mrf.mxu2  ;;  %v4969_v1 = vpop.f32.mrf.mxu3 }
0x100c   :  { %v4921_v14 = vadd.f32 %v4920_v63, %v10637_v27  ;;  %v4970_v61 = vadd.f32 %v4969_v1, %v10640_v55 }
0x100e   :  { %v5002_v37 = vmul.f32 %v4921_v14, %v4921_v14  ;;  %v5003_v8 = vmul.f32 %v4970_v61, %v4970_v61 }
0x1010   :  { %v5034_v5 = vmul.f32 %v5002_v37, %v4921_v14  ;;  %v5035_v38 = vmul.f32 %v5003_v8, %v4970_v61 }
0x1012   :  { %v5066_v3 = vmul.f32 0.044715, %v5034_v5  ;;  %v5067_v20 = vmul.f32 0.044715, %v5035_v38 }
0x1013   :  { %v4922_v48 = vpop.f32.mrf.mxu2  ;;  %v4971_v16 = vpop.f32.mrf.mxu3 }
0x1014   :  { %v5098_v25 = vadd.f32 %v5066_v3, %v4921_v14  ;;  %v5099_v52 = vadd.f32 %v5067_v20, %v4970_v61  ;;  %v4923_v0 = vadd.f32 %v4922_v48, %v10637_v27  ;;  %v4972_v30 = vadd.f32 %v4971_v16, %v10640_v55 }
0x1016   :  { %v5130_v62 = vmul.f32 0.7978846, %v5098_v25  ;;  %v5004_v9 = vmul.f32 %v4923_v0, %v4923_v0  ;;  %v5005_v10 = vmul.f32 %v4972_v30, %v4972_v30  ;;  %v5131_v24 = vmul.f32 0.7978846, %v5099_v52 }
0x1018   :  { %v5036_v12 = vmul.f32 %v5004_v9, %v4923_v0  ;;  %v5037_v11 = vmul.f32 %v5005_v10, %v4972_v30  ;;  %7419 = vtanh.f32 %v5130_v62 }
0x1019   :  { %7421 = vtanh.f32 %v5131_v24 }
0x101a   :  { %v5068_v56 = vmul.f32 0.044715, %v5036_v12  ;;  %v5069_v21 = vmul.f32 0.044715, %v5037_v11 }
0x101c   :  { %v5100_v7 = vadd.f32 %v5068_v56, %v4923_v0  ;;  %v5101_v50 = vadd.f32 %v5069_v21, %v4972_v30 }
0x101e   :  { %v5132_v45 = vmul.f32 0.7978846, %v5100_v7  ;;  %v5133_v27 = vmul.f32 0.7978846, %v5101_v50  ;;  %v7420_v51 = vpop.eup %7419 }
0x101f   :  { %v7422_v55 = vpop.eup %7421  ;;  %v5194_v59 = vadd.f32 1.0, %v7420_v51 }
0x1020   :  { %7423 = vtanh.f32 %v5132_v45  ;;  %v5195_v6 = vadd.f32 1.0, %v7422_v55 }
0x1021   :  { %7425 = vtanh.f32 %v5133_v27  ;;  %v5226_v63 = vmul.f32 0.5, %v5194_v59 }
0x1022   :  { %v5436_v23 = vpop.f32.mrf.mxu0  ;;  %v5227_v37 = vmul.f32 0.5, %v5195_v6 }
0x1023   :  { %v5437_v22 = vadd.f32 %v10872_v46, %v5436_v23  ;;  %v5485_v31 = vpop.f32.mrf.mxu1  ;;  %v5258_v20 = vmul.f32 %v5226_v63, %v4921_v14 }
0x1024   :  { %v5259_v16 = vmul.f32 %v5227_v37, %v4970_v61 }
0x1025   :  { %v10952_v49 = vadd.f32 %v5485_v31, %v5437_v22 }
0x1026   :  { %v7424_v18 = vpop.eup %7423 }
0x1027   :  { %v7426_v13 = vpop.eup %7425  ;;  %v5196_v4 = vadd.f32 1.0, %v7424_v18 }
0x1028   :  { %v5197_v1 = vadd.f32 1.0, %v7426_v13 }
0x1029   :  { %v5228_v8 = vmul.f32 0.5, %v5196_v4 }
0x102a   :  { %v5438_v5 = vpop.f32.mrf.mxu0  ;;  %v5229_v38 = vmul.f32 0.5, %v5197_v1 }
0x102b   :  { %v5487_v3 = vpop.f32.mrf.mxu1  ;;  %v5260_v48 = vmul.f32 %v5228_v8, %v4923_v0  ;;  %v5439_v1 = vadd.f32 %v10872_v46, %v5438_v5 }
0x102c   :  { %v5261_v25 = vmul.f32 %v5229_v38, %v4972_v30  ;;  %v5514_v38 = vadd.f32 %v10939_v32, %v10549_v33  ;;  %v5434_v33 = vadd.f32 %v10872_v46, %v10947_v60 }
0x102d   :  { %v5276_v52 = vpack.c.bf16 %v5260_v48, %v5258_v20 }
0x102e   :  { %v5277_v62 = vpack.c.bf16 %v5261_v25, %v5259_v16 }
0x102f   :  { %5455 = vmatmul.bf16.gmra.mxu0 %v5276_v52 }
0x1030   :  { %5504 = vmatmul.bf16.gmra.mxu1 %v5277_v62 }
0x1032   :  { %v5441_v9 = vpop.f32.mrf.mxu0 }
0x1033   :  { %v5442_v10 = vadd.f32 %v10872_v46, %v5441_v9  ;;  %v5490_v24 = vpop.f32.mrf.mxu1 }
0x1035   :  { %v5491_v12 = vadd.f32 %v5490_v24, %v5442_v10  ;;  %v11016_v24 = vadd.f32 %v10887_v2, %v10497_v47 }
0x1037   :  { %v5518_v32 = vadd.f32 %v5491_v12, %v10659_v44  ;;  %v10991_v44 = vadd.f32 %v10925_v36, %v10525_v35  ;;  %v11006_v35 = vadd.f32 %v10932_v41, %v10528_v43 }
0x103a   :  { %v5443_v11 = vpop.f32.mrf.mxu0 }
0x103b   :  { %v5444_v56 = vadd.f32 %v10872_v46, %v5443_v11  ;;  %v5492_v21 = vpop.f32.mrf.mxu1 }
0x103d   :  { %v5493_v7 = vadd.f32 %v5492_v21, %v5444_v56 }
0x1042   :  { %v5446_v50 = vpop.f32.mrf.mxu0 }
0x1043   :  { %v5447_v14 = vadd.f32 %v10872_v46, %v5446_v50 }
0x1044   :  { %v5495_v0 = vpop.f32.mrf.mxu1 }
0x1045   :  { %v5496_v61 = vadd.f32 %v5495_v0, %v5447_v14 }
0x1047   :  { %v10958_v30 = vadd.f32 %v5496_v61, %v10745_v15 }
0x1049   :  { %5550 = vadd.xlane.f32.xlu2 %v10958_v30 }
0x104a   :  { %v5448_v45 = vpop.f32.mrf.mxu0 }
0x104b   :  { %v5449_v27 = vadd.f32 %v10872_v46, %v5448_v45 }
0x104c   :  { %v5497_v51 = vpop.f32.mrf.mxu1 }
0x104d   :  { %v5498_v55 = vadd.f32 %v5497_v51, %v5449_v27 }
0x104f   :  { %v5521_v23 = vadd.f32 %v5498_v55, %v10736_v54  ;;  %v5488_v54 = vadd.f32 %v5487_v3, %v5439_v1 }
0x1051   :  { %5552 = vadd.xlane.f32.xlu1 %v5521_v23  ;;  %v5517_v8 = vadd.f32 %v5488_v54, %v10600_v58 }
0x1054   :  { %v5451_v22 = vpop.f32.mrf.mxu0 }
0x1055   :  { %v5452_v31 = vadd.f32 %v10872_v46, %v5451_v22  ;;  %v5500_v59 = vpop.f32.mrf.mxu1 }
0x1057   :  { %v5501_v6 = vadd.f32 %v5500_v59, %v5452_v31 }
0x1059   :  { %v5522_v18 = vadd.f32 %v5501_v6, %v10790_v19  ;;  %v5511_v19 = vadd.f32 %v10907_v34, %v10500_v39  ;;  %v5483_v34 = vadd.f32 %v10949_v26, %v5434_v33 }
0x105b   :  { %5554 = vadd.xlane.f32.xlu0 %v5522_v18  ;;  %v10982_v62 = vadd.f32 %v5483_v34, %v10552_v42 }
0x105c   :  { %v5453_v15 = vpop.f32.mrf.mxu0 }
0x105d   :  { %v5454_v13 = vadd.f32 %v10872_v46, %v5453_v15  ;;  %v5502_v4 = vpop.f32.mrf.mxu1 }
0x105f   :  { %v5503_v63 = vadd.f32 %v5502_v4, %v5454_v13 }
0x1061   :  { %v5523_v37 = vadd.f32 %v5503_v63, %v10793_v28 }
0x1063   :  { %5556 = vadd.xlane.f32.xlu2 %v5523_v37 }
0x106b   :  { %5544 = vadd.xlane.f32.xlu2 %v5517_v8 }
0x1073   :  { %5538 = vadd.xlane.f32.xlu2 %v5514_v38 }
0x107b   :  { %5532 = vadd.xlane.f32.xlu2 %v5511_v19 }
0x10ac   :  { %v5456_v20 = vpop.f32.mrf.mxu0 }
0x10ad   :  { %v5457_v48 = vadd.f32 %v10872_v46, %v5456_v20  ;;  %v5505_v16 = vpop.f32.mrf.mxu1 }
0x10af   :  { %v5506_v5 = vadd.f32 %v5505_v16, %v5457_v48 }
0x10b1   :  { %v5524_v28 = vadd.f32 %v5506_v5, %v10826_v40  ;;  %v10985_v40 = vadd.f32 %v5493_v7, %v10666_v17 }
0x10b3   :  { %5558 = vadd.xlane.f32.xlu1 %v5524_v28 }
0x10b4   :  { %v5458_v3 = vpop.f32.mrf.mxu0 }
0x10b5   :  { %v5459_v58 = vadd.f32 %v10872_v46, %v5458_v3  ;;  %v5507_v25 = vpop.f32.mrf.mxu1 }
0x10b7   :  { %v5508_v52 = vadd.f32 %v5507_v25, %v5459_v58 }
0x10b9   :  { %v5525_v39 = vadd.f32 %v5508_v52, %v10829_v29  ;;  %v10995_v29 = vadd.f32 %v10952_v49, %v10597_v53 }
0x10bb   :  { %5560 = vadd.xlane.f32.xlu0 %v5525_v39  ;;  %5546 = vadd.xlane.f32.xlu1 %v5518_v32 }
0x10bc   :  { %v5551_v60 = vpop.xlane.xlu2 %5550 }
0x10bd   :  { %v5572_v12 = vmul.f32 %v5551_v60, %v8473_v57 }
0x10bf   :  { %v11021_v43 = vsub.f32 %v10958_v30, %v5572_v12 }
0x10c1   :  { %v5604_v11 = vmul.f32 %v11021_v43, %v11021_v43 }
0x10c3   :  { %5548 = vadd.xlane.f32.xlu0 %v10985_v40  ;;  %5540 = vadd.xlane.f32.xlu1 %v10982_v62 }
0x10c4   :  { %v5553_v9 = vpop.xlane.xlu1 %5552 }
0x10c5   :  { %v5573_v46 = vmul.f32 %v5553_v9, %v8473_v57 }
0x10c7   :  { %v10998_v42 = vsub.f32 %v5521_v23, %v5573_v46 }
0x10c9   :  { %v5605_v17 = vmul.f32 %v10998_v42, %v10998_v42 }
0x10cb   :  { %5542 = vadd.xlane.f32.xlu0 %v10995_v29  ;;  %5534 = vadd.xlane.f32.xlu1 %v10991_v44 }
0x10cc   :  { %5632 = vadd.xlane.f32.xlu2 %v5605_v17 }
0x10ce   :  { %v5555_v26 = vpop.xlane.xlu0 %5554 }
0x10cf   :  { %v5574_v53 = vmul.f32 %v5555_v26, %v8473_v57 }
0x10d1   :  { %v11009_v36 = vsub.f32 %v5522_v18, %v5574_v53 }
0x10d3   :  { %5536 = vadd.xlane.f32.xlu0 %v11006_v35  ;;  %v5606_v49 = vmul.f32 %v11009_v36, %v11009_v36 }
0x10d5   :  { %5634 = vadd.xlane.f32.xlu1 %v5606_v49 }
0x10d6   :  { %v5557_v10 = vpop.xlane.xlu2 %5556 }
0x10d7   :  { %v5575_v41 = vmul.f32 %v5557_v10, %v8473_v57 }
0x10d9   :  { %v11026_v21 = vsub.f32 %v5523_v37, %v5575_v41 }
0x10db   :  { %5530 = vadd.xlane.f32.xlu0 %v11016_v24  ;;  %v5607_v47 = vmul.f32 %v11026_v21, %v11026_v21 }
0x10de   :  { %v5545_v56 = vpop.xlane.xlu2 %5544 }
0x10df   :  { %v5569_v7 = vmul.f32 %v5545_v56, %v8473_v57 }
0x10e1   :  { %v11031_v50 = vsub.f32 %v5517_v8, %v5569_v7 }
0x10e3   :  { %5630 = vadd.xlane.f32.xlu0 %v5604_v11  ;;  %v5601_v0 = vmul.f32 %v11031_v50, %v11031_v50 }
0x10e6   :  { %v5539_v2 = vpop.xlane.xlu2 %5538 }
0x10e7   :  { %v5566_v14 = vmul.f32 %v5539_v2, %v8473_v57 }
0x10e9   :  { %v11036_v61 = vsub.f32 %v5514_v38, %v5566_v14 }
0x10eb   :  { %5636 = vadd.xlane.f32.xlu0 %v5607_v47  ;;  %v5598_v27 = vmul.f32 %v11036_v61, %v11036_v61 }
0x10ee   :  { %v5533_v30 = vpop.xlane.xlu2 %5532 }
0x10ef   :  { %v5563_v45 = vmul.f32 %v5533_v30, %v8473_v57 }
0x10f1   :  { %v11041_v51 = vsub.f32 %v5511_v19, %v5563_v45 }
0x10f3   :  { %5624 = vadd.xlane.f32.xlu0 %v5601_v0  ;;  %v5595_v55 = vmul.f32 %v11041_v51, %v11041_v51 }
0x10fb   :  { %5618 = vadd.xlane.f32.xlu0 %v5598_v27 }
0x1103   :  { %5612 = vadd.xlane.f32.xlu0 %v5595_v55 }
0x1126   :  { %v5559_v23 = vpop.xlane.xlu1 %5558 }
0x1127   :  { %v5576_v22 = vmul.f32 %v5559_v23, %v8473_v57 }
0x1129   :  { %v11046_v31 = vsub.f32 %v5524_v28, %v5576_v22 }
0x112b   :  { %v5608_v59 = vmul.f32 %v11046_v31, %v11046_v31 }
0x112d   :  { %5638 = vadd.xlane.f32.xlu2 %v5608_v59 }
0x112e   :  { %v5561_v6 = vpop.xlane.xlu0 %5560  ;;  %v5547_v18 = vpop.xlane.xlu1 %5546 }
0x112f   :  { %v5577_v15 = vmul.f32 %v5561_v6, %v8473_v57  ;;  %v5570_v13 = vmul.f32 %v5547_v18, %v8473_v57 }
0x1131   :  { %v11052_v4 = vsub.f32 %v5525_v39, %v5577_v15  ;;  %v11054_v63 = vsub.f32 %v5518_v32, %v5570_v13 }
0x1133   :  { %v5609_v1 = vmul.f32 %v11052_v4, %v11052_v4  ;;  %v5602_v37 = vmul.f32 %v11054_v63, %v11054_v63 }
0x1135   :  { %5640 = vadd.xlane.f32.xlu1 %v5609_v1  ;;  %5626 = vadd.xlane.f32.xlu2 %v5602_v37 }
0x1136   :  { %v5549_v54 = vpop.xlane.xlu0 %5548  ;;  %v5541_v8 = vpop.xlane.xlu1 %5540 }
0x1137   :  { %v5571_v38 = vmul.f32 %v5549_v54, %v8473_v57  ;;  %v5567_v19 = vmul.f32 %v5541_v8, %v8473_v57 }
0x1139   :  { %v11063_v20 = vsub.f32 %v10985_v40, %v5571_v38  ;;  %v11066_v48 = vsub.f32 %v10982_v62, %v5567_v19 }
0x113b   :  { %v5603_v16 = vmul.f32 %v11063_v20, %v11063_v20  ;;  %v5599_v5 = vmul.f32 %v11066_v48, %v11066_v48 }
0x113d   :  { %5628 = vadd.xlane.f32.xlu1 %v5603_v16  ;;  %5620 = vadd.xlane.f32.xlu2 %v5599_v5 }
0x113e   :  { %v5543_v28 = vpop.xlane.xlu0 %5542  ;;  %v5535_v3 = vpop.xlane.xlu1 %5534 }
0x113f   :  { %v5568_v58 = vmul.f32 %v5543_v28, %v8473_v57  ;;  %v5564_v25 = vmul.f32 %v5535_v3, %v8473_v57  ;;  %v5633_v26 = vpop.xlane.xlu2 %5632 }
0x1141   :  { %v11075_v52 = vsub.f32 %v10995_v29, %v5568_v58  ;;  %v11078_v33 = vsub.f32 %v10991_v44, %v5564_v25 }
0x1143   :  { %v5600_v32 = vmul.f32 %v11075_v52, %v11075_v52  ;;  %v5596_v39 = vmul.f32 %v11078_v33, %v11078_v33 }
0x1145   :  { %5622 = vadd.xlane.f32.xlu1 %v5600_v32  ;;  %5614 = vadd.xlane.f32.xlu2 %v5596_v39 }
0x1146   :  { %v5537_v34 = vpop.xlane.xlu0 %5536 }
0x1147   :  { %v5565_v62 = vmul.f32 %v5537_v34, %v8473_v57 }
0x1148   :  { %v5635_v53 = vpop.xlane.xlu1 %5634 }
0x1149   :  { %v11086_v40 = vsub.f32 %v11006_v35, %v5565_v62  ;;  %v5653_v35 = vmul.f32 %v5633_v26, %v8473_v57  ;;  %v5654_v49 = vmul.f32 %v5635_v53, %v8473_v57 }
0x114b   :  { %v5597_v9 = vmul.f32 %v11086_v40, %v11086_v40  ;;  %v5669_v12 = vadd.f32 1e-12, %v5653_v35  ;;  %v5670_v41 = vadd.f32 1e-12, %v5654_v49 }
0x114d   :  { %5616 = vadd.xlane.f32.xlu1 %v5597_v9  ;;  %7427 = vrsqrt.f32 %v5669_v12  ;;  %vm5790_vm8 = vweird.f32 %v5669_v12  ;;  %vm5800_vm11 = vweird.f32 %v5670_v41 }
0x114e   :  { %v5531_v44 = vpop.xlane.xlu0 %5530  ;;  %7429 = vrsqrt.f32 %v5670_v41 }
0x114f   :  { %v5562_v29 = vmul.f32 %v5531_v44, %v8473_v57 }
0x1151   :  { %v11092_v46 = vsub.f32 %v11016_v24, %v5562_v29 }
0x1153   :  { %v5594_v17 = vmul.f32 %v11092_v46, %v11092_v46  ;;  %v11102_v47 = vpop.eup %7427 }
0x1154   :  { %v11104_v2 = vpop.eup %7429  ;;  %v5785_v0 = vmul.f32 %v11102_v47, %v5669_v12  ;;  %vm5791_vm0 = vweird.f32 %v11102_v47 }
0x1155   :  { %5610 = vadd.xlane.f32.xlu1 %v5594_v17  ;;  %v5795_v30 = vmul.f32 %v11104_v2, %v5670_v41  ;;  %vm5801_vm9 = vweird.f32 %v11104_v2  ;;  %vm11149_vm10 = vmor %vm5790_vm8, %vm5791_vm0 }
0x1156   :  { %v5631_v60 = vpop.xlane.xlu0 %5630  ;;  %v5786_v45 = vmul.f32 %v11102_v47, %v5785_v0  ;;  %vm11164_vm12 = vmor %vm5800_vm11, %vm5801_vm9 }
0x1157   :  { %v5652_v11 = vmul.f32 %v5631_v60, %v8473_v57  ;;  %v5796_v55 = vmul.f32 %v11104_v2, %v5795_v30 }
0x1158   :  { %v5787_v6 = vmul.f32 0.5, %v5786_v45 }
0x1159   :  { %v11100_v56 = vadd.f32 1e-12, %v5652_v11  ;;  %v5797_v1 = vmul.f32 0.5, %v5796_v55 }
0x115a   :  { %v5788_v8 = vsub.f32 1.5, %v5787_v6 }
0x115b   :  { %7431 = vrsqrt.f32 %v11100_v56  ;;  %v5798_v16 = vsub.f32 1.5, %v5797_v1  ;;  %vm5780_vm13 = vweird.f32 %v11100_v56 }
0x115c   :  { %v5789_v58 = vmul.f32 %v11102_v47, %v5788_v8 }
0x115d   :  { %v5799_v44 = vmul.f32 %v11104_v2, %v5798_v16 }
0x115e   :  { %v5637_v10 = vpop.xlane.xlu0 %5636 }
0x115f   :  { %v5655_v24 = vmul.f32 %v5637_v10, %v8473_v57  ;;  %v5793_v10 = vsel %vm11149_vm10, %v11102_v47, %v5789_v58 }
0x1161   :  { %v11106_v14 = vadd.f32 1e-12, %v5655_v24  ;;  %v11113_v27 = vpop.eup %7431 }
0x1162   :  { %v5775_v13 = vmul.f32 %v11113_v27, %v11100_v56  ;;  %vm5781_vm14 = vweird.f32 %v11113_v27 }
0x1163   :  { %7433 = vrsqrt.f32 %v11106_v14  ;;  %vm11217_vm1 = vmor %vm5780_vm13, %vm5781_vm14  ;;  %vm5810_vm3 = vweird.f32 %v11106_v14 }
0x1164   :  { %v5776_v19 = vmul.f32 %v11113_v27, %v5775_v13 }
0x1166   :  { %v5625_v7 = vpop.xlane.xlu0 %5624  ;;  %v5777_v62 = vmul.f32 0.5, %v5776_v19 }
0x1167   :  { %v5649_v23 = vmul.f32 %v5625_v7, %v8473_v57  ;;  %v5803_v7 = vsel %vm11164_vm12, %v11104_v2, %v5799_v44 }
0x1168   :  { %v5778_v0 = vsub.f32 1.5, %v5777_v62  ;;  %v5846_v13 = vmul.f32 %v5803_v7, %v11009_v36  ;;  %v11205_v36 = vld [vmem:[%s11478_s13 + $0x1] ss:$0 sm:$0xff] }
0x1169   :  { %v11118_v15 = vpop.eup %7433  ;;  %v11122_v37 = vadd.f32 1e-12, %v5649_v23  ;;  %v11181_v23 = vld [vmem:[%s11477_s12 + $0x1] ss:$0 sm:$0xff] }
0x116a   :  { %v5805_v38 = vmul.f32 %v11118_v15, %v11106_v14  ;;  %v5779_v8 = vmul.f32 %v11113_v27, %v5778_v0  ;;  %vm5811_vm15 = vweird.f32 %v11118_v15 }
0x116b   :  { %vm11231_vm4 = vmor %vm5810_vm3, %vm5811_vm15  ;;  %vm5750_vm0 = vweird.f32 %v11122_v37 }
0x116c   :  { %v5806_v25 = vmul.f32 %v11118_v15, %v5805_v38  ;;  %v5783_v62 = vsel %vm11217_vm1, %v11113_v27, %v5779_v8 }
0x116e   :  { %v5619_v22 = vpop.xlane.xlu0 %5618  ;;  %v5807_v12 = vmul.f32 0.5, %v5806_v25 }
0x116f   :  { %v5646_v5 = vmul.f32 %v5619_v22, %v8473_v57  ;;  %v5845_v22 = vmul.f32 %v5793_v10, %v10998_v42 }
0x1171   :  { %v11141_v29 = vadd.f32 1e-12, %v5646_v5 }
0x1176   :  { %v5613_v32 = vpop.xlane.xlu0 %5612 }
0x1177   :  { %v5643_v53 = vmul.f32 %v5613_v32, %v8473_v57 }
0x1179   :  { %v11176_v47 = vadd.f32 1e-12, %v5643_v53 }
0x11a0   :  { %v5639_v59 = vpop.xlane.xlu2 %5638 }
0x11a1   :  { %v5656_v18 = vmul.f32 %v5639_v59, %v8473_v57  ;;  %v5808_v59 = vsub.f32 1.5, %v5807_v12 }
0x11a3   :  { %v11124_v54 = vadd.f32 1e-12, %v5656_v18  ;;  %v5809_v58 = vmul.f32 %v11118_v15, %v5808_v59 }
0x11a5   :  { %7435 = vrsqrt.f32 %v11124_v54  ;;  %vm5820_vm5 = vweird.f32 %v11124_v54  ;;  %v5813_v14 = vsel %vm11231_vm4, %v11118_v15, %v5809_v58 }
0x11a6   :  { %7437 = vrsqrt.f32 %v11122_v37 }
0x11a8   :  { %v5627_v28 = vpop.xlane.xlu2 %5626  ;;  %v5641_v3 = vpop.xlane.xlu1 %5640 }
0x11a9   :  { %v5650_v39 = vmul.f32 %v5627_v28, %v8473_v57  ;;  %v5657_v34 = vmul.f32 %v5641_v3, %v8473_v57  ;;  %v5864_v28 = vmul.f32 %v11181_v23, %v5845_v22 }
0x11ab   :  { %v11138_v9 = vpop.eup %7435  ;;  %v11143_v17 = vadd.f32 1e-12, %v5650_v39  ;;  %v11145_v60 = vadd.f32 1e-12, %v5657_v34  ;;  %v5865_v34 = vmul.f32 %v11181_v23, %v5846_v13  ;;  %v11239_v27 = vadd.f32 %v11205_v36, %v5864_v28 }
0x11ac   :  { %v5815_v35 = vmul.f32 %v11138_v9, %v11124_v54  ;;  %v11156_v49 = vpop.eup %7437  ;;  %vm5821_vm2 = vweird.f32 %v11138_v9 }
0x11ad   :  { %7439 = vrsqrt.f32 %v11143_v17  ;;  %v5745_v41 = vmul.f32 %v11156_v49, %v11122_v37  ;;  %vm11246_vm6 = vmor %vm5820_vm5, %vm5821_vm2  ;;  %v11259_v15 = vadd.f32 %v11205_v36, %v5865_v34  ;;  %vm5830_vm8 = vweird.f32 %v11145_v60 }
0x11ae   :  { %v5816_v24 = vmul.f32 %v11138_v9, %v5815_v35  ;;  %7441 = vrsqrt.f32 %v11145_v60  ;;  %vm5751_vm10 = vweird.f32 %v11156_v49  ;;  %vm5760_vm14 = vweird.f32 %v11143_v17 }
0x11af   :  { %7443 = vrsqrt.f32 %v11141_v29  ;;  %v5746_v16 = vmul.f32 %v11156_v49, %v5745_v41  ;;  %vm11313_vm13 = vmor %vm5750_vm0, %vm5751_vm10 }
0x11b0   :  { %v5817_v30 = vmul.f32 0.5, %v5816_v24  ;;  %v5621_v45 = vpop.xlane.xlu2 %5620  ;;  %v5629_v55 = vpop.xlane.xlu1 %5628  ;;  %7445 = vrsqrt.f32 %v11176_v47 }
0x11b1   :  { %v5647_v2 = vmul.f32 %v5621_v45, %v8473_v57  ;;  %v5651_v6 = vmul.f32 %v5629_v55, %v8473_v57  ;;  %v5747_v53 = vmul.f32 0.5, %v5746_v16 }
0x11b2   :  { %v5818_v18 = vsub.f32 1.5, %v5817_v30  ;;  %v5844_v30 = vmul.f32 %v5783_v62, %v11021_v43  ;;  %v5847_v43 = vmul.f32 %v5813_v14, %v11026_v21 }
0x11b3   :  { %v11188_v1 = vpop.eup %7439  ;;  %v11192_v38 = vadd.f32 1e-12, %v5647_v2  ;;  %v11194_v19 = vadd.f32 1e-12, %v5651_v6 }
0x11b4   :  { %v11196_v42 = vpop.eup %7441  ;;  %v5755_v5 = vmul.f32 %v11188_v1, %v11143_v17  ;;  %v5819_v39 = vmul.f32 %v11138_v9, %v5818_v18  ;;  %v11290_v32 = vmul.f32 %v11181_v23, %v5844_v30  ;;  %vm5761_vm11 = vweird.f32 %v11188_v1 }
0x11b5   :  { %v11208_v3 = vpop.eup %7443  ;;  %v5825_v25 = vmul.f32 %v11196_v42, %v11145_v60  ;;  %7447 = vrsqrt.f32 %v11192_v38  ;;  %vm5831_vm7 = vweird.f32 %v11196_v42  ;;  %vm5770_vm15 = vweird.f32 %v11194_v19  ;;  %vm11322_vm1 = vmor %vm5760_vm14, %vm5761_vm11 }
0x11b6   :  { %7449 = vrsqrt.f32 %v11194_v19  ;;  %v5756_v56 = vmul.f32 %v11188_v1, %v5755_v5  ;;  %v5715_v35 = vmul.f32 %v11208_v3, %v11141_v29  ;;  %v11252_v0 = vpop.eup %7445  ;;  %v5823_v41 = vsel %vm11246_vm6, %v11138_v9, %v5819_v39  ;;  %vm5832_vm9 = vmor %vm5830_vm8, %vm5831_vm7 }
0x11b7   :  { %v5826_v44 = vmul.f32 %v11196_v42, %v5825_v25  ;;  %v5748_v9 = vsub.f32 1.5, %v5747_v53  ;;  %v5685_v5 = vmul.f32 %v11252_v0, %v11176_v47  ;;  %v5848_v21 = vmul.f32 %v5823_v41, %v11046_v31 }
0x11b8   :  { %v5615_v10 = vpop.xlane.xlu2 %5614  ;;  %v5623_v12 = vpop.xlane.xlu1 %5622  ;;  %v5757_v55 = vmul.f32 0.5, %v5756_v56  ;;  %v5716_v18 = vmul.f32 %v11208_v3, %v5715_v35  ;;  %v5866_v56 = vmul.f32 %v11181_v23, %v5847_v43  ;;  %vm5721_vm3 = vweird.f32 %v11208_v3 }
0x11b9   :  { %v5827_v24 = vmul.f32 0.5, %v5826_v44  ;;  %v5644_v7 = vmul.f32 %v5615_v10, %v8473_v57  ;;  %v5648_v54 = vmul.f32 %v5623_v12, %v8473_v57  ;;  %v5749_v39 = vmul.f32 %v11156_v49, %v5748_v9 }
0x11ba   :  { %v5758_v58 = vsub.f32 1.5, %v5757_v55  ;;  %v5717_v44 = vmul.f32 0.5, %v5716_v18  ;;  %v5867_v10 = vmul.f32 %v11181_v23, %v5848_v21  ;;  %v5885_v18 = vadd.f32 %v11205_v36, %v5866_v56 }
0x11bb   :  { %v11262_v45 = vpop.eup %7447  ;;  %v5828_v22 = vsub.f32 1.5, %v5827_v24  ;;  %v11265_v59 = vadd.f32 1e-12, %v5644_v7  ;;  %v11267_v2 = vadd.f32 1e-12, %v5648_v54  ;;  %vm5730_vm5 = vweird.f32 %v11192_v38 }
0x11bc   :  { %v11269_v6 = vpop.eup %7449  ;;  %v5725_v13 = vmul.f32 %v11262_v45, %v11192_v38  ;;  %v5718_v17 = vsub.f32 1.5, %v5717_v44  ;;  %v5886_v9 = vadd.f32 %v11205_v36, %v5867_v10  ;;  %vm5731_vm4 = vweird.f32 %v11262_v45  ;;  %v6897_v38 = vld [vmem:[%s11479_s14] sm:$0xff] }
0x11bd   :  { %v5829_v8 = vmul.f32 %v11196_v42, %v5828_v22  ;;  %v5765_v16 = vmul.f32 %v11269_v6, %v11194_v19  ;;  %7451 = vrsqrt.f32 %v11265_v59  ;;  %vm5771_vm12 = vweird.f32 %v11269_v6  ;;  %vm11356_vm0 = vmor %vm5730_vm5, %vm5731_vm4 }
0x11be   :  { %v5726_v28 = vmul.f32 %v11262_v45, %v5725_v13  ;;  %7453 = vrsqrt.f32 %v11267_v2  ;;  %vm5772_vm2 = vmor %vm5770_vm15, %vm5771_vm12  ;;  %v5753_v13 = vsel %vm11313_vm13, %v11156_v49, %v5749_v39  ;;  %vm5720_vm7 = vweird.f32 %v11141_v29 }
0x11bf   :  { %v5833_v60 = vsel %vm5832_vm9, %v11196_v42, %v5829_v8  ;;  %v5766_v25 = vmul.f32 %v11269_v6, %v5765_v16  ;;  %v5686_v42 = vmul.f32 %v11252_v0, %v5685_v5  ;;  %v5841_v39 = vmul.f32 %v5753_v13, %v11031_v50  ;;  %vm11365_vm8 = vmor %vm5720_vm7, %vm5721_vm3 }
0x11c0   :  { %v5849_v34 = vmul.f32 %v5833_v60, %v11052_v4  ;;  %v5617_v62 = vpop.xlane.xlu1 %5616  ;;  %v5727_v26 = vmul.f32 0.5, %v5726_v28  ;;  %v5759_v4 = vmul.f32 %v11188_v1, %v5758_v58  ;;  %vm5740_vm9 = vweird.f32 %v11267_v2 }
0x11c1   :  { %v5767_v31 = vmul.f32 0.5, %v5766_v25  ;;  %v5645_v53 = vmul.f32 %v5617_v62, %v8473_v57  ;;  %v5687_v5 = vmul.f32 0.5, %v5686_v42  ;;  %vm5691_vm12 = vweird.f32 %v11252_v0 }
0x11c2   :  { %v5868_v35 = vmul.f32 %v11181_v23, %v5849_v34  ;;  %v5728_v55 = vsub.f32 1.5, %v5727_v26  ;;  %v5763_v43 = vsel %vm11322_vm1, %v11188_v1, %v5759_v4  ;;  %v5719_v1 = vmul.f32 %v11208_v3, %v5718_v17 }
0x11c3   :  { %v11301_v12 = vpop.eup %7451  ;;  %v5768_v14 = vsub.f32 1.5, %v5767_v31  ;;  %v11305_v11 = vadd.f32 1e-12, %v5645_v53  ;;  %v5688_v44 = vsub.f32 1.5, %v5687_v5  ;;  %v5882_v53 = vadd.f32 %v11205_v36, %v11290_v32 }
0x11c4   :  { %v11307_v24 = vpop.eup %7453  ;;  %v5695_v54 = vmul.f32 %v11301_v12, %v11265_v59  ;;  %v5887_v41 = vadd.f32 %v11205_v36, %v5868_v35  ;;  %v5729_v60 = vmul.f32 %v11262_v45, %v5728_v55  ;;  %vm5701_vm11 = vweird.f32 %v11301_v12 }
0x11c5   :  { %v5769_v37 = vmul.f32 %v11269_v6, %v5768_v14  ;;  %v5735_v22 = vmul.f32 %v11307_v24, %v11267_v2  ;;  %7455 = vrsqrt.f32 %v11305_v11  ;;  %vm5741_vm6 = vweird.f32 %v11307_v24 }
0x11c6   :  { %v5696_v19 = vmul.f32 %v11301_v12, %v5695_v54  ;;  %5901 = vmatpush.msrb.mxu2 %v5887_v41  ;;  %v5733_v29 = vsel %vm11356_vm0, %v11262_v45, %v5729_v60  ;;  %vm5742_vm10 = vmor %vm5740_vm9, %vm5741_vm6  ;;  %v5860_v35 = vmul.f32 %v11181_v23, %v5841_v39  ;;  %v5689_v32 = vmul.f32 %v11252_v0, %v5688_v44  ;;  %v6903_v44 = vld [vmem:[%s11479_s14 + $0x30] sm:$0xff] }
0x11c7   :  { %v5773_v8 = vsel %vm5772_vm2, %v11269_v6, %v5769_v37  ;;  %v5736_v16 = vmul.f32 %v11307_v24, %v5735_v22  ;;  %v5842_v6 = vmul.f32 %v5763_v43, %v11054_v63  ;;  %vm5700_vm13 = vweird.f32 %v11265_v59 }
0x11c8   :  { %v5697_v28 = vmul.f32 0.5, %v5696_v19  ;;  %5902 = vmatpush.msrb.mxu2 %v5886_v9  ;;  %v5611_v21 = vpop.xlane.xlu1 %5610  ;;  %v5843_v58 = vmul.f32 %v5773_v8, %v11063_v20  ;;  %vm11393_vm14 = vmor %vm5700_vm13, %vm5701_vm11  ;;  %vm5690_vm1 = vweird.f32 %v11176_v47  ;;  %vm5710_vm3 = vweird.f32 %v11305_v11 }
0x11c9   :  { %v5737_v49 = vmul.f32 0.5, %v5736_v16  ;;  %v5642_v25 = vmul.f32 %v5611_v21, %v8473_v57  ;;  %v5861_v42 = vmul.f32 %v11181_v23, %v5842_v6  ;;  %vm11404_vm2 = vmor %vm5690_vm1, %vm5691_vm12  ;;  %v6900_v57 = vld [vmem:[%s11479_s14 + $0x18] sm:$0xff] }
0x11ca   :  { %5903 = vmatpush.msrb.mxu2 %v5885_v18  ;;  %v5698_v62 = vsub.f32 1.5, %v5697_v28  ;;  %v5862_v50 = vmul.f32 %v11181_v23, %v5843_v58  ;;  %v5693_v47 = vsel %vm11404_vm2, %v11252_v0, %v5689_v32  ;;  %v5888_v18 = vlaneseq }
0x11cb   :  { %v7456_v34 = vpop.eup %7455  ;;  %v5738_v56 = vsub.f32 1.5, %v5737_v49  ;;  %v11351_v20 = vadd.f32 1e-12, %v5642_v25  ;;  %v5880_v54 = vadd.f32 %v11205_v36, %v5861_v42  ;;  %v5835_v0 = vmul.f32 %v5693_v47, %v11041_v51 }
0x11cc   :  { %v5705_v63 = vmul.f32 %v7456_v34, %v11305_v11  ;;  %5904 = vmatpush.msrb.mxu2 %v11259_v15  ;;  %v5723_v15 = vsel %vm11365_vm8, %v11208_v3, %v5719_v1  ;;  %v5699_v45 = vmul.f32 %v11301_v12, %v5698_v62  ;;  %v5881_v3 = vadd.f32 %v11205_v36, %v5862_v50  ;;  %v6898_v50 = vld [vmem:[%s11479_s14 + $0x8] sm:$0xff] }
0x11cd   :  { %v5739_v26 = vmul.f32 %v11307_v24, %v5738_v56  ;;  %7457 = vrsqrt.f32 %v11351_v20  ;;  %v5838_v14 = vmul.f32 %v5723_v15, %v11036_v61  ;;  %vm5711_vm15 = vweird.f32 %v7456_v34  ;;  %v6904_v56 = vld [vmem:[%s11479_s14 + $0x38] sm:$0xff] }
0x11ce   :  { %v5706_v31 = vmul.f32 %v7456_v34, %v5705_v63  ;;  %5905 = vmatpush.msrb.mxu2 %v11239_v27  ;;  %v5839_v27 = vmul.f32 %v5733_v29, %v11066_v48  ;;  %v5703_v59 = vsel %vm11393_vm14, %v11301_v12, %v5699_v45  ;;  %v5879_v61 = vadd.f32 %v11205_v36, %v5860_v35  ;;  %vm5712_vm4 = vmor %vm5710_vm3, %vm5711_vm15  ;;  %v6899_v63 = vld [vmem:[%s11479_s14 + $0x10] sm:$0xff] }
0x11cf   :  { %v5743_v2 = vsel %vm5742_vm10, %v11307_v24, %v5739_v26  ;;  %v5857_v12 = vmul.f32 %v11181_v23, %v5838_v14  ;;  %v5836_v11 = vmul.f32 %v5703_v59, %v11078_v33  ;;  %v5891_v21 = vshrl.u32 %v5888_v18, 7 }
0x11d0   :  { %v5707_v10 = vmul.f32 0.5, %v5706_v31  ;;  %5906 = vmatpush.msrb.mxu2 %v5882_v53  ;;  %v5840_v4 = vmul.f32 %v5743_v2, %v11075_v52  ;;  %v5858_v37 = vmul.f32 %v11181_v23, %v5839_v27  ;;  %vm5680_vm6 = vweird.f32 %v11351_v20  ;;  %v6944_v31 = vld [vmem:[%s11480_s15] ss:$0 sm:$0xff] }
0x11d1   :  { %v5876_v5 = vadd.f32 %v11205_v36, %v5857_v12  ;;  %v5855_v28 = vmul.f32 %v11181_v23, %v5836_v11  ;;  %v5854_v58 = vmul.f32 %v11181_v23, %v5835_v0  ;;  %v5889_v25 = vand.u32 127, %v5888_v18 }
0x11d2   :  { %v5708_v7 = vsub.f32 1.5, %v5707_v10  ;;  %5907 = vmatpush.msrb.mxu2 %v5881_v3  ;;  %v5859_v52 = vmul.f32 %v11181_v23, %v5840_v4  ;;  %v5877_v43 = vadd.f32 %v11205_v36, %v5858_v37  ;;  %v5893_v1 = vmul.u32 8, %v5891_v21 }
0x11d3   :  { %v7458_v48 = vpop.eup %7457  ;;  %v5874_v60 = vadd.f32 %v11205_v36, %v5855_v28  ;;  %v5873_v6 = vadd.f32 %v11205_v36, %v5854_v58  ;;  %v5892_v62 = vadd.s32 8, %v5891_v21 }
0x11d4   :  { %v5709_v30 = vmul.f32 %v7456_v34, %v5708_v7  ;;  %v5675_v55 = vmul.f32 %v7458_v48, %v11351_v20  ;;  %5908 = vmatpush.msrb.mxu2 %v5880_v54  ;;  %v5878_v19 = vadd.f32 %v11205_v36, %v5859_v52  ;;  %vm5681_vm5 = vweird.f32 %v7458_v48 }
0x11d5   :  { %vm5682_vm7 = vmor %vm5680_vm6, %vm5681_vm5  ;;  %vm5895_vm0 = vcmp.eq.s32.totalorder %v5889_v25, %v5893_v1  ;;  %v7501_v20 = vmov 1.0  }
0x11d6   :  { %v5713_v22 = vsel %vm5712_vm4, %v7456_v34, %v5709_v30  ;;  %v5676_v17 = vmul.f32 %v7458_v48, %v5675_v55  ;;  %5909 = vmatpush.msrb.mxu2 %v5879_v61 }
0x11d7   :  { %v5837_v9 = vmul.f32 %v5713_v22, %v11086_v40 }
0x11d8   :  { %v5677_v13 = vmul.f32 0.5, %v5676_v17  ;;  %5910 = vmatpush.msrb.mxu2 %v5878_v19 }
0x11d9   :  { %v5856_v8 = vmul.f32 %v11181_v23, %v5837_v9 }
0x11da   :  { %v5678_v16 = vsub.f32 1.5, %v5677_v13  ;;  %5911 = vmatpush.msrb.mxu2 %v5877_v43 }
0x11db   :  { %v5875_v33 = vadd.f32 %v11205_v36, %v5856_v8 }
0x11dc   :  { %v5679_v40 = vmul.f32 %v7458_v48, %v5678_v16  ;;  %5912 = vmatpush.msrb.mxu2 %v5876_v5 }
0x11de   :  { %v5683_v51 = vsel %vm5682_vm7, %v7458_v48, %v5679_v40  ;;  %5913 = vmatpush.msrb.mxu2 %v5875_v33 }
0x11df   :  { %v5834_v49 = vmul.f32 %v5683_v51, %v11092_v46  ;;  %v5894_v46 = vmul.u32 8, %v5892_v62 }
0x11e0   :  { %5914 = vmatpush.msrb.mxu2 %v5874_v60 }
0x11e1   :  { %v5853_v39 = vmul.f32 %v11181_v23, %v5834_v49  ;;  %vm5896_vm8 = vcmp.eq.s32.totalorder %v5889_v25, %v5894_v46  ;;  %v6902_v23 = vld [vmem:[%s11479_s14 + $0x28] sm:$0xff] }
0x11e2   :  { %5915 = vmatpush.msrb.mxu2 %v5873_v6 }
0x11e3   :  { %v5872_v34 = vadd.f32 %v11205_v36, %v5853_v39  ;;  %v6901_v36 = vld [vmem:[%s11479_s14 + $0x20] sm:$0xff] }
0x11e5   :  { %5916 = vmatpush.msrb.mxu2 %v5872_v34 }
0x11e6   :  { %6733 = vmatmul.msk.f32.vlgmr.msrb.gmra.mxu2 %vm5895_vm0, %v7501_v20 }
0x11e7   :  { %5993 = vmatpush.bf16.msra.mxu2 %v6904_v56 }
0x11eb   :  { %5994 = vmatpush.bf16.msra.mxu2 %v6903_v44 }
0x11ee   :  { %6734 = vmatmul.msk.f32.gmra.mxu2 %vm5896_vm8, %v7501_v20 }
0x11ef   :  { %5995 = vmatpush.bf16.msra.mxu2 %v6902_v23 }
0x11f3   :  { %5996 = vmatpush.bf16.msra.mxu2 %v6901_v36 }
0x11f7   :  { %5997 = vmatpush.bf16.msra.mxu2 %v6900_v57 }
0x11fb   :  { %5998 = vmatpush.bf16.msra.mxu2 %v6899_v63 }
0x11ff   :  { %5999 = vmatpush.bf16.msra.mxu2 %v6898_v50 }
0x1203   :  { %6000 = vmatpush.bf16.msra.mxu2 %v6897_v38 }
0x1269   :  { %v5918_v29 = vpop.f32.mrf.mxu2 }
0x1271   :  { %v5921_v26 = vpop.f32.mrf.mxu2 }
0x1272   :  { %v5924_v15 = vpack.c.bf16 %v5921_v26, %v5918_v29 }
0x1274   :  { %6001 = vmatmul.bf16.vlgmr.msra.gmra.mxu2 %v5924_v15 }
0x12f7   :  { %v6002_v53 = vpop.f32.mrf.mxu2 }
0x12f8   :  { %v6003_v42 = vadd.f32 %v6944_v31, %v6002_v53 }
0x12fa   :  { %v6767_v45 = vmul.f32 -1.442695, %v6003_v42 }
0x12fc   :  { %7459 = vpow2.f32 %v6767_v45 }
0x12ff   :  { %v6004_v2 = vpop.f32.mrf.mxu2 }
0x1300   :  { %v6005_v35 = vadd.f32 %v6944_v31, %v6004_v2 }
0x1302   :  { %v7460_v10 = vpop.eup %7459  ;;  %v6768_v3 = vmul.f32 -1.442695, %v6005_v35 }
0x1303   :  { %v6013_v4 = vadd.f32 1.0, %v7460_v10 }
0x1304   :  { %7461 = vpow2.f32 %v6768_v3 }
0x1305   :  { %7463 = vrcp.f32 %v6013_v4  ;;  %v6026_v54 = vand.u32 2147483648, %v6013_v4  ;;  %v6024_v48 = vand.u32 2147483647, %v6013_v4  ;;  %vm6020_vm10 = vweird.f32 %v6013_v4 }
0x1307   :  { %v6027_v41 = vor.u32 1.1754944e-38, %v6026_v54  ;;  %vm6025_vm12 = vcmp.eq.f32.partialorder %v6024_v48, 8.507059e+37 }
0x130a   :  { %v7462_v27 = vpop.eup %7461 }
0x130b   :  { %v7464_v32 = vpop.eup %7463  ;;  %v6014_v14 = vadd.f32 1.0, %v7462_v27 }
0x130c   :  { %v6016_v24 = vmul.f32 %v7464_v32, %v6013_v4  ;;  %vm6021_vm9 = vweird.f32 %v7464_v32 }
0x130d   :  { %7465 = vrcp.f32 %v6014_v14  ;;  %vm6022_vm11 = vmor %vm6020_vm10, %vm6021_vm9  ;;  %v6041_v12 = vand.u32 2147483648, %v6014_v14  ;;  %v6039_v17 = vand.u32 2147483647, %v6014_v14  ;;  %vm6035_vm14 = vweird.f32 %v6014_v14 }
0x130e   :  { %v6017_v7 = vsub.f32 1.0, %v6016_v24 }
0x130f   :  { %v6042_v11 = vor.u32 1.1754944e-38, %v6041_v12  ;;  %vm6040_vm1 = vcmp.eq.f32.partialorder %v6039_v17, 8.507059e+37 }
0x1310   :  { %v6018_v52 = vmul.f32 %v7464_v32, %v6017_v7 }
0x1312   :  { %v6019_v59 = vadd.f32 %v7464_v32, %v6018_v52 }
0x1313   :  { %v7466_v61 = vpop.eup %7465 }
0x1314   :  { %v6023_v30 = vsel %vm6022_vm11, %v7464_v32, %v6019_v59  ;;  %v6031_v55 = vmul.f32 %v7466_v61, %v6014_v14  ;;  %vm6036_vm13 = vweird.f32 %v7466_v61 }
0x1315   :  { %v6028_v37 = vsel %vm6025_vm12, %v6027_v41, %v6023_v30  ;;  %vm6037_vm15 = vmor %vm6035_vm14, %vm6036_vm13 }
0x1316   :  { %6045 = vst [vmem:[%s11481_s16] sm:$0xff] %v6028_v37  ;;  %v6032_v47 = vsub.f32 1.0, %v6031_v55 }
0x1318   :  { %v6033_v22 = vmul.f32 %v7466_v61, %v6032_v47 }
0x131a   :  { %v6034_v19 = vadd.f32 %v7466_v61, %v6033_v22 }
0x131c   :  { %v6038_v9 = vsel %vm6037_vm15, %v7466_v61, %v6034_v19 }
0x131d   :  { %v6043_v18 = vsel %vm6040_vm1, %v6042_v11, %v6038_v9 }
0x131e   :  { %6046 = vst [vmem:[%s11481_s16 + $0x8] sm:$0xff] %v6043_v18 }

</bundles_post_ra>
